<compile_context>
chip_gen: v6e
topology: v6e:2x2x1
jax: 0.10.0
libtpu: 0.0.40
codegen_flags: <defaults>
</compile_context>

<pallas_src>
import math

import jax
import jax.numpy as jnp
from jax import lax
from jax.experimental import pallas as pl
from jax.experimental.pallas import tpu as pltpu


# ---------------------------------------------------------------------------
# Kernel 2: per-channel affine (folded BatchNorm) + ReLU on a lane-dense view.
# ---------------------------------------------------------------------------
def _bn_relu_kernel(y_ref, scale_ref, shift_ref, o_ref):
    # y_ref/o_ref: (tile_r, L); scale_ref/shift_ref: (1, L) broadcast over rows.
    o_ref[...] = jnp.maximum(y_ref[...] * scale_ref[...] + shift_ref[...], 0.0)


def _pick_row_tile(n_rows, n_lanes, budget_bytes=4 * 1024 * 1024):
    """Whole array if it fits the budget, else the largest multiple-of-8 tile
    that divides n_rows and fits; fall back to the whole array."""
    if n_rows * n_lanes * 4 <= budget_bytes:
        return n_rows
    cap = max(8, (budget_bytes // (4 * n_lanes)) // 8 * 8)
    t = min(cap, n_rows - n_rows % 8)
    while t >= 8 and n_rows % t != 0:
        t -= 8
    return t if t >= 8 and n_rows % t == 0 else n_rows


# ---------------------------------------------------------------------------
# Forward pass: fused-5x5 conv (+ per-image BN partial stats), then BN + ReLU.
# ---------------------------------------------------------------------------
def inception_module_forward(x_nchw, w_comb, gamma, beta, eps=1e-5):
    """x_nchw: (N, Cin, H, W) f32; w_comb: (5, 5, Cin, Cout) fused HWIO weights.
    Returns (N, Cout, H, W) f32.  The conv bias is intentionally omitted: a
    per-channel bias before training-mode BatchNorm cancels exactly."""
    N, Cin, H, W = x_nchw.shape
    Cout = w_comb.shape[-1]

    # Over-wide rows: each output row carries Wp = W+4 columns; the last 4 are
    # junk (they read wrapped/padded data), are masked out of the BN stats and
    # sliced away at the end.
    Wp = W + 4
    HW_WIDE = H * Wp
    PAD_ROWS = (H + 5) * Wp                     # +3 bottom rows keep junk reads in-bounds
    offsets = [(dy, dx) for dy in range(5) for dx in range(5)]   # matches w_comb order

    x_nhwc = jnp.transpose(x_nchw, (0, 2, 3, 1))
    x_pad = jnp.pad(x_nhwc, ((0, 0), (2, 3), (2, 2), (0, 0)))    # (N, H+5, W+4, Cin)
    x_flat = x_pad.reshape(N, PAD_ROWS, Cin)
    w_taps = w_comb.reshape(25, Cin, Cout)
    # 1.0 for real output columns (x < W), 0.0 for the 4 junk columns per row.
    col_mask = (jnp.arange(HW_WIDE) % Wp < W).astype(jnp.float32).reshape(HW_WIDE, 1)

    def conv_stats_kernel(x_ref, w_ref, mask_ref, o_ref, psum_ref, pssq_ref):
        # x_ref: (1, PAD_ROWS, Cin); w_ref: (25, Cin, Cout); mask_ref: (HW_WIDE, 1)
        # o_ref: (1, HW_WIDE, Cout); psum_ref/pssq_ref: (1, 1, Cout) per-image partials.
        acc = jnp.zeros((HW_WIDE, Cout), jnp.float32)
        # TODO(synk): with larger Cin/Cout this unrolled tap loop should collapse
        # into a single im2col matmul (K = 25*Cin) via an in-VMEM column buffer;
        # at Cin=4 the unaligned 4-lane column writes are not worth the lowering
        # risk and the kernel is HBM-bandwidth-bound at these channel counts.
        for t, (dy, dx) in enumerate(offsets):
            start = dy * Wp + dx                            # static offset
            tap = x_ref[0, start:start + HW_WIDE, :]        # (HW_WIDE, Cin) contiguous rows
            acc = acc + jnp.dot(tap, w_ref[t], preferred_element_type=jnp.float32)
        o_ref[0] = acc
        # Per-image BN partial statistics with junk columns masked out.
        av = acc * mask_ref[...]
        psum_ref[0] = jnp.sum(av, axis=0, keepdims=True)
        pssq_ref[0] = jnp.sum(av * acc, axis=0, keepdims=True)

    conv_out, psum, pssq = pl.pallas_call(
        conv_stats_kernel,
        out_shape=(
            jax.ShapeDtypeStruct((N, HW_WIDE, Cout), jnp.float32),
            jax.ShapeDtypeStruct((N, 1, Cout), jnp.float32),
            jax.ShapeDtypeStruct((N, 1, Cout), jnp.float32),
        ),
        grid_spec=pltpu.PrefetchScalarGridSpec(
            num_scalar_prefetch=0,
            grid=(N,),
            in_specs=[
                pl.BlockSpec((1, PAD_ROWS, Cin), lambda n: (n, 0, 0)),
                pl.BlockSpec((25, Cin, Cout), lambda n: (0, 0, 0)),
                pl.BlockSpec((HW_WIDE, 1), lambda n: (0, 0)),
            ],
            out_specs=(
                pl.BlockSpec((1, HW_WIDE, Cout), lambda n: (n, 0, 0)),
                pl.BlockSpec((1, 1, Cout), lambda n: (n, 0, 0)),
                pl.BlockSpec((1, 1, Cout), lambda n: (n, 0, 0)),
            ),
        ),
        # Per-image partial stats => no cross-iteration accumulator, so the batch
        # axis is genuinely parallel (both TensorCores on v7x, free elsewhere).
        compiler_params=pltpu.CompilerParams(
            dimension_semantics=("parallel",),
            vmem_limit_bytes=32 * 1024 * 1024),
    )(x_flat, w_taps, col_mask)
    # TODO(synk): for very large H*W / Cin the per-image block should be split into
    # halo'd H tiles (manual DMA via memory_space=pl.ANY) to stay inside v7x's
    # 64 MiB VMEM; not needed at these shapes.

    # Finalize training-mode BatchNorm statistics (junk columns already excluded).
    count = jnp.float32(N * H * W)
    ch_sum = jnp.sum(psum[:, 0, :], axis=0)
    ch_ssq = jnp.sum(pssq[:, 0, :], axis=0)
    mean = ch_sum / count
    var = jnp.maximum(ch_ssq / count - mean * mean, 0.0)   # biased variance
    scale = gamma * lax.rsqrt(var + eps)
    shift = beta - mean * scale
    # TODO(synk): PyTorch also updates running_mean/running_var buffers in training
    # mode; that in-place side effect does not affect the forward output.

    # Lane-dense BN + ReLU pass: view the conv output as (rows, k*Cout) with
    # k*Cout a multiple of 128 so every store is an unmasked full-lane vst.
    k_group = 128 // math.gcd(Cout, 128)
    if (N * HW_WIDE) % k_group != 0:
        k_group = 1                                   # fallback: channel-width lanes
    lanes = k_group * Cout
    rows = (N * HW_WIDE) // k_group
    y2d = conv_out.reshape(rows, lanes)
    scale2d = jnp.tile(scale, k_group).reshape(1, lanes)
    shift2d = jnp.tile(shift, k_group).reshape(1, lanes)
    tile_r = _pick_row_tile(rows, lanes)

    out2d = pl.pallas_call(
        _bn_relu_kernel,
        out_shape=jax.ShapeDtypeStruct((rows, lanes), jnp.float32),
        grid_spec=pltpu.PrefetchScalarGridSpec(
            num_scalar_prefetch=0,
            grid=(rows // tile_r,),
            in_specs=[
                pl.BlockSpec((tile_r, lanes), lambda i: (i, 0)),
                pl.BlockSpec((1, lanes), lambda i: (0, 0)),
                pl.BlockSpec((1, lanes), lambda i: (0, 0)),
            ],
            out_specs=pl.BlockSpec((tile_r, lanes), lambda i: (i, 0)),
        ),
        compiler_params=pltpu.CompilerParams(
            dimension_semantics=("parallel",)),
        input_output_aliases={0: 0},                  # overwrite conv buffer in place
    )(y2d, scale2d, shift2d)

    out_wide = out2d.reshape(N, H, Wp, Cout)[:, :, :W, :]   # drop the 4 junk columns
    return jnp.transpose(out_wide, (0, 3, 1, 2))            # NHWC -> NCHW


# ---------------------------------------------------------------------------
# Deterministic parameter init (PyTorch-style shapes) + fusion into one 5x5.
# ---------------------------------------------------------------------------
def init_params(key, in_chan, out_chan):
    assert out_chan % 3 == 0
    cb = out_chan // 3
    k1, k2, k3, k4, k5, k6 = jax.random.split(key, 6)
    w1 = 0.1 * jax.random.normal(k1, (cb, in_chan, 1, 1), jnp.float32)  # OIHW
    w3 = 0.1 * jax.random.normal(k2, (cb, in_chan, 3, 3), jnp.float32)
    w5 = 0.1 * jax.random.normal(k3, (cb, in_chan, 5, 5), jnp.float32)
    b1 = 0.1 * jax.random.normal(k4, (cb,), jnp.float32)
    b3 = 0.1 * jax.random.normal(k5, (cb,), jnp.float32)
    b5 = 0.1 * jax.random.normal(k6, (cb,), jnp.float32)
    gamma = jnp.ones((out_chan,), jnp.float32)   # PyTorch BatchNorm2d defaults
    beta = jnp.zeros((out_chan,), jnp.float32)

    # Fuse the three branches into one 5x5 HWIO kernel (zero-embed 1x1 / 3x3).
    w_comb = jnp.zeros((5, 5, in_chan, out_chan), jnp.float32)
    w_comb = w_comb.at[2, 2, :, 0:cb].set(jnp.transpose(w1[:, :, 0, 0], (1, 0)))
    w_comb = w_comb.at[1:4, 1:4, :, cb:2 * cb].set(jnp.transpose(w3, (2, 3, 1, 0)))
    w_comb = w_comb.at[:, :, :, 2 * cb:].set(jnp.transpose(w5, (2, 3, 1, 0)))
    b_comb = jnp.concatenate([b1, b3, b5])
    return (w1, b1, w3, b3, w5, b5, gamma, beta), (w_comb, b_comb)


def reference_forward(x, params, eps=1e-5):
    """Pure-JAX reference mirroring the PyTorch module (NCHW, training-mode BN)."""
    w1, b1, w3, b3, w5, b5, gamma, beta = params
    dn = lax.conv_dimension_numbers(x.shape, w1.shape, ('NCHW', 'OIHW', 'NCHW'))
    y1 = lax.conv_general_dilated(x, w1, (1, 1), [(0, 0), (0, 0)],
                                  dimension_numbers=dn) + b1[None, :, None, None]
    y3 = lax.conv_general_dilated(x, w3, (1, 1), [(1, 1), (1, 1)],
                                  dimension_numbers=dn) + b3[None, :, None, None]
    y5 = lax.conv_general_dilated(x, w5, (1, 1), [(2, 2), (2, 2)],
                                  dimension_numbers=dn) + b5[None, :, None, None]
    y = jnp.concatenate([y1, y3, y5], axis=1)
    mean = jnp.mean(y, axis=(0, 2, 3), keepdims=True)
    var = jnp.mean((y - mean) ** 2, axis=(0, 2, 3), keepdims=True)  # biased
    yn = (y - mean) / jnp.sqrt(var + eps)
    yn = yn * gamma[None, :, None, None] + beta[None, :, None, None]
    return jnp.maximum(yn, 0.0)


if __name__ == "__main__":
    key = jax.random.PRNGKey(0)
    kx, kp = jax.random.split(key)
    N, Cin, H, W = 2, 4, 16, 16
    Cout = 12  # out_chan; each inception branch contributes Cout // 3 channels

    x = jax.random.normal(kx, (N, Cin, H, W), jnp.float32)
    torch_params, (w_comb, b_comb) = init_params(kp, Cin, Cout)
    gamma, beta = torch_params[6], torch_params[7]

    fwd = jax.jit(inception_module_forward)   # fuse XLA-side glue; single dispatch
    out = fwd(x, w_comb, gamma, beta)
    out = jax.block_until_ready(out)

    ref = reference_forward(x, torch_params)
    assert out.shape == (N, Cout, H, W), out.shape
    err = float(jnp.max(jnp.abs(out - ref)))
    assert err < 1e-3, f"max abs err {err}"
    print("KERNEL_OK")
</pallas_src>

<mosaic_0001>
module attributes {stable_mosaic.version = 11 : i64} {
  func.func @conv_stats_kernel(%arg0: i32, %arg1: memref<1x420x4xf32, #tpu.memory_space<vmem>>, %arg2: memref<25x4x12xf32, #tpu.memory_space<vmem>>, %arg3: memref<320x1xf32, #tpu.memory_space<vmem>>, %arg4: memref<1x320x12xf32, #tpu.memory_space<vmem>>, %arg5: memref<1x1x12xf32, #tpu.memory_space<vmem>>, %arg6: memref<1x1x12xf32, #tpu.memory_space<vmem>>) attributes {dimension_semantics = [#tpu.dimension_semantics<parallel>], iteration_bounds = array<i64: 2>, scalar_prefetch = 0 : i64, scratch_operands = 0 : i64, tpu.core_type = #tpu.core_type<tc>, window_params = [{transform_indices = @transform_0, window_bounds = array<i64: 1, 420, 4>}, {pipeline_mode = #tpu.pipeline_mode<synchronous>, transform_indices = @transform_1, window_bounds = array<i64: 25, 4, 12>}, {pipeline_mode = #tpu.pipeline_mode<synchronous>, transform_indices = @transform_2, window_bounds = array<i64: 320, 1>}, {transform_indices = @transform_3, window_bounds = array<i64: 1, 320, 12>}, {transform_indices = @transform_4, window_bounds = array<i64: 1, 1, 12>}, {transform_indices = @transform_5, window_bounds = array<i64: 1, 1, 12>}]} {
    %cst = arith.constant 0.000000e+00 : f32
    %0 = vector.broadcast %cst : f32 to vector<320x12xf32>
    %c0 = arith.constant 0 : index
    %c0_0 = arith.constant 0 : index
    %c0_1 = arith.constant 0 : index
    %1 = vector.load %arg1[%c0, %c0_0, %c0_1] : memref<1x420x4xf32, #tpu.memory_space<vmem>>, vector<1x320x4xf32>
    %2 = vector.shape_cast %1 : vector<1x320x4xf32> to vector<320x4xf32>
    %c0_2 = arith.constant 0 : index
    %c0_3 = arith.constant 0 : index
    %c0_4 = arith.constant 0 : index
    %3 = vector.load %arg2[%c0_2, %c0_3, %c0_4] : memref<25x4x12xf32, #tpu.memory_space<vmem>>, vector<1x4x12xf32>
    %4 = vector.shape_cast %3 : vector<1x4x12xf32> to vector<4x12xf32>
    %cst_5 = arith.constant dense<0.000000e+00> : vector<320x12xf32>
    %5 = tpu.matmul %2, %4, %cst_5 {dimension_numbers = #tpu.dot_dimension_numbers<[1], [0], [0], [1], [0, 0, 1, 1], [], []>} : vector<320x4xf32>, vector<4x12xf32>, vector<320x12xf32> -> vector<320x12xf32>
    %6 = arith.addf %0, %5 : vector<320x12xf32>
    %c0_6 = arith.constant 0 : index
    %c1 = arith.constant 1 : index
    %c0_7 = arith.constant 0 : index
    %7 = vector.load %arg1[%c0_6, %c1, %c0_7] : memref<1x420x4xf32, #tpu.memory_space<vmem>>, vector<1x320x4xf32>
    %8 = vector.shape_cast %7 : vector<1x320x4xf32> to vector<320x4xf32>
    %c1_8 = arith.constant 1 : index
    %c0_9 = arith.constant 0 : index
    %c0_10 = arith.constant 0 : index
    %9 = vector.load %arg2[%c1_8, %c0_9, %c0_10] : memref<25x4x12xf32, #tpu.memory_space<vmem>>, vector<1x4x12xf32>
    %10 = vector.shape_cast %9 : vector<1x4x12xf32> to vector<4x12xf32>
    %cst_11 = arith.constant dense<0.000000e+00> : vector<320x12xf32>
    %11 = tpu.matmul %8, %10, %cst_11 {dimension_numbers = #tpu.dot_dimension_numbers<[1], [0], [0], [1], [0, 0, 1, 1], [], []>} : vector<320x4xf32>, vector<4x12xf32>, vector<320x12xf32> -> vector<320x12xf32>
    %12 = arith.addf %6, %11 : vector<320x12xf32>
    %c0_12 = arith.constant 0 : index
    %c2 = arith.constant 2 : index
    %c0_13 = arith.constant 0 : index
    %13 = vector.load %arg1[%c0_12, %c2, %c0_13] : memref<1x420x4xf32, #tpu.memory_space<vmem>>, vector<1x320x4xf32>
    %14 = vector.shape_cast %13 : vector<1x320x4xf32> to vector<320x4xf32>
    %c2_14 = arith.constant 2 : index
    %c0_15 = arith.constant 0 : index
    %c0_16 = arith.constant 0 : index
    %15 = vector.load %arg2[%c2_14, %c0_15, %c0_16] : memref<25x4x12xf32, #tpu.memory_space<vmem>>, vector<1x4x12xf32>
    %16 = vector.shape_cast %15 : vector<1x4x12xf32> to vector<4x12xf32>
    %cst_17 = arith.constant dense<0.000000e+00> : vector<320x12xf32>
    %17 = tpu.matmul %14, %16, %cst_17 {dimension_numbers = #tpu.dot_dimension_numbers<[1], [0], [0], [1], [0, 0, 1, 1], [], []>} : vector<320x4xf32>, vector<4x12xf32>, vector<320x12xf32> -> vector<320x12xf32>
    %18 = arith.addf %12, %17 : vector<320x12xf32>
    %c0_18 = arith.constant 0 : index
    %c3 = arith.constant 3 : index
    %c0_19 = arith.constant 0 : index
    %19 = vector.load %arg1[%c0_18, %c3, %c0_19] : memref<1x420x4xf32, #tpu.memory_space<vmem>>, vector<1x320x4xf32>
    %20 = vector.shape_cast %19 : vector<1x320x4xf32> to vector<320x4xf32>
    %c3_20 = arith.constant 3 : index
    %c0_21 = arith.constant 0 : index
    %c0_22 = arith.constant 0 : index
    %21 = vector.load %arg2[%c3_20, %c0_21, %c0_22] : memref<25x4x12xf32, #tpu.memory_space<vmem>>, vector<1x4x12xf32>
    %22 = vector.shape_cast %21 : vector<1x4x12xf32> to vector<4x12xf32>
    %cst_23 = arith.constant dense<0.000000e+00> : vector<320x12xf32>
    %23 = tpu.matmul %20, %22, %cst_23 {dimension_numbers = #tpu.dot_dimension_numbers<[1], [0], [0], [1], [0, 0, 1, 1], [], []>} : vector<320x4xf32>, vector<4x12xf32>, vector<320x12xf32> -> vector<320x12xf32>
    %24 = arith.addf %18, %23 : vector<320x12xf32>
    %c0_24 = arith.constant 0 : index
    %c4 = arith.constant 4 : index
    %c0_25 = arith.constant 0 : index
    %25 = vector.load %arg1[%c0_24, %c4, %c0_25] : memref<1x420x4xf32, #tpu.memory_space<vmem>>, vector<1x320x4xf32>
    %26 = vector.shape_cast %25 : vector<1x320x4xf32> to vector<320x4xf32>
    %c4_26 = arith.constant 4 : index
    %c0_27 = arith.constant 0 : index
    %c0_28 = arith.constant 0 : index
    %27 = vector.load %arg2[%c4_26, %c0_27, %c0_28] : memref<25x4x12xf32, #tpu.memory_space<vmem>>, vector<1x4x12xf32>
    %28 = vector.shape_cast %27 : vector<1x4x12xf32> to vector<4x12xf32>
    %cst_29 = arith.constant dense<0.000000e+00> : vector<320x12xf32>
    %29 = tpu.matmul %26, %28, %cst_29 {dimension_numbers = #tpu.dot_dimension_numbers<[1], [0], [0], [1], [0, 0, 1, 1], [], []>} : vector<320x4xf32>, vector<4x12xf32>, vector<320x12xf32> -> vector<320x12xf32>
    %30 = arith.addf %24, %29 : vector<320x12xf32>
    %c0_30 = arith.constant 0 : index
    %c20 = arith.constant 20 : index
    %c0_31 = arith.constant 0 : index
    %31 = vector.load %arg1[%c0_30, %c20, %c0_31] : memref<1x420x4xf32, #tpu.memory_space<vmem>>, vector<1x320x4xf32>
    %32 = vector.shape_cast %31 : vector<1x320x4xf32> to vector<320x4xf32>
    %c5 = arith.constant 5 : index
    %c0_32 = arith.constant 0 : index
    %c0_33 = arith.constant 0 : index
    %33 = vector.load %arg2[%c5, %c0_32, %c0_33] : memref<25x4x12xf32, #tpu.memory_space<vmem>>, vector<1x4x12xf32>
    %34 = vector.shape_cast %33 : vector<1x4x12xf32> to vector<4x12xf32>
    %cst_34 = arith.constant dense<0.000000e+00> : vector<320x12xf32>
    %35 = tpu.matmul %32, %34, %cst_34 {dimension_numbers = #tpu.dot_dimension_numbers<[1], [0], [0], [1], [0, 0, 1, 1], [], []>} : vector<320x4xf32>, vector<4x12xf32>, vector<320x12xf32> -> vector<320x12xf32>
    %36 = arith.addf %30, %35 : vector<320x12xf32>
    %c0_35 = arith.constant 0 : index
    %c21 = arith.constant 21 : index
    %c0_36 = arith.constant 0 : index
    %37 = vector.load %arg1[%c0_35, %c21, %c0_36] : memref<1x420x4xf32, #tpu.memory_space<vmem>>, vector<1x320x4xf32>
    %38 = vector.shape_cast %37 : vector<1x320x4xf32> to vector<320x4xf32>
    %c6 = arith.constant 6 : index
    %c0_37 = arith.constant 0 : index
    %c0_38 = arith.constant 0 : index
    %39 = vector.load %arg2[%c6, %c0_37, %c0_38] : memref<25x4x12xf32, #tpu.memory_space<vmem>>, vector<1x4x12xf32>
    %40 = vector.shape_cast %39 : vector<1x4x12xf32> to vector<4x12xf32>
    %cst_39 = arith.constant dense<0.000000e+00> : vector<320x12xf32>
    %41 = tpu.matmul %38, %40, %cst_39 {dimension_numbers = #tpu.dot_dimension_numbers<[1], [0], [0], [1], [0, 0, 1, 1], [], []>} : vector<320x4xf32>, vector<4x12xf32>, vector<320x12xf32> -> vector<320x12xf32>
    %42 = arith.addf %36, %41 : vector<320x12xf32>
    %c0_40 = arith.constant 0 : index
    %c22 = arith.constant 22 : index
    %c0_41 = arith.constant 0 : index
    %43 = vector.load %arg1[%c0_40, %c22, %c0_41] : memref<1x420x4xf32, #tpu.memory_space<vmem>>, vector<1x320x4xf32>
    %44 = vector.shape_cast %43 : vector<1x320x4xf32> to vector<320x4xf32>
    %c7 = arith.constant 7 : index
    %c0_42 = arith.constant 0 : index
    %c0_43 = arith.constant 0 : index
    %45 = vector.load %arg2[%c7, %c0_42, %c0_43] : memref<25x4x12xf32, #tpu.memory_space<vmem>>, vector<1x4x12xf32>
    %46 = vector.shape_cast %45 : vector<1x4x12xf32> to vector<4x12xf32>
    %cst_44 = arith.constant dense<0.000000e+00> : vector<320x12xf32>
    %47 = tpu.matmul %44, %46, %cst_44 {dimension_numbers = #tpu.dot_dimension_numbers<[1], [0], [0], [1], [0, 0, 1, 1], [], []>} : vector<320x4xf32>, vector<4x12xf32>, vector<320x12xf32> -> vector<320x12xf32>
    %48 = arith.addf %42, %47 : vector<320x12xf32>
    %c0_45 = arith.constant 0 : index
    %c23 = arith.constant 23 : index
    %c0_46 = arith.constant 0 : index
    %49 = vector.load %arg1[%c0_45, %c23, %c0_46] : memref<1x420x4xf32, #tpu.memory_space<vmem>>, vector<1x320x4xf32>
    %50 = vector.shape_cast %49 : vector<1x320x4xf32> to vector<320x4xf32>
    %c8 = arith.constant 8 : index
    %c0_47 = arith.constant 0 : index
    %c0_48 = arith.constant 0 : index
    %51 = vector.load %arg2[%c8, %c0_47, %c0_48] : memref<25x4x12xf32, #tpu.memory_space<vmem>>, vector<1x4x12xf32>
    %52 = vector.shape_cast %51 : vector<1x4x12xf32> to vector<4x12xf32>
    %cst_49 = arith.constant dense<0.000000e+00> : vector<320x12xf32>
    %53 = tpu.matmul %50, %52, %cst_49 {dimension_numbers = #tpu.dot_dimension_numbers<[1], [0], [0], [1], [0, 0, 1, 1], [], []>} : vector<320x4xf32>, vector<4x12xf32>, vector<320x12xf32> -> vector<320x12xf32>
    %54 = arith.addf %48, %53 : vector<320x12xf32>
    %c0_50 = arith.constant 0 : index
    %c24 = arith.constant 24 : index
    %c0_51 = arith.constant 0 : index
    %55 = vector.load %arg1[%c0_50, %c24, %c0_51] : memref<1x420x4xf32, #tpu.memory_space<vmem>>, vector<1x320x4xf32>
    %56 = vector.shape_cast %55 : vector<1x320x4xf32> to vector<320x4xf32>
    %c9 = arith.constant 9 : index
    %c0_52 = arith.constant 0 : index
    %c0_53 = arith.constant 0 : index
    %57 = vector.load %arg2[%c9, %c0_52, %c0_53] : memref<25x4x12xf32, #tpu.memory_space<vmem>>, vector<1x4x12xf32>
    %58 = vector.shape_cast %57 : vector<1x4x12xf32> to vector<4x12xf32>
    %cst_54 = arith.constant dense<0.000000e+00> : vector<320x12xf32>
    %59 = tpu.matmul %56, %58, %cst_54 {dimension_numbers = #tpu.dot_dimension_numbers<[1], [0], [0], [1], [0, 0, 1, 1], [], []>} : vector<320x4xf32>, vector<4x12xf32>, vector<320x12xf32> -> vector<320x12xf32>
    %60 = arith.addf %54, %59 : vector<320x12xf32>
    %c0_55 = arith.constant 0 : index
    %c40 = arith.constant 40 : index
    %c0_56 = arith.constant 0 : index
    %61 = vector.load %arg1[%c0_55, %c40, %c0_56] : memref<1x420x4xf32, #tpu.memory_space<vmem>>, vector<1x320x4xf32>
    %62 = vector.shape_cast %61 : vector<1x320x4xf32> to vector<320x4xf32>
    %c10 = arith.constant 10 : index
    %c0_57 = arith.constant 0 : index
    %c0_58 = arith.constant 0 : index
    %63 = vector.load %arg2[%c10, %c0_57, %c0_58] : memref<25x4x12xf32, #tpu.memory_space<vmem>>, vector<1x4x12xf32>
    %64 = vector.shape_cast %63 : vector<1x4x12xf32> to vector<4x12xf32>
    %cst_59 = arith.constant dense<0.000000e+00> : vector<320x12xf32>
    %65 = tpu.matmul %62, %64, %cst_59 {dimension_numbers = #tpu.dot_dimension_numbers<[1], [0], [0], [1], [0, 0, 1, 1], [], []>} : vector<320x4xf32>, vector<4x12xf32>, vector<320x12xf32> -> vector<320x12xf32>
    %66 = arith.addf %60, %65 : vector<320x12xf32>
    %c0_60 = arith.constant 0 : index
    %c41 = arith.constant 41 : index
    %c0_61 = arith.constant 0 : index
    %67 = vector.load %arg1[%c0_60, %c41, %c0_61] : memref<1x420x4xf32, #tpu.memory_space<vmem>>, vector<1x320x4xf32>
    %68 = vector.shape_cast %67 : vector<1x320x4xf32> to vector<320x4xf32>
    %c11 = arith.constant 11 : index
    %c0_62 = arith.constant 0 : index
    %c0_63 = arith.constant 0 : index
    %69 = vector.load %arg2[%c11, %c0_62, %c0_63] : memref<25x4x12xf32, #tpu.memory_space<vmem>>, vector<1x4x12xf32>
    %70 = vector.shape_cast %69 : vector<1x4x12xf32> to vector<4x12xf32>
    %cst_64 = arith.constant dense<0.000000e+00> : vector<320x12xf32>
    %71 = tpu.matmul %68, %70, %cst_64 {dimension_numbers = #tpu.dot_dimension_numbers<[1], [0], [0], [1], [0, 0, 1, 1], [], []>} : vector<320x4xf32>, vector<4x12xf32>, vector<320x12xf32> -> vector<320x12xf32>
    %72 = arith.addf %66, %71 : vector<320x12xf32>
    %c0_65 = arith.constant 0 : index
    %c42 = arith.constant 42 : index
    %c0_66 = arith.constant 0 : index
    %73 = vector.load %arg1[%c0_65, %c42, %c0_66] : memref<1x420x4xf32, #tpu.memory_space<vmem>>, vector<1x320x4xf32>
    %74 = vector.shape_cast %73 : vector<1x320x4xf32> to vector<320x4xf32>
    %c12 = arith.constant 12 : index
    %c0_67 = arith.constant 0 : index
    %c0_68 = arith.constant 0 : index
    %75 = vector.load %arg2[%c12, %c0_67, %c0_68] : memref<25x4x12xf32, #tpu.memory_space<vmem>>, vector<1x4x12xf32>
    %76 = vector.shape_cast %75 : vector<1x4x12xf32> to vector<4x12xf32>
    %cst_69 = arith.constant dense<0.000000e+00> : vector<320x12xf32>
    %77 = tpu.matmul %74, %76, %cst_69 {dimension_numbers = #tpu.dot_dimension_numbers<[1], [0], [0], [1], [0, 0, 1, 1], [], []>} : vector<320x4xf32>, vector<4x12xf32>, vector<320x12xf32> -> vector<320x12xf32>
    %78 = arith.addf %72, %77 : vector<320x12xf32>
    %c0_70 = arith.constant 0 : index
    %c43 = arith.constant 43 : index
    %c0_71 = arith.constant 0 : index
    %79 = vector.load %arg1[%c0_70, %c43, %c0_71] : memref<1x420x4xf32, #tpu.memory_space<vmem>>, vector<1x320x4xf32>
    %80 = vector.shape_cast %79 : vector<1x320x4xf32> to vector<320x4xf32>
    %c13 = arith.constant 13 : index
    %c0_72 = arith.constant 0 : index
    %c0_73 = arith.constant 0 : index
    %81 = vector.load %arg2[%c13, %c0_72, %c0_73] : memref<25x4x12xf32, #tpu.memory_space<vmem>>, vector<1x4x12xf32>
    %82 = vector.shape_cast %81 : vector<1x4x12xf32> to vector<4x12xf32>
    %cst_74 = arith.constant dense<0.000000e+00> : vector<320x12xf32>
    %83 = tpu.matmul %80, %82, %cst_74 {dimension_numbers = #tpu.dot_dimension_numbers<[1], [0], [0], [1], [0, 0, 1, 1], [], []>} : vector<320x4xf32>, vector<4x12xf32>, vector<320x12xf32> -> vector<320x12xf32>
    %84 = arith.addf %78, %83 : vector<320x12xf32>
    %c0_75 = arith.constant 0 : index
    %c44 = arith.constant 44 : index
    %c0_76 = arith.constant 0 : index
    %85 = vector.load %arg1[%c0_75, %c44, %c0_76] : memref<1x420x4xf32, #tpu.memory_space<vmem>>, vector<1x320x4xf32>
    %86 = vector.shape_cast %85 : vector<1x320x4xf32> to vector<320x4xf32>
    %c14 = arith.constant 14 : index
    %c0_77 = arith.constant 0 : index
    %c0_78 = arith.constant 0 : index
    %87 = vector.load %arg2[%c14, %c0_77, %c0_78] : memref<25x4x12xf32, #tpu.memory_space<vmem>>, vector<1x4x12xf32>
    %88 = vector.shape_cast %87 : vector<1x4x12xf32> to vector<4x12xf32>
    %cst_79 = arith.constant dense<0.000000e+00> : vector<320x12xf32>
    %89 = tpu.matmul %86, %88, %cst_79 {dimension_numbers = #tpu.dot_dimension_numbers<[1], [0], [0], [1], [0, 0, 1, 1], [], []>} : vector<320x4xf32>, vector<4x12xf32>, vector<320x12xf32> -> vector<320x12xf32>
    %90 = arith.addf %84, %89 : vector<320x12xf32>
    %c0_80 = arith.constant 0 : index
    %c60 = arith.constant 60 : index
    %c0_81 = arith.constant 0 : index
    %91 = vector.load %arg1[%c0_80, %c60, %c0_81] : memref<1x420x4xf32, #tpu.memory_space<vmem>>, vector<1x320x4xf32>
    %92 = vector.shape_cast %91 : vector<1x320x4xf32> to vector<320x4xf32>
    %c15 = arith.constant 15 : index
    %c0_82 = arith.constant 0 : index
    %c0_83 = arith.constant 0 : index
    %93 = vector.load %arg2[%c15, %c0_82, %c0_83] : memref<25x4x12xf32, #tpu.memory_space<vmem>>, vector<1x4x12xf32>
    %94 = vector.shape_cast %93 : vector<1x4x12xf32> to vector<4x12xf32>
    %cst_84 = arith.constant dense<0.000000e+00> : vector<320x12xf32>
    %95 = tpu.matmul %92, %94, %cst_84 {dimension_numbers = #tpu.dot_dimension_numbers<[1], [0], [0], [1], [0, 0, 1, 1], [], []>} : vector<320x4xf32>, vector<4x12xf32>, vector<320x12xf32> -> vector<320x12xf32>
    %96 = arith.addf %90, %95 : vector<320x12xf32>
    %c0_85 = arith.constant 0 : index
    %c61 = arith.constant 61 : index
    %c0_86 = arith.constant 0 : index
    %97 = vector.load %arg1[%c0_85, %c61, %c0_86] : memref<1x420x4xf32, #tpu.memory_space<vmem>>, vector<1x320x4xf32>
    %98 = vector.shape_cast %97 : vector<1x320x4xf32> to vector<320x4xf32>
    %c16 = arith.constant 16 : index
    %c0_87 = arith.constant 0 : index
    %c0_88 = arith.constant 0 : index
    %99 = vector.load %arg2[%c16, %c0_87, %c0_88] : memref<25x4x12xf32, #tpu.memory_space<vmem>>, vector<1x4x12xf32>
    %100 = vector.shape_cast %99 : vector<1x4x12xf32> to vector<4x12xf32>
    %cst_89 = arith.constant dense<0.000000e+00> : vector<320x12xf32>
    %101 = tpu.matmul %98, %100, %cst_89 {dimension_numbers = #tpu.dot_dimension_numbers<[1], [0], [0], [1], [0, 0, 1, 1], [], []>} : vector<320x4xf32>, vector<4x12xf32>, vector<320x12xf32> -> vector<320x12xf32>
    %102 = arith.addf %96, %101 : vector<320x12xf32>
    %c0_90 = arith.constant 0 : index
    %c62 = arith.constant 62 : index
    %c0_91 = arith.constant 0 : index
    %103 = vector.load %arg1[%c0_90, %c62, %c0_91] : memref<1x420x4xf32, #tpu.memory_space<vmem>>, vector<1x320x4xf32>
    %104 = vector.shape_cast %103 : vector<1x320x4xf32> to vector<320x4xf32>
    %c17 = arith.constant 17 : index
    %c0_92 = arith.constant 0 : index
    %c0_93 = arith.constant 0 : index
    %105 = vector.load %arg2[%c17, %c0_92, %c0_93] : memref<25x4x12xf32, #tpu.memory_space<vmem>>, vector<1x4x12xf32>
    %106 = vector.shape_cast %105 : vector<1x4x12xf32> to vector<4x12xf32>
    %cst_94 = arith.constant dense<0.000000e+00> : vector<320x12xf32>
    %107 = tpu.matmul %104, %106, %cst_94 {dimension_numbers = #tpu.dot_dimension_numbers<[1], [0], [0], [1], [0, 0, 1, 1], [], []>} : vector<320x4xf32>, vector<4x12xf32>, vector<320x12xf32> -> vector<320x12xf32>
    %108 = arith.addf %102, %107 : vector<320x12xf32>
    %c0_95 = arith.constant 0 : index
    %c63 = arith.constant 63 : index
    %c0_96 = arith.constant 0 : index
    %109 = vector.load %arg1[%c0_95, %c63, %c0_96] : memref<1x420x4xf32, #tpu.memory_space<vmem>>, vector<1x320x4xf32>
    %110 = vector.shape_cast %109 : vector<1x320x4xf32> to vector<320x4xf32>
    %c18 = arith.constant 18 : index
    %c0_97 = arith.constant 0 : index
    %c0_98 = arith.constant 0 : index
    %111 = vector.load %arg2[%c18, %c0_97, %c0_98] : memref<25x4x12xf32, #tpu.memory_space<vmem>>, vector<1x4x12xf32>
    %112 = vector.shape_cast %111 : vector<1x4x12xf32> to vector<4x12xf32>
    %cst_99 = arith.constant dense<0.000000e+00> : vector<320x12xf32>
    %113 = tpu.matmul %110, %112, %cst_99 {dimension_numbers = #tpu.dot_dimension_numbers<[1], [0], [0], [1], [0, 0, 1, 1], [], []>} : vector<320x4xf32>, vector<4x12xf32>, vector<320x12xf32> -> vector<320x12xf32>
    %114 = arith.addf %108, %113 : vector<320x12xf32>
    %c0_100 = arith.constant 0 : index
    %c64 = arith.constant 64 : index
    %c0_101 = arith.constant 0 : index
    %115 = vector.load %arg1[%c0_100, %c64, %c0_101] : memref<1x420x4xf32, #tpu.memory_space<vmem>>, vector<1x320x4xf32>
    %116 = vector.shape_cast %115 : vector<1x320x4xf32> to vector<320x4xf32>
    %c19 = arith.constant 19 : index
    %c0_102 = arith.constant 0 : index
    %c0_103 = arith.constant 0 : index
    %117 = vector.load %arg2[%c19, %c0_102, %c0_103] : memref<25x4x12xf32, #tpu.memory_space<vmem>>, vector<1x4x12xf32>
    %118 = vector.shape_cast %117 : vector<1x4x12xf32> to vector<4x12xf32>
    %cst_104 = arith.constant dense<0.000000e+00> : vector<320x12xf32>
    %119 = tpu.matmul %116, %118, %cst_104 {dimension_numbers = #tpu.dot_dimension_numbers<[1], [0], [0], [1], [0, 0, 1, 1], [], []>} : vector<320x4xf32>, vector<4x12xf32>, vector<320x12xf32> -> vector<320x12xf32>
    %120 = arith.addf %114, %119 : vector<320x12xf32>
    %c0_105 = arith.constant 0 : index
    %c80 = arith.constant 80 : index
    %c0_106 = arith.constant 0 : index
    %121 = vector.load %arg1[%c0_105, %c80, %c0_106] : memref<1x420x4xf32, #tpu.memory_space<vmem>>, vector<1x320x4xf32>
    %122 = vector.shape_cast %121 : vector<1x320x4xf32> to vector<320x4xf32>
    %c20_107 = arith.constant 20 : index
    %c0_108 = arith.constant 0 : index
    %c0_109 = arith.constant 0 : index
    %123 = vector.load %arg2[%c20_107, %c0_108, %c0_109] : memref<25x4x12xf32, #tpu.memory_space<vmem>>, vector<1x4x12xf32>
    %124 = vector.shape_cast %123 : vector<1x4x12xf32> to vector<4x12xf32>
    %cst_110 = arith.constant dense<0.000000e+00> : vector<320x12xf32>
    %125 = tpu.matmul %122, %124, %cst_110 {dimension_numbers = #tpu.dot_dimension_numbers<[1], [0], [0], [1], [0, 0, 1, 1], [], []>} : vector<320x4xf32>, vector<4x12xf32>, vector<320x12xf32> -> vector<320x12xf32>
    %126 = arith.addf %120, %125 : vector<320x12xf32>
    %c0_111 = arith.constant 0 : index
    %c81 = arith.constant 81 : index
    %c0_112 = arith.constant 0 : index
    %127 = vector.load %arg1[%c0_111, %c81, %c0_112] : memref<1x420x4xf32, #tpu.memory_space<vmem>>, vector<1x320x4xf32>
    %128 = vector.shape_cast %127 : vector<1x320x4xf32> to vector<320x4xf32>
    %c21_113 = arith.constant 21 : index
    %c0_114 = arith.constant 0 : index
    %c0_115 = arith.constant 0 : index
    %129 = vector.load %arg2[%c21_113, %c0_114, %c0_115] : memref<25x4x12xf32, #tpu.memory_space<vmem>>, vector<1x4x12xf32>
    %130 = vector.shape_cast %129 : vector<1x4x12xf32> to vector<4x12xf32>
    %cst_116 = arith.constant dense<0.000000e+00> : vector<320x12xf32>
    %131 = tpu.matmul %128, %130, %cst_116 {dimension_numbers = #tpu.dot_dimension_numbers<[1], [0], [0], [1], [0, 0, 1, 1], [], []>} : vector<320x4xf32>, vector<4x12xf32>, vector<320x12xf32> -> vector<320x12xf32>
    %132 = arith.addf %126, %131 : vector<320x12xf32>
    %c0_117 = arith.constant 0 : index
    %c82 = arith.constant 82 : index
    %c0_118 = arith.constant 0 : index
    %133 = vector.load %arg1[%c0_117, %c82, %c0_118] : memref<1x420x4xf32, #tpu.memory_space<vmem>>, vector<1x320x4xf32>
    %134 = vector.shape_cast %133 : vector<1x320x4xf32> to vector<320x4xf32>
    %c22_119 = arith.constant 22 : index
    %c0_120 = arith.constant 0 : index
    %c0_121 = arith.constant 0 : index
    %135 = vector.load %arg2[%c22_119, %c0_120, %c0_121] : memref<25x4x12xf32, #tpu.memory_space<vmem>>, vector<1x4x12xf32>
    %136 = vector.shape_cast %135 : vector<1x4x12xf32> to vector<4x12xf32>
    %cst_122 = arith.constant dense<0.000000e+00> : vector<320x12xf32>
    %137 = tpu.matmul %134, %136, %cst_122 {dimension_numbers = #tpu.dot_dimension_numbers<[1], [0], [0], [1], [0, 0, 1, 1], [], []>} : vector<320x4xf32>, vector<4x12xf32>, vector<320x12xf32> -> vector<320x12xf32>
    %138 = arith.addf %132, %137 : vector<320x12xf32>
    %c0_123 = arith.constant 0 : index
    %c83 = arith.constant 83 : index
    %c0_124 = arith.constant 0 : index
    %139 = vector.load %arg1[%c0_123, %c83, %c0_124] : memref<1x420x4xf32, #tpu.memory_space<vmem>>, vector<1x320x4xf32>
    %140 = vector.shape_cast %139 : vector<1x320x4xf32> to vector<320x4xf32>
    %c23_125 = arith.constant 23 : index
    %c0_126 = arith.constant 0 : index
    %c0_127 = arith.constant 0 : index
    %141 = vector.load %arg2[%c23_125, %c0_126, %c0_127] : memref<25x4x12xf32, #tpu.memory_space<vmem>>, vector<1x4x12xf32>
    %142 = vector.shape_cast %141 : vector<1x4x12xf32> to vector<4x12xf32>
    %cst_128 = arith.constant dense<0.000000e+00> : vector<320x12xf32>
    %143 = tpu.matmul %140, %142, %cst_128 {dimension_numbers = #tpu.dot_dimension_numbers<[1], [0], [0], [1], [0, 0, 1, 1], [], []>} : vector<320x4xf32>, vector<4x12xf32>, vector<320x12xf32> -> vector<320x12xf32>
    %144 = arith.addf %138, %143 : vector<320x12xf32>
    %c0_129 = arith.constant 0 : index
    %c84 = arith.constant 84 : index
    %c0_130 = arith.constant 0 : index
    %145 = vector.load %arg1[%c0_129, %c84, %c0_130] : memref<1x420x4xf32, #tpu.memory_space<vmem>>, vector<1x320x4xf32>
    %146 = vector.shape_cast %145 : vector<1x320x4xf32> to vector<320x4xf32>
    %c24_131 = arith.constant 24 : index
    %c0_132 = arith.constant 0 : index
    %c0_133 = arith.constant 0 : index
    %147 = vector.load %arg2[%c24_131, %c0_132, %c0_133] : memref<25x4x12xf32, #tpu.memory_space<vmem>>, vector<1x4x12xf32>
    %148 = vector.shape_cast %147 : vector<1x4x12xf32> to vector<4x12xf32>
    %cst_134 = arith.constant dense<0.000000e+00> : vector<320x12xf32>
    %149 = tpu.matmul %146, %148, %cst_134 {dimension_numbers = #tpu.dot_dimension_numbers<[1], [0], [0], [1], [0, 0, 1, 1], [], []>} : vector<320x4xf32>, vector<4x12xf32>, vector<320x12xf32> -> vector<320x12xf32>
    %150 = arith.addf %144, %149 : vector<320x12xf32>
    %c0_135 = arith.constant 0 : index
    %c0_136 = arith.constant 0 : index
    %c0_137 = arith.constant 0 : index
    %151 = vector.load %arg4[%c0_135, %c0_136, %c0_137] : memref<1x320x12xf32, #tpu.memory_space<vmem>>, vector<1x320x12xf32>
    %152 = vector.shape_cast %151 : vector<1x320x12xf32> to vector<320x12xf32>
    %153 = vector.shape_cast %150 : vector<320x12xf32> to vector<1x320x12xf32>
    tpu.vector_store %arg4[%c0_135, %c0_136, %c0_137], %153 {strides = array<i32>} : memref<1x320x12xf32, #tpu.memory_space<vmem>>, vector<1x320x12xf32>,
    %c0_138 = arith.constant 0 : index
    %c0_139 = arith.constant 0 : index
    %154 = vector.load %arg3[%c0_138, %c0_139] : memref<320x1xf32, #tpu.memory_space<vmem>>, vector<320x1xf32>
    %155 = vector.broadcast %154 : vector<320x1xf32> to vector<320x12xf32>
    %156 = arith.mulf %150, %155 : vector<320x12xf32>
    %cst_140 = arith.constant dense<0.000000e+00> : vector<12xf32>
    %157 = vector.multi_reduction <add>, %156, %cst_140 [0] : vector<320x12xf32> to vector<12xf32>
    %158 = vector.shape_cast %157 : vector<12xf32> to vector<1x12xf32>
    %c0_141 = arith.constant 0 : index
    %c0_142 = arith.constant 0 : index
    %c0_143 = arith.constant 0 : index
    %159 = vector.load %arg5[%c0_141, %c0_142, %c0_143] : memref<1x1x12xf32, #tpu.memory_space<vmem>>, vector<1x1x12xf32>
    %160 = vector.shape_cast %159 : vector<1x1x12xf32> to vector<1x12xf32>
    %161 = vector.shape_cast %158 : vector<1x12xf32> to vector<1x1x12xf32>
    tpu.vector_store %arg5[%c0_141, %c0_142, %c0_143], %161 {strides = array<i32>} : memref<1x1x12xf32, #tpu.memory_space<vmem>>, vector<1x1x12xf32>,
    %162 = arith.mulf %156, %150 : vector<320x12xf32>
    %cst_144 = arith.constant dense<0.000000e+00> : vector<12xf32>
    %163 = vector.multi_reduction <add>, %162, %cst_144 [0] : vector<320x12xf32> to vector<12xf32>
    %164 = vector.shape_cast %163 : vector<12xf32> to vector<1x12xf32>
    %c0_145 = arith.constant 0 : index
    %c0_146 = arith.constant 0 : index
    %c0_147 = arith.constant 0 : index
    %165 = vector.load %arg6[%c0_145, %c0_146, %c0_147] : memref<1x1x12xf32, #tpu.memory_space<vmem>>, vector<1x1x12xf32>
    %166 = vector.shape_cast %165 : vector<1x1x12xf32> to vector<1x12xf32>
    %167 = vector.shape_cast %164 : vector<1x12xf32> to vector<1x1x12xf32>
    tpu.vector_store %arg6[%c0_145, %c0_146, %c0_147], %167 {strides = array<i32>} : memref<1x1x12xf32, #tpu.memory_space<vmem>>, vector<1x1x12xf32>,
    return
  }
  func.func @transform_0(%arg0: i32) -> (i32, i32, i32) {
    %c0_i32 = arith.constant 0 : i32
    %c0_i32_0 = arith.constant 0 : i32
    %c0_i32_1 = arith.constant 0 : i32
    return %arg0, %c0_i32, %c0_i32_0 : i32, i32, i32
  }
  func.func @transform_1(%arg0: i32) -> (i32, i32, i32) {
    %c0_i32 = arith.constant 0 : i32
    %c0_i32_0 = arith.constant 0 : i32
    %c0_i32_1 = arith.constant 0 : i32
    %c0_i32_2 = arith.constant 0 : i32
    return %c0_i32, %c0_i32_0, %c0_i32_1 : i32, i32, i32
  }
  func.func @transform_2(%arg0: i32) -> (i32, i32) {
    %c0_i32 = arith.constant 0 : i32
    %c0_i32_0 = arith.constant 0 : i32
    %c0_i32_1 = arith.constant 0 : i32
    return %c0_i32, %c0_i32_0 : i32, i32
  }
  func.func @transform_3(%arg0: i32) -> (i32, i32, i32) {
    %c0_i32 = arith.constant 0 : i32
    %c0_i32_0 = arith.constant 0 : i32
    %c0_i32_1 = arith.constant 0 : i32
    return %arg0, %c0_i32, %c0_i32_0 : i32, i32, i32
  }
  func.func @transform_4(%arg0: i32) -> (i32, i32, i32) {
    %c0_i32 = arith.constant 0 : i32
    %c0_i32_0 = arith.constant 0 : i32
    %c0_i32_1 = arith.constant 0 : i32
    return %arg0, %c0_i32, %c0_i32_0 : i32, i32, i32
  }
  func.func @transform_5(%arg0: i32) -> (i32, i32, i32) {
    %c0_i32 = arith.constant 0 : i32
    %c0_i32_0 = arith.constant 0 : i32
    %c0_i32_1 = arith.constant 0 : i32
    return %arg0, %c0_i32, %c0_i32_0 : i32, i32, i32
  }
}

module attributes {stable_mosaic.version = 11 : i64} {
  func.func @_bn_relu_kernel(%arg0: i32, %arg1: memref<20x384xf32, #tpu.memory_space<vmem>>, %arg2: memref<1x384xf32, #tpu.memory_space<vmem>>, %arg3: memref<1x384xf32, #tpu.memory_space<vmem>>, %arg4: memref<20x384xf32, #tpu.memory_space<vmem>>) attributes {dimension_semantics = [#tpu.dimension_semantics<parallel>], iteration_bounds = array<i64: 1>, scalar_prefetch = 0 : i64, scratch_operands = 0 : i64, tpu.core_type = #tpu.core_type<tc>, window_params = [{transform_indices = @transform_0, window_bounds = array<i64: 20, 384>}, {pipeline_mode = #tpu.pipeline_mode<synchronous>, transform_indices = @transform_1, window_bounds = array<i64: 1, 384>}, {pipeline_mode = #tpu.pipeline_mode<synchronous>, transform_indices = @transform_2, window_bounds = array<i64: 1, 384>}, {transform_indices = @transform_3, window_bounds = array<i64: 20, 384>}]} {
    %c0 = arith.constant 0 : index
    %c0_0 = arith.constant 0 : index
    %0 = vector.load %arg1[%c0, %c0_0] : memref<20x384xf32, #tpu.memory_space<vmem>>, vector<20x384xf32>
    %c0_1 = arith.constant 0 : index
    %c0_2 = arith.constant 0 : index
    %1 = vector.load %arg2[%c0_1, %c0_2] : memref<1x384xf32, #tpu.memory_space<vmem>>, vector<1x384xf32>
    %2 = vector.broadcast %1 : vector<1x384xf32> to vector<20x384xf32>
    %3 = arith.mulf %0, %2 : vector<20x384xf32>
    %c0_3 = arith.constant 0 : index
    %c0_4 = arith.constant 0 : index
    %4 = vector.load %arg3[%c0_3, %c0_4] : memref<1x384xf32, #tpu.memory_space<vmem>>, vector<1x384xf32>
    %5 = vector.broadcast %4 : vector<1x384xf32> to vector<20x384xf32>
    %6 = arith.addf %3, %5 : vector<20x384xf32>
    %cst = arith.constant 0.000000e+00 : f32
    %7 = vector.broadcast %cst : f32 to vector<20x384xf32>
    %8 = arith.maximumf %6, %7 : vector<20x384xf32>
    %c0_5 = arith.constant 0 : index
    %c0_6 = arith.constant 0 : index
    %9 = vector.load %arg4[%c0_5, %c0_6] : memref<20x384xf32, #tpu.memory_space<vmem>>, vector<20x384xf32>
    tpu.vector_store %arg4[%c0_5, %c0_6], %8 {strides = array<i32>} : memref<20x384xf32, #tpu.memory_space<vmem>>, vector<20x384xf32>,
    return
  }
  func.func @transform_0(%arg0: i32) -> (i32, i32) {
    %c0_i32 = arith.constant 0 : i32
    %c0_i32_0 = arith.constant 0 : i32
    return %arg0, %c0_i32 : i32, i32
  }
  func.func @transform_1(%arg0: i32) -> (i32, i32) {
    %c0_i32 = arith.constant 0 : i32
    %c0_i32_0 = arith.constant 0 : i32
    %c0_i32_1 = arith.constant 0 : i32
    return %c0_i32, %c0_i32_0 : i32, i32
  }
  func.func @transform_2(%arg0: i32) -> (i32, i32) {
    %c0_i32 = arith.constant 0 : i32
    %c0_i32_0 = arith.constant 0 : i32
    %c0_i32_1 = arith.constant 0 : i32
    return %c0_i32, %c0_i32_0 : i32, i32
  }
  func.func @transform_3(%arg0: i32) -> (i32, i32) {
    %c0_i32 = arith.constant 0 : i32
    %c0_i32_0 = arith.constant 0 : i32
    return %arg0, %c0_i32 : i32, i32
  }
}

</mosaic_0001>

<bundles_post_ra>
// kernel: tile.18
= control target key start
LH: loop header
LB: loop body
LE: loop exit
PB: predicated region body
PF: predicated region fallthrough
CT: control target
= control target key end

     0   :  { %s40_s0 = inlined_call_operand.vmem [shape: f32[12], index: 0, kind: input, shape index: {}]   ;;  %s41_s1 = inlined_call_operand.vmem [shape: f32[32,12], index: 1, kind: output, shape index: {}]  }
   0x1   :  { %v4_v0 = vld [vmem:[%s40_s0] ss:$0 sm:$0xff] }
   0x2   :  { %5 = vst [vmem:[%s41_s1] sm:$0xff] %v4_v0  ;;  %12 = vst [vmem:[%s41_s1 + $0x8] sm:$0xff] %v4_v0 }
   0x3   :  { %13 = vst [vmem:[%s41_s1 + $0x10] sm:$0xff] %v4_v0  ;;  %14 = vst [vmem:[%s41_s1 + $0x18] sm:$0xff] %v4_v0 }

// kernel: tile.19
= control target key start
LH: loop header
LB: loop body
LE: loop exit
PB: predicated region body
PF: predicated region fallthrough
CT: control target
= control target key end

     0   :  { %vm9_vm0 = vcmask 31744   ;;  %vm13_vm1 = vcmask 64512   ;;  %s314_s14 = smov 124   ;;  %s315_s15 = smov 116   ;;  %vm3_vm2 = vcmask 97280   ;;  %vm16_vm3 = vcmask 1048544   ;;  %s470_s0 = inlined_call_operand.vmem [shape: f32[32,12], index: 0, kind: input, shape index: {}]   ;;  %s471_s1 = inlined_call_operand.vmem [shape: f32[1,384], index: 1, kind: output, shape index: {}]  }
   0x1   :  { %v248_v0 = vld [vmem:[%s470_s0 + $0x15] sm:$0x1]   ;;  %v252_v3 = vld [vmem:[%s470_s0 + $0x1f] sm:$0x1]   ;;  %v250_v4 = vld [vmem:[%s470_s0 + $0xa] sm:$0x1]  }
   0x2   :  { %v249_v1 = vld [vmem:[%s470_s0 + $0x15] sm:$0x1]   ;;  %34 = vrot.lane.b32.xlu1 %v252_v3, %s315_s15  ;;  %v251_v5 = vld [vmem:[%s470_s0 + $0xa] sm:$0x1]   ;;  %v253_v7 = vld [vmem:[%s470_s0 + $0x14] sm:$0x1]  }
   0x3   :  { %v10_v2 = vsel %vm9_vm0, %v249_v1, %v248_v0  ;;  %v24_v6 = vsel %vm13_vm1, %v251_v5, %v250_v4  ;;  %s316_s20 = smov 120   ;;  %s317_s21 = smov 112   ;;  %v254_v8 = vld [vmem:[%s470_s0 + $0x9] sm:$0x1]   ;;  %v255_v9 = vld [vmem:[%s470_s0 + $0x1e] sm:$0x1]  }
   0x4   :  { %11 = vrot.lane.b32.xlu0 %v10_v2, %s314_s14  ;;  %s318_s26 = smov 108   ;;  %s319_s27 = smov 104   ;;  %v256_v10 = vld [vmem:[%s470_s0 + $0x13] sm:$0x1]   ;;  %v257_v11 = vld [vmem:[%s470_s0 + $0x8] sm:$0x1]  }
   0x5   :  { %s320_s3 = smov 100   ;;  %s321_s4 = smov 96   ;;  %v258_v12 = vld [vmem:[%s470_s0 + $0x1d] sm:$0x1]   ;;  %v259_v13 = vld [vmem:[%s470_s0 + $0x12] sm:$0x1]  }
   0x6   :  { %41 = vrot.lane.b32.xlu1 %v253_v7, %s317_s21  ;;  %v2_v14 = vld [vmem:[%s470_s0] sm:$0x1]   ;;  %s322_s11 = smov 92   ;;  %s323_s12 = smov 88   ;;  %v260_v15 = vld [vmem:[%s470_s0 + $0x7] sm:$0x1]  }
   0x7   :  { %4 = vst.msk [vmem:[#allocation0] sm:$0x1] %vm3_vm2, %v2_v14   ;;  %v261_v16 = vld [vmem:[%s470_s0 + $0x1c] sm:$0x1]   ;;  %s324_s17 = smov 84   ;;  %s325_s18 = smov 80  }
   0x8   :  { %25 = vrot.lane.b32.xlu0 %v24_v6, %s316_s20  ;;  %v262_v17 = vld [vmem:[%s470_s0 + $0x11] sm:$0x1]   ;;  %v263_v18 = vld [vmem:[%s470_s0 + $0x6] sm:$0x1]   ;;  %s326_s23 = smov 76   ;;  %s327_s24 = smov 72  }
   0x9   :  { %v264_v19 = vld [vmem:[%s470_s0 + $0x1b] sm:$0x1]   ;;  %v265_v20 = vld [vmem:[%s470_s0 + $0x10] sm:$0x1]   ;;  %s328_s29 = smov 68   ;;  %s329_s30 = smov 64  }
   0xa   :  { %54 = vrot.lane.b32.xlu1 %v255_v9, %s319_s27  ;;  %v266_v21 = vld [vmem:[%s470_s0 + $0x5] sm:$0x1]   ;;  %v267_v22 = vld [vmem:[%s470_s0 + $0x1a] sm:$0x1]   ;;  %s330_s6 = smov 60   ;;  %s331_s7 = smov 56  }
   0xb   :  { %v268_v23 = vld [vmem:[%s470_s0 + $0xf] sm:$0x1]   ;;  %v269_v24 = vld [vmem:[%s470_s0 + $0x4] sm:$0x1]   ;;  %s333_s13 = smov 48   ;;  %s335_s19 = smov 40  }
   0xc   :  { %48 = vrot.lane.b32.xlu0 %v254_v8, %s318_s26  ;;  %v270_v25 = vld [vmem:[%s470_s0 + $0x19] sm:$0x1]   ;;  %v271_v26 = vld [vmem:[%s470_s0 + $0xe] sm:$0x1]   ;;  %v272_v27 = vld [vmem:[%s470_s0 + $0x3] sm:$0x1]  }
   0xd   :  { %v273_v28 = vld [vmem:[%s470_s0 + $0x18] sm:$0x1]   ;;  %s337_s25 = smov 32   ;;  %v274_v29 = vld [vmem:[%s470_s0 + $0xd] sm:$0x1]   ;;  %s339_s2 = smov 24  }
   0xe   :  { %68 = vrot.lane.b32.xlu1 %v257_v11, %s321_s4  ;;  %v275_v30 = vld [vmem:[%s470_s0 + $0x2] sm:$0x1]   ;;  %v276_v31 = vld [vmem:[%s470_s0 + $0x17] sm:$0x1]   ;;  %v277_v32 = vld [vmem:[%s470_s0 + $0xc] sm:$0x1]  }
   0xf   :  { %s341_s8 = smov 16   ;;  %v278_v33 = vld [vmem:[%s470_s0 + $0x1] sm:$0x1]   ;;  %v279_v34 = vld [vmem:[%s470_s0 + $0x16] sm:$0x1]   ;;  %s343_s14 = smov 8  }
  0x10   :  { %61 = vrot.lane.b32.xlu0 %v256_v10, %s320_s3  ;;  %v280_v35 = vld [vmem:[%s470_s0 + $0xb] sm:$0x1]   ;;  %s344_s0 = smov 4   ;;  %vm36_vm4 = vcmask 1048480   ;;  %vm30_vm5 = vcmask 1048512   ;;  %vm43_vm6 = vcmask 1015680  }
  0x11   :  { %vm50_vm7 = vcmask 982880   ;;  %vm56_vm8 = vcmask 950080   ;;  %vm63_vm9 = vcmask 917280   ;;  %vm70_vm10 = vcmask 884480  }
  0x12   :  { %81 = vrot.lane.b32.xlu1 %v259_v13, %s323_s12  ;;  %s332_s12 = smov 52   ;;  %vm76_vm11 = vcmask 851680   ;;  %vm83_vm12 = vcmask 818880   ;;  %vm90_vm13 = vcmask 786080   ;;  %vm96_vm14 = vcmask 753280  }
  0x13   :  { %vm103_vm15 = vcmask 720480   ;;  %vm123_vm2 = vcmask 622080  }
  0x14   :  { %74 = vrot.lane.b32.xlu0 %v258_v12, %s322_s11 }
  0x16   :  { %94 = vrot.lane.b32.xlu1 %v261_v16, %s325_s18  ;;  %s334_s18 = smov 44  }
  0x18   :  { %88 = vrot.lane.b32.xlu0 %v260_v15, %s324_s17 }
  0x1a   :  { %108 = vrot.lane.b32.xlu1 %v263_v18, %s327_s24  ;;  %s336_s24 = smov 36  }
  0x1c   :  { %101 = vrot.lane.b32.xlu0 %v262_v17, %s326_s23 }
  0x1e   :  { %121 = vrot.lane.b32.xlu1 %v265_v20, %s329_s30  ;;  %s338_s30 = smov 28  }
  0x20   :  { %114 = vrot.lane.b32.xlu0 %v264_v19, %s328_s29 }
  0x22   :  { %134 = vrot.lane.b32.xlu1 %v267_v22, %s331_s7  ;;  %s340_s7 = smov 20  }
  0x24   :  { %128 = vrot.lane.b32.xlu0 %v266_v21, %s330_s6 }
  0x26   :  { %148 = vrot.lane.b32.xlu1 %v269_v24, %s333_s13  ;;  %s342_s13 = smov 12  }
  0x28   :  { %141 = vrot.lane.b32.xlu0 %v268_v23, %s332_s12 }
  0x2a   :  { %161 = vrot.lane.b32.xlu1 %v271_v26, %s335_s19 }
  0x2c   :  { %154 = vrot.lane.b32.xlu0 %v270_v25, %s334_s18 }
  0x2e   :  { %174 = vrot.lane.b32.xlu1 %v273_v28, %s337_s25 }
  0x30   :  { %168 = vrot.lane.b32.xlu0 %v272_v27, %s336_s24 }
  0x32   :  { %188 = vrot.lane.b32.xlu1 %v275_v30, %s339_s2 }
  0x34   :  { %181 = vrot.lane.b32.xlu0 %v274_v29, %s338_s30 }
  0x36   :  { %201 = vrot.lane.b32.xlu1 %v277_v32, %s341_s8 }
  0x38   :  { %194 = vrot.lane.b32.xlu0 %v276_v31, %s340_s7 }
  0x3a   :  { %214 = vrot.lane.b32.xlu1 %v279_v34, %s343_s14 }
  0x3c   :  { %208 = vrot.lane.b32.xlu0 %v278_v33, %s342_s13 }
  0x40   :  { %221 = vrot.lane.b32.xlu0 %v280_v35, %s344_s0 }
  0x74   :  { %v35_v37 = vpop.permute.xlu1 %34  }
  0x76   :  { %v12_v36 = vpop.permute.xlu0 %11  }
  0x77   :  { %15 = vst.msk [vmem:[#allocation0 + $0x10] sm:$0x1] %vm13_vm1, %v12_v36   ;;  %vm116_vm1 = vcmask 654880  }
  0x78   :  { %18 = vst.msk [vmem:[#allocation0 + $0x8] sm:$0x1] %vm16_vm3, %v12_v36   ;;  %v42_v39 = vpop.permute.xlu1 %41   ;;  %vm130_vm3 = vcmask 589280  }
  0x79   :  { %38 = vst.msk [vmem:[#allocation0 + $0x10] sm:$0x1] %vm36_vm4, %v35_v37   ;;  %vm136_vm4 = vcmask 556480  }
  0x7a   :  { %v26_v38 = vpop.permute.xlu0 %25  }
  0x7b   :  { %29 = vst.msk [vmem:[#allocation0 + $0x8] sm:$0x1] %vm9_vm0, %v26_v38   ;;  %vm110_vm0 = vcmask 687680  }
  0x7c   :  { %31 = vst.msk [vmem:[#allocation0] sm:$0x1] %vm30_vm5, %v26_v38   ;;  %v55_v41 = vpop.permute.xlu1 %54   ;;  %vm143_vm5 = vcmask 523680  }
  0x7d   :  { %45 = vst.msk [vmem:[#allocation0 + $0x8] sm:$0x1] %vm43_vm6, %v42_v39   ;;  %vm150_vm6 = vcmask 490880  }
  0x7e   :  { %v49_v40 = vpop.permute.xlu0 %48   ;;  %58 = vst.msk [vmem:[#allocation0 + $0x10] sm:$0x1] %vm56_vm8, %v55_v41   ;;  %vm163_vm8 = vcmask 425280  }
  0x7f   :  { %51 = vst.msk [vmem:[#allocation0] sm:$0x1] %vm50_vm7, %v49_v40   ;;  %vm156_vm7 = vcmask 458080  }
  0x80   :  { %v69_v43 = vpop.permute.xlu1 %68  }
  0x81   :  { %71 = vst.msk [vmem:[#allocation0] sm:$0x1] %vm70_vm10, %v69_v43   ;;  %vm176_vm10 = vcmask 359680  }
  0x82   :  { %v62_v42 = vpop.permute.xlu0 %61  }
  0x83   :  { %65 = vst.msk [vmem:[#allocation0 + $0x8] sm:$0x1] %vm63_vm9, %v62_v42   ;;  %vm170_vm9 = vcmask 392480  }
  0x84   :  { %v82_v45 = vpop.permute.xlu1 %81  }
  0x85   :  { %85 = vst.msk [vmem:[#allocation0 + $0x8] sm:$0x1] %vm83_vm12, %v82_v45   ;;  %vm190_vm12 = vcmask 294080  }
  0x86   :  { %v75_v44 = vpop.permute.xlu0 %74  }
  0x87   :  { %78 = vst.msk [vmem:[#allocation0 + $0x10] sm:$0x1] %vm76_vm11, %v75_v44   ;;  %vm183_vm11 = vcmask 326880  }
  0x88   :  { %v95_v47 = vpop.permute.xlu1 %94  }
  0x89   :  { %98 = vst.msk [vmem:[#allocation0 + $0x10] sm:$0x1] %vm96_vm14, %v95_v47   ;;  %vm203_vm14 = vcmask 228480  }
  0x8a   :  { %v89_v46 = vpop.permute.xlu0 %88  }
  0x8b   :  { %91 = vst.msk [vmem:[#allocation0] sm:$0x1] %vm90_vm13, %v89_v46   ;;  %vm196_vm13 = vcmask 261280  }
  0x8c   :  { %v109_v49 = vpop.permute.xlu1 %108  }
  0x8d   :  { %111 = vst.msk [vmem:[#allocation0] sm:$0x1] %vm110_vm0, %v109_v49   ;;  %vm216_vm0 = vcmask 162880  }
  0x8e   :  { %v102_v48 = vpop.permute.xlu0 %101  }
  0x8f   :  { %105 = vst.msk [vmem:[#allocation0 + $0x8] sm:$0x1] %vm103_vm15, %v102_v48   ;;  %vm210_vm15 = vcmask 195680  }
  0x90   :  { %v122_v51 = vpop.permute.xlu1 %121  }
  0x91   :  { %125 = vst.msk [vmem:[#allocation0 + $0x8] sm:$0x1] %vm123_vm2, %v122_v51  }
  0x92   :  { %v115_v50 = vpop.permute.xlu0 %114  }
  0x93   :  { %118 = vst.msk [vmem:[#allocation0 + $0x10] sm:$0x1] %vm116_vm1, %v115_v50   ;;  %vm223_vm1 = vcmask 130080  }
  0x94   :  { %v135_v53 = vpop.permute.xlu1 %134  }
  0x95   :  { %138 = vst.msk [vmem:[#allocation0 + $0x10] sm:$0x1] %vm136_vm4, %v135_v53  }
  0x96   :  { %v129_v52 = vpop.permute.xlu0 %128  }
  0x97   :  { %131 = vst.msk [vmem:[#allocation0] sm:$0x1] %vm130_vm3, %v129_v52  }
  0x98   :  { %v149_v55 = vpop.permute.xlu1 %148  }
  0x99   :  { %151 = vst.msk [vmem:[#allocation0] sm:$0x1] %vm150_vm6, %v149_v55  }
  0x9a   :  { %v142_v54 = vpop.permute.xlu0 %141  }
  0x9b   :  { %145 = vst.msk [vmem:[#allocation0 + $0x8] sm:$0x1] %vm143_vm5, %v142_v54  }
  0x9c   :  { %v162_v57 = vpop.permute.xlu1 %161  }
  0x9d   :  { %165 = vst.msk [vmem:[#allocation0 + $0x8] sm:$0x1] %vm163_vm8, %v162_v57  }
  0x9e   :  { %v155_v56 = vpop.permute.xlu0 %154  }
  0x9f   :  { %158 = vst.msk [vmem:[#allocation0 + $0x10] sm:$0x1] %vm156_vm7, %v155_v56  }
  0xa0   :  { %v175_v59 = vpop.permute.xlu1 %174  }
  0xa1   :  { %178 = vst.msk [vmem:[#allocation0 + $0x10] sm:$0x1] %vm176_vm10, %v175_v59  }
  0xa2   :  { %v169_v58 = vpop.permute.xlu0 %168  }
  0xa3   :  { %171 = vst.msk [vmem:[#allocation0] sm:$0x1] %vm170_vm9, %v169_v58  }
  0xa4   :  { %v189_v61 = vpop.permute.xlu1 %188  }
  0xa5   :  { %191 = vst.msk [vmem:[#allocation0] sm:$0x1] %vm190_vm12, %v189_v61  }
  0xa6   :  { %v182_v60 = vpop.permute.xlu0 %181  }
  0xa7   :  { %185 = vst.msk [vmem:[#allocation0 + $0x8] sm:$0x1] %vm183_vm11, %v182_v60  }
  0xa8   :  { %v202_v63 = vpop.permute.xlu1 %201  }
  0xa9   :  { %205 = vst.msk [vmem:[#allocation0 + $0x8] sm:$0x1] %vm203_vm14, %v202_v63  }
  0xaa   :  { %v195_v62 = vpop.permute.xlu0 %194  }
  0xab   :  { %198 = vst.msk [vmem:[#allocation0 + $0x10] sm:$0x1] %vm196_vm13, %v195_v62  }
  0xac   :  { %v215_v1 = vpop.permute.xlu1 %214  }
  0xad   :  { %218 = vst.msk [vmem:[#allocation0 + $0x10] sm:$0x1] %vm216_vm0, %v215_v1  }
  0xae   :  { %v209_v0 = vpop.permute.xlu0 %208  }
  0xaf   :  { %211 = vst.msk [vmem:[#allocation0] sm:$0x1] %vm210_vm15, %v209_v0  }
  0xb2   :  { %v222_v2 = vpop.permute.xlu0 %221  }
  0xb3   :  { %225 = vst.msk [vmem:[#allocation0 + $0x8] sm:$0x1] %vm223_vm1, %v222_v2  }
  0xb4   :  { %v241_v4 = vld [vmem:[#allocation0 + $0x10] sm:$0x1] }
  0xb5   :  { %282 = vst [vmem:[%s471_s1 + $0x2] sm:$0x1] %v241_v4 }
  0xb6   :  { %v230_v3 = vld [vmem:[#allocation0] sm:$0x1] }
  0xb7   :  { %233 = vst [vmem:[%s471_s1] sm:$0x1] %v230_v3 }
  0xba   :  { %v235_v5 = vld [vmem:[#allocation0 + $0x8] sm:$0x1] }
  0xbb   :  { %281 = vst [vmem:[%s471_s1 + $0x1] sm:$0x1] %v235_v5 }

// kernel: inception_module_forward.3
= control target key start
LH: loop header
LB: loop body
LE: loop exit
PB: predicated region body
PF: predicated region fallthrough
CT: control target
= control target key end

     0   :  { %v25_v0 = vlaneseq  ;;  %s177_s1 = inlined_call_operand.vmem [shape: f32[1,384], index: 1, kind: input, shape index: {}]   ;;  %s178_s2 = inlined_call_operand.vmem [shape: f32[1,384], index: 2, kind: input, shape index: {}]   ;;  %s179_s0 = inlined_call_operand.vmem [shape: f32[20,384], index: 0, kind: input, shape index: {}, may-alias: {0,3}]   ;;  %s180_s3 = inlined_call_operand.vmem [shape: f32[20,384], index: 3, kind: output, shape index: {}, may-alias: {0,3}]  }
   0x1   :  { %v23_v2 = vld [vmem:[%s177_s1] sm:$0x7]  ;;  %v15_v6 = vld [vmem:[%s179_s0 + $0x8] sm:$0xff]  ;;  %v16_v9 = vld [vmem:[%s179_s0 + $0x10] sm:$0xff] }
   0x2   :  { %v26_v1 = vshrl.u32 %v25_v0, 7  ;;  %v49_v3 = vld [vmem:[%s178_s2] sm:$0x7]  ;;  %v17_v10 = vld [vmem:[%s179_s0 + $0x18] sm:$0xff]  ;;  %v19_v16 = vld [vmem:[%s179_s0 + $0x28] sm:$0xff] }
   0x3   :  { %v14_v4 = vld [vmem:[%s179_s0] sm:$0xff]  ;;  %v20_v17 = vld [vmem:[%s179_s0 + $0x30] sm:$0xf]  ;;  %v21_v18 = vld [vmem:[%s179_s0 + $0x38] sm:$0xf] }
   0x4   :  { %v27_v5 = vsub.s32 0, %v26_v1  ;;  %v31_v7 = vsub.s32 1, %v26_v1  ;;  %v35_v8 = vsub.s32 2, %v26_v1  ;;  %v18_v11 = vld [vmem:[%s179_s0 + $0x20] sm:$0xff] }
   0x5   :  { %v22_v37 = vld [vmem:[%s179_s0 + $0x40] sm:$0xf] }
   0x6   :  { %v28_v12 = vrot.slane %v23_v2, %v27_v5  ;;  %v54_v13 = vrot.slane %v49_v3, %v27_v5  ;;  %v32_v14 = vrot.slane %v23_v2, %v31_v7  ;;  %v58_v15 = vrot.slane %v49_v3, %v31_v7 }
   0x7   :  { %v36_v19 = vrot.slane %v23_v2, %v35_v8  ;;  %v62_v20 = vrot.slane %v49_v3, %v35_v8 }
   0x8   :  { %v40_v21 = vmul.f32 %v28_v12, %v14_v4  ;;  %v41_v22 = vmul.f32 %v32_v14, %v15_v6  ;;  %v43_v23 = vmul.f32 %v28_v12, %v17_v10  ;;  %v44_v24 = vmul.f32 %v32_v14, %v18_v11 }
   0x9   :  { %v42_v25 = vmul.f32 %v36_v19, %v16_v9  ;;  %v45_v26 = vmul.f32 %v36_v19, %v19_v16  ;;  %v46_v27 = vmul.f32 %v28_v12, %v20_v17  ;;  %v47_v28 = vmul.f32 %v32_v14, %v21_v18 }
   0xa   :  { %v66_v29 = vadd.f32 %v54_v13, %v40_v21  ;;  %v67_v30 = vadd.f32 %v58_v15, %v41_v22  ;;  %v69_v31 = vadd.f32 %v54_v13, %v43_v23  ;;  %v70_v32 = vadd.f32 %v58_v15, %v44_v24 }
   0xb   :  { %v68_v33 = vadd.f32 %v62_v20, %v42_v25  ;;  %v71_v34 = vadd.f32 %v62_v20, %v45_v26  ;;  %v72_v35 = vadd.f32 %v54_v13, %v46_v27  ;;  %v73_v36 = vadd.f32 %v58_v15, %v47_v28 }
   0xc   :  { %v75_v38 = vmax.f32 %v66_v29, 0.0  ;;  %v76_v39 = vmax.f32 %v67_v30, 0.0  ;;  %v78_v40 = vmax.f32 %v69_v31, 0.0  ;;  %v79_v41 = vmax.f32 %v70_v32, 0.0 }
   0xd   :  { %v77_v42 = vmax.f32 %v68_v33, 0.0  ;;  %v80_v43 = vmax.f32 %v71_v34, 0.0  ;;  %v81_v44 = vmax.f32 %v72_v35, 0.0  ;;  %v82_v45 = vmax.f32 %v73_v36, 0.0 }
   0xe   :  { %84 = vst [vmem:[%s180_s3] sm:$0xff] %v75_v38  ;;  %85 = vst [vmem:[%s180_s3 + $0x8] sm:$0xff] %v76_v39  ;;  %v48_v46 = vmul.f32 %v36_v19, %v22_v37 }
   0xf   :  { %87 = vst [vmem:[%s180_s3 + $0x18] sm:$0xff] %v78_v40  ;;  %88 = vst [vmem:[%s180_s3 + $0x20] sm:$0xff] %v79_v41 }
  0x10   :  { %86 = vst [vmem:[%s180_s3 + $0x10] sm:$0xff] %v77_v42  ;;  %89 = vst [vmem:[%s180_s3 + $0x28] sm:$0xff] %v80_v43  ;;  %v74_v47 = vadd.f32 %v62_v20, %v48_v46 }
  0x11   :  { %90 = vst [vmem:[%s180_s3 + $0x30] sm:$0xf] %v81_v44  ;;  %91 = vst [vmem:[%s180_s3 + $0x38] sm:$0xf] %v82_v45 }
  0x12   :  { %v83_v48 = vmax.f32 %v74_v47, 0.0 }
  0x14   :  { %92 = vst [vmem:[%s180_s3 + $0x40] sm:$0xf] %v83_v48 }

// kernel: inception_module_forward.2
= control target key start
LH: loop header
LB: loop body
LE: loop exit
PB: predicated region body
PF: predicated region fallthrough
CT: control target
= control target key end

     0   :  { %s16239_s18 = smov 0   ;;  %s20446_s0 = inlined_call_operand.vmem [shape: f32[2,420,4], index: 0, kind: input, shape index: {}]   ;;  %s20447_s1 = inlined_call_operand.vmem [shape: f32[25,4,12], index: 1, kind: input, shape index: {}]   ;;  %s20448_s2 = inlined_call_operand.vmem [shape: f32[320,1], index: 2, kind: input, shape index: {}]   ;;  %s20449_s3 = inlined_call_operand.vmem [shape: f32[2,320,12], index: 3, kind: output, shape index: {0}]   ;;  %s20450_s4 = inlined_call_operand.vmem [shape: f32[2,1,12], index: 4, kind: output, shape index: {1}]   ;;  %s20451_s5 = inlined_call_operand.vmem [shape: f32[2,1,12], index: 5, kind: output, shape index: {2}]  }
   0x1 LB: > { %s12552_s19 = sadd.s32 4294967295, %s16206_s18   ;;  %p12556_p0 = scmp.ge.s32.totalorder %s16206_s18, 1  ;;  %s16206_s18 = sphi %s16239_s18, %s16_s18  }
   0x2   : > { %p192_p1 = scmp.lt.s32.totalorder %s16206_s18, 3 }
   0x4   : > { %p193_p2 = pnand %p12556_p0, %p192_p1 }
   0x6   : > { %196 = sbr.rel (%p193_p2) target bundleno = 1237 (0x4d5), region = 32 }
   0xb   : > { %v12559_v0 = vld [vmem:[%s20447_s1 + $0x4] sm:$0xf]  ;;  %vm446_vm0 = vcmask 1043456   ;;  %p226_p3 = scmp.lt.s32.totalorder %s12552_s19, 1  ;;  %v282_v1 = vld [vmem:[%s20447_s1] sm:$0xf] }
   0xc   : > { %16185 = vmatprep.subr.msk.mxu1 %vm446_vm0, %v12559_v0  ;;  %14635 = vmatprep.subr.msk.mxu0 %vm446_vm0, %v12559_v0  ;;  %v12642_v2 = vld [vmem:[%s20447_s1 + $0x8] sm:$0xf]  ;;  %vm325_vm1 = vcmask 31744   ;;  %v16283_v9 = vld [vmem:[%s20447_s1 + $0xc] sm:$0xf]  ;;  %vm11913_vm2 = vcmask 97280  }
   0xd   : > { %16186 = vmatpush3.msk.msra.mxu1 %vm446_vm0, %v12559_v0  ;;  %14636 = vmatpush3.msk.msra.mxu0 %vm446_vm0, %v12559_v0  ;;  %s20545_s19 = smov (!%p226_p3, %s12552_s19), 1  ;;  %v16288_v10 = vld [vmem:[%s20447_s1 + $0x10] sm:$0xf]  ;;  %v16379_v51 = vld [vmem:[%s20447_s1 + $0x14] sm:$0xf]  ;;  %vm12319_vm3 = vcmask 90112  }
   0xe   : > { %14697 = vmatprep.subr.msk.mxu1 %vm446_vm0, %v282_v1  ;;  %14759 = vmatprep.subr.msk.mxu0 %vm446_vm0, %v12642_v2  ;;  %s16187_s26 = smul.u32 424, %s20545_s19  ;;  %v16384_v52 = vld [vmem:[%s20447_s1 + $0x18] sm:$0xf]  ;;  %s241_s30 = scalar_lea.vmem %s20451_s5, %s20545_s19 }
  0x10   : > { %s16268_s29 = scalar_lea.vmem %s20446_s0, %s16187_s26  ;;  %s238_s26 = scalar_lea.vmem %s20450_s4, %s20545_s19 }
  0x11   : > { %v283_v3 = vld [vmem:[%s16268_s29 + $0x1] sm:$0xff]  ;;  %v284_v5 = vld [vmem:[%s16268_s29 + $0x9] sm:$0xff]  ;;  %v285_v7 = vld [vmem:[%s16268_s29 + $0x11] sm:$0xff] }
  0x12   : > { %v303_v4 = vld [vmem:[%s16268_s29 + $0xa1] sm:$0xff]  ;;  %14637 = vmatprep.mubr.msk.f32.mxu0 %vm325_vm1, %v283_v3  ;;  %v304_v6 = vld [vmem:[%s16268_s29 + $0xa9] sm:$0xff]  ;;  %v305_v8 = vld [vmem:[%s16268_s29 + $0xb1] sm:$0xff] }
  0x13   : > { %14667 = vmatprep.mubr.msk.f32.mxu1 %vm325_vm1, %v303_v4  ;;  %14638 = vmatmul.mubr.msk.f32.vlgmr.msra.gmra.mxu0 %vm325_vm1, %v284_v5  ;;  %v286_v11 = vld [vmem:[%s16268_s29 + $0x19] sm:$0xff]  ;;  %v287_v13 = vld [vmem:[%s16268_s29 + $0x21] sm:$0xff]  ;;  %v288_v15 = vld [vmem:[%s16268_s29 + $0x29] sm:$0xff] }
  0x14   : > { %14668 = vmatmul.mubr.msk.f32.vlgmr.msra.gmra.mxu1 %vm325_vm1, %v304_v6  ;;  %14760 = vmatpush3.msk.msra.mxu0 %vm446_vm0, %v12642_v2  ;;  %v306_v12 = vld [vmem:[%s16268_s29 + $0xb9] sm:$0xff]  ;;  %v307_v14 = vld [vmem:[%s16268_s29 + $0xc1] sm:$0xff]  ;;  %v308_v16 = vld [vmem:[%s16268_s29 + $0xc9] sm:$0xff] }
  0x15   : > { %14698 = vmatpush3.msk.msra.mxu1 %vm446_vm0, %v282_v1  ;;  %14640 = vmatprep.mubr.msk.f32.mxu0 %vm325_vm1, %v285_v7  ;;  %v289_v17 = vld [vmem:[%s16268_s29 + $0x31] sm:$0xff]  ;;  %v290_v19 = vld [vmem:[%s16268_s29 + $0x39] sm:$0xff]  ;;  %v291_v21 = vld [vmem:[%s16268_s29 + $0x41] sm:$0xff] }
  0x16   : > { %14670 = vmatprep.mubr.msk.f32.mxu1 %vm325_vm1, %v305_v8  ;;  %14821 = vmatprep.subr.msk.mxu1 %vm446_vm0, %v16283_v9  ;;  %v309_v18 = vld [vmem:[%s16268_s29 + $0xd1] sm:$0xff]  ;;  %v310_v20 = vld [vmem:[%s16268_s29 + $0xd9] sm:$0xff]  ;;  %v311_v22 = vld [vmem:[%s16268_s29 + $0xe1] sm:$0xff] }
  0x17   : > { %14883 = vmatprep.subr.msk.mxu0 %vm446_vm0, %v16288_v10  ;;  %14641 = vmatmul.mubr.msk.f32.gmra.mxu0 %vm325_vm1, %v286_v11  ;;  %v292_v23 = vld [vmem:[%s16268_s29 + $0x49] sm:$0xff]  ;;  %v293_v25 = vld [vmem:[%s16268_s29 + $0x51] sm:$0xff]  ;;  %v294_v27 = vld [vmem:[%s16268_s29 + $0x59] sm:$0xff] }
  0x18   : > { %14671 = vmatmul.mubr.msk.f32.gmra.mxu1 %vm325_vm1, %v306_v12  ;;  %14643 = vmatprep.mubr.msk.f32.mxu0 %vm325_vm1, %v287_v13  ;;  %v312_v24 = vld [vmem:[%s16268_s29 + $0xe9] sm:$0xff]  ;;  %v313_v26 = vld [vmem:[%s16268_s29 + $0xf1] sm:$0xff]  ;;  %v314_v28 = vld [vmem:[%s16268_s29 + $0xf9] sm:$0xff] }
  0x19   : > { %14673 = vmatprep.mubr.msk.f32.mxu1 %vm325_vm1, %v307_v14  ;;  %v295_v29 = vld [vmem:[%s16268_s29 + $0x61] sm:$0xff]  ;;  %v296_v31 = vld [vmem:[%s16268_s29 + $0x69] sm:$0xff]  ;;  %v297_v33 = vld [vmem:[%s16268_s29 + $0x71] sm:$0xff] }
  0x1a   : > { %v315_v30 = vld [vmem:[%s16268_s29 + $0x101] sm:$0xff]  ;;  %v316_v32 = vld [vmem:[%s16268_s29 + $0x109] sm:$0xff]  ;;  %v317_v34 = vld [vmem:[%s16268_s29 + $0x111] sm:$0xff] }
  0x1b   : > { %14644 = vmatmul.mubr.msk.f32.gmra.mxu0 %vm325_vm1, %v288_v15  ;;  %v298_v35 = vld [vmem:[%s16268_s29 + $0x79] sm:$0xff]  ;;  %v299_v37 = vld [vmem:[%s16268_s29 + $0x81] sm:$0xff]  ;;  %v300_v39 = vld [vmem:[%s16268_s29 + $0x89] sm:$0xff] }
  0x1c   : > { %14674 = vmatmul.mubr.msk.f32.gmra.mxu1 %vm325_vm1, %v308_v16  ;;  %14646 = vmatprep.mubr.msk.f32.mxu0 %vm325_vm1, %v289_v17  ;;  %v318_v36 = vld [vmem:[%s16268_s29 + $0x119] sm:$0xff]  ;;  %v319_v38 = vld [vmem:[%s16268_s29 + $0x121] sm:$0xff]  ;;  %v320_v40 = vld [vmem:[%s16268_s29 + $0x129] sm:$0xff] }
  0x1d   : > { %14676 = vmatprep.mubr.msk.f32.mxu1 %vm325_vm1, %v309_v18  ;;  %v301_v41 = vld [vmem:[%s16268_s29 + $0x91] sm:$0xff]  ;;  %v302_v43 = vld [vmem:[%s16268_s29 + $0x99] sm:$0xff]  ;;  %v1103_v46 = vld [vmem:[%s16268_s29 + $0x2] sm:$0xff] }
  0x1e   : > { %v321_v42 = vld [vmem:[%s16268_s29 + $0x131] sm:$0xff]  ;;  %v322_v44 = vld [vmem:[%s16268_s29 + $0x139] sm:$0xff]  ;;  %v243_v47 = vld [vmem:[%s16268_s29 + $0x8] sm:$0xff] }
  0x1f   : > { %14647 = vmatmul.mubr.msk.f32.gmra.mxu0 %vm325_vm1, %v290_v19  ;;  %v242_v45 = vld [vmem:[%s16268_s29] sm:$0xff]  ;;  %v1104_v48 = vld [vmem:[%s16268_s29 + $0xa] sm:$0xff]  ;;  %v1105_v50 = vld [vmem:[%s16268_s29 + $0x12] sm:$0xff] }
  0x20   : > { %14677 = vmatmul.mubr.msk.f32.gmra.mxu1 %vm325_vm1, %v310_v20  ;;  %14649 = vmatprep.mubr.msk.f32.mxu0 %vm325_vm1, %v291_v21  ;;  %v244_v49 = vld [vmem:[%s16268_s29 + $0x10] sm:$0xff]  ;;  %v245_v53 = vld [vmem:[%s16268_s29 + $0x18] sm:$0xff]  ;;  %v246_v55 = vld [vmem:[%s16268_s29 + $0x20] sm:$0xff] }
  0x21   : > { %14679 = vmatprep.mubr.msk.f32.mxu1 %vm325_vm1, %v311_v22  ;;  %v1106_v54 = vld [vmem:[%s16268_s29 + $0x1a] sm:$0xff]  ;;  %v1107_v56 = vld [vmem:[%s16268_s29 + $0x22] sm:$0xff]  ;;  %v1108_v58 = vld [vmem:[%s16268_s29 + $0x2a] sm:$0xff] }
  0x22   : > { %v247_v57 = vld [vmem:[%s16268_s29 + $0x28] sm:$0xff]  ;;  %v248_v59 = vld [vmem:[%s16268_s29 + $0x30] sm:$0xff]  ;;  %v249_v61 = vld [vmem:[%s16268_s29 + $0x38] sm:$0xff] }
  0x23   : > { %14650 = vmatmul.mubr.msk.f32.gmra.mxu0 %vm325_vm1, %v292_v23  ;;  %v1109_v60 = vld [vmem:[%s16268_s29 + $0x32] sm:$0xff]  ;;  %v1110_v62 = vld [vmem:[%s16268_s29 + $0x3a] sm:$0xff]  ;;  %v1111_v0 = vld [vmem:[%s16268_s29 + $0x42] sm:$0xff] }
  0x24   : > { %14680 = vmatmul.mubr.msk.f32.gmra.mxu1 %vm325_vm1, %v312_v24  ;;  %14652 = vmatprep.mubr.msk.f32.mxu0 %vm325_vm1, %v293_v25  ;;  %v250_v63 = vld [vmem:[%s16268_s29 + $0x40] sm:$0xff]  ;;  %v251_v1 = vld [vmem:[%s16268_s29 + $0x48] sm:$0xff]  ;;  %v252_v3 = vld [vmem:[%s16268_s29 + $0x50] sm:$0xff] }
  0x25   : > { %14682 = vmatprep.mubr.msk.f32.mxu1 %vm325_vm1, %v313_v26  ;;  %v1112_v2 = vld [vmem:[%s16268_s29 + $0x4a] sm:$0xff]  ;;  %v1113_v4 = vld [vmem:[%s16268_s29 + $0x52] sm:$0xff]  ;;  %v1114_v6 = vld [vmem:[%s16268_s29 + $0x5a] sm:$0xff] }
  0x26   : > { %v253_v5 = vld [vmem:[%s16268_s29 + $0x58] sm:$0xff]  ;;  %v254_v7 = vld [vmem:[%s16268_s29 + $0x60] sm:$0xff]  ;;  %v256_v11 = vld [vmem:[%s16268_s29 + $0x70] sm:$0xff] }
  0x27   : > { %14653 = vmatmul.mubr.msk.f32.gmra.mxu0 %vm325_vm1, %v294_v27  ;;  %v1115_v8 = vld [vmem:[%s16268_s29 + $0x62] sm:$0xff]  ;;  %v1117_v12 = vld [vmem:[%s16268_s29 + $0x72] sm:$0xff]  ;;  %v1118_v14 = vld [vmem:[%s16268_s29 + $0x7a] sm:$0xff] }
  0x28   : > { %14683 = vmatmul.mubr.msk.f32.gmra.mxu1 %vm325_vm1, %v314_v28  ;;  %14655 = vmatprep.mubr.msk.f32.mxu0 %vm325_vm1, %v295_v29  ;;  %v257_v13 = vld [vmem:[%s16268_s29 + $0x78] sm:$0xff]  ;;  %v258_v15 = vld [vmem:[%s16268_s29 + $0x80] sm:$0xff]  ;;  %v259_v17 = vld [vmem:[%s16268_s29 + $0x88] sm:$0xff] }
  0x29   : > { %14685 = vmatprep.mubr.msk.f32.mxu1 %vm325_vm1, %v315_v30  ;;  %v1119_v16 = vld [vmem:[%s16268_s29 + $0x82] sm:$0xff]  ;;  %v1120_v18 = vld [vmem:[%s16268_s29 + $0x8a] sm:$0xff]  ;;  %v1121_v20 = vld [vmem:[%s16268_s29 + $0x92] sm:$0xff] }
  0x2a   : > { %v260_v19 = vld [vmem:[%s16268_s29 + $0x90] sm:$0xff]  ;;  %v261_v21 = vld [vmem:[%s16268_s29 + $0x98] sm:$0xff]  ;;  %v262_v23 = vld [vmem:[%s16268_s29 + $0xa0] sm:$0xff] }
  0x2b   : > { %14656 = vmatmul.mubr.msk.f32.gmra.mxu0 %vm325_vm1, %v296_v31  ;;  %v1122_v22 = vld [vmem:[%s16268_s29 + $0x9a] sm:$0xff]  ;;  %v1123_v24 = vld [vmem:[%s16268_s29 + $0xa2] sm:$0xff]  ;;  %v1124_v26 = vld [vmem:[%s16268_s29 + $0xaa] sm:$0xff] }
  0x2c   : > { %14686 = vmatmul.mubr.msk.f32.gmra.mxu1 %vm325_vm1, %v316_v32  ;;  %14658 = vmatprep.mubr.msk.f32.mxu0 %vm325_vm1, %v297_v33  ;;  %v263_v25 = vld [vmem:[%s16268_s29 + $0xa8] sm:$0xff]  ;;  %v264_v27 = vld [vmem:[%s16268_s29 + $0xb0] sm:$0xff]  ;;  %v265_v29 = vld [vmem:[%s16268_s29 + $0xb8] sm:$0xff] }
  0x2d   : > { %14688 = vmatprep.mubr.msk.f32.mxu1 %vm325_vm1, %v317_v34  ;;  %v1125_v28 = vld [vmem:[%s16268_s29 + $0xb2] sm:$0xff]  ;;  %v1126_v30 = vld [vmem:[%s16268_s29 + $0xba] sm:$0xff]  ;;  %v1127_v32 = vld [vmem:[%s16268_s29 + $0xc2] sm:$0xff] }
  0x2e   : > { %v266_v31 = vld [vmem:[%s16268_s29 + $0xc0] sm:$0xff]  ;;  %v267_v33 = vld [vmem:[%s16268_s29 + $0xc8] sm:$0xff] }
  0x2f   : > { %14659 = vmatmul.mubr.msk.f32.gmra.mxu0 %vm325_vm1, %v298_v35  ;;  %v1128_v34 = vld [vmem:[%s16268_s29 + $0xca] sm:$0xff] }
  0x30   : > { %14689 = vmatmul.mubr.msk.f32.gmra.mxu1 %vm325_vm1, %v318_v36  ;;  %14661 = vmatprep.mubr.msk.f32.mxu0 %vm325_vm1, %v299_v37  ;;  %v268_v35 = vld [vmem:[%s16268_s29 + $0xd0] sm:$0xff]  ;;  %v269_v37 = vld [vmem:[%s16268_s29 + $0xd8] sm:$0xff] }
  0x31   : > { %14691 = vmatprep.mubr.msk.f32.mxu1 %vm325_vm1, %v319_v38  ;;  %v1129_v36 = vld [vmem:[%s16268_s29 + $0xd2] sm:$0xff]  ;;  %v1130_v38 = vld [vmem:[%s16268_s29 + $0xda] sm:$0xff] }
  0x33   : > { %14662 = vmatmul.mubr.msk.f32.gmra.mxu0 %vm325_vm1, %v300_v39  ;;  %v270_v39 = vld [vmem:[%s16268_s29 + $0xe0] sm:$0xff] }
  0x34   : > { %14692 = vmatmul.mubr.msk.f32.gmra.mxu1 %vm325_vm1, %v320_v40  ;;  %14664 = vmatprep.mubr.msk.f32.mxu0 %vm325_vm1, %v301_v41  ;;  %v1131_v40 = vld [vmem:[%s16268_s29 + $0xe2] sm:$0xff] }
  0x35   : > { %14694 = vmatprep.mubr.msk.f32.mxu1 %vm325_vm1, %v321_v42  ;;  %v271_v41 = vld [vmem:[%s16268_s29 + $0xe8] sm:$0xff] }
  0x36   : > { %v1132_v42 = vld [vmem:[%s16268_s29 + $0xea] sm:$0xff] }
  0x37   : > { %14665 = vmatmul.mubr.msk.f32.gmra.mxu0 %vm325_vm1, %v302_v43  ;;  %v272_v43 = vld [vmem:[%s16268_s29 + $0xf0] sm:$0xff] }
  0x38   : > { %14695 = vmatmul.mubr.msk.f32.gmra.mxu1 %vm325_vm1, %v322_v44  ;;  %14761 = vmatprep.mubr.msk.f32.mxu0 %vm325_vm1, %v1103_v46  ;;  %v1133_v44 = vld [vmem:[%s16268_s29 + $0xf2] sm:$0xff]  ;;  %v1134_v46 = vld [vmem:[%s16268_s29 + $0xfa] sm:$0xff] }
  0x39   : > { %14699 = vmatprep.mubr.msk.f32.mxu1 %vm325_vm1, %v242_v45  ;;  %v273_v45 = vld [vmem:[%s16268_s29 + $0xf8] sm:$0xff] }
  0x3b   : > { %14762 = vmatmul.mubr.msk.f32.vlgmr.msra.gmra.mxu0 %vm325_vm1, %v1104_v48  ;;  %v1135_v48 = vld [vmem:[%s16268_s29 + $0x102] sm:$0xff] }
  0x3c   : > { %14700 = vmatmul.mubr.msk.f32.vlgmr.msra.gmra.mxu1 %vm325_vm1, %v243_v47  ;;  %14884 = vmatpush3.msk.msra.mxu0 %vm446_vm0, %v16288_v10  ;;  %v1116_v10 = vld [vmem:[%s16268_s29 + $0x6a] sm:$0xff]  ;;  %v274_v47 = vld [vmem:[%s16268_s29 + $0x100] sm:$0xff] }
  0x3d   : > { %14822 = vmatpush3.msk.msra.mxu1 %vm446_vm0, %v16283_v9  ;;  %14702 = vmatprep.mubr.msk.f32.mxu1 %vm325_vm1, %v244_v49  ;;  %v255_v9 = vld [vmem:[%s16268_s29 + $0x68] sm:$0xff] }
  0x3e   : > { %14764 = vmatprep.mubr.msk.f32.mxu0 %vm325_vm1, %v1105_v50  ;;  %14945 = vmatprep.subr.msk.mxu1 %vm446_vm0, %v16379_v51  ;;  %v275_v49 = vld [vmem:[%s16268_s29 + $0x108] sm:$0xff] }
  0x3f   : > { %15007 = vmatprep.subr.msk.mxu0 %vm446_vm0, %v16384_v52  ;;  %14765 = vmatmul.mubr.msk.f32.gmra.mxu0 %vm325_vm1, %v1106_v54  ;;  %v1136_v50 = vld [vmem:[%s16268_s29 + $0x10a] sm:$0xff]  ;;  %v1137_v54 = vld [vmem:[%s16268_s29 + $0x112] sm:$0xff] }
  0x40   : > { %14703 = vmatmul.mubr.msk.f32.gmra.mxu1 %vm325_vm1, %v245_v53  ;;  %14767 = vmatprep.mubr.msk.f32.mxu0 %vm325_vm1, %v1107_v56  ;;  %v276_v53 = vld [vmem:[%s16268_s29 + $0x110] sm:$0xff]  ;;  %v1138_v56 = vld [vmem:[%s16268_s29 + $0x11a] sm:$0xff] }
  0x41   : > { %14705 = vmatprep.mubr.msk.f32.mxu1 %vm325_vm1, %v246_v55  ;;  %v277_v55 = vld [vmem:[%s16268_s29 + $0x118] sm:$0xff] }
  0x43   : > { %14768 = vmatmul.mubr.msk.f32.gmra.mxu0 %vm325_vm1, %v1108_v58  ;;  %v1139_v58 = vld [vmem:[%s16268_s29 + $0x122] sm:$0xff] }
  0x44   : > { %14706 = vmatmul.mubr.msk.f32.gmra.mxu1 %vm325_vm1, %v247_v57  ;;  %14770 = vmatprep.mubr.msk.f32.mxu0 %vm325_vm1, %v1109_v60  ;;  %v278_v57 = vld [vmem:[%s16268_s29 + $0x120] sm:$0xff]  ;;  %v1140_v60 = vld [vmem:[%s16268_s29 + $0x12a] sm:$0xff] }
  0x45   : > { %14708 = vmatprep.mubr.msk.f32.mxu1 %vm325_vm1, %v248_v59  ;;  %v279_v59 = vld [vmem:[%s16268_s29 + $0x128] sm:$0xff] }
  0x47   : > { %14771 = vmatmul.mubr.msk.f32.gmra.mxu0 %vm325_vm1, %v1110_v62  ;;  %v1141_v62 = vld [vmem:[%s16268_s29 + $0x132] sm:$0xff] }
  0x48   : > { %14709 = vmatmul.mubr.msk.f32.gmra.mxu1 %vm325_vm1, %v249_v61  ;;  %14773 = vmatprep.mubr.msk.f32.mxu0 %vm325_vm1, %v1111_v0  ;;  %v280_v61 = vld [vmem:[%s16268_s29 + $0x130] sm:$0xff]  ;;  %v1142_v0 = vld [vmem:[%s16268_s29 + $0x13a] sm:$0xff] }
  0x49   : > { %14711 = vmatprep.mubr.msk.f32.mxu1 %vm325_vm1, %v250_v63  ;;  %v281_v63 = vld [vmem:[%s16268_s29 + $0x138] sm:$0xff] }
  0x4b   : > { %14774 = vmatmul.mubr.msk.f32.gmra.mxu0 %vm325_vm1, %v1112_v2  ;;  %v2043_v2 = vld [vmem:[%s16268_s29 + $0x4] sm:$0xff] }
  0x4c   : > { %14712 = vmatmul.mubr.msk.f32.gmra.mxu1 %vm325_vm1, %v251_v1  ;;  %14776 = vmatprep.mubr.msk.f32.mxu0 %vm325_vm1, %v1113_v4  ;;  %v1573_v1 = vld [vmem:[%s16268_s29 + $0x3] sm:$0xff]  ;;  %v2044_v4 = vld [vmem:[%s16268_s29 + $0xc] sm:$0xff] }
  0x4d   : > { %14714 = vmatprep.mubr.msk.f32.mxu1 %vm325_vm1, %v252_v3  ;;  %v1574_v3 = vld [vmem:[%s16268_s29 + $0xb] sm:$0xff] }
  0x4f   : > { %14777 = vmatmul.mubr.msk.f32.gmra.mxu0 %vm325_vm1, %v1114_v6  ;;  %v16552_v6 = vld [vmem:[%s16268_s29 + $0x14] sm:$0xff] }
  0x50   : > { %14715 = vmatmul.mubr.msk.f32.gmra.mxu1 %vm325_vm1, %v253_v5  ;;  %14779 = vmatprep.mubr.msk.f32.mxu0 %vm325_vm1, %v1115_v8  ;;  %v1575_v5 = vld [vmem:[%s16268_s29 + $0x13] sm:$0xff]  ;;  %v16564_v8 = vld [vmem:[%s20447_s1 + $0x20] sm:$0xf] }
  0x51   : > { %14717 = vmatprep.mubr.msk.f32.mxu1 %vm325_vm1, %v254_v7  ;;  %v16559_v7 = vld [vmem:[%s20447_s1 + $0x1c] sm:$0xf] }
  0x53   : > { %14780 = vmatmul.mubr.msk.f32.gmra.mxu0 %vm325_vm1, %v1116_v10  ;;  %v16572_v10 = vld [vmem:[%s16268_s29 + $0x1c] sm:$0xff] }
  0x54   : > { %14718 = vmatmul.mubr.msk.f32.gmra.mxu1 %vm325_vm1, %v255_v9  ;;  %14782 = vmatprep.mubr.msk.f32.mxu0 %vm325_vm1, %v1117_v12  ;;  %v1576_v9 = vld [vmem:[%s16268_s29 + $0x1b] sm:$0xff]  ;;  %v16579_v12 = vld [vmem:[%s16268_s29 + $0x24] sm:$0xff] }
  0x55   : > { %14720 = vmatprep.mubr.msk.f32.mxu1 %vm325_vm1, %v256_v11  ;;  %v1577_v11 = vld [vmem:[%s16268_s29 + $0x23] sm:$0xff] }
  0x57   : > { %14783 = vmatmul.mubr.msk.f32.gmra.mxu0 %vm325_vm1, %v1118_v14  ;;  %v16597_v14 = vld [vmem:[%s16268_s29 + $0x34] sm:$0xff] }
  0x58   : > { %14721 = vmatmul.mubr.msk.f32.gmra.mxu1 %vm325_vm1, %v257_v13  ;;  %14785 = vmatprep.mubr.msk.f32.mxu0 %vm325_vm1, %v1119_v16  ;;  %v1579_v13 = vld [vmem:[%s16268_s29 + $0x33] sm:$0xff]  ;;  %v16607_v16 = vld [vmem:[%s16268_s29 + $0x3c] sm:$0xff] }
  0x59   : > { %14723 = vmatprep.mubr.msk.f32.mxu1 %vm325_vm1, %v258_v15  ;;  %v1580_v15 = vld [vmem:[%s16268_s29 + $0x3b] sm:$0xff] }
  0x5b   : > { %14786 = vmatmul.mubr.msk.f32.gmra.mxu0 %vm325_vm1, %v1120_v18  ;;  %v16611_v18 = vld [vmem:[%s16268_s29 + $0x44] sm:$0xff] }
  0x5c   : > { %14724 = vmatmul.mubr.msk.f32.gmra.mxu1 %vm325_vm1, %v259_v17  ;;  %14788 = vmatprep.mubr.msk.f32.mxu0 %vm325_vm1, %v1121_v20  ;;  %v1581_v17 = vld [vmem:[%s16268_s29 + $0x43] sm:$0xff]  ;;  %v16621_v20 = vld [vmem:[%s16268_s29 + $0x4c] sm:$0xff] }
  0x5d   : > { %14726 = vmatprep.mubr.msk.f32.mxu1 %vm325_vm1, %v260_v19  ;;  %v1582_v19 = vld [vmem:[%s16268_s29 + $0x4b] sm:$0xff] }
  0x5f   : > { %14789 = vmatmul.mubr.msk.f32.gmra.mxu0 %vm325_vm1, %v1122_v22  ;;  %v16625_v22 = vld [vmem:[%s16268_s29 + $0x54] sm:$0xff] }
  0x60   : > { %14727 = vmatmul.mubr.msk.f32.gmra.mxu1 %vm325_vm1, %v261_v21  ;;  %14791 = vmatprep.mubr.msk.f32.mxu0 %vm325_vm1, %v1123_v24  ;;  %v1583_v21 = vld [vmem:[%s16268_s29 + $0x53] sm:$0xff]  ;;  %v16635_v24 = vld [vmem:[%s16268_s29 + $0x5c] sm:$0xff] }
  0x61   : > { %14729 = vmatprep.mubr.msk.f32.mxu1 %vm325_vm1, %v262_v23  ;;  %v1584_v23 = vld [vmem:[%s16268_s29 + $0x5b] sm:$0xff] }
  0x63   : > { %14792 = vmatmul.mubr.msk.f32.gmra.mxu0 %vm325_vm1, %v1124_v26  ;;  %v16639_v26 = vld [vmem:[%s16268_s29 + $0x64] sm:$0xff] }
  0x64   : > { %14730 = vmatmul.mubr.msk.f32.gmra.mxu1 %vm325_vm1, %v263_v25  ;;  %14794 = vmatprep.mubr.msk.f32.mxu0 %vm325_vm1, %v1125_v28  ;;  %v1585_v25 = vld [vmem:[%s16268_s29 + $0x63] sm:$0xff]  ;;  %v16649_v28 = vld [vmem:[%s16268_s29 + $0x6c] sm:$0xff] }
  0x65   : > { %14732 = vmatprep.mubr.msk.f32.mxu1 %vm325_vm1, %v264_v27  ;;  %v1586_v27 = vld [vmem:[%s16268_s29 + $0x6b] sm:$0xff] }
  0x67   : > { %14795 = vmatmul.mubr.msk.f32.gmra.mxu0 %vm325_vm1, %v1126_v30  ;;  %v16653_v30 = vld [vmem:[%s16268_s29 + $0x74] sm:$0xff] }
  0x68   : > { %14733 = vmatmul.mubr.msk.f32.gmra.mxu1 %vm325_vm1, %v265_v29  ;;  %14797 = vmatprep.mubr.msk.f32.mxu0 %vm325_vm1, %v1127_v32  ;;  %v1587_v29 = vld [vmem:[%s16268_s29 + $0x73] sm:$0xff]  ;;  %v16663_v32 = vld [vmem:[%s16268_s29 + $0x7c] sm:$0xff] }
  0x69   : > { %14735 = vmatprep.mubr.msk.f32.mxu1 %vm325_vm1, %v266_v31  ;;  %v1588_v31 = vld [vmem:[%s16268_s29 + $0x7b] sm:$0xff] }
  0x6b   : > { %14798 = vmatmul.mubr.msk.f32.gmra.mxu0 %vm325_vm1, %v1128_v34  ;;  %v16667_v34 = vld [vmem:[%s16268_s29 + $0x84] sm:$0xff] }
  0x6c   : > { %14736 = vmatmul.mubr.msk.f32.gmra.mxu1 %vm325_vm1, %v267_v33  ;;  %14800 = vmatprep.mubr.msk.f32.mxu0 %vm325_vm1, %v1129_v36  ;;  %v1589_v33 = vld [vmem:[%s16268_s29 + $0x83] sm:$0xff]  ;;  %v16677_v36 = vld [vmem:[%s16268_s29 + $0x8c] sm:$0xff] }
  0x6d   : > { %14738 = vmatprep.mubr.msk.f32.mxu1 %vm325_vm1, %v268_v35  ;;  %v1590_v35 = vld [vmem:[%s16268_s29 + $0x8b] sm:$0xff] }
  0x6f   : > { %14801 = vmatmul.mubr.msk.f32.gmra.mxu0 %vm325_vm1, %v1130_v38  ;;  %v16681_v38 = vld [vmem:[%s16268_s29 + $0x94] sm:$0xff] }
  0x70   : > { %14739 = vmatmul.mubr.msk.f32.gmra.mxu1 %vm325_vm1, %v269_v37  ;;  %14803 = vmatprep.mubr.msk.f32.mxu0 %vm325_vm1, %v1131_v40  ;;  %v1591_v37 = vld [vmem:[%s16268_s29 + $0x93] sm:$0xff]  ;;  %v16691_v40 = vld [vmem:[%s16268_s29 + $0x9c] sm:$0xff] }
  0x71   : > { %14741 = vmatprep.mubr.msk.f32.mxu1 %vm325_vm1, %v270_v39  ;;  %v1592_v39 = vld [vmem:[%s16268_s29 + $0x9b] sm:$0xff] }
  0x73   : > { %14804 = vmatmul.mubr.msk.f32.gmra.mxu0 %vm325_vm1, %v1132_v42  ;;  %v16695_v42 = vld [vmem:[%s16268_s29 + $0xa4] sm:$0xff] }
  0x74   : > { %14742 = vmatmul.mubr.msk.f32.gmra.mxu1 %vm325_vm1, %v271_v41  ;;  %14806 = vmatprep.mubr.msk.f32.mxu0 %vm325_vm1, %v1133_v44  ;;  %v1593_v41 = vld [vmem:[%s16268_s29 + $0xa3] sm:$0xff]  ;;  %v16705_v44 = vld [vmem:[%s16268_s29 + $0xac] sm:$0xff] }
  0x75   : > { %14744 = vmatprep.mubr.msk.f32.mxu1 %vm325_vm1, %v272_v43  ;;  %v1594_v43 = vld [vmem:[%s16268_s29 + $0xab] sm:$0xff] }
  0x77   : > { %14807 = vmatmul.mubr.msk.f32.gmra.mxu0 %vm325_vm1, %v1134_v46  ;;  %v16709_v46 = vld [vmem:[%s16268_s29 + $0xb4] sm:$0xff] }
  0x78   : > { %14745 = vmatmul.mubr.msk.f32.gmra.mxu1 %vm325_vm1, %v273_v45  ;;  %14809 = vmatprep.mubr.msk.f32.mxu0 %vm325_vm1, %v1135_v48  ;;  %v1595_v45 = vld [vmem:[%s16268_s29 + $0xb3] sm:$0xff]  ;;  %v16719_v48 = vld [vmem:[%s16268_s29 + $0xbc] sm:$0xff] }
  0x79   : > { %14747 = vmatprep.mubr.msk.f32.mxu1 %vm325_vm1, %v274_v47  ;;  %v1596_v47 = vld [vmem:[%s16268_s29 + $0xbb] sm:$0xff] }
  0x7b   : > { %14810 = vmatmul.mubr.msk.f32.gmra.mxu0 %vm325_vm1, %v1136_v50  ;;  %v16723_v50 = vld [vmem:[%s16268_s29 + $0xc4] sm:$0xff] }
  0x7c   : > { %14748 = vmatmul.mubr.msk.f32.gmra.mxu1 %vm325_vm1, %v275_v49  ;;  %14812 = vmatprep.mubr.msk.f32.mxu0 %vm325_vm1, %v1137_v54  ;;  %v1597_v49 = vld [vmem:[%s16268_s29 + $0xc3] sm:$0xff]  ;;  %v16733_v54 = vld [vmem:[%s16268_s29 + $0xcc] sm:$0xff] }
  0x7d   : > { %14750 = vmatprep.mubr.msk.f32.mxu1 %vm325_vm1, %v276_v53  ;;  %v1598_v53 = vld [vmem:[%s16268_s29 + $0xcb] sm:$0xff] }
  0x7f   : > { %14813 = vmatmul.mubr.msk.f32.gmra.mxu0 %vm325_vm1, %v1138_v56  ;;  %v16737_v56 = vld [vmem:[%s16268_s29 + $0xd4] sm:$0xff] }
  0x80   : > { %14751 = vmatmul.mubr.msk.f32.gmra.mxu1 %vm325_vm1, %v277_v55  ;;  %14815 = vmatprep.mubr.msk.f32.mxu0 %vm325_vm1, %v1139_v58  ;;  %v1599_v55 = vld [vmem:[%s16268_s29 + $0xd3] sm:$0xff]  ;;  %v16747_v58 = vld [vmem:[%s16268_s29 + $0xdc] sm:$0xff] }
  0x81   : > { %14753 = vmatprep.mubr.msk.f32.mxu1 %vm325_vm1, %v278_v57  ;;  %v1600_v57 = vld [vmem:[%s16268_s29 + $0xdb] sm:$0xff] }
  0x83   : > { %14816 = vmatmul.mubr.msk.f32.gmra.mxu0 %vm325_vm1, %v1140_v60  ;;  %v16751_v60 = vld [vmem:[%s16268_s29 + $0xe4] sm:$0xff] }
  0x84   : > { %14754 = vmatmul.mubr.msk.f32.gmra.mxu1 %vm325_vm1, %v279_v59  ;;  %14818 = vmatprep.mubr.msk.f32.mxu0 %vm325_vm1, %v1141_v62  ;;  %v1601_v59 = vld [vmem:[%s16268_s29 + $0xe3] sm:$0xff]  ;;  %v16761_v62 = vld [vmem:[%s16268_s29 + $0xec] sm:$0xff] }
  0x85   : > { %14756 = vmatprep.mubr.msk.f32.mxu1 %vm325_vm1, %v280_v61  ;;  %v1602_v61 = vld [vmem:[%s16268_s29 + $0xeb] sm:$0xff] }
  0x87   : > { %14819 = vmatmul.mubr.msk.f32.gmra.mxu0 %vm325_vm1, %v1142_v0  ;;  %v16765_v0 = vld [vmem:[%s16268_s29 + $0xf4] sm:$0xff] }
  0x88   : > { %14757 = vmatmul.mubr.msk.f32.gmra.mxu1 %vm325_vm1, %v281_v63  ;;  %14885 = vmatprep.mubr.msk.f32.mxu0 %vm325_vm1, %v2043_v2  ;;  %v1603_v63 = vld [vmem:[%s16268_s29 + $0xf3] sm:$0xff]  ;;  %v16775_v2 = vld [vmem:[%s16268_s29 + $0xfc] sm:$0xff] }
  0x89   : > { %14823 = vmatprep.mubr.msk.f32.mxu1 %vm325_vm1, %v1573_v1  ;;  %v1604_v1 = vld [vmem:[%s16268_s29 + $0xfb] sm:$0xff] }
  0x8b   : > { %14886 = vmatmul.mubr.msk.f32.vlgmr.msra.gmra.mxu0 %vm325_vm1, %v2044_v4  ;;  %v16779_v4 = vld [vmem:[%s16268_s29 + $0x104] sm:$0xff] }
  0x8c   : > { %14824 = vmatmul.mubr.msk.f32.vlgmr.msra.gmra.mxu1 %vm325_vm1, %v1574_v3  ;;  %15008 = vmatpush3.msk.msra.mxu0 %vm446_vm0, %v16384_v52  ;;  %v16593_v52 = vld [vmem:[%s16268_s29 + $0x2c] sm:$0xff]  ;;  %v1605_v3 = vld [vmem:[%s16268_s29 + $0x103] sm:$0xff] }
  0x8d   : > { %14946 = vmatpush3.msk.msra.mxu1 %vm446_vm0, %v16379_v51  ;;  %14826 = vmatprep.mubr.msk.f32.mxu1 %vm325_vm1, %v1575_v5  ;;  %v1578_v51 = vld [vmem:[%s16268_s29 + $0x2b] sm:$0xff] }
  0x8e   : > { %14888 = vmatprep.mubr.msk.f32.mxu0 %vm325_vm1, %v16552_v6  ;;  %15069 = vmatprep.subr.msk.mxu1 %vm446_vm0, %v16559_v7  ;;  %v1606_v5 = vld [vmem:[%s16268_s29 + $0x10b] sm:$0xff] }
  0x8f   : > { %15131 = vmatprep.subr.msk.mxu0 %vm446_vm0, %v16564_v8  ;;  %14889 = vmatmul.mubr.msk.f32.gmra.mxu0 %vm325_vm1, %v16572_v10 }
  0x90   : > { %14827 = vmatmul.mubr.msk.f32.gmra.mxu1 %vm325_vm1, %v1576_v9  ;;  %14891 = vmatprep.mubr.msk.f32.mxu0 %vm325_vm1, %v16579_v12  ;;  %v16789_v9 = vld [vmem:[%s16268_s29 + $0x10c] sm:$0xff] }
  0x91   : > { %14829 = vmatprep.mubr.msk.f32.mxu1 %vm325_vm1, %v1577_v11  ;;  %v1607_v11 = vld [vmem:[%s16268_s29 + $0x113] sm:$0xff] }
  0x93   : > { %14892 = vmatmul.mubr.msk.f32.gmra.mxu0 %vm325_vm1, %v16593_v52 }
  0x94   : > { %14830 = vmatmul.mubr.msk.f32.gmra.mxu1 %vm325_vm1, %v1578_v51  ;;  %14894 = vmatprep.mubr.msk.f32.mxu0 %vm325_vm1, %v16597_v14  ;;  %v16793_v51 = vld [vmem:[%s16268_s29 + $0x114] sm:$0xff] }
  0x95   : > { %14832 = vmatprep.mubr.msk.f32.mxu1 %vm325_vm1, %v1579_v13  ;;  %v1608_v13 = vld [vmem:[%s16268_s29 + $0x11b] sm:$0xff] }
  0x97   : > { %14895 = vmatmul.mubr.msk.f32.gmra.mxu0 %vm325_vm1, %v16607_v16 }
  0x98   : > { %14833 = vmatmul.mubr.msk.f32.gmra.mxu1 %vm325_vm1, %v1580_v15  ;;  %14897 = vmatprep.mubr.msk.f32.mxu0 %vm325_vm1, %v16611_v18  ;;  %v16803_v15 = vld [vmem:[%s16268_s29 + $0x11c] sm:$0xff] }
  0x99   : > { %14835 = vmatprep.mubr.msk.f32.mxu1 %vm325_vm1, %v1581_v17  ;;  %v1609_v17 = vld [vmem:[%s16268_s29 + $0x123] sm:$0xff] }
  0x9b   : > { %14898 = vmatmul.mubr.msk.f32.gmra.mxu0 %vm325_vm1, %v16621_v20 }
  0x9c   : > { %14836 = vmatmul.mubr.msk.f32.gmra.mxu1 %vm325_vm1, %v1582_v19  ;;  %14900 = vmatprep.mubr.msk.f32.mxu0 %vm325_vm1, %v16625_v22  ;;  %v16807_v19 = vld [vmem:[%s16268_s29 + $0x124] sm:$0xff] }
  0x9d   : > { %14838 = vmatprep.mubr.msk.f32.mxu1 %vm325_vm1, %v1583_v21  ;;  %v1610_v21 = vld [vmem:[%s16268_s29 + $0x12b] sm:$0xff] }
  0x9f   : > { %14901 = vmatmul.mubr.msk.f32.gmra.mxu0 %vm325_vm1, %v16635_v24 }
  0xa0   : > { %14839 = vmatmul.mubr.msk.f32.gmra.mxu1 %vm325_vm1, %v1584_v23  ;;  %14903 = vmatprep.mubr.msk.f32.mxu0 %vm325_vm1, %v16639_v26  ;;  %v16817_v23 = vld [vmem:[%s16268_s29 + $0x12c] sm:$0xff] }
  0xa1   : > { %14841 = vmatprep.mubr.msk.f32.mxu1 %vm325_vm1, %v1585_v25  ;;  %v1611_v25 = vld [vmem:[%s16268_s29 + $0x133] sm:$0xff] }
  0xa3   : > { %14904 = vmatmul.mubr.msk.f32.gmra.mxu0 %vm325_vm1, %v16649_v28 }
  0xa4   : > { %14842 = vmatmul.mubr.msk.f32.gmra.mxu1 %vm325_vm1, %v1586_v27  ;;  %14906 = vmatprep.mubr.msk.f32.mxu0 %vm325_vm1, %v16653_v30  ;;  %v16821_v27 = vld [vmem:[%s16268_s29 + $0x134] sm:$0xff] }
  0xa5   : > { %14844 = vmatprep.mubr.msk.f32.mxu1 %vm325_vm1, %v1587_v29 }
  0xa7   : > { %14907 = vmatmul.mubr.msk.f32.gmra.mxu0 %vm325_vm1, %v16663_v32 }
  0xa8   : > { %14845 = vmatmul.mubr.msk.f32.gmra.mxu1 %vm325_vm1, %v1588_v31  ;;  %14909 = vmatprep.mubr.msk.f32.mxu0 %vm325_vm1, %v16667_v34 }
  0xa9   : > { %14847 = vmatprep.mubr.msk.f32.mxu1 %vm325_vm1, %v1589_v33  ;;  %v1612_v33 = vld [vmem:[%s16268_s29 + $0x13b] sm:$0xff] }
  0xab   : > { %14910 = vmatmul.mubr.msk.f32.gmra.mxu0 %vm325_vm1, %v16677_v36 }
  0xac   : > { %14848 = vmatmul.mubr.msk.f32.gmra.mxu1 %vm325_vm1, %v1590_v35  ;;  %14912 = vmatprep.mubr.msk.f32.mxu0 %vm325_vm1, %v16681_v38  ;;  %v16835_v35 = vld [vmem:[%s16268_s29 + $0x13c] sm:$0xff] }
  0xad   : > { %14850 = vmatprep.mubr.msk.f32.mxu1 %vm325_vm1, %v1591_v37 }
  0xaf   : > { %14913 = vmatmul.mubr.msk.f32.gmra.mxu0 %vm325_vm1, %v16691_v40 }
  0xb0   : > { %14851 = vmatmul.mubr.msk.f32.gmra.mxu1 %vm325_vm1, %v1592_v39  ;;  %14915 = vmatprep.mubr.msk.f32.mxu0 %vm325_vm1, %v16695_v42 }
  0xb1   : > { %14853 = vmatprep.mubr.msk.f32.mxu1 %vm325_vm1, %v1593_v41  ;;  %v2983_v41 = vld [vmem:[%s16268_s29 + $0x15] sm:$0xff] }
  0xb3   : > { %14916 = vmatmul.mubr.msk.f32.gmra.mxu0 %vm325_vm1, %v16705_v44 }
  0xb4   : > { %14854 = vmatmul.mubr.msk.f32.gmra.mxu1 %vm325_vm1, %v1594_v43  ;;  %14918 = vmatprep.mubr.msk.f32.mxu0 %vm325_vm1, %v16709_v46 }
  0xb5   : > { %14856 = vmatprep.mubr.msk.f32.mxu1 %vm325_vm1, %v1595_v45 }
  0xb7   : > { %14919 = vmatmul.mubr.msk.f32.gmra.mxu0 %vm325_vm1, %v16719_v48 }
  0xb8   : > { %14857 = vmatmul.mubr.msk.f32.gmra.mxu1 %vm325_vm1, %v1596_v47  ;;  %14921 = vmatprep.mubr.msk.f32.mxu0 %vm325_vm1, %v16723_v50  ;;  %v2984_v47 = vld [vmem:[%s16268_s29 + $0x1d] sm:$0xff] }
  0xb9   : > { %14859 = vmatprep.mubr.msk.f32.mxu1 %vm325_vm1, %v1597_v49 }
  0xbb   : > { %14922 = vmatmul.mubr.msk.f32.gmra.mxu0 %vm325_vm1, %v16733_v54 }
  0xbc   : > { %14860 = vmatmul.mubr.msk.f32.gmra.mxu1 %vm325_vm1, %v1598_v53  ;;  %14924 = vmatprep.mubr.msk.f32.mxu0 %vm325_vm1, %v16737_v56 }
  0xbd   : > { %14862 = vmatprep.mubr.msk.f32.mxu1 %vm325_vm1, %v1599_v55  ;;  %v2985_v55 = vld [vmem:[%s16268_s29 + $0x25] sm:$0xff] }
  0xbf   : > { %14925 = vmatmul.mubr.msk.f32.gmra.mxu0 %vm325_vm1, %v16747_v58 }
  0xc0   : > { %14863 = vmatmul.mubr.msk.f32.gmra.mxu1 %vm325_vm1, %v1600_v57  ;;  %14927 = vmatprep.mubr.msk.f32.mxu0 %vm325_vm1, %v16751_v60 }
  0xc1   : > { %14865 = vmatprep.mubr.msk.f32.mxu1 %vm325_vm1, %v1601_v59 }
  0xc3   : > { %14928 = vmatmul.mubr.msk.f32.gmra.mxu0 %vm325_vm1, %v16761_v62 }
  0xc4   : > { %14866 = vmatmul.mubr.msk.f32.gmra.mxu1 %vm325_vm1, %v1602_v61  ;;  %14930 = vmatprep.mubr.msk.f32.mxu0 %vm325_vm1, %v16765_v0  ;;  %v16873_v61 = vld [vmem:[%s20447_s1 + $0x28] sm:$0xf] }
  0xc5   : > { %14868 = vmatprep.mubr.msk.f32.mxu1 %vm325_vm1, %v1603_v63 }
  0xc7   : > { %14931 = vmatmul.mubr.msk.f32.gmra.mxu0 %vm325_vm1, %v16775_v2 }
  0xc8   : > { %14869 = vmatmul.mubr.msk.f32.gmra.mxu1 %vm325_vm1, %v1604_v1  ;;  %14933 = vmatprep.mubr.msk.f32.mxu0 %vm325_vm1, %v16779_v4 }
  0xc9   : > { %14871 = vmatprep.mubr.msk.f32.mxu1 %vm325_vm1, %v1605_v3  ;;  %v2987_v3 = vld [vmem:[%s16268_s29 + $0x35] sm:$0xff] }
  0xcb   : > { %14934 = vmatmul.mubr.msk.f32.gmra.mxu0 %vm325_vm1, %v16789_v9 }
  0xcc   : > { %14872 = vmatmul.mubr.msk.f32.gmra.mxu1 %vm325_vm1, %v1606_v5  ;;  %14936 = vmatprep.mubr.msk.f32.mxu0 %vm325_vm1, %v16793_v51 }
  0xcd   : > { %14874 = vmatprep.mubr.msk.f32.mxu1 %vm325_vm1, %v1607_v11 }
  0xcf   : > { %14937 = vmatmul.mubr.msk.f32.gmra.mxu0 %vm325_vm1, %v16803_v15 }
  0xd0   : > { %14875 = vmatmul.mubr.msk.f32.gmra.mxu1 %vm325_vm1, %v1608_v13  ;;  %14939 = vmatprep.mubr.msk.f32.mxu0 %vm325_vm1, %v16807_v19  ;;  %v2989_v13 = vld [vmem:[%s16268_s29 + $0x45] sm:$0xff] }
  0xd1   : > { %14877 = vmatprep.mubr.msk.f32.mxu1 %vm325_vm1, %v1609_v17 }
  0xd3   : > { %v16823_v29 = vpop.f32.mrf.mxu0  ;;  %14940 = vmatmul.mubr.msk.f32.gmra.mxu0 %vm325_vm1, %v16817_v23 }
  0xd4   : > { %v16825_v31 = vpop.f32.mrf.mxu1  ;;  %14878 = vmatmul.mubr.msk.f32.gmra.mxu1 %vm325_vm1, %v1610_v21  ;;  %14942 = vmatprep.mubr.msk.f32.mxu0 %vm325_vm1, %v16821_v27 }
  0xd5   : > { %14880 = vmatprep.mubr.msk.f32.mxu1 %vm325_vm1, %v1611_v25  ;;  %v16837_v37 = vpop.f32.mrf.mxu0 }
  0xd6   : > { %v16839_v39 = vpop.f32.mrf.mxu1 }
  0xd7   : > { %v16842_v43 = vpop.f32.mrf.mxu0  ;;  %14943 = vmatmul.mubr.msk.f32.gmra.mxu0 %vm325_vm1, %v16835_v35 }
  0xd8   : > { %v16844_v45 = vpop.f32.mrf.mxu1  ;;  %14881 = vmatmul.mubr.msk.f32.gmra.mxu1 %vm325_vm1, %v1612_v33  ;;  %15009 = vmatprep.mubr.msk.f32.mxu0 %vm325_vm1, %v2983_v41  ;;  %v2991_v33 = vld [vmem:[%s16268_s29 + $0x55] sm:$0xff] }
  0xd9   : > { %14947 = vmatprep.mubr.msk.f32.mxu1 %vm325_vm1, %v16552_v6  ;;  %v16853_v49 = vpop.f32.mrf.mxu0  ;;  %v16868_v6 = vld [vmem:[%s20447_s1 + $0x24] sm:$0xf] }
  0xda   : > { %v16855_v53 = vpop.f32.mrf.mxu1 }
  0xdb   : > { %v16858_v57 = vpop.f32.mrf.mxu0  ;;  %15010 = vmatmul.mubr.msk.f32.vlgmr.msra.gmra.mxu0 %vm325_vm1, %v2984_v47 }
  0xdc   : > { %v16860_v59 = vpop.f32.mrf.mxu1  ;;  %14948 = vmatmul.mubr.msk.f32.vlgmr.msra.gmra.mxu1 %vm325_vm1, %v16572_v10  ;;  %15132 = vmatpush3.msk.msra.mxu0 %vm446_vm0, %v16564_v8  ;;  %v2986_v10 = vld [vmem:[%s16268_s29 + $0x2d] sm:$0xff] }
  0xdd   : > { %15070 = vmatpush3.msk.msra.mxu1 %vm446_vm0, %v16559_v7  ;;  %v16880_v63 = vpop.f32.mrf.mxu0  ;;  %14950 = vmatprep.mubr.msk.f32.mxu1 %vm325_vm1, %v16579_v12  ;;  %v2988_v12 = vld [vmem:[%s16268_s29 + $0x3d] sm:$0xff] }
  0xde   : > { %v16882_v1 = vpop.f32.mrf.mxu1  ;;  %15012 = vmatprep.mubr.msk.f32.mxu0 %vm325_vm1, %v2985_v55  ;;  %15193 = vmatprep.subr.msk.mxu1 %vm446_vm0, %v16868_v6 }
  0xdf   : > { %15255 = vmatprep.subr.msk.mxu0 %vm446_vm0, %v16873_v61  ;;  %v16892_v7 = vpop.f32.mrf.mxu0  ;;  %15013 = vmatmul.mubr.msk.f32.gmra.mxu0 %vm325_vm1, %v2986_v10  ;;  %v2993_v10 = vld [vmem:[%s16268_s29 + $0x65] sm:$0xff] }
  0xe0   : > { %v16894_v8 = vpop.f32.mrf.mxu1  ;;  %14951 = vmatmul.mubr.msk.f32.gmra.mxu1 %vm325_vm1, %v16593_v52  ;;  %15015 = vmatprep.mubr.msk.f32.mxu0 %vm325_vm1, %v2987_v3  ;;  %v2990_v52 = vld [vmem:[%s16268_s29 + $0x4d] sm:$0xff] }
  0xe1   : > { %14953 = vmatprep.mubr.msk.f32.mxu1 %vm325_vm1, %v16597_v14  ;;  %v16903_v5 = vpop.f32.mrf.mxu0 }
  0xe2   : > { %v16905_v11 = vpop.f32.mrf.mxu1 }
  0xe3   : > { %v16908_v17 = vpop.f32.mrf.mxu0  ;;  %15016 = vmatmul.mubr.msk.f32.gmra.mxu0 %vm325_vm1, %v2988_v12 }
  0xe4   : > { %v16910_v21 = vpop.f32.mrf.mxu1  ;;  %14954 = vmatmul.mubr.msk.f32.gmra.mxu1 %vm325_vm1, %v16607_v16  ;;  %15018 = vmatprep.mubr.msk.f32.mxu0 %vm325_vm1, %v2989_v13  ;;  %v2992_v16 = vld [vmem:[%s16268_s29 + $0x5d] sm:$0xff] }
  0xe5   : > { %14956 = vmatprep.mubr.msk.f32.mxu1 %vm325_vm1, %v16611_v18  ;;  %v16919_v14 = vpop.f32.mrf.mxu0 }
  0xe6   : > { %v16921_v25 = vpop.f32.mrf.mxu1 }
  0xe7   : > { %20452 = vst [vmem:[#allocation2_spill] sm:$0xff] %v16921_v25  ;;  %v16924_v41 = vpop.f32.mrf.mxu0  ;;  %15019 = vmatmul.mubr.msk.f32.gmra.mxu0 %vm325_vm1, %v2990_v52  ;;  %v2995_v52 = vld [vmem:[%s16268_s29 + $0x75] sm:$0xff] }
  0xe8   : > { %v16926_v47 = vpop.f32.mrf.mxu1  ;;  %14957 = vmatmul.mubr.msk.f32.gmra.mxu1 %vm325_vm1, %v16621_v20  ;;  %15021 = vmatprep.mubr.msk.f32.mxu0 %vm325_vm1, %v2991_v33  ;;  %v2994_v20 = vld [vmem:[%s16268_s29 + $0x6d] sm:$0xff] }
  0xe9   : > { %20453 = vst [vmem:[#allocation3_spill] sm:$0xff] %v16926_v47  ;;  %14959 = vmatprep.mubr.msk.f32.mxu1 %vm325_vm1, %v16625_v22  ;;  %v16935_v18 = vpop.f32.mrf.mxu0 }
  0xea   : > { %v16937_v55 = vpop.f32.mrf.mxu1 }
  0xeb   : > { %20454 = vst [vmem:[#allocation4_spill] sm:$0xff] %v16937_v55  ;;  %v16940_v3 = vpop.f32.mrf.mxu0  ;;  %15022 = vmatmul.mubr.msk.f32.gmra.mxu0 %vm325_vm1, %v2992_v16 }
  0xec   : > { %v16942_v12 = vpop.f32.mrf.mxu1  ;;  %14960 = vmatmul.mubr.msk.f32.gmra.mxu1 %vm325_vm1, %v16635_v24  ;;  %15024 = vmatprep.mubr.msk.f32.mxu0 %vm325_vm1, %v2993_v10  ;;  %v2996_v24 = vld [vmem:[%s16268_s29 + $0x7d] sm:$0xff]  ;;  %v2997_v10 = vld [vmem:[%s16268_s29 + $0x85] sm:$0xff] }
  0xed   : > { %20455 = vst [vmem:[#allocation5_spill] sm:$0xff] %v16942_v12  ;;  %14962 = vmatprep.mubr.msk.f32.mxu1 %vm325_vm1, %v16639_v26  ;;  %v16951_v22 = vpop.f32.mrf.mxu0 }
  0xee   : > { %v16953_v13 = vpop.f32.mrf.mxu1 }
  0xef   : > { %20456 = vst [vmem:[#allocation6_spill] sm:$0xff] %v16953_v13  ;;  %v16956_v33 = vpop.f32.mrf.mxu0  ;;  %15025 = vmatmul.mubr.msk.f32.gmra.mxu0 %vm325_vm1, %v2994_v20 }
  0xf0   : > { %v16958_v12 = vpop.f32.mrf.mxu1  ;;  %14963 = vmatmul.mubr.msk.f32.gmra.mxu1 %vm325_vm1, %v16649_v28  ;;  %15027 = vmatprep.mubr.msk.f32.mxu0 %vm325_vm1, %v2995_v52  ;;  %v2998_v28 = vld [vmem:[%s16268_s29 + $0x8d] sm:$0xff]  ;;  %v2999_v52 = vld [vmem:[%s16268_s29 + $0x95] sm:$0xff] }
  0xf1   : > { %20457 = vst [vmem:[#allocation7_spill] sm:$0xff] %v16958_v12  ;;  %14965 = vmatprep.mubr.msk.f32.mxu1 %vm325_vm1, %v16653_v30  ;;  %v16967_v26 = vpop.f32.mrf.mxu0 }
  0xf2   : > { %v16969_v16 = vpop.f32.mrf.mxu1 }
  0xf3   : > { %20458 = vst [vmem:[#allocation8_spill] sm:$0xff] %v16969_v16  ;;  %v16972_v13 = vpop.f32.mrf.mxu0  ;;  %15028 = vmatmul.mubr.msk.f32.gmra.mxu0 %vm325_vm1, %v2996_v24 }
  0xf4   : > { %v16974_v12 = vpop.f32.mrf.mxu1  ;;  %14966 = vmatmul.mubr.msk.f32.gmra.mxu1 %vm325_vm1, %v16663_v32  ;;  %15030 = vmatprep.mubr.msk.f32.mxu0 %vm325_vm1, %v2997_v10  ;;  %v3000_v32 = vld [vmem:[%s16268_s29 + $0x9d] sm:$0xff]  ;;  %v3001_v10 = vld [vmem:[%s16268_s29 + $0xa5] sm:$0xff] }
  0xf5   : > { %20459 = vst [vmem:[#allocation9_spill] sm:$0xff] %v16974_v12  ;;  %14968 = vmatprep.mubr.msk.f32.mxu1 %vm325_vm1, %v16667_v34  ;;  %v16983_v30 = vpop.f32.mrf.mxu0 }
  0xf6   : > { %v16985_v20 = vpop.f32.mrf.mxu1 }
  0xf7   : > { %20460 = vst [vmem:[#allocation10_spill] sm:$0xff] %v16985_v20  ;;  %v16988_v16 = vpop.f32.mrf.mxu0  ;;  %15031 = vmatmul.mubr.msk.f32.gmra.mxu0 %vm325_vm1, %v2998_v28 }
  0xf8   : > { %v16990_v12 = vpop.f32.mrf.mxu1  ;;  %14969 = vmatmul.mubr.msk.f32.gmra.mxu1 %vm325_vm1, %v16677_v36  ;;  %15033 = vmatprep.mubr.msk.f32.mxu0 %vm325_vm1, %v2999_v52 }
  0xf9   : > { %20461 = vst [vmem:[#allocation11_spill] sm:$0xff] %v16990_v12  ;;  %14971 = vmatprep.mubr.msk.f32.mxu1 %vm325_vm1, %v16681_v38  ;;  %v16999_v34 = vpop.f32.mrf.mxu0  ;;  %v3002_v38 = vld [vmem:[%s16268_s29 + $0xad] sm:$0xff] }
  0xfa   : > { %v17001_v24 = vpop.f32.mrf.mxu1 }
  0xfb   : > { %20462 = vst [vmem:[#allocation12_spill] sm:$0xff] %v17001_v24  ;;  %v14763_v12 = vpop.f32.mrf.mxu0  ;;  %15034 = vmatmul.mubr.msk.f32.gmra.mxu0 %vm325_vm1, %v3000_v32  ;;  %v3003_v24 = vld [vmem:[%s16268_s29 + $0xb5] sm:$0xff]  ;;  %v3005_v32 = vld [vmem:[%s16268_s29 + $0xc5] sm:$0xff] }
  0xfc   : > { %v14701_v20 = vpop.f32.mrf.mxu1  ;;  %14972 = vmatmul.mubr.msk.f32.gmra.mxu1 %vm325_vm1, %v16691_v40  ;;  %15036 = vmatprep.mubr.msk.f32.mxu0 %vm325_vm1, %v3001_v10 }
  0xfd   : > { %v910_v36 = vadd.f32 %v14701_v20, %v16823_v29  ;;  %14974 = vmatprep.mubr.msk.f32.mxu1 %vm325_vm1, %v16695_v42  ;;  %v1334_v52 = vpop.f32.mrf.mxu0 }
  0xfe   : > { %v904_v28 = vpop.f32.mrf.mxu1 }
  0xff   : > { %v17013_v55 = vadd.f32 %v14763_v12, %v910_v36  ;;  %v905_v47 = vadd.f32 %v904_v28, %v16837_v37  ;;  %v14766_v25 = vpop.f32.mrf.mxu0  ;;  %15037 = vmatmul.mubr.msk.f32.gmra.mxu0 %vm325_vm1, %v3002_v38  ;;  %v3004_v12 = vld [vmem:[%s16268_s29 + $0xbd] sm:$0xff]  ;;  %v3007_v38 = vld [vmem:[%s16268_s29 + $0xd5] sm:$0xff] }
 0x100   : > { %v14704_v40 = vpop.f32.mrf.mxu1  ;;  %14975 = vmatmul.mubr.msk.f32.gmra.mxu1 %vm325_vm1, %v16705_v44  ;;  %15039 = vmatprep.mubr.msk.f32.mxu0 %vm325_vm1, %v3003_v24 }
 0x101   : > { %v17019_v42 = vadd.f32 %v1334_v52, %v905_v47  ;;  %v920_v29 = vadd.f32 %v14704_v40, %v16842_v43  ;;  %14977 = vmatprep.mubr.msk.f32.mxu1 %vm325_vm1, %v16709_v46  ;;  %v1344_v37 = vpop.f32.mrf.mxu0 }
 0x102   : > { %v914_v20 = vpop.f32.mrf.mxu1 }
 0x103   : > { %v17027_v10 = vadd.f32 %v14766_v25, %v920_v29  ;;  %v915_v44 = vadd.f32 %v914_v20, %v16853_v49  ;;  %v14769_v47 = vpop.f32.mrf.mxu0  ;;  %15040 = vmatmul.mubr.msk.f32.gmra.mxu0 %vm325_vm1, %v3004_v12  ;;  %v3006_v25 = vld [vmem:[%s16268_s29 + $0xcd] sm:$0xff]  ;;  %v3008_v29 = vld [vmem:[%s16268_s29 + $0xdd] sm:$0xff]  ;;  %v3009_v20 = vld [vmem:[%s16268_s29 + $0xe5] sm:$0xff] }
 0x104   : > { %v14707_v36 = vpop.f32.mrf.mxu1  ;;  %14978 = vmatmul.mubr.msk.f32.gmra.mxu1 %vm325_vm1, %v16719_v48  ;;  %15042 = vmatprep.mubr.msk.f32.mxu0 %vm325_vm1, %v3005_v32 }
 0x105   : > { %v17033_v46 = vadd.f32 %v1344_v37, %v915_v44  ;;  %v930_v43 = vadd.f32 %v14707_v36, %v16858_v57  ;;  %14980 = vmatprep.mubr.msk.f32.mxu1 %vm325_vm1, %v16723_v50  ;;  %v1354_v49 = vpop.f32.mrf.mxu0  ;;  %v3010_v36 = vld [vmem:[%s16268_s29 + $0xed] sm:$0xff] }
 0x106   : > { %v924_v24 = vpop.f32.mrf.mxu1 }
 0x107   : > { %v17041_v28 = vadd.f32 %v14769_v47, %v930_v43  ;;  %v925_v48 = vadd.f32 %v924_v24, %v16880_v63  ;;  %v14772_v40 = vpop.f32.mrf.mxu0  ;;  %15043 = vmatmul.mubr.msk.f32.gmra.mxu0 %vm325_vm1, %v3006_v25  ;;  %v3011_v43 = vld [vmem:[%s16268_s29 + $0xf5] sm:$0xff] }
 0x108   : > { %v14710_v52 = vpop.f32.mrf.mxu1  ;;  %14981 = vmatmul.mubr.msk.f32.gmra.mxu1 %vm325_vm1, %v16733_v54  ;;  %15045 = vmatprep.mubr.msk.f32.mxu0 %vm325_vm1, %v3007_v38  ;;  %v3012_v38 = vld [vmem:[%s16268_s29 + $0xfd] sm:$0xff] }
 0x109   : > { %v17047_v50 = vadd.f32 %v1354_v49, %v925_v48  ;;  %v940_v57 = vadd.f32 %v14710_v52, %v16892_v7  ;;  %14983 = vmatprep.mubr.msk.f32.mxu1 %vm325_vm1, %v16737_v56  ;;  %v1364_v63 = vpop.f32.mrf.mxu0  ;;  %v3013_v52 = vld [vmem:[%s16268_s29 + $0x105] sm:$0xff] }
 0x10a   : > { %v934_v12 = vpop.f32.mrf.mxu1 }
 0x10b   : > { %v17055_v37 = vadd.f32 %v14772_v40, %v940_v57  ;;  %v935_v54 = vadd.f32 %v934_v12, %v16903_v5  ;;  %v14775_v44 = vpop.f32.mrf.mxu0  ;;  %15046 = vmatmul.mubr.msk.f32.gmra.mxu0 %vm325_vm1, %v3008_v29  ;;  %v3014_v12 = vld [vmem:[%s16268_s29 + $0x10d] sm:$0xff] }
 0x10c   : > { %v14713_v32 = vpop.f32.mrf.mxu1  ;;  %14984 = vmatmul.mubr.msk.f32.gmra.mxu1 %vm325_vm1, %v16747_v58  ;;  %15048 = vmatprep.mubr.msk.f32.mxu0 %vm325_vm1, %v3009_v20  ;;  %v3015_v20 = vld [vmem:[%s16268_s29 + $0x115] sm:$0xff] }
 0x10d   : > { %v17061_v56 = vadd.f32 %v1364_v63, %v935_v54  ;;  %v950_v7 = vadd.f32 %v14713_v32, %v16908_v17  ;;  %14986 = vmatprep.mubr.msk.f32.mxu1 %vm325_vm1, %v16751_v60  ;;  %v1374_v5 = vpop.f32.mrf.mxu0 }
 0x10e   : > { %v944_v47 = vpop.f32.mrf.mxu1 }
 0x10f   : > { %v17069_v25 = vadd.f32 %v14775_v44, %v950_v7  ;;  %v945_v58 = vadd.f32 %v944_v47, %v16919_v14  ;;  %v14778_v49 = vpop.f32.mrf.mxu0  ;;  %15049 = vmatmul.mubr.msk.f32.gmra.mxu0 %vm325_vm1, %v3010_v36  ;;  %v3016_v7 = vld [vmem:[%s16268_s29 + $0x11d] sm:$0xff]  ;;  %v3017_v47 = vld [vmem:[%s16268_s29 + $0x125] sm:$0xff] }
 0x110   : > { %v14716_v24 = vpop.f32.mrf.mxu1  ;;  %14987 = vmatmul.mubr.msk.f32.gmra.mxu1 %vm325_vm1, %v16761_v62  ;;  %15051 = vmatprep.mubr.msk.f32.mxu0 %vm325_vm1, %v3011_v43 }
 0x111   : > { %v17075_v60 = vadd.f32 %v1374_v5, %v945_v58  ;;  %v960_v17 = vadd.f32 %v14716_v24, %v16924_v41  ;;  %14989 = vmatprep.mubr.msk.f32.mxu1 %vm325_vm1, %v16765_v0  ;;  %v1384_v14 = vpop.f32.mrf.mxu0  ;;  %v3018_v24 = vld [vmem:[%s16268_s29 + $0x12d] sm:$0xff] }
 0x112   : > { %v954_v48 = vpop.f32.mrf.mxu1 }
 0x113   : > { %v17083_v40 = vadd.f32 %v14778_v49, %v960_v17  ;;  %v955_v62 = vadd.f32 %v954_v48, %v16935_v18  ;;  %v14781_v29 = vpop.f32.mrf.mxu0  ;;  %15052 = vmatmul.mubr.msk.f32.gmra.mxu0 %vm325_vm1, %v3012_v38  ;;  %v3019_v17 = vld [vmem:[%s16268_s29 + $0x135] sm:$0xff] }
 0x114   : > { %v14719_v57 = vpop.f32.mrf.mxu1  ;;  %14990 = vmatmul.mubr.msk.f32.gmra.mxu1 %vm325_vm1, %v16775_v2  ;;  %15054 = vmatprep.mubr.msk.f32.mxu0 %vm325_vm1, %v3013_v52  ;;  %v3020_v52 = vld [vmem:[%s16268_s29 + $0x13d] sm:$0xff] }
 0x115   : > { %v17089_v0 = vadd.f32 %v1384_v14, %v955_v62  ;;  %v970_v41 = vadd.f32 %v14719_v57, %v16940_v3  ;;  %14992 = vmatprep.mubr.msk.f32.mxu1 %vm325_vm1, %v16779_v4  ;;  %v1394_v18 = vpop.f32.mrf.mxu0  ;;  %v2551_v57 = vld [vmem:[%s16268_s29 + $0x144] sm:$0xff] }
 0x116   : > { %v964_v63 = vpop.f32.mrf.mxu1 }
 0x117   : > { %v17097_v54 = vadd.f32 %v14781_v29, %v970_v41  ;;  %v965_v2 = vadd.f32 %v964_v63, %v16951_v22  ;;  %v14784_v44 = vpop.f32.mrf.mxu0  ;;  %15055 = vmatmul.mubr.msk.f32.gmra.mxu0 %vm325_vm1, %v3014_v12  ;;  %v3021_v29 = vld [vmem:[%s16268_s29 + $0x145] sm:$0xff] }
 0x118   : > { %v14722_v32 = vpop.f32.mrf.mxu1  ;;  %14993 = vmatmul.mubr.msk.f32.gmra.mxu1 %vm325_vm1, %v16789_v9  ;;  %15057 = vmatprep.mubr.msk.f32.mxu0 %vm325_vm1, %v3015_v20  ;;  %v3022_v20 = vld [vmem:[%s16268_s29 + $0x14d] sm:$0xff] }
 0x119   : > { %v17103_v4 = vadd.f32 %v1394_v18, %v965_v2  ;;  %v980_v3 = vadd.f32 %v14722_v32, %v16956_v33  ;;  %14995 = vmatprep.mubr.msk.f32.mxu1 %vm325_vm1, %v16793_v51  ;;  %v1404_v22 = vpop.f32.mrf.mxu0  ;;  %v2552_v18 = vld [vmem:[%s16268_s29 + $0x14c] sm:$0xff]  ;;  %v3453_v32 = vld [vmem:[%s16268_s29 + $0x16] sm:$0xff] }
 0x11a   : > { %v974_v36 = vpop.f32.mrf.mxu1 }
 0x11b   : > { %v17111_v5 = vadd.f32 %v14784_v44, %v980_v3  ;;  %v975_v9 = vadd.f32 %v974_v36, %v16967_v26  ;;  %v14787_v58 = vpop.f32.mrf.mxu0  ;;  %15058 = vmatmul.mubr.msk.f32.gmra.mxu0 %vm325_vm1, %v3016_v7  ;;  %v3923_v44 = vld [vmem:[%s16268_s29 + $0x17] sm:$0xff] }
 0x11c   : > { %v14725_v43 = vpop.f32.mrf.mxu1  ;;  %14996 = vmatmul.mubr.msk.f32.gmra.mxu1 %vm325_vm1, %v16803_v15  ;;  %15060 = vmatprep.mubr.msk.f32.mxu0 %vm325_vm1, %v3017_v47  ;;  %v3454_v47 = vld [vmem:[%s16268_s29 + $0x1e] sm:$0xff] }
 0x11d   : > { %v17117_v51 = vadd.f32 %v1404_v22, %v975_v9  ;;  %v990_v33 = vadd.f32 %v14725_v43, %v16972_v13  ;;  %14998 = vmatprep.mubr.msk.f32.mxu1 %vm325_vm1, %v16807_v19  ;;  %v1414_v26 = vpop.f32.mrf.mxu0  ;;  %v3924_v9 = vld [vmem:[%s16268_s29 + $0x1f] sm:$0xff] }
 0x11e   : > { %v984_v49 = vpop.f32.mrf.mxu1 }
 0x11f   : > { %v17125_v38 = vadd.f32 %v14787_v58, %v990_v33  ;;  %v985_v15 = vadd.f32 %v984_v49, %v16983_v30  ;;  %v14790_v14 = vpop.f32.mrf.mxu0  ;;  %15061 = vmatmul.mubr.msk.f32.gmra.mxu0 %vm325_vm1, %v3018_v24  ;;  %v3455_v24 = vld [vmem:[%s16268_s29 + $0x26] sm:$0xff] }
 0x120   : > { %v14728_v48 = vpop.f32.mrf.mxu1  ;;  %14999 = vmatmul.mubr.msk.f32.gmra.mxu1 %vm325_vm1, %v16817_v23  ;;  %15063 = vmatprep.mubr.msk.f32.mxu0 %vm325_vm1, %v3019_v17  ;;  %v3925_v49 = vld [vmem:[%s16268_s29 + $0x27] sm:$0xff] }
 0x121   : > { %v17131_v19 = vadd.f32 %v1414_v26, %v985_v15  ;;  %v1000_v13 = vadd.f32 %v14728_v48, %v16988_v16  ;;  %15001 = vmatprep.mubr.msk.f32.mxu1 %vm325_vm1, %v16821_v27  ;;  %v1424_v62 = vpop.f32.mrf.mxu0  ;;  %v17182_v15 = vld [vmem:[%s20447_s1 + $0x30] sm:$0xf] }
 0x122   : > { %v994_v30 = vpop.f32.mrf.mxu1 }
 0x123   : > { %v17140_v23 = vadd.f32 %v14790_v14, %v1000_v13  ;;  %v995_v41 = vadd.f32 %v994_v30, %v16999_v34  ;;  %v14793_v16 = vpop.f32.mrf.mxu0  ;;  %15064 = vmatmul.mubr.msk.f32.gmra.mxu0 %vm325_vm1, %v3020_v52  ;;  %v3456_v14 = vld [vmem:[%s16268_s29 + $0x2e] sm:$0xff] }
 0x124   : > { %v14731_v12 = vpop.f32.mrf.mxu1  ;;  %15002 = vmatmul.mubr.msk.f32.gmra.mxu1 %vm325_vm1, %v16835_v35  ;;  %15066 = vmatprep.mubr.msk.f32.mxu0 %vm325_vm1, %v3021_v29  ;;  %v3926_v13 = vld [vmem:[%s16268_s29 + $0x2f] sm:$0xff] }
 0x125   : > { %v17146_v27 = vadd.f32 %v1424_v62, %v995_v41  ;;  %v1010_v63 = vadd.f32 %v14731_v12, %v16825_v31  ;;  %15004 = vmatprep.mubr.msk.f32.mxu1 %vm325_vm1, %v2551_v57  ;;  %v1434_v2 = vpop.f32.mrf.mxu0  ;;  %v3457_v62 = vld [vmem:[%s16268_s29 + $0x36] sm:$0xff] }
 0x126   : > { %v1004_v34 = vpop.f32.mrf.mxu1  ;;  %v3927_v57 = vld [vmem:[%s16268_s29 + $0x37] sm:$0xff] }
 0x127   : > { %v17155_v3 = vadd.f32 %v14793_v16, %v1010_v63  ;;  %v1005_v35 = vadd.f32 %v1004_v34, %v16839_v39  ;;  %v14796_v31 = vpop.f32.mrf.mxu0  ;;  %15067 = vmatmul.mubr.msk.f32.gmra.mxu0 %vm325_vm1, %v3022_v20  ;;  %v3928_v16 = vld [vmem:[%s16268_s29 + $0x3f] sm:$0xff]  ;;  %v3929_v34 = vld [vmem:[%s16268_s29 + $0x47] sm:$0xff] }
 0x128   : > { %v14734_v7 = vpop.f32.mrf.mxu1  ;;  %15005 = vmatmul.mubr.msk.f32.gmra.mxu1 %vm325_vm1, %v2552_v18  ;;  %15133 = vmatprep.mubr.msk.f32.mxu0 %vm325_vm1, %v3923_v44  ;;  %v3459_v20 = vld [vmem:[%s16268_s29 + $0x46] sm:$0xff] }
 0x129   : > { %v17160_v36 = vadd.f32 %v1434_v2, %v1005_v35  ;;  %v1020_v22 = vadd.f32 %v14734_v7, %v16844_v45  ;;  %15071 = vmatprep.mubr.msk.f32.mxu1 %vm325_vm1, %v3453_v32  ;;  %v1444_v39 = vpop.f32.mrf.mxu0  ;;  %v17177_v45 = vld [vmem:[%s20447_s1 + $0x2c] sm:$0xf] }
 0x12a   : > { %v1014_v43 = vpop.f32.mrf.mxu1 }
 0x12b   : > { %v17167_v58 = vadd.f32 %v14796_v31, %v1020_v22  ;;  %v1015_v33 = vadd.f32 %v1014_v43, %v16855_v53  ;;  %v14799_v17 = vpop.f32.mrf.mxu0  ;;  %15134 = vmatmul.mubr.msk.f32.vlgmr.msra.gmra.mxu0 %vm325_vm1, %v3924_v9  ;;  %v3460_v31 = vld [vmem:[%s16268_s29 + $0x4e] sm:$0xff]  ;;  %v3461_v9 = vld [vmem:[%s16268_s29 + $0x56] sm:$0xff] }
 0x12c   : > { %v14737_v26 = vpop.f32.mrf.mxu1  ;;  %15072 = vmatmul.mubr.msk.f32.vlgmr.msra.gmra.mxu1 %vm325_vm1, %v3454_v47  ;;  %15256 = vmatpush3.msk.msra.mxu0 %vm446_vm0, %v16873_v61  ;;  %v3930_v22 = vld [vmem:[%s16268_s29 + $0x4f] sm:$0xff]  ;;  %v3931_v43 = vld [vmem:[%s16268_s29 + $0x57] sm:$0xff] }
 0x12d   : > { %v17184_v53 = vadd.f32 %v1444_v39, %v1015_v33  ;;  %v1030_v48 = vadd.f32 %v14737_v26, %v16860_v59  ;;  %15194 = vmatpush3.msk.msra.mxu1 %vm446_vm0, %v16868_v6  ;;  %v1454_v30 = vpop.f32.mrf.mxu0  ;;  %15074 = vmatprep.mubr.msk.f32.mxu1 %vm325_vm1, %v3455_v24  ;;  %v20463_v33 = vld [vmem:[#allocation2_spill] sm:$0xff] }
 0x12e   : > { %v1024_v52 = vpop.f32.mrf.mxu1  ;;  %15136 = vmatprep.mubr.msk.f32.mxu0 %vm325_vm1, %v3925_v49  ;;  %15317 = vmatprep.subr.msk.mxu1 %vm446_vm0, %v17177_v45 }
 0x12f   : > { %v17197_v29 = vadd.f32 %v14799_v17, %v1030_v48  ;;  %v1025_v59 = vadd.f32 %v1024_v52, %v16882_v1  ;;  %15379 = vmatprep.subr.msk.mxu0 %vm446_vm0, %v17182_v15  ;;  %v14802_v61 = vpop.f32.mrf.mxu0  ;;  %15137 = vmatmul.mubr.msk.f32.gmra.mxu0 %vm325_vm1, %v3926_v13  ;;  %v3458_v1 = vld [vmem:[%s16268_s29 + $0x3e] sm:$0xff]  ;;  %v20464_v17 = vld [vmem:[#allocation3_spill] sm:$0xff] }
 0x130   : > { %v14740_v6 = vpop.f32.mrf.mxu1  ;;  %15075 = vmatmul.mubr.msk.f32.gmra.mxu1 %vm325_vm1, %v3456_v14  ;;  %15139 = vmatprep.mubr.msk.f32.mxu0 %vm325_vm1, %v3927_v57  ;;  %v3462_v14 = vld [vmem:[%s16268_s29 + $0x5e] sm:$0xff]  ;;  %v3933_v57 = vld [vmem:[%s16268_s29 + $0x67] sm:$0xff] }
 0x131   : > { %v17206_v41 = vadd.f32 %v1454_v30, %v1025_v59  ;;  %v1040_v12 = vadd.f32 %v14740_v6, %v16894_v8  ;;  %15077 = vmatprep.mubr.msk.f32.mxu1 %vm325_vm1, %v3457_v62  ;;  %v1464_v18 = vpop.f32.mrf.mxu0  ;;  %v3932_v13 = vld [vmem:[%s16268_s29 + $0x5f] sm:$0xff]  ;;  %v20465_v6 = vld [vmem:[#allocation4_spill] sm:$0xff] }
 0x132   : > { %v1034_v63 = vpop.f32.mrf.mxu1  ;;  %v3463_v62 = vld [vmem:[%s16268_s29 + $0x66] sm:$0xff] }
 0x133   : > { %v17215_v2 = vadd.f32 %v14802_v61, %v1040_v12  ;;  %v1035_v32 = vadd.f32 %v1034_v63, %v16905_v11  ;;  %v14805_v8 = vpop.f32.mrf.mxu0  ;;  %15140 = vmatmul.mubr.msk.f32.gmra.mxu0 %vm325_vm1, %v3928_v16  ;;  %v20466_v63 = vld [vmem:[#allocation5_spill] sm:$0xff] }
 0x134   : > { %v14743_v44 = vpop.f32.mrf.mxu1  ;;  %15078 = vmatmul.mubr.msk.f32.gmra.mxu1 %vm325_vm1, %v3458_v1  ;;  %15142 = vmatprep.mubr.msk.f32.mxu0 %vm325_vm1, %v3929_v34  ;;  %v3934_v34 = vld [vmem:[%s16268_s29 + $0x6f] sm:$0xff] }
 0x135   : > { %v17220_v35 = vadd.f32 %v1464_v18, %v1035_v32  ;;  %v1050_v7 = vadd.f32 %v14743_v44, %v16910_v21  ;;  %15080 = vmatprep.mubr.msk.f32.mxu1 %vm325_vm1, %v3459_v20  ;;  %v1474_v11 = vpop.f32.mrf.mxu0  ;;  %v3464_v20 = vld [vmem:[%s16268_s29 + $0x6e] sm:$0xff] }
 0x136   : > { %v1044_v47 = vpop.f32.mrf.mxu1 }
 0x137   : > { %v17229_v39 = vadd.f32 %v14805_v8, %v1050_v7  ;;  %v1045_v24 = vadd.f32 %v1044_v47, %v20463_v33  ;;  %v14808_v21 = vpop.f32.mrf.mxu0  ;;  %15143 = vmatmul.mubr.msk.f32.gmra.mxu0 %vm325_vm1, %v3930_v22  ;;  %v3465_v8 = vld [vmem:[%s16268_s29 + $0x76] sm:$0xff]  ;;  %v20467_v22 = vld [vmem:[#allocation6_spill] sm:$0xff]  ;;  %v20468_v33 = vld [vmem:[#allocation7_spill] sm:$0xff] }
 0x138   : > { %v14746_v49 = vpop.f32.mrf.mxu1  ;;  %15081 = vmatmul.mubr.msk.f32.gmra.mxu1 %vm325_vm1, %v3460_v31  ;;  %15145 = vmatprep.mubr.msk.f32.mxu0 %vm325_vm1, %v3931_v43  ;;  %v3935_v7 = vld [vmem:[%s16268_s29 + $0x77] sm:$0xff] }
 0x139   : > { %v17234_v26 = vadd.f32 %v1474_v11, %v1045_v24  ;;  %v1060_v48 = vadd.f32 %v14746_v49, %v20464_v17  ;;  %15083 = vmatprep.mubr.msk.f32.mxu1 %vm325_vm1, %v3461_v9  ;;  %v1484_v30 = vpop.f32.mrf.mxu0  ;;  %v3466_v49 = vld [vmem:[%s16268_s29 + $0x7e] sm:$0xff] }
 0x13a   : > { %v1054_v52 = vpop.f32.mrf.mxu1 }
 0x13b   : > { %v17243_v59 = vadd.f32 %v14808_v21, %v1060_v48  ;;  %v1055_v61 = vadd.f32 %v1054_v52, %v20465_v6  ;;  %v14811_v1 = vpop.f32.mrf.mxu0  ;;  %15146 = vmatmul.mubr.msk.f32.gmra.mxu0 %vm325_vm1, %v3932_v13  ;;  %v3936_v21 = vld [vmem:[%s16268_s29 + $0x7f] sm:$0xff]  ;;  %v3937_v13 = vld [vmem:[%s16268_s29 + $0x87] sm:$0xff] }
 0x13c   : > { %v14749_v12 = vpop.f32.mrf.mxu1  ;;  %15084 = vmatmul.mubr.msk.f32.gmra.mxu1 %vm325_vm1, %v3462_v14  ;;  %15148 = vmatprep.mubr.msk.f32.mxu0 %vm325_vm1, %v3933_v57  ;;  %v3467_v14 = vld [vmem:[%s16268_s29 + $0x86] sm:$0xff] }
 0x13d   : > { %v17248_v16 = vadd.f32 %v1484_v30, %v1055_v61  ;;  %v1070_v18 = vadd.f32 %v14749_v12, %v20466_v63  ;;  %15086 = vmatprep.mubr.msk.f32.mxu1 %vm325_vm1, %v3463_v62  ;;  %v1494_v44 = vpop.f32.mrf.mxu0  ;;  %v20469_v30 = vld [vmem:[#allocation8_spill] sm:$0xff]  ;;  %v20470_v12 = vld [vmem:[#allocation9_spill] sm:$0xff] }
 0x13e   : > { %v1064_v32 = vpop.f32.mrf.mxu1  ;;  %v3468_v63 = vld [vmem:[%s16268_s29 + $0x8e] sm:$0xff] }
 0x13f   : > { %v17257_v31 = vadd.f32 %v14811_v1, %v1070_v18  ;;  %v1065_v47 = vadd.f32 %v1064_v32, %v20467_v22  ;;  %v14814_v9 = vpop.f32.mrf.mxu0  ;;  %15149 = vmatmul.mubr.msk.f32.gmra.mxu0 %vm325_vm1, %v3934_v34  ;;  %v3938_v18 = vld [vmem:[%s16268_s29 + $0x8f] sm:$0xff] }
 0x140   : > { %v14752_v11 = vpop.f32.mrf.mxu1  ;;  %15087 = vmatmul.mubr.msk.f32.gmra.mxu1 %vm325_vm1, %v3464_v20  ;;  %15151 = vmatprep.mubr.msk.f32.mxu0 %vm325_vm1, %v3935_v7  ;;  %v3469_v32 = vld [vmem:[%s16268_s29 + $0x96] sm:$0xff]  ;;  %v20471_v7 = vld [vmem:[#allocation10_spill] sm:$0xff] }
 0x141   : > { %v17262_v43 = vadd.f32 %v1494_v44, %v1065_v47  ;;  %v1080_v24 = vadd.f32 %v14752_v11, %v20468_v33  ;;  %15089 = vmatprep.mubr.msk.f32.mxu1 %vm325_vm1, %v3465_v8  ;;  %v1504_v48 = vpop.f32.mrf.mxu0  ;;  %v3939_v44 = vld [vmem:[%s16268_s29 + $0x97] sm:$0xff]  ;;  %v20472_v33 = vld [vmem:[#allocation11_spill] sm:$0xff] }
 0x142   : > { %v1074_v17 = vpop.f32.mrf.mxu1 }
 0x143   : > { %v17271_v52 = vadd.f32 %v14814_v9, %v1080_v24  ;;  %v1075_v62 = vadd.f32 %v1074_v17, %v20469_v30  ;;  %v14817_v6 = vpop.f32.mrf.mxu0  ;;  %15152 = vmatmul.mubr.msk.f32.gmra.mxu0 %vm325_vm1, %v3936_v21  ;;  %v3940_v21 = vld [vmem:[%s16268_s29 + $0x9f] sm:$0xff] }
 0x144   : > { %v14755_v57 = vpop.f32.mrf.mxu1  ;;  %15090 = vmatmul.mubr.msk.f32.gmra.mxu1 %vm325_vm1, %v3466_v49  ;;  %15154 = vmatprep.mubr.msk.f32.mxu0 %vm325_vm1, %v3937_v13  ;;  %v3470_v49 = vld [vmem:[%s16268_s29 + $0x9e] sm:$0xff]  ;;  %v3941_v13 = vld [vmem:[%s16268_s29 + $0xa7] sm:$0xff] }
 0x145   : > { %v17276_v61 = vadd.f32 %v1504_v48, %v1075_v62  ;;  %v1090_v1 = vadd.f32 %v14755_v57, %v20470_v12  ;;  %15092 = vmatprep.mubr.msk.f32.mxu1 %vm325_vm1, %v3467_v14  ;;  %v1514_v34 = vpop.f32.mrf.mxu0  ;;  %v3471_v14 = vld [vmem:[%s16268_s29 + $0xa6] sm:$0xff]  ;;  %v20473_v62 = vld [vmem:[#allocation12_spill] sm:$0xff] }
 0x146   : > { %v1084_v20 = vpop.f32.mrf.mxu1 }
 0x147   : > { %v17285_v8 = vadd.f32 %v14817_v6, %v1090_v1  ;;  %v1085_v22 = vadd.f32 %v1084_v20, %v20471_v7  ;;  %v14820_v11 = vpop.f32.mrf.mxu0  ;;  %15155 = vmatmul.mubr.msk.f32.gmra.mxu0 %vm325_vm1, %v3938_v18  ;;  %v3472_v18 = vld [vmem:[%s16268_s29 + $0xae] sm:$0xff]  ;;  %v3943_v7 = vld [vmem:[%s16268_s29 + $0xb7] sm:$0xff] }
 0x148   : > { %v14758_v47 = vpop.f32.mrf.mxu1  ;;  %15093 = vmatmul.mubr.msk.f32.gmra.mxu1 %vm325_vm1, %v3468_v63  ;;  %15157 = vmatprep.mubr.msk.f32.mxu0 %vm325_vm1, %v3939_v44  ;;  %v3942_v20 = vld [vmem:[%s16268_s29 + $0xaf] sm:$0xff] }
 0x149   : > { %v17290_v9 = vadd.f32 %v1514_v34, %v1085_v22  ;;  %v1100_v24 = vadd.f32 %v14758_v47, %v20472_v33  ;;  %15095 = vmatprep.mubr.msk.f32.mxu1 %vm325_vm1, %v3469_v32  ;;  %v1524_v48 = vpop.f32.mrf.mxu0  ;;  %v3473_v44 = vld [vmem:[%s16268_s29 + $0xb6] sm:$0xff] }
 0x14a   : > { %v1094_v17 = vpop.f32.mrf.mxu1 }
 0x14b   : > { %v17299_v30 = vadd.f32 %v14820_v11, %v1100_v24  ;;  %v1095_v57 = vadd.f32 %v1094_v17, %v20473_v62  ;;  %v14887_v12 = vpop.f32.mrf.mxu0  ;;  %15158 = vmatmul.mubr.msk.f32.gmra.mxu0 %vm325_vm1, %v3940_v21  ;;  %v3944_v21 = vld [vmem:[%s16268_s29 + $0xbf] sm:$0xff] }
 0x14c   : > { %v14825_v6 = vpop.f32.mrf.mxu1  ;;  %15096 = vmatmul.mubr.msk.f32.gmra.mxu1 %vm325_vm1, %v3470_v49  ;;  %15160 = vmatprep.mubr.msk.f32.mxu0 %vm325_vm1, %v3941_v13  ;;  %v3474_v49 = vld [vmem:[%s16268_s29 + $0xbe] sm:$0xff] }
 0x14d   : > { %v17304_v1 = vadd.f32 %v1524_v48, %v1095_v57  ;;  %v2004_v63 = vadd.f32 %v14825_v6, %v17013_v55  ;;  %15098 = vmatprep.mubr.msk.f32.mxu1 %vm325_vm1, %v3471_v14  ;;  %v2274_v32 = vpop.f32.mrf.mxu0  ;;  %v3475_v48 = vld [vmem:[%s16268_s29 + $0xc6] sm:$0xff] }
 0x14e   : > { %v1804_v34 = vpop.f32.mrf.mxu1  ;;  %v3945_v14 = vld [vmem:[%s16268_s29 + $0xc7] sm:$0xff] }
 0x14f   : > { %v17313_v22 = vadd.f32 %v14887_v12, %v2004_v63  ;;  %v2003_v47 = vadd.f32 %v1804_v34, %v17019_v42  ;;  %v14890_v55 = vpop.f32.mrf.mxu0  ;;  %15161 = vmatmul.mubr.msk.f32.gmra.mxu0 %vm325_vm1, %v3942_v20  ;;  %v3476_v63 = vld [vmem:[%s16268_s29 + $0xce] sm:$0xff]  ;;  %v3477_v34 = vld [vmem:[%s16268_s29 + $0xd6] sm:$0xff] }
 0x150   : > { %v14828_v11 = vpop.f32.mrf.mxu1  ;;  %15099 = vmatmul.mubr.msk.f32.gmra.mxu1 %vm325_vm1, %v3472_v18  ;;  %15163 = vmatprep.mubr.msk.f32.mxu0 %vm325_vm1, %v3943_v7  ;;  %v3946_v18 = vld [vmem:[%s16268_s29 + $0xcf] sm:$0xff] }
 0x151   : > { %v17318_v33 = vadd.f32 %v2274_v32, %v2003_v47  ;;  %v2006_v24 = vadd.f32 %v14828_v11, %v17027_v10  ;;  %15101 = vmatprep.mubr.msk.f32.mxu1 %vm325_vm1, %v3473_v44  ;;  %v2284_v42 = vpop.f32.mrf.mxu0  ;;  %v3947_v32 = vld [vmem:[%s16268_s29 + $0xd7] sm:$0xff] }
 0x152   : > { %v1814_v17 = vpop.f32.mrf.mxu1 }
 0x153   : > { %v17327_v13 = vadd.f32 %v14890_v55, %v2006_v24  ;;  %v2005_v62 = vadd.f32 %v1814_v17, %v17033_v46  ;;  %v14893_v10 = vpop.f32.mrf.mxu0  ;;  %15164 = vmatmul.mubr.msk.f32.gmra.mxu0 %vm325_vm1, %v3944_v21  ;;  %v3478_v24 = vld [vmem:[%s16268_s29 + $0xde] sm:$0xff]  ;;  %v3479_v17 = vld [vmem:[%s16268_s29 + $0xe6] sm:$0xff] }
 0x154   : > { %v14831_v57 = vpop.f32.mrf.mxu1  ;;  %15102 = vmatmul.mubr.msk.f32.gmra.mxu1 %vm325_vm1, %v3474_v49  ;;  %15166 = vmatprep.mubr.msk.f32.mxu0 %vm325_vm1, %v3945_v14  ;;  %v3948_v49 = vld [vmem:[%s16268_s29 + $0xdf] sm:$0xff] }
 0x155   : > { %v17332_v6 = vadd.f32 %v2284_v42, %v2005_v62  ;;  %v2008_v12 = vadd.f32 %v14831_v57, %v17041_v28  ;;  %15104 = vmatprep.mubr.msk.f32.mxu1 %vm325_vm1, %v3475_v48  ;;  %v2294_v46 = vpop.f32.mrf.mxu0  ;;  %v3949_v42 = vld [vmem:[%s16268_s29 + $0xe7] sm:$0xff] }
 0x156   : > { %v1824_v20 = vpop.f32.mrf.mxu1 }
 0x157   : > { %v17341_v44 = vadd.f32 %v14893_v10, %v2008_v12  ;;  %v2007_v7 = vadd.f32 %v1824_v20, %v17047_v50  ;;  %v14896_v28 = vpop.f32.mrf.mxu0  ;;  %15167 = vmatmul.mubr.msk.f32.gmra.mxu0 %vm325_vm1, %v3946_v18  ;;  %v3480_v12 = vld [vmem:[%s16268_s29 + $0xee] sm:$0xff]  ;;  %v3481_v20 = vld [vmem:[%s16268_s29 + $0xf6] sm:$0xff] }
 0x158   : > { %v14834_v47 = vpop.f32.mrf.mxu1  ;;  %15105 = vmatmul.mubr.msk.f32.gmra.mxu1 %vm325_vm1, %v3476_v63  ;;  %15169 = vmatprep.mubr.msk.f32.mxu0 %vm325_vm1, %v3947_v32  ;;  %v3950_v63 = vld [vmem:[%s16268_s29 + $0xef] sm:$0xff] }
 0x159   : > { %v17346_v11 = vadd.f32 %v2294_v46, %v2007_v7  ;;  %v2010_v55 = vadd.f32 %v14834_v47, %v17055_v37  ;;  %15107 = vmatprep.mubr.msk.f32.mxu1 %vm325_vm1, %v3477_v34  ;;  %v2304_v50 = vpop.f32.mrf.mxu0  ;;  %v3951_v46 = vld [vmem:[%s16268_s29 + $0xf7] sm:$0xff] }
 0x15a   : > { %v1834_v21 = vpop.f32.mrf.mxu1 }
 0x15b   : > { %v17355_v48 = vadd.f32 %v14896_v28, %v2010_v55  ;;  %v2009_v14 = vadd.f32 %v1834_v21, %v17061_v56  ;;  %v14899_v37 = vpop.f32.mrf.mxu0  ;;  %15170 = vmatmul.mubr.msk.f32.gmra.mxu0 %vm325_vm1, %v3948_v49  ;;  %v3482_v55 = vld [vmem:[%s16268_s29 + $0xfe] sm:$0xff]  ;;  %v3483_v21 = vld [vmem:[%s16268_s29 + $0x106] sm:$0xff] }
 0x15c   : > { %v14837_v62 = vpop.f32.mrf.mxu1  ;;  %15108 = vmatmul.mubr.msk.f32.gmra.mxu1 %vm325_vm1, %v3478_v24  ;;  %15172 = vmatprep.mubr.msk.f32.mxu0 %vm325_vm1, %v3949_v42  ;;  %v3952_v24 = vld [vmem:[%s16268_s29 + $0xff] sm:$0xff] }
 0x15d   : > { %v17360_v57 = vadd.f32 %v2304_v50, %v2009_v14  ;;  %v2012_v10 = vadd.f32 %v14837_v62, %v17069_v25  ;;  %15110 = vmatprep.mubr.msk.f32.mxu1 %vm325_vm1, %v3479_v17  ;;  %v2314_v56 = vpop.f32.mrf.mxu0  ;;  %v3953_v50 = vld [vmem:[%s16268_s29 + $0x107] sm:$0xff] }
 0x15e   : > { %v1844_v18 = vpop.f32.mrf.mxu1 }
 0x15f   : > { %v17369_v34 = vadd.f32 %v14899_v37, %v2012_v10  ;;  %v2011_v32 = vadd.f32 %v1844_v18, %v17075_v60  ;;  %v14902_v25 = vpop.f32.mrf.mxu0  ;;  %15173 = vmatmul.mubr.msk.f32.gmra.mxu0 %vm325_vm1, %v3950_v63  ;;  %v3484_v10 = vld [vmem:[%s16268_s29 + $0x10e] sm:$0xff]  ;;  %v3485_v18 = vld [vmem:[%s16268_s29 + $0x116] sm:$0xff] }
 0x160   : > { %v14840_v7 = vpop.f32.mrf.mxu1  ;;  %15111 = vmatmul.mubr.msk.f32.gmra.mxu1 %vm325_vm1, %v3480_v12  ;;  %15175 = vmatprep.mubr.msk.f32.mxu0 %vm325_vm1, %v3951_v46  ;;  %v3954_v12 = vld [vmem:[%s16268_s29 + $0x10f] sm:$0xff] }
 0x161   : > { %v17374_v47 = vadd.f32 %v2314_v56, %v2011_v32  ;;  %v2014_v28 = vadd.f32 %v14840_v7, %v17083_v40  ;;  %15113 = vmatprep.mubr.msk.f32.mxu1 %vm325_vm1, %v3481_v20  ;;  %v2324_v60 = vpop.f32.mrf.mxu0  ;;  %v3955_v56 = vld [vmem:[%s16268_s29 + $0x117] sm:$0xff] }
 0x162   : > { %v1854_v49 = vpop.f32.mrf.mxu1 }
 0x163   : > { %v17383_v17 = vadd.f32 %v14902_v25, %v2014_v28  ;;  %v2013_v42 = vadd.f32 %v1854_v49, %v17089_v0  ;;  %v14905_v40 = vpop.f32.mrf.mxu0  ;;  %15176 = vmatmul.mubr.msk.f32.gmra.mxu0 %vm325_vm1, %v3952_v24  ;;  %v3486_v28 = vld [vmem:[%s16268_s29 + $0x11e] sm:$0xff]  ;;  %v3487_v49 = vld [vmem:[%s16268_s29 + $0x126] sm:$0xff] }
 0x164   : > { %v14843_v14 = vpop.f32.mrf.mxu1  ;;  %15114 = vmatmul.mubr.msk.f32.gmra.mxu1 %vm325_vm1, %v3482_v55  ;;  %15178 = vmatprep.mubr.msk.f32.mxu0 %vm325_vm1, %v3953_v50  ;;  %v3956_v55 = vld [vmem:[%s16268_s29 + $0x11f] sm:$0xff] }
 0x165   : > { %v17388_v62 = vadd.f32 %v2324_v60, %v2013_v42  ;;  %v2016_v37 = vadd.f32 %v14843_v14, %v17097_v54  ;;  %15116 = vmatprep.mubr.msk.f32.mxu1 %vm325_vm1, %v3483_v21  ;;  %v2334_v0 = vpop.f32.mrf.mxu0  ;;  %v3957_v60 = vld [vmem:[%s16268_s29 + $0x127] sm:$0xff] }
 0x166   : > { %v1864_v63 = vpop.f32.mrf.mxu1 }
 0x167   : > { %v17397_v20 = vadd.f32 %v14905_v40, %v2016_v37  ;;  %v2015_v46 = vadd.f32 %v1864_v63, %v17103_v4  ;;  %v14908_v54 = vpop.f32.mrf.mxu0  ;;  %15179 = vmatmul.mubr.msk.f32.gmra.mxu0 %vm325_vm1, %v3954_v12  ;;  %v3488_v37 = vld [vmem:[%s16268_s29 + $0x12e] sm:$0xff]  ;;  %v3489_v63 = vld [vmem:[%s16268_s29 + $0x136] sm:$0xff] }
 0x168   : > { %v14846_v32 = vpop.f32.mrf.mxu1  ;;  %15117 = vmatmul.mubr.msk.f32.gmra.mxu1 %vm325_vm1, %v3484_v10  ;;  %15181 = vmatprep.mubr.msk.f32.mxu0 %vm325_vm1, %v3955_v56  ;;  %v3958_v10 = vld [vmem:[%s16268_s29 + $0x12f] sm:$0xff] }
 0x169   : > { %v17402_v7 = vadd.f32 %v2334_v0, %v2015_v46  ;;  %v2018_v25 = vadd.f32 %v14846_v32, %v17111_v5  ;;  %15119 = vmatprep.mubr.msk.f32.mxu1 %vm325_vm1, %v3485_v18  ;;  %v2344_v4 = vpop.f32.mrf.mxu0  ;;  %v3959_v0 = vld [vmem:[%s16268_s29 + $0x137] sm:$0xff] }
 0x16a   : > { %v1874_v24 = vpop.f32.mrf.mxu1 }
 0x16b   : > { %v17411_v21 = vadd.f32 %v14908_v54, %v2018_v25  ;;  %v2017_v50 = vadd.f32 %v1874_v24, %v17117_v51  ;;  %v14911_v5 = vpop.f32.mrf.mxu0  ;;  %15182 = vmatmul.mubr.msk.f32.gmra.mxu0 %vm325_vm1, %v3956_v55  ;;  %v3490_v25 = vld [vmem:[%s16268_s29 + $0x13e] sm:$0xff]  ;;  %v3491_v24 = vld [vmem:[%s16268_s29 + $0x146] sm:$0xff] }
 0x16c   : > { %v14849_v42 = vpop.f32.mrf.mxu1  ;;  %15120 = vmatmul.mubr.msk.f32.gmra.mxu1 %vm325_vm1, %v3486_v28  ;;  %15184 = vmatprep.mubr.msk.f32.mxu0 %vm325_vm1, %v3957_v60  ;;  %v3960_v28 = vld [vmem:[%s16268_s29 + $0x13f] sm:$0xff] }
 0x16d   : > { %v17416_v14 = vadd.f32 %v2344_v4, %v2017_v50  ;;  %v2020_v40 = vadd.f32 %v14849_v42, %v17125_v38  ;;  %15122 = vmatprep.mubr.msk.f32.mxu1 %vm325_vm1, %v3487_v49  ;;  %v2354_v51 = vpop.f32.mrf.mxu0  ;;  %v3961_v4 = vld [vmem:[%s16268_s29 + $0x147] sm:$0xff] }
 0x16e   : > { %v1884_v12 = vpop.f32.mrf.mxu1 }
 0x16f   : > { %v17425_v18 = vadd.f32 %v14911_v5, %v2020_v40  ;;  %v2019_v56 = vadd.f32 %v1884_v12, %v17131_v19  ;;  %v14914_v38 = vpop.f32.mrf.mxu0  ;;  %15185 = vmatmul.mubr.msk.f32.gmra.mxu0 %vm325_vm1, %v3958_v10  ;;  %v3492_v40 = vld [vmem:[%s16268_s29 + $0x14e] sm:$0xff]  ;;  %v4393_v12 = vld [vmem:[%s16268_s29 + $0x18] sm:$0xff] }
 0x170   : > { %v14852_v46 = vpop.f32.mrf.mxu1  ;;  %15123 = vmatmul.mubr.msk.f32.gmra.mxu1 %vm325_vm1, %v3488_v37  ;;  %15187 = vmatprep.mubr.msk.f32.mxu0 %vm325_vm1, %v3959_v0  ;;  %v3962_v37 = vld [vmem:[%s16268_s29 + $0x14f] sm:$0xff] }
 0x171   : > { %v17430_v32 = vadd.f32 %v2354_v51, %v2019_v56  ;;  %v2022_v54 = vadd.f32 %v14852_v46, %v17140_v23  ;;  %15125 = vmatprep.mubr.msk.f32.mxu1 %vm325_vm1, %v3489_v63  ;;  %v2364_v19 = vpop.f32.mrf.mxu0  ;;  %v4863_v51 = vld [vmem:[%s16268_s29 + $0x28] sm:$0xff] }
 0x172   : > { %v1894_v55 = vpop.f32.mrf.mxu1 }
 0x173   : > { %v17439_v49 = vadd.f32 %v14914_v38, %v2022_v54  ;;  %v2021_v60 = vadd.f32 %v1894_v55, %v17146_v27  ;;  %v14917_v23 = vpop.f32.mrf.mxu0  ;;  %15188 = vmatmul.mubr.msk.f32.gmra.mxu0 %vm325_vm1, %v3960_v28  ;;  %v4394_v54 = vld [vmem:[%s16268_s29 + $0x20] sm:$0xff] }
 0x174   : > { %v14855_v50 = vpop.f32.mrf.mxu1  ;;  %15126 = vmatmul.mubr.msk.f32.gmra.mxu1 %vm325_vm1, %v3490_v25  ;;  %15190 = vmatprep.mubr.msk.f32.mxu0 %vm325_vm1, %v3961_v4  ;;  %v4864_v25 = vld [vmem:[%s16268_s29 + $0x30] sm:$0xff] }
 0x175   : > { %v17444_v42 = vadd.f32 %v2364_v19, %v2021_v60  ;;  %v2024_v5 = vadd.f32 %v14855_v50, %v17155_v3  ;;  %15128 = vmatprep.mubr.msk.f32.mxu1 %vm325_vm1, %v3491_v24  ;;  %v2374_v27 = vpop.f32.mrf.mxu0  ;;  %v4865_v24 = vld [vmem:[%s16268_s29 + $0x38] sm:$0xff] }
 0x176   : > { %v1904_v10 = vpop.f32.mrf.mxu1  ;;  %v17479_v50 = vld [vmem:[%s20447_s1 + $0x38] sm:$0xf] }
 0x177   : > { %v17453_v63 = vadd.f32 %v14917_v23, %v2024_v5  ;;  %v2023_v0 = vadd.f32 %v1904_v10, %v17160_v36  ;;  %v14920_v46 = vpop.f32.mrf.mxu0  ;;  %15191 = vmatmul.mubr.msk.f32.gmra.mxu0 %vm325_vm1, %v3962_v37  ;;  %v4866_v5 = vld [vmem:[%s16268_s29 + $0x40] sm:$0xff]  ;;  %v4867_v10 = vld [vmem:[%s16268_s29 + $0x48] sm:$0xff] }
 0x178   : > { %v14858_v56 = vpop.f32.mrf.mxu1  ;;  %15129 = vmatmul.mubr.msk.f32.gmra.mxu1 %vm325_vm1, %v3492_v40  ;;  %15257 = vmatprep.mubr.msk.f32.mxu0 %vm325_vm1, %v4863_v51 }
 0x179   : > { %v17458_v3 = vadd.f32 %v2374_v27, %v2023_v0  ;;  %v2026_v38 = vadd.f32 %v14858_v56, %v17167_v58  ;;  %15195 = vmatprep.mubr.msk.f32.mxu1 %vm325_vm1, %v4393_v12  ;;  %v2384_v55 = vpop.f32.mrf.mxu0  ;;  %v17474_v58 = vld [vmem:[%s20447_s1 + $0x34] sm:$0xf] }
 0x17a   : > { %v1914_v28 = vpop.f32.mrf.mxu1 }
 0x17b   : > { %v17465_v36 = vadd.f32 %v14920_v46, %v2026_v38  ;;  %v2025_v19 = vadd.f32 %v1914_v28, %v17184_v53  ;;  %v14923_v60 = vpop.f32.mrf.mxu0  ;;  %15258 = vmatmul.mubr.msk.f32.vlgmr.msra.gmra.mxu0 %vm325_vm1, %v4864_v25  ;;  %v4869_v46 = vld [vmem:[%s16268_s29 + $0x58] sm:$0xff] }
 0x17c   : > { %v14861_v4 = vpop.f32.mrf.mxu1  ;;  %15196 = vmatmul.mubr.msk.f32.vlgmr.msra.gmra.mxu1 %vm325_vm1, %v4394_v54  ;;  %15380 = vmatpush3.msk.msra.mxu0 %vm446_vm0, %v17182_v15 }
 0x17d   : > { %v17481_v23 = vadd.f32 %v2384_v55, %v2025_v19  ;;  %v2028_v53 = vadd.f32 %v14861_v4, %v17197_v29  ;;  %15318 = vmatpush3.msk.msra.mxu1 %vm446_vm0, %v17177_v45  ;;  %v2394_v37 = vpop.f32.mrf.mxu0  ;;  %15198 = vmatprep.mubr.msk.f32.mxu1 %vm325_vm1, %v4863_v51  ;;  %v4870_v19 = vld [vmem:[%s16268_s29 + $0x60] sm:$0xff] }
 0x17e   : > { %v1924_v40 = vpop.f32.mrf.mxu1  ;;  %15260 = vmatprep.mubr.msk.f32.mxu0 %vm325_vm1, %v4865_v24  ;;  %15441 = vmatprep.subr.msk.mxu1 %vm446_vm0, %v17474_v58 }
 0x17f   : > { %v17492_v27 = vadd.f32 %v14923_v60, %v2028_v53  ;;  %v2027_v29 = vadd.f32 %v1924_v40, %v17206_v41  ;;  %15503 = vmatprep.subr.msk.mxu0 %vm446_vm0, %v17479_v50  ;;  %v14926_v15 = vpop.f32.mrf.mxu0  ;;  %15261 = vmatmul.mubr.msk.f32.gmra.mxu0 %vm325_vm1, %v4866_v5  ;;  %v4868_v41 = vld [vmem:[%s16268_s29 + $0x50] sm:$0xff] }
 0x180   : > { %v14864_v45 = vpop.f32.mrf.mxu1  ;;  %15199 = vmatmul.mubr.msk.f32.gmra.mxu1 %vm325_vm1, %v4864_v25  ;;  %15263 = vmatprep.mubr.msk.f32.mxu0 %vm325_vm1, %v4867_v10 }
 0x181   : > { %v17501_v12 = vadd.f32 %v2394_v37, %v2027_v29  ;;  %v2030_v51 = vadd.f32 %v14864_v45, %v17215_v2  ;;  %15201 = vmatprep.mubr.msk.f32.mxu1 %vm325_vm1, %v4865_v24  ;;  %v2404_v56 = vpop.f32.mrf.mxu0 }
 0x182   : > { %v1934_v0 = vpop.f32.mrf.mxu1 }
 0x183   : > { %v17508_v38 = vadd.f32 %v14926_v15, %v2030_v51  ;;  %v2029_v54 = vadd.f32 %v1934_v0, %v17220_v35  ;;  %v14929_v28 = vpop.f32.mrf.mxu0  ;;  %15264 = vmatmul.mubr.msk.f32.gmra.mxu0 %vm325_vm1, %v4868_v41  ;;  %v4871_v35 = vld [vmem:[%s16268_s29 + $0x68] sm:$0xff] }
 0x184   : > { %v14867_v25 = vpop.f32.mrf.mxu1  ;;  %15202 = vmatmul.mubr.msk.f32.gmra.mxu1 %vm325_vm1, %v4866_v5  ;;  %15266 = vmatprep.mubr.msk.f32.mxu0 %vm325_vm1, %v4869_v46 }
 0x185   : > { %v17513_v2 = vadd.f32 %v2404_v56, %v2029_v54  ;;  %v2032_v55 = vadd.f32 %v14867_v25, %v17229_v39  ;;  %15204 = vmatprep.mubr.msk.f32.mxu1 %vm325_vm1, %v4867_v10  ;;  %v2414_v4 = vpop.f32.mrf.mxu0  ;;  %v4872_v10 = vld [vmem:[%s16268_s29 + $0x70] sm:$0xff] }
 0x186   : > { %v1944_v24 = vpop.f32.mrf.mxu1 }
 0x187   : > { %v17520_v60 = vadd.f32 %v14929_v28, %v2032_v55  ;;  %v2031_v53 = vadd.f32 %v1944_v24, %v17234_v26  ;;  %v14932_v40 = vpop.f32.mrf.mxu0  ;;  %15267 = vmatmul.mubr.msk.f32.gmra.mxu0 %vm325_vm1, %v4870_v19  ;;  %v4873_v26 = vld [vmem:[%s16268_s29 + $0x78] sm:$0xff] }
 0x188   : > { %v14870_v5 = vpop.f32.mrf.mxu1  ;;  %15205 = vmatmul.mubr.msk.f32.gmra.mxu1 %vm325_vm1, %v4868_v41  ;;  %15269 = vmatprep.mubr.msk.f32.mxu0 %vm325_vm1, %v4871_v35 }
 0x189   : > { %v17525_v39 = vadd.f32 %v2414_v4, %v2031_v53  ;;  %v2034_v37 = vadd.f32 %v14870_v5, %v17243_v59  ;;  %15207 = vmatprep.mubr.msk.f32.mxu1 %vm325_vm1, %v4869_v46  ;;  %v2424_v45 = vpop.f32.mrf.mxu0  ;;  %v4874_v46 = vld [vmem:[%s16268_s29 + $0x80] sm:$0xff] }
 0x18a   : > { %v1954_v29 = vpop.f32.mrf.mxu1 }
 0x18b   : > { %v17532_v15 = vadd.f32 %v14932_v40, %v2034_v37  ;;  %v2033_v51 = vadd.f32 %v1954_v29, %v17248_v16  ;;  %v14935_v0 = vpop.f32.mrf.mxu0  ;;  %15270 = vmatmul.mubr.msk.f32.gmra.mxu0 %vm325_vm1, %v4872_v10  ;;  %v4875_v16 = vld [vmem:[%s16268_s29 + $0x88] sm:$0xff] }
 0x18c   : > { %v14873_v41 = vpop.f32.mrf.mxu1  ;;  %15208 = vmatmul.mubr.msk.f32.gmra.mxu1 %vm325_vm1, %v4870_v19  ;;  %15272 = vmatprep.mubr.msk.f32.mxu0 %vm325_vm1, %v4873_v26 }
 0x18d   : > { %v17537_v59 = vadd.f32 %v2424_v45, %v2033_v51  ;;  %v2036_v56 = vadd.f32 %v14873_v41, %v17257_v31  ;;  %15210 = vmatprep.mubr.msk.f32.mxu1 %vm325_vm1, %v4871_v35  ;;  %v2434_v25 = vpop.f32.mrf.mxu0  ;;  %v4876_v35 = vld [vmem:[%s16268_s29 + $0x90] sm:$0xff] }
 0x18e   : > { %v1964_v54 = vpop.f32.mrf.mxu1 }
 0x18f   : > { %v17544_v28 = vadd.f32 %v14935_v0, %v2036_v56  ;;  %v2035_v55 = vadd.f32 %v1964_v54, %v17262_v43  ;;  %v14938_v24 = vpop.f32.mrf.mxu0  ;;  %15273 = vmatmul.mubr.msk.f32.gmra.mxu0 %vm325_vm1, %v4874_v46  ;;  %v4877_v43 = vld [vmem:[%s16268_s29 + $0x98] sm:$0xff] }
 0x190   : > { %v14876_v19 = vpop.f32.mrf.mxu1  ;;  %15211 = vmatmul.mubr.msk.f32.gmra.mxu1 %vm325_vm1, %v4872_v10  ;;  %15275 = vmatprep.mubr.msk.f32.mxu0 %vm325_vm1, %v4875_v16 }
 0x191   : > { %v17549_v31 = vadd.f32 %v2434_v25, %v2035_v55  ;;  %v2038_v4 = vadd.f32 %v14876_v19, %v17271_v52  ;;  %15213 = vmatprep.mubr.msk.f32.mxu1 %vm325_vm1, %v4873_v26  ;;  %v2444_v5 = vpop.f32.mrf.mxu0  ;;  %v4878_v26 = vld [vmem:[%s16268_s29 + $0xa0] sm:$0xff] }
 0x192   : > { %v1974_v53 = vpop.f32.mrf.mxu1 }
 0x193   : > { %v17556_v40 = vadd.f32 %v14938_v24, %v2038_v4  ;;  %v2037_v37 = vadd.f32 %v1974_v53, %v17276_v61  ;;  %v14941_v29 = vpop.f32.mrf.mxu0  ;;  %15276 = vmatmul.mubr.msk.f32.gmra.mxu0 %vm325_vm1, %v4876_v35  ;;  %v4879_v61 = vld [vmem:[%s16268_s29 + $0xa8] sm:$0xff] }
 0x194   : > { %v14879_v10 = vpop.f32.mrf.mxu1  ;;  %15214 = vmatmul.mubr.msk.f32.gmra.mxu1 %vm325_vm1, %v4874_v46  ;;  %15278 = vmatprep.mubr.msk.f32.mxu0 %vm325_vm1, %v4877_v43 }
 0x195   : > { %v17561_v52 = vadd.f32 %v2444_v5, %v2037_v37  ;;  %v2040_v45 = vadd.f32 %v14879_v10, %v17285_v8  ;;  %15216 = vmatprep.mubr.msk.f32.mxu1 %vm325_vm1, %v4875_v16  ;;  %v2454_v41 = vpop.f32.mrf.mxu0  ;;  %v4880_v16 = vld [vmem:[%s16268_s29 + $0xb0] sm:$0xff] }
 0x196   : > { %v1984_v51 = vpop.f32.mrf.mxu1 }
 0x197   : > { %v17568_v0 = vadd.f32 %v14941_v29, %v2040_v45  ;;  %v2039_v56 = vadd.f32 %v1984_v51, %v17290_v9  ;;  %v14944_v54 = vpop.f32.mrf.mxu0  ;;  %15279 = vmatmul.mubr.msk.f32.gmra.mxu0 %vm325_vm1, %v4878_v26  ;;  %v4881_v9 = vld [vmem:[%s16268_s29 + $0xb8] sm:$0xff] }
 0x198   : > { %v14882_v46 = vpop.f32.mrf.mxu1  ;;  %15217 = vmatmul.mubr.msk.f32.gmra.mxu1 %vm325_vm1, %v4876_v35  ;;  %15281 = vmatprep.mubr.msk.f32.mxu0 %vm325_vm1, %v4879_v61 }
 0x199   : > { %v17573_v8 = vadd.f32 %v2454_v41, %v2039_v56  ;;  %v2042_v25 = vadd.f32 %v14882_v46, %v17299_v30  ;;  %15219 = vmatprep.mubr.msk.f32.mxu1 %vm325_vm1, %v4877_v43  ;;  %v2464_v19 = vpop.f32.mrf.mxu0  ;;  %v4882_v43 = vld [vmem:[%s16268_s29 + $0xc0] sm:$0xff] }
 0x19a   : > { %v1994_v55 = vpop.f32.mrf.mxu1 }
 0x19b   : > { %v17580_v24 = vadd.f32 %v14944_v54, %v2042_v25  ;;  %v2041_v4 = vadd.f32 %v1994_v55, %v17304_v1  ;;  %v15011_v53 = vpop.f32.mrf.mxu0  ;;  %15282 = vmatmul.mubr.msk.f32.gmra.mxu0 %vm325_vm1, %v4880_v16  ;;  %v4883_v1 = vld [vmem:[%s16268_s29 + $0xc8] sm:$0xff] }
 0x19c   : > { %v14949_v35 = vpop.f32.mrf.mxu1  ;;  %15220 = vmatmul.mubr.msk.f32.gmra.mxu1 %vm325_vm1, %v4878_v26  ;;  %15284 = vmatprep.mubr.msk.f32.mxu0 %vm325_vm1, %v4881_v9 }
 0x19d   : > { %v17585_v30 = vadd.f32 %v2464_v19, %v2041_v4  ;;  %v2944_v5 = vadd.f32 %v14949_v35, %v17313_v22  ;;  %15222 = vmatprep.mubr.msk.f32.mxu1 %vm325_vm1, %v4879_v61  ;;  %v3214_v10 = vpop.f32.mrf.mxu0  ;;  %v4884_v61 = vld [vmem:[%s16268_s29 + $0xd0] sm:$0xff] }
 0x19e   : > { %v2744_v37 = vpop.f32.mrf.mxu1 }
 0x19f   : > { %v17592_v29 = vadd.f32 %v15011_v53, %v2944_v5  ;;  %v2943_v45 = vadd.f32 %v2744_v37, %v17318_v33  ;;  %v15014_v51 = vpop.f32.mrf.mxu0  ;;  %15285 = vmatmul.mubr.msk.f32.gmra.mxu0 %vm325_vm1, %v4882_v43  ;;  %v4885_v33 = vld [vmem:[%s16268_s29 + $0xd8] sm:$0xff] }
 0x1a0   : > { %v14952_v26 = vpop.f32.mrf.mxu1  ;;  %15223 = vmatmul.mubr.msk.f32.gmra.mxu1 %vm325_vm1, %v4880_v16  ;;  %15287 = vmatprep.mubr.msk.f32.mxu0 %vm325_vm1, %v4883_v1 }
 0x1a1   : > { %v17597_v22 = vadd.f32 %v3214_v10, %v2943_v45  ;;  %v2946_v41 = vadd.f32 %v14952_v26, %v17327_v13  ;;  %15225 = vmatprep.mubr.msk.f32.mxu1 %vm325_vm1, %v4881_v9  ;;  %v3224_v46 = vpop.f32.mrf.mxu0  ;;  %v4886_v9 = vld [vmem:[%s16268_s29 + $0xe0] sm:$0xff] }
 0x1a2   : > { %v2754_v56 = vpop.f32.mrf.mxu1 }
 0x1a3   : > { %v17604_v54 = vadd.f32 %v15014_v51, %v2946_v41  ;;  %v2945_v25 = vadd.f32 %v2754_v56, %v17332_v6  ;;  %v15017_v55 = vpop.f32.mrf.mxu0  ;;  %15288 = vmatmul.mubr.msk.f32.gmra.mxu0 %vm325_vm1, %v4884_v61  ;;  %v4887_v6 = vld [vmem:[%s16268_s29 + $0xe8] sm:$0xff] }
 0x1a4   : > { %v14955_v16 = vpop.f32.mrf.mxu1  ;;  %15226 = vmatmul.mubr.msk.f32.gmra.mxu1 %vm325_vm1, %v4882_v43  ;;  %15290 = vmatprep.mubr.msk.f32.mxu0 %vm325_vm1, %v4885_v33 }
 0x1a5   : > { %v17609_v13 = vadd.f32 %v3224_v46, %v2945_v25  ;;  %v2948_v19 = vadd.f32 %v14955_v16, %v17341_v44  ;;  %15228 = vmatprep.mubr.msk.f32.mxu1 %vm325_vm1, %v4883_v1  ;;  %v3234_v35 = vpop.f32.mrf.mxu0  ;;  %v4888_v1 = vld [vmem:[%s16268_s29 + $0xf0] sm:$0xff] }
 0x1a6   : > { %v2764_v4 = vpop.f32.mrf.mxu1 }
 0x1a7   : > { %v17616_v53 = vadd.f32 %v15017_v55, %v2948_v19  ;;  %v2947_v5 = vadd.f32 %v2764_v4, %v17346_v11  ;;  %v15020_v37 = vpop.f32.mrf.mxu0  ;;  %15291 = vmatmul.mubr.msk.f32.gmra.mxu0 %vm325_vm1, %v4886_v9  ;;  %v4889_v11 = vld [vmem:[%s16268_s29 + $0xf8] sm:$0xff] }
 0x1a8   : > { %v14958_v43 = vpop.f32.mrf.mxu1  ;;  %15229 = vmatmul.mubr.msk.f32.gmra.mxu1 %vm325_vm1, %v4884_v61  ;;  %15293 = vmatprep.mubr.msk.f32.mxu0 %vm325_vm1, %v4887_v6 }
 0x1a9   : > { %v17621_v44 = vadd.f32 %v3234_v35, %v2947_v5  ;;  %v2950_v10 = vadd.f32 %v14958_v43, %v17355_v48  ;;  %15231 = vmatprep.mubr.msk.f32.mxu1 %vm325_vm1, %v4885_v33  ;;  %v3244_v26 = vpop.f32.mrf.mxu0  ;;  %v4890_v33 = vld [vmem:[%s16268_s29 + $0x100] sm:$0xff] }
 0x1aa   : > { %v2774_v45 = vpop.f32.mrf.mxu1 }
 0x1ab   : > { %v17628_v51 = vadd.f32 %v15020_v37, %v2950_v10  ;;  %v2949_v41 = vadd.f32 %v2774_v45, %v17360_v57  ;;  %v15023_v56 = vpop.f32.mrf.mxu0  ;;  %15294 = vmatmul.mubr.msk.f32.gmra.mxu0 %vm325_vm1, %v4888_v1  ;;  %v4891_v57 = vld [vmem:[%s16268_s29 + $0x108] sm:$0xff] }
 0x1ac   : > { %v14961_v61 = vpop.f32.mrf.mxu1  ;;  %15232 = vmatmul.mubr.msk.f32.gmra.mxu1 %vm325_vm1, %v4886_v9  ;;  %15296 = vmatprep.mubr.msk.f32.mxu0 %vm325_vm1, %v4889_v11 }
 0x1ad   : > { %v17633_v48 = vadd.f32 %v3244_v26, %v2949_v41  ;;  %v2952_v46 = vadd.f32 %v14961_v61, %v17369_v34  ;;  %15234 = vmatprep.mubr.msk.f32.mxu1 %vm325_vm1, %v4887_v6  ;;  %v3254_v16 = vpop.f32.mrf.mxu0  ;;  %v4892_v6 = vld [vmem:[%s16268_s29 + $0x110] sm:$0xff] }
 0x1ae   : > { %v2784_v25 = vpop.f32.mrf.mxu1 }
 0x1af   : > { %v17640_v55 = vadd.f32 %v15023_v56, %v2952_v46  ;;  %v2951_v19 = vadd.f32 %v2784_v25, %v17374_v47  ;;  %v15026_v4 = vpop.f32.mrf.mxu0  ;;  %15297 = vmatmul.mubr.msk.f32.gmra.mxu0 %vm325_vm1, %v4890_v33  ;;  %v4893_v47 = vld [vmem:[%s16268_s29 + $0x118] sm:$0xff] }
 0x1b0   : > { %v14964_v9 = vpop.f32.mrf.mxu1  ;;  %15235 = vmatmul.mubr.msk.f32.gmra.mxu1 %vm325_vm1, %v4888_v1  ;;  %15299 = vmatprep.mubr.msk.f32.mxu0 %vm325_vm1, %v4891_v57 }
 0x1b1   : > { %v17645_v34 = vadd.f32 %v3254_v16, %v2951_v19  ;;  %v2954_v35 = vadd.f32 %v14964_v9, %v17383_v17  ;;  %15237 = vmatprep.mubr.msk.f32.mxu1 %vm325_vm1, %v4889_v11  ;;  %v3264_v43 = vpop.f32.mrf.mxu0  ;;  %v4894_v11 = vld [vmem:[%s16268_s29 + $0x120] sm:$0xff] }
 0x1b2   : > { %v2794_v5 = vpop.f32.mrf.mxu1 }
 0x1b3   : > { %v17652_v37 = vadd.f32 %v15026_v4, %v2954_v35  ;;  %v2953_v10 = vadd.f32 %v2794_v5, %v17388_v62  ;;  %v15029_v45 = vpop.f32.mrf.mxu0  ;;  %15300 = vmatmul.mubr.msk.f32.gmra.mxu0 %vm325_vm1, %v4892_v6  ;;  %v4895_v62 = vld [vmem:[%s16268_s29 + $0x128] sm:$0xff] }
 0x1b4   : > { %v14967_v1 = vpop.f32.mrf.mxu1  ;;  %15238 = vmatmul.mubr.msk.f32.gmra.mxu1 %vm325_vm1, %v4890_v33  ;;  %15302 = vmatprep.mubr.msk.f32.mxu0 %vm325_vm1, %v4893_v47 }
 0x1b5   : > { %v17657_v17 = vadd.f32 %v3264_v43, %v2953_v10  ;;  %v2956_v26 = vadd.f32 %v14967_v1, %v17397_v20  ;;  %15240 = vmatprep.mubr.msk.f32.mxu1 %vm325_vm1, %v4891_v57  ;;  %v3274_v61 = vpop.f32.mrf.mxu0  ;;  %v4896_v57 = vld [vmem:[%s16268_s29 + $0x130] sm:$0xff] }
 0x1b6   : > { %v2804_v41 = vpop.f32.mrf.mxu1 }
 0x1b7   : > { %v17664_v56 = vadd.f32 %v15029_v45, %v2956_v26  ;;  %v2955_v46 = vadd.f32 %v2804_v41, %v17402_v7  ;;  %v15032_v25 = vpop.f32.mrf.mxu0  ;;  %15303 = vmatmul.mubr.msk.f32.gmra.mxu0 %vm325_vm1, %v4894_v11  ;;  %v4897_v7 = vld [vmem:[%s16268_s29 + $0x138] sm:$0xff] }
 0x1b8   : > { %v14970_v33 = vpop.f32.mrf.mxu1  ;;  %15241 = vmatmul.mubr.msk.f32.gmra.mxu1 %vm325_vm1, %v4892_v6  ;;  %15305 = vmatprep.mubr.msk.f32.mxu0 %vm325_vm1, %v4895_v62 }
 0x1b9   : > { %v17669_v20 = vadd.f32 %v3274_v61, %v2955_v46  ;;  %v2958_v16 = vadd.f32 %v14970_v33, %v17411_v21  ;;  %15243 = vmatprep.mubr.msk.f32.mxu1 %vm325_vm1, %v4893_v47  ;;  %v3284_v9 = vpop.f32.mrf.mxu0  ;;  %v4898_v47 = vld [vmem:[%s16268_s29 + $0x140] sm:$0xff] }
 0x1ba   : > { %v2814_v19 = vpop.f32.mrf.mxu1 }
 0x1bb   : > { %v17676_v4 = vadd.f32 %v15032_v25, %v2958_v16  ;;  %v2957_v35 = vadd.f32 %v2814_v19, %v17416_v14  ;;  %v15035_v5 = vpop.f32.mrf.mxu0  ;;  %15306 = vmatmul.mubr.msk.f32.gmra.mxu0 %vm325_vm1, %v4896_v57  ;;  %v4899_v14 = vld [vmem:[%s16268_s29 + $0x148] sm:$0xff] }
 0x1bc   : > { %v14973_v6 = vpop.f32.mrf.mxu1  ;;  %15244 = vmatmul.mubr.msk.f32.gmra.mxu1 %vm325_vm1, %v4894_v11  ;;  %15308 = vmatprep.mubr.msk.f32.mxu0 %vm325_vm1, %v4897_v7 }
 0x1bd   : > { %v17681_v21 = vadd.f32 %v3284_v9, %v2957_v35  ;;  %v2960_v43 = vadd.f32 %v14973_v6, %v17425_v18  ;;  %15246 = vmatprep.mubr.msk.f32.mxu1 %vm325_vm1, %v4895_v62  ;;  %v3294_v1 = vpop.f32.mrf.mxu0  ;;  %v4900_v62 = vld [vmem:[%s16268_s29 + $0x150] sm:$0xff] }
 0x1be   : > { %v2824_v10 = vpop.f32.mrf.mxu1 }
 0x1bf   : > { %v17688_v45 = vadd.f32 %v15035_v5, %v2960_v43  ;;  %v2959_v26 = vadd.f32 %v2824_v10, %v17430_v32  ;;  %v15038_v41 = vpop.f32.mrf.mxu0  ;;  %15309 = vmatmul.mubr.msk.f32.gmra.mxu0 %vm325_vm1, %v4898_v47  ;;  %v4901_v32 = vld [vmem:[%s16268_s29 + $0x158] sm:$0xff]  ;;  %v5803_v5 = vld [vmem:[%s16268_s29 + $0x2a] sm:$0xff] }
 0x1c0   : > { %v14976_v11 = vpop.f32.mrf.mxu1  ;;  %15247 = vmatmul.mubr.msk.f32.gmra.mxu1 %vm325_vm1, %v4896_v57  ;;  %15311 = vmatprep.mubr.msk.f32.mxu0 %vm325_vm1, %v4899_v14 }
 0x1c1   : > { %v17693_v18 = vadd.f32 %v3294_v1, %v2959_v26  ;;  %v2962_v61 = vadd.f32 %v14976_v11, %v17439_v49  ;;  %15249 = vmatprep.mubr.msk.f32.mxu1 %vm325_vm1, %v4897_v7  ;;  %v3304_v33 = vpop.f32.mrf.mxu0  ;;  %v4902_v7 = vld [vmem:[%s16268_s29 + $0x160] sm:$0xff]  ;;  %v5334_v26 = vld [vmem:[%s16268_s29 + $0x31] sm:$0xff] }
 0x1c2   : > { %v2834_v46 = vpop.f32.mrf.mxu1  ;;  %v5804_v11 = vld [vmem:[%s16268_s29 + $0x32] sm:$0xff] }
 0x1c3   : > { %v17700_v25 = vadd.f32 %v15038_v41, %v2962_v61  ;;  %v2961_v16 = vadd.f32 %v2834_v46, %v17444_v42  ;;  %v15041_v19 = vpop.f32.mrf.mxu0  ;;  %15312 = vmatmul.mubr.msk.f32.gmra.mxu0 %vm325_vm1, %v4900_v62  ;;  %v5333_v42 = vld [vmem:[%s16268_s29 + $0x29] sm:$0xff]  ;;  %v5335_v46 = vld [vmem:[%s16268_s29 + $0x39] sm:$0xff] }
 0x1c4   : > { %v14979_v57 = vpop.f32.mrf.mxu1  ;;  %15250 = vmatmul.mubr.msk.f32.gmra.mxu1 %vm325_vm1, %v4898_v47  ;;  %15314 = vmatprep.mubr.msk.f32.mxu0 %vm325_vm1, %v4901_v32 }
 0x1c5   : > { %v17705_v49 = vadd.f32 %v3304_v33, %v2961_v16  ;;  %v2964_v9 = vadd.f32 %v14979_v57, %v17453_v63  ;;  %15252 = vmatprep.mubr.msk.f32.mxu1 %vm325_vm1, %v4899_v14  ;;  %v3314_v6 = vpop.f32.mrf.mxu0  ;;  %v5805_v33 = vld [vmem:[%s16268_s29 + $0x3a] sm:$0xff] }
 0x1c6   : > { %v2844_v35 = vpop.f32.mrf.mxu1  ;;  %v17740_v57 = vld [vmem:[%s20447_s1 + $0x40] sm:$0xf] }
 0x1c7   : > { %v17713_v43 = vadd.f32 %v15041_v19, %v2964_v9  ;;  %v2963_v47 = vadd.f32 %v2844_v35, %v17458_v3  ;;  %v15044_v1 = vpop.f32.mrf.mxu0  ;;  %15315 = vmatmul.mubr.msk.f32.gmra.mxu0 %vm325_vm1, %v4902_v7  ;;  %v5336_v9 = vld [vmem:[%s16268_s29 + $0x41] sm:$0xff] }
 0x1c8   : > { %v14982_v10 = vpop.f32.mrf.mxu1  ;;  %15253 = vmatmul.mubr.msk.f32.gmra.mxu1 %vm325_vm1, %v4900_v62  ;;  %15381 = vmatprep.mubr.msk.f32.mxu0 %vm325_vm1, %v5803_v5  ;;  %v5806_v7 = vld [vmem:[%s16268_s29 + $0x42] sm:$0xff]  ;;  %v5807_v5 = vld [vmem:[%s16268_s29 + $0x4a] sm:$0xff] }
 0x1c9   : > { %v17718_v63 = vadd.f32 %v3314_v6, %v2963_v47  ;;  %v2966_v14 = vadd.f32 %v14982_v10, %v17465_v36  ;;  %15319 = vmatprep.mubr.msk.f32.mxu1 %vm325_vm1, %v5333_v42  ;;  %v3324_v3 = vpop.f32.mrf.mxu0  ;;  %v17735_v36 = vld [vmem:[%s20447_s1 + $0x3c] sm:$0xf]  ;;  %v5337_v42 = vld [vmem:[%s16268_s29 + $0x49] sm:$0xff] }
 0x1ca   : > { %v2854_v41 = vpop.f32.mrf.mxu1 }
 0x1cb   : > { %v17725_v61 = vadd.f32 %v15044_v1, %v2966_v14  ;;  %v2965_v62 = vadd.f32 %v2854_v41, %v17481_v23  ;;  %v15047_v16 = vpop.f32.mrf.mxu0  ;;  %15382 = vmatmul.mubr.msk.f32.vlgmr.msra.gmra.mxu0 %vm325_vm1, %v5804_v11  ;;  %v5808_v14 = vld [vmem:[%s16268_s29 + $0x52] sm:$0xff] }
 0x1cc   : > { %v14985_v32 = vpop.f32.mrf.mxu1  ;;  %15320 = vmatmul.mubr.msk.f32.vlgmr.msra.gmra.mxu1 %vm325_vm1, %v5334_v26  ;;  %15504 = vmatpush3.msk.msra.mxu0 %vm446_vm0, %v17479_v50  ;;  %v5339_v41 = vld [vmem:[%s16268_s29 + $0x59] sm:$0xff] }
 0x1cd   : > { %v17742_v23 = vadd.f32 %v3324_v3, %v2965_v62  ;;  %v2968_v19 = vadd.f32 %v14985_v32, %v17492_v27  ;;  %15442 = vmatpush3.msk.msra.mxu1 %vm446_vm0, %v17474_v58  ;;  %v3334_v6 = vpop.f32.mrf.mxu0  ;;  %15322 = vmatprep.mubr.msk.f32.mxu1 %vm325_vm1, %v5335_v46  ;;  %v5809_v3 = vld [vmem:[%s16268_s29 + $0x5a] sm:$0xff] }
 0x1ce   : > { %v2864_v35 = vpop.f32.mrf.mxu1  ;;  %15384 = vmatprep.mubr.msk.f32.mxu0 %vm325_vm1, %v5805_v33  ;;  %15565 = vmatprep.subr.msk.mxu1 %vm446_vm0, %v17735_v36 }
 0x1cf   : > { %v17755_v47 = vadd.f32 %v15047_v16, %v2968_v19  ;;  %v2967_v58 = vadd.f32 %v2864_v35, %v17501_v12  ;;  %15627 = vmatprep.subr.msk.mxu0 %vm446_vm0, %v17740_v57  ;;  %v15050_v27 = vpop.f32.mrf.mxu0  ;;  %15385 = vmatmul.mubr.msk.f32.gmra.mxu0 %vm325_vm1, %v5806_v7  ;;  %v5338_v12 = vld [vmem:[%s16268_s29 + $0x51] sm:$0xff]  ;;  %v5340_v19 = vld [vmem:[%s16268_s29 + $0x61] sm:$0xff]  ;;  %v5341_v35 = vld [vmem:[%s16268_s29 + $0x69] sm:$0xff] }
 0x1d0   : > { %v14988_v50 = vpop.f32.mrf.mxu1  ;;  %15323 = vmatmul.mubr.msk.f32.gmra.mxu1 %vm325_vm1, %v5336_v9  ;;  %15387 = vmatprep.mubr.msk.f32.mxu0 %vm325_vm1, %v5807_v5  ;;  %v5810_v9 = vld [vmem:[%s16268_s29 + $0x62] sm:$0xff] }
 0x1d1   : > { %v17764_v10 = vadd.f32 %v3334_v6, %v2967_v58  ;;  %v2970_v1 = vadd.f32 %v14988_v50, %v17508_v38  ;;  %15325 = vmatprep.mubr.msk.f32.mxu1 %vm325_vm1, %v5337_v42  ;;  %v3344_v11 = vpop.f32.mrf.mxu0  ;;  %v5811_v6 = vld [vmem:[%s16268_s29 + $0x6a] sm:$0xff] }
 0x1d2   : > { %v2874_v26 = vpop.f32.mrf.mxu1 }
 0x1d3   : > { %v17773_v62 = vadd.f32 %v15050_v27, %v2970_v1  ;;  %v2969_v46 = vadd.f32 %v2874_v26, %v17513_v2  ;;  %v15053_v38 = vpop.f32.mrf.mxu0  ;;  %15388 = vmatmul.mubr.msk.f32.gmra.mxu0 %vm325_vm1, %v5808_v14  ;;  %v5342_v1 = vld [vmem:[%s16268_s29 + $0x71] sm:$0xff]  ;;  %v5343_v26 = vld [vmem:[%s16268_s29 + $0x79] sm:$0xff] }
 0x1d4   : > { %v14991_v33 = vpop.f32.mrf.mxu1  ;;  %15326 = vmatmul.mubr.msk.f32.gmra.mxu1 %vm325_vm1, %v5338_v12  ;;  %15390 = vmatprep.mubr.msk.f32.mxu0 %vm325_vm1, %v5809_v3  ;;  %v5812_v12 = vld [vmem:[%s16268_s29 + $0x72] sm:$0xff] }
 0x1d5   : > { %v17778_v32 = vadd.f32 %v3344_v11, %v2969_v46  ;;  %v2972_v16 = vadd.f32 %v14991_v33, %v17520_v60  ;;  %15328 = vmatprep.mubr.msk.f32.mxu1 %vm325_vm1, %v5339_v41  ;;  %v3354_v2 = vpop.f32.mrf.mxu0  ;;  %v5813_v11 = vld [vmem:[%s16268_s29 + $0x7a] sm:$0xff] }
 0x1d6   : > { %v2884_v7 = vpop.f32.mrf.mxu1 }
 0x1d7   : > { %v17787_v42 = vadd.f32 %v15053_v38, %v2972_v16  ;;  %v2971_v5 = vadd.f32 %v2884_v7, %v17525_v39  ;;  %v15056_v60 = vpop.f32.mrf.mxu0  ;;  %15391 = vmatmul.mubr.msk.f32.gmra.mxu0 %vm325_vm1, %v5810_v9  ;;  %v5344_v16 = vld [vmem:[%s16268_s29 + $0x81] sm:$0xff]  ;;  %v5345_v7 = vld [vmem:[%s16268_s29 + $0x89] sm:$0xff] }
 0x1d8   : > { %v14994_v58 = vpop.f32.mrf.mxu1  ;;  %15329 = vmatmul.mubr.msk.f32.gmra.mxu1 %vm325_vm1, %v5340_v19  ;;  %15393 = vmatprep.mubr.msk.f32.mxu0 %vm325_vm1, %v5811_v6  ;;  %v5814_v19 = vld [vmem:[%s16268_s29 + $0x82] sm:$0xff] }
 0x1d9   : > { %v17792_v50 = vadd.f32 %v3354_v2, %v2971_v5  ;;  %v2974_v27 = vadd.f32 %v14994_v58, %v17532_v15  ;;  %15331 = vmatprep.mubr.msk.f32.mxu1 %vm325_vm1, %v5341_v35  ;;  %v3364_v39 = vpop.f32.mrf.mxu0  ;;  %v5815_v2 = vld [vmem:[%s16268_s29 + $0x8a] sm:$0xff] }
 0x1da   : > { %v2894_v14 = vpop.f32.mrf.mxu1 }
 0x1db   : > { %v17801_v41 = vadd.f32 %v15056_v60, %v2974_v27  ;;  %v2973_v3 = vadd.f32 %v2894_v14, %v17537_v59  ;;  %v15059_v15 = vpop.f32.mrf.mxu0  ;;  %15394 = vmatmul.mubr.msk.f32.gmra.mxu0 %vm325_vm1, %v5812_v12  ;;  %v5346_v27 = vld [vmem:[%s16268_s29 + $0x91] sm:$0xff]  ;;  %v5347_v14 = vld [vmem:[%s16268_s29 + $0x99] sm:$0xff] }
 0x1dc   : > { %v14997_v46 = vpop.f32.mrf.mxu1  ;;  %15332 = vmatmul.mubr.msk.f32.gmra.mxu1 %vm325_vm1, %v5342_v1  ;;  %15396 = vmatprep.mubr.msk.f32.mxu0 %vm325_vm1, %v5813_v11  ;;  %v5816_v1 = vld [vmem:[%s16268_s29 + $0x92] sm:$0xff] }
 0x1dd   : > { %v17806_v33 = vadd.f32 %v3364_v39, %v2973_v3  ;;  %v2976_v38 = vadd.f32 %v14997_v46, %v17544_v28  ;;  %15334 = vmatprep.mubr.msk.f32.mxu1 %vm325_vm1, %v5343_v26  ;;  %v3374_v59 = vpop.f32.mrf.mxu0  ;;  %v5817_v39 = vld [vmem:[%s16268_s29 + $0x9a] sm:$0xff] }
 0x1de   : > { %v2904_v9 = vpop.f32.mrf.mxu1 }
 0x1df   : > { %v17815_v35 = vadd.f32 %v15059_v15, %v2976_v38  ;;  %v2975_v6 = vadd.f32 %v2904_v9, %v17549_v31  ;;  %v15062_v28 = vpop.f32.mrf.mxu0  ;;  %15397 = vmatmul.mubr.msk.f32.gmra.mxu0 %vm325_vm1, %v5814_v19  ;;  %v5348_v38 = vld [vmem:[%s16268_s29 + $0xa1] sm:$0xff]  ;;  %v5349_v9 = vld [vmem:[%s16268_s29 + $0xa9] sm:$0xff] }
 0x1e0   : > { %v15000_v5 = vpop.f32.mrf.mxu1  ;;  %15335 = vmatmul.mubr.msk.f32.gmra.mxu1 %vm325_vm1, %v5344_v16  ;;  %15399 = vmatprep.mubr.msk.f32.mxu0 %vm325_vm1, %v5815_v2  ;;  %v5818_v16 = vld [vmem:[%s16268_s29 + $0xa2] sm:$0xff] }
 0x1e1   : > { %v17820_v58 = vadd.f32 %v3374_v59, %v2975_v6  ;;  %v2978_v60 = vadd.f32 %v15000_v5, %v17556_v40  ;;  %15337 = vmatprep.mubr.msk.f32.mxu1 %vm325_vm1, %v5345_v7  ;;  %v3384_v31 = vpop.f32.mrf.mxu0  ;;  %v5819_v59 = vld [vmem:[%s16268_s29 + $0xaa] sm:$0xff] }
 0x1e2   : > { %v2914_v12 = vpop.f32.mrf.mxu1 }
 0x1e3   : > { %v17829_v26 = vadd.f32 %v15062_v28, %v2978_v60  ;;  %v2977_v11 = vadd.f32 %v2914_v12, %v17561_v52  ;;  %v15065_v40 = vpop.f32.mrf.mxu0  ;;  %15400 = vmatmul.mubr.msk.f32.gmra.mxu0 %vm325_vm1, %v5816_v1  ;;  %v5350_v60 = vld [vmem:[%s16268_s29 + $0xb1] sm:$0xff]  ;;  %v5351_v12 = vld [vmem:[%s16268_s29 + $0xb9] sm:$0xff] }
 0x1e4   : > { %v15003_v3 = vpop.f32.mrf.mxu1  ;;  %15338 = vmatmul.mubr.msk.f32.gmra.mxu1 %vm325_vm1, %v5346_v27  ;;  %15402 = vmatprep.mubr.msk.f32.mxu0 %vm325_vm1, %v5817_v39  ;;  %v5820_v27 = vld [vmem:[%s16268_s29 + $0xb2] sm:$0xff] }
 0x1e5   : > { %v17834_v46 = vadd.f32 %v3384_v31, %v2977_v11  ;;  %v2980_v15 = vadd.f32 %v15003_v3, %v17568_v0  ;;  %15340 = vmatprep.mubr.msk.f32.mxu1 %vm325_vm1, %v5347_v14  ;;  %v3394_v52 = vpop.f32.mrf.mxu0  ;;  %v5821_v31 = vld [vmem:[%s16268_s29 + $0xba] sm:$0xff] }
 0x1e6   : > { %v2924_v19 = vpop.f32.mrf.mxu1 }
 0x1e7   : > { %v17843_v7 = vadd.f32 %v15065_v40, %v2980_v15  ;;  %v2979_v2 = vadd.f32 %v2924_v19, %v17573_v8  ;;  %v15068_v0 = vpop.f32.mrf.mxu0  ;;  %15403 = vmatmul.mubr.msk.f32.gmra.mxu0 %vm325_vm1, %v5818_v16  ;;  %v5352_v15 = vld [vmem:[%s16268_s29 + $0xc1] sm:$0xff]  ;;  %v5353_v19 = vld [vmem:[%s16268_s29 + $0xc9] sm:$0xff] }
 0x1e8   : > { %v15006_v6 = vpop.f32.mrf.mxu1  ;;  %15341 = vmatmul.mubr.msk.f32.gmra.mxu1 %vm325_vm1, %v5348_v38  ;;  %15405 = vmatprep.mubr.msk.f32.mxu0 %vm325_vm1, %v5819_v59  ;;  %v5822_v38 = vld [vmem:[%s16268_s29 + $0xc2] sm:$0xff] }
 0x1e9   : > { %v17848_v5 = vadd.f32 %v3394_v52, %v2979_v2  ;;  %v2982_v28 = vadd.f32 %v15006_v6, %v17580_v24  ;;  %15343 = vmatprep.mubr.msk.f32.mxu1 %vm325_vm1, %v5349_v9  ;;  %v3404_v8 = vpop.f32.mrf.mxu0  ;;  %v5823_v52 = vld [vmem:[%s16268_s29 + $0xca] sm:$0xff] }
 0x1ea   : > { %v2934_v1 = vpop.f32.mrf.mxu1 }
 0x1eb   : > { %v17857_v14 = vadd.f32 %v15068_v0, %v2982_v28  ;;  %v2981_v39 = vadd.f32 %v2934_v1, %v17585_v30  ;;  %v15135_v24 = vpop.f32.mrf.mxu0  ;;  %15406 = vmatmul.mubr.msk.f32.gmra.mxu0 %vm325_vm1, %v5820_v27  ;;  %v5354_v28 = vld [vmem:[%s16268_s29 + $0xd1] sm:$0xff]  ;;  %v5355_v1 = vld [vmem:[%s16268_s29 + $0xd9] sm:$0xff] }
 0x1ec   : > { %v15073_v11 = vpop.f32.mrf.mxu1  ;;  %15344 = vmatmul.mubr.msk.f32.gmra.mxu1 %vm325_vm1, %v5350_v60  ;;  %15408 = vmatprep.mubr.msk.f32.mxu0 %vm325_vm1, %v5821_v31  ;;  %v5824_v60 = vld [vmem:[%s16268_s29 + $0xd2] sm:$0xff] }
 0x1ed   : > { %v17862_v3 = vadd.f32 %v3404_v8, %v2981_v39  ;;  %v3884_v40 = vadd.f32 %v15073_v11, %v17592_v29  ;;  %15346 = vmatprep.mubr.msk.f32.mxu1 %vm325_vm1, %v5351_v12  ;;  %v4154_v30 = vpop.f32.mrf.mxu0  ;;  %v5825_v8 = vld [vmem:[%s16268_s29 + $0xda] sm:$0xff] }
 0x1ee   : > { %v3684_v16 = vpop.f32.mrf.mxu1 }
 0x1ef   : > { %v17871_v9 = vadd.f32 %v15135_v24, %v3884_v40  ;;  %v3883_v59 = vadd.f32 %v3684_v16, %v17597_v22  ;;  %v15138_v29 = vpop.f32.mrf.mxu0  ;;  %15409 = vmatmul.mubr.msk.f32.gmra.mxu0 %vm325_vm1, %v5822_v38  ;;  %v5356_v40 = vld [vmem:[%s16268_s29 + $0xe1] sm:$0xff]  ;;  %v5357_v16 = vld [vmem:[%s16268_s29 + $0xe9] sm:$0xff] }
 0x1f0   : > { %v15076_v2 = vpop.f32.mrf.mxu1  ;;  %15347 = vmatmul.mubr.msk.f32.gmra.mxu1 %vm325_vm1, %v5352_v15  ;;  %15411 = vmatprep.mubr.msk.f32.mxu0 %vm325_vm1, %v5823_v52  ;;  %v5826_v15 = vld [vmem:[%s16268_s29 + $0xe2] sm:$0xff] }
 0x1f1   : > { %v17876_v6 = vadd.f32 %v4154_v30, %v3883_v59  ;;  %v3886_v0 = vadd.f32 %v15076_v2, %v17604_v54  ;;  %15349 = vmatprep.mubr.msk.f32.mxu1 %vm325_vm1, %v5353_v19  ;;  %v4164_v22 = vpop.f32.mrf.mxu0  ;;  %v5827_v30 = vld [vmem:[%s16268_s29 + $0xea] sm:$0xff] }
 0x1f2   : > { %v3694_v27 = vpop.f32.mrf.mxu1 }
 0x1f3   : > { %v17885_v12 = vadd.f32 %v15138_v29, %v3886_v0  ;;  %v3885_v31 = vadd.f32 %v3694_v27, %v17609_v13  ;;  %v15141_v54 = vpop.f32.mrf.mxu0  ;;  %15412 = vmatmul.mubr.msk.f32.gmra.mxu0 %vm325_vm1, %v5824_v60  ;;  %v5358_v0 = vld [vmem:[%s16268_s29 + $0xf1] sm:$0xff]  ;;  %v5359_v27 = vld [vmem:[%s16268_s29 + $0xf9] sm:$0xff] }
 0x1f4   : > { %v15079_v39 = vpop.f32.mrf.mxu1  ;;  %15350 = vmatmul.mubr.msk.f32.gmra.mxu1 %vm325_vm1, %v5354_v28  ;;  %15414 = vmatprep.mubr.msk.f32.mxu0 %vm325_vm1, %v5825_v8  ;;  %v5828_v28 = vld [vmem:[%s16268_s29 + $0xf2] sm:$0xff] }
 0x1f5   : > { %v17890_v11 = vadd.f32 %v4164_v22, %v3885_v31  ;;  %v3888_v24 = vadd.f32 %v15079_v39, %v17616_v53  ;;  %15352 = vmatprep.mubr.msk.f32.mxu1 %vm325_vm1, %v5355_v1  ;;  %v4174_v13 = vpop.f32.mrf.mxu0  ;;  %v5829_v22 = vld [vmem:[%s16268_s29 + $0xfa] sm:$0xff] }
 0x1f6   : > { %v3704_v38 = vpop.f32.mrf.mxu1 }
 0x1f7   : > { %v17899_v19 = vadd.f32 %v15141_v54, %v3888_v24  ;;  %v3887_v52 = vadd.f32 %v3704_v38, %v17621_v44  ;;  %v15144_v53 = vpop.f32.mrf.mxu0  ;;  %15415 = vmatmul.mubr.msk.f32.gmra.mxu0 %vm325_vm1, %v5826_v15  ;;  %v5360_v24 = vld [vmem:[%s16268_s29 + $0x101] sm:$0xff]  ;;  %v5361_v38 = vld [vmem:[%s16268_s29 + $0x109] sm:$0xff] }
 0x1f8   : > { %v15082_v59 = vpop.f32.mrf.mxu1  ;;  %15353 = vmatmul.mubr.msk.f32.gmra.mxu1 %vm325_vm1, %v5356_v40  ;;  %15417 = vmatprep.mubr.msk.f32.mxu0 %vm325_vm1, %v5827_v30  ;;  %v5830_v40 = vld [vmem:[%s16268_s29 + $0x102] sm:$0xff] }
 0x1f9   : > { %v17904_v2 = vadd.f32 %v4174_v13, %v3887_v52  ;;  %v3890_v29 = vadd.f32 %v15082_v59, %v17628_v51  ;;  %15355 = vmatprep.mubr.msk.f32.mxu1 %vm325_vm1, %v5357_v16  ;;  %v4184_v44 = vpop.f32.mrf.mxu0  ;;  %v5831_v13 = vld [vmem:[%s16268_s29 + $0x10a] sm:$0xff] }
 0x1fa   : > { %v3714_v60 = vpop.f32.mrf.mxu1 }
 0x1fb   : > { %v17913_v1 = vadd.f32 %v15144_v53, %v3890_v29  ;;  %v3889_v8 = vadd.f32 %v3714_v60, %v17633_v48  ;;  %v15147_v51 = vpop.f32.mrf.mxu0  ;;  %15418 = vmatmul.mubr.msk.f32.gmra.mxu0 %vm325_vm1, %v5828_v28  ;;  %v5362_v29 = vld [vmem:[%s16268_s29 + $0x111] sm:$0xff]  ;;  %v5363_v60 = vld [vmem:[%s16268_s29 + $0x119] sm:$0xff] }
 0x1fc   : > { %v15085_v31 = vpop.f32.mrf.mxu1  ;;  %15356 = vmatmul.mubr.msk.f32.gmra.mxu1 %vm325_vm1, %v5358_v0  ;;  %15420 = vmatprep.mubr.msk.f32.mxu0 %vm325_vm1, %v5829_v22  ;;  %v5832_v0 = vld [vmem:[%s16268_s29 + $0x112] sm:$0xff] }
 0x1fd   : > { %v17918_v39 = vadd.f32 %v4184_v44, %v3889_v8  ;;  %v3892_v54 = vadd.f32 %v15085_v31, %v17640_v55  ;;  %15358 = vmatprep.mubr.msk.f32.mxu1 %vm325_vm1, %v5359_v27  ;;  %v4194_v48 = vpop.f32.mrf.mxu0  ;;  %v5833_v44 = vld [vmem:[%s16268_s29 + $0x11a] sm:$0xff] }
 0x1fe   : > { %v3724_v15 = vpop.f32.mrf.mxu1 }
 0x1ff   : > { %v17927_v16 = vadd.f32 %v15147_v51, %v3892_v54  ;;  %v3891_v30 = vadd.f32 %v3724_v15, %v17645_v34  ;;  %v15150_v55 = vpop.f32.mrf.mxu0  ;;  %15421 = vmatmul.mubr.msk.f32.gmra.mxu0 %vm325_vm1, %v5830_v40  ;;  %v5364_v54 = vld [vmem:[%s16268_s29 + $0x121] sm:$0xff]  ;;  %v5365_v15 = vld [vmem:[%s16268_s29 + $0x129] sm:$0xff] }
 0x200   : > { %v15088_v52 = vpop.f32.mrf.mxu1  ;;  %15359 = vmatmul.mubr.msk.f32.gmra.mxu1 %vm325_vm1, %v5360_v24  ;;  %15423 = vmatprep.mubr.msk.f32.mxu0 %vm325_vm1, %v5831_v13  ;;  %v5834_v24 = vld [vmem:[%s16268_s29 + $0x122] sm:$0xff] }
 0x201   : > { %v17932_v59 = vadd.f32 %v4194_v48, %v3891_v30  ;;  %v3894_v53 = vadd.f32 %v15088_v52, %v17652_v37  ;;  %15361 = vmatprep.mubr.msk.f32.mxu1 %vm325_vm1, %v5361_v38  ;;  %v4204_v34 = vpop.f32.mrf.mxu0  ;;  %v5835_v48 = vld [vmem:[%s16268_s29 + $0x12a] sm:$0xff] }
 0x202   : > { %v3734_v28 = vpop.f32.mrf.mxu1 }
 0x203   : > { %v17941_v27 = vadd.f32 %v15150_v55, %v3894_v53  ;;  %v3893_v22 = vadd.f32 %v3734_v28, %v17657_v17  ;;  %v15153_v37 = vpop.f32.mrf.mxu0  ;;  %15424 = vmatmul.mubr.msk.f32.gmra.mxu0 %vm325_vm1, %v5832_v0  ;;  %v5366_v53 = vld [vmem:[%s16268_s29 + $0x131] sm:$0xff]  ;;  %v5367_v28 = vld [vmem:[%s16268_s29 + $0x139] sm:$0xff] }
 0x204   : > { %v15091_v8 = vpop.f32.mrf.mxu1  ;;  %15362 = vmatmul.mubr.msk.f32.gmra.mxu1 %vm325_vm1, %v5362_v29  ;;  %15426 = vmatprep.mubr.msk.f32.mxu0 %vm325_vm1, %v5833_v44  ;;  %v5836_v29 = vld [vmem:[%s16268_s29 + $0x132] sm:$0xff] }
 0x205   : > { %v17946_v31 = vadd.f32 %v4204_v34, %v3893_v22  ;;  %v3896_v51 = vadd.f32 %v15091_v8, %v17664_v56  ;;  %15364 = vmatprep.mubr.msk.f32.mxu1 %vm325_vm1, %v5363_v60  ;;  %v4214_v17 = vpop.f32.mrf.mxu0  ;;  %v5837_v34 = vld [vmem:[%s16268_s29 + $0x13a] sm:$0xff] }
 0x206   : > { %v3744_v40 = vpop.f32.mrf.mxu1 }
 0x207   : > { %v17955_v38 = vadd.f32 %v15153_v37, %v3896_v51  ;;  %v3895_v13 = vadd.f32 %v3744_v40, %v17669_v20  ;;  %v15156_v56 = vpop.f32.mrf.mxu0  ;;  %15427 = vmatmul.mubr.msk.f32.gmra.mxu0 %vm325_vm1, %v5834_v24  ;;  %v5368_v51 = vld [vmem:[%s16268_s29 + $0x141] sm:$0xff]  ;;  %v5369_v40 = vld [vmem:[%s16268_s29 + $0x149] sm:$0xff] }
 0x208   : > { %v15094_v30 = vpop.f32.mrf.mxu1  ;;  %15365 = vmatmul.mubr.msk.f32.gmra.mxu1 %vm325_vm1, %v5364_v54  ;;  %15429 = vmatprep.mubr.msk.f32.mxu0 %vm325_vm1, %v5835_v48  ;;  %v5838_v54 = vld [vmem:[%s16268_s29 + $0x142] sm:$0xff] }
 0x209   : > { %v17960_v52 = vadd.f32 %v4214_v17, %v3895_v13  ;;  %v3898_v55 = vadd.f32 %v15094_v30, %v17676_v4  ;;  %15367 = vmatprep.mubr.msk.f32.mxu1 %vm325_vm1, %v5365_v15  ;;  %v4224_v20 = vpop.f32.mrf.mxu0  ;;  %v5839_v17 = vld [vmem:[%s16268_s29 + $0x14a] sm:$0xff] }
 0x20a   : > { %v3754_v0 = vpop.f32.mrf.mxu1 }
 0x20b   : > { %v17969_v60 = vadd.f32 %v15156_v56, %v3898_v55  ;;  %v3897_v44 = vadd.f32 %v3754_v0, %v17681_v21  ;;  %v15159_v4 = vpop.f32.mrf.mxu0  ;;  %15430 = vmatmul.mubr.msk.f32.gmra.mxu0 %vm325_vm1, %v5836_v29  ;;  %v5370_v55 = vld [vmem:[%s16268_s29 + $0x151] sm:$0xff]  ;;  %v5371_v0 = vld [vmem:[%s16268_s29 + $0x159] sm:$0xff] }
 0x20c   : > { %v15097_v22 = vpop.f32.mrf.mxu1  ;;  %15368 = vmatmul.mubr.msk.f32.gmra.mxu1 %vm325_vm1, %v5366_v53  ;;  %15432 = vmatprep.mubr.msk.f32.mxu0 %vm325_vm1, %v5837_v34  ;;  %v5840_v53 = vld [vmem:[%s16268_s29 + $0x152] sm:$0xff] }
 0x20d   : > { %v17974_v8 = vadd.f32 %v4224_v20, %v3897_v44  ;;  %v3900_v37 = vadd.f32 %v15097_v22, %v17688_v45  ;;  %15370 = vmatprep.mubr.msk.f32.mxu1 %vm325_vm1, %v5367_v28  ;;  %v4234_v21 = vpop.f32.mrf.mxu0  ;;  %v5841_v20 = vld [vmem:[%s16268_s29 + $0x15a] sm:$0xff] }
 0x20e   : > { %v3764_v24 = vpop.f32.mrf.mxu1 }
 0x20f   : > { %v17983_v15 = vadd.f32 %v15159_v4, %v3900_v37  ;;  %v3899_v48 = vadd.f32 %v3764_v24, %v17693_v18  ;;  %v15162_v45 = vpop.f32.mrf.mxu0  ;;  %15433 = vmatmul.mubr.msk.f32.gmra.mxu0 %vm325_vm1, %v5838_v54  ;;  %v5372_v37 = vld [vmem:[%s16268_s29 + $0x161] sm:$0xff]  ;;  %v6273_v24 = vld [vmem:[%s16268_s29 + $0x2b] sm:$0xff] }
 0x210   : > { %v15100_v13 = vpop.f32.mrf.mxu1  ;;  %15371 = vmatmul.mubr.msk.f32.gmra.mxu1 %vm325_vm1, %v5368_v51  ;;  %15435 = vmatprep.mubr.msk.f32.mxu0 %vm325_vm1, %v5839_v17  ;;  %v5842_v51 = vld [vmem:[%s16268_s29 + $0x162] sm:$0xff] }
 0x211   : > { %v17988_v30 = vadd.f32 %v4234_v21, %v3899_v48  ;;  %v3902_v56 = vadd.f32 %v15100_v13, %v17700_v25  ;;  %15373 = vmatprep.mubr.msk.f32.mxu1 %vm325_vm1, %v5369_v40  ;;  %v4244_v18 = vpop.f32.mrf.mxu0  ;;  %v6743_v21 = vld [vmem:[%s16268_s29 + $0x2c] sm:$0xff] }
 0x212   : > { %v3774_v29 = vpop.f32.mrf.mxu1 }
 0x213   : > { %v17997_v28 = vadd.f32 %v15162_v45, %v3902_v56  ;;  %v3901_v34 = vadd.f32 %v3774_v29, %v17705_v49  ;;  %v15165_v25 = vpop.f32.mrf.mxu0  ;;  %15436 = vmatmul.mubr.msk.f32.gmra.mxu0 %vm325_vm1, %v5840_v53  ;;  %v6274_v56 = vld [vmem:[%s16268_s29 + $0x33] sm:$0xff] }
 0x214   : > { %v15103_v44 = vpop.f32.mrf.mxu1  ;;  %15374 = vmatmul.mubr.msk.f32.gmra.mxu1 %vm325_vm1, %v5370_v55  ;;  %15438 = vmatprep.mubr.msk.f32.mxu0 %vm325_vm1, %v5841_v20  ;;  %v6744_v55 = vld [vmem:[%s16268_s29 + $0x34] sm:$0xff]  ;;  %v18028_v20 = vld [vmem:[%s16268_s29 + $0x3c] sm:$0xff] }
 0x215   : > { %v18002_v22 = vadd.f32 %v4244_v18, %v3901_v34  ;;  %v3904_v4 = vadd.f32 %v15103_v44, %v17713_v43  ;;  %15376 = vmatprep.mubr.msk.f32.mxu1 %vm325_vm1, %v5371_v0  ;;  %v4254_v49 = vpop.f32.mrf.mxu0  ;;  %v6275_v0 = vld [vmem:[%s16268_s29 + $0x3b] sm:$0xff]  ;;  %v18035_v44 = vld [vmem:[%s20447_s1 + $0x44] sm:$0xf] }
 0x216   : > { %v3784_v54 = vpop.f32.mrf.mxu1 }
 0x217   : > { %v18011_v40 = vadd.f32 %v15165_v25, %v3904_v4  ;;  %v3903_v17 = vadd.f32 %v3784_v54, %v17718_v63  ;;  %v15168_v43 = vpop.f32.mrf.mxu0  ;;  %15439 = vmatmul.mubr.msk.f32.gmra.mxu0 %vm325_vm1, %v5842_v51  ;;  %v18051_v51 = vld [vmem:[%s16268_s29 + $0x44] sm:$0xff] }
 0x218   : > { %v15106_v48 = vpop.f32.mrf.mxu1  ;;  %15377 = vmatmul.mubr.msk.f32.gmra.mxu1 %vm325_vm1, %v5372_v37  ;;  %15505 = vmatprep.mubr.msk.f32.mxu0 %vm325_vm1, %v6743_v21  ;;  %v6276_v37 = vld [vmem:[%s16268_s29 + $0x43] sm:$0xff] }
 0x219   : > { %v18016_v13 = vadd.f32 %v4254_v49, %v3903_v17  ;;  %v3906_v45 = vadd.f32 %v15106_v48, %v17725_v61  ;;  %15443 = vmatprep.mubr.msk.f32.mxu1 %vm325_vm1, %v6273_v24  ;;  %v4264_v63 = vpop.f32.mrf.mxu0  ;;  %v6277_v24 = vld [vmem:[%s16268_s29 + $0x4b] sm:$0xff] }
 0x21a   : > { %v3794_v53 = vpop.f32.mrf.mxu1 }
 0x21b   : > { %v18023_v29 = vadd.f32 %v15168_v43, %v3906_v45  ;;  %v3905_v18 = vadd.f32 %v3794_v53, %v17742_v23  ;;  %v15171_v61 = vpop.f32.mrf.mxu0  ;;  %15506 = vmatmul.mubr.msk.f32.vlgmr.msra.gmra.mxu0 %vm325_vm1, %v6744_v55  ;;  %v18040_v23 = vld [vmem:[%s20447_s1 + $0x48] sm:$0xf]  ;;  %v18078_v45 = vld [vmem:[%s16268_s29 + $0x54] sm:$0xff] }
 0x21c   : > { %v15109_v34 = vpop.f32.mrf.mxu1  ;;  %15444 = vmatmul.mubr.msk.f32.vlgmr.msra.gmra.mxu1 %vm325_vm1, %v6274_v56  ;;  %15628 = vmatpush3.msk.msra.mxu0 %vm446_vm0, %v17740_v57  ;;  %v6279_v53 = vld [vmem:[%s16268_s29 + $0x5b] sm:$0xff] }
 0x21d   : > { %v18042_v25 = vadd.f32 %v4264_v63, %v3905_v18  ;;  %v3908_v4 = vadd.f32 %v15109_v34, %v17755_v47  ;;  %15566 = vmatpush3.msk.msra.mxu1 %vm446_vm0, %v17735_v36  ;;  %v4274_v49 = vpop.f32.mrf.mxu0  ;;  %15446 = vmatprep.mubr.msk.f32.mxu1 %vm325_vm1, %v6275_v0  ;;  %v18058_v47 = vld [vmem:[%s16268_s29 + $0x4c] sm:$0xff]  ;;  %v18082_v63 = vld [vmem:[%s16268_s29 + $0x5c] sm:$0xff] }
 0x21e   : > { %v3804_v54 = vpop.f32.mrf.mxu1  ;;  %15508 = vmatprep.mubr.msk.f32.mxu0 %vm325_vm1, %v18028_v20  ;;  %15689 = vmatprep.subr.msk.mxu1 %vm446_vm0, %v18035_v44 }
 0x21f   : > { %v18060_v21 = vadd.f32 %v15171_v61, %v3908_v4  ;;  %v3907_v36 = vadd.f32 %v3804_v54, %v17764_v10  ;;  %15751 = vmatprep.subr.msk.mxu0 %vm446_vm0, %v18040_v23  ;;  %v15174_v17 = vpop.f32.mrf.mxu0  ;;  %15509 = vmatmul.mubr.msk.f32.gmra.mxu0 %vm325_vm1, %v18051_v51  ;;  %v6278_v10 = vld [vmem:[%s16268_s29 + $0x53] sm:$0xff]  ;;  %v18098_v54 = vld [vmem:[%s16268_s29 + $0x64] sm:$0xff] }
 0x220   : > { %v15112_v57 = vpop.f32.mrf.mxu1  ;;  %15447 = vmatmul.mubr.msk.f32.gmra.mxu1 %vm325_vm1, %v6276_v37  ;;  %15511 = vmatprep.mubr.msk.f32.mxu0 %vm325_vm1, %v18058_v47  ;;  %v6280_v37 = vld [vmem:[%s16268_s29 + $0x63] sm:$0xff] }
 0x221   : > { %v18070_v48 = vadd.f32 %v4274_v49, %v3907_v36  ;;  %v3910_v43 = vadd.f32 %v15112_v57, %v17773_v62  ;;  %15449 = vmatprep.mubr.msk.f32.mxu1 %vm325_vm1, %v6277_v24  ;;  %v4284_v55 = vpop.f32.mrf.mxu0  ;;  %v6281_v24 = vld [vmem:[%s16268_s29 + $0x6b] sm:$0xff] }
 0x222   : > { %v3814_v56 = vpop.f32.mrf.mxu1  ;;  %v18102_v36 = vld [vmem:[%s16268_s29 + $0x6c] sm:$0xff] }
 0x223   : > { %v18084_v18 = vadd.f32 %v15174_v17, %v3910_v43  ;;  %v3909_v62 = vadd.f32 %v3814_v56, %v17778_v32  ;;  %v15177_v34 = vpop.f32.mrf.mxu0  ;;  %15512 = vmatmul.mubr.msk.f32.gmra.mxu0 %vm325_vm1, %v18078_v45 }
 0x224   : > { %v15115_v0 = vpop.f32.mrf.mxu1  ;;  %15450 = vmatmul.mubr.msk.f32.gmra.mxu1 %vm325_vm1, %v6278_v10  ;;  %15514 = vmatprep.mubr.msk.f32.mxu0 %vm325_vm1, %v18082_v63 }
 0x225   : > { %v18090_v61 = vadd.f32 %v4284_v55, %v3909_v62  ;;  %v3912_v4 = vadd.f32 %v15115_v0, %v17787_v42  ;;  %15452 = vmatprep.mubr.msk.f32.mxu1 %vm325_vm1, %v6279_v53  ;;  %v4294_v49 = vpop.f32.mrf.mxu0  ;;  %v6282_v55 = vld [vmem:[%s16268_s29 + $0x73] sm:$0xff]  ;;  %v6283_v0 = vld [vmem:[%s16268_s29 + $0x7b] sm:$0xff] }
 0x226   : > { %v3824_v32 = vpop.f32.mrf.mxu1  ;;  %v18118_v53 = vld [vmem:[%s16268_s29 + $0x74] sm:$0xff] }
 0x227   : > { %v18104_v57 = vadd.f32 %v15177_v34, %v3912_v4  ;;  %v3911_v42 = vadd.f32 %v3824_v32, %v17792_v50  ;;  %v15180_v43 = vpop.f32.mrf.mxu0  ;;  %15515 = vmatmul.mubr.msk.f32.gmra.mxu0 %vm325_vm1, %v18098_v54  ;;  %v18122_v34 = vld [vmem:[%s16268_s29 + $0x7c] sm:$0xff] }
 0x228   : > { %v15118_v17 = vpop.f32.mrf.mxu1  ;;  %15453 = vmatmul.mubr.msk.f32.gmra.mxu1 %vm325_vm1, %v6280_v37  ;;  %15517 = vmatprep.mubr.msk.f32.mxu0 %vm325_vm1, %v18102_v36 }
 0x229   : > { %v18110_v10 = vadd.f32 %v4294_v49, %v3911_v42  ;;  %v3914_v56 = vadd.f32 %v15118_v17, %v17801_v41  ;;  %15455 = vmatprep.mubr.msk.f32.mxu1 %vm325_vm1, %v6281_v24  ;;  %v4304_v62 = vpop.f32.mrf.mxu0  ;;  %v6284_v42 = vld [vmem:[%s16268_s29 + $0x83] sm:$0xff] }
 0x22a   : > { %v3834_v50 = vpop.f32.mrf.mxu1  ;;  %v18138_v17 = vld [vmem:[%s16268_s29 + $0x84] sm:$0xff] }
 0x22b   : > { %v18124_v4 = vadd.f32 %v15180_v43, %v3914_v56  ;;  %v3913_v41 = vadd.f32 %v3834_v50, %v17806_v33  ;;  %v15183_v32 = vpop.f32.mrf.mxu0  ;;  %15518 = vmatmul.mubr.msk.f32.gmra.mxu0 %vm325_vm1, %v18118_v53  ;;  %v6285_v56 = vld [vmem:[%s16268_s29 + $0x8b] sm:$0xff] }
 0x22c   : > { %v15121_v37 = vpop.f32.mrf.mxu1  ;;  %15456 = vmatmul.mubr.msk.f32.gmra.mxu1 %vm325_vm1, %v6282_v55  ;;  %15520 = vmatprep.mubr.msk.f32.mxu0 %vm325_vm1, %v18122_v34  ;;  %v18142_v55 = vld [vmem:[%s16268_s29 + $0x8c] sm:$0xff] }
 0x22d   : > { %v18130_v49 = vadd.f32 %v4304_v62, %v3913_v41  ;;  %v3916_v24 = vadd.f32 %v15121_v37, %v17815_v35  ;;  %15458 = vmatprep.mubr.msk.f32.mxu1 %vm325_vm1, %v6283_v0  ;;  %v4314_v43 = vpop.f32.mrf.mxu0 }
 0x22e   : > { %v3844_v33 = vpop.f32.mrf.mxu1 }
 0x22f   : > { %v18144_v50 = vadd.f32 %v15183_v32, %v3916_v24  ;;  %v3915_v35 = vadd.f32 %v3844_v33, %v17820_v58  ;;  %v15186_v0 = vpop.f32.mrf.mxu0  ;;  %15521 = vmatmul.mubr.msk.f32.gmra.mxu0 %vm325_vm1, %v18138_v17  ;;  %v6286_v32 = vld [vmem:[%s16268_s29 + $0x93] sm:$0xff] }
 0x230   : > { %v15124_v62 = vpop.f32.mrf.mxu1  ;;  %15459 = vmatmul.mubr.msk.f32.gmra.mxu1 %vm325_vm1, %v6284_v42  ;;  %15523 = vmatprep.mubr.msk.f32.mxu0 %vm325_vm1, %v18142_v55  ;;  %v18158_v24 = vld [vmem:[%s16268_s29 + $0x94] sm:$0xff] }
 0x231   : > { %20474 = vst [vmem:[#allocation2_spill] sm:$0xff] %v18144_v50  ;;  %v18150_v41 = vadd.f32 %v4314_v43, %v3915_v35  ;;  %v3918_v37 = vadd.f32 %v15124_v62, %v17829_v26  ;;  %15461 = vmatprep.mubr.msk.f32.mxu1 %vm325_vm1, %v6285_v56  ;;  %v4324_v33 = vpop.f32.mrf.mxu0  ;;  %v6287_v42 = vld [vmem:[%s16268_s29 + $0x9b] sm:$0xff] }
 0x232   : > { %v3854_v58 = vpop.f32.mrf.mxu1  ;;  %v18162_v50 = vld [vmem:[%s16268_s29 + $0x9c] sm:$0xff] }
 0x233   : > { %20475 = vst [vmem:[#allocation3_spill] sm:$0xff] %v18150_v41  ;;  %v18164_v43 = vadd.f32 %v15186_v0, %v3918_v37  ;;  %v3917_v26 = vadd.f32 %v3854_v58, %v17834_v46  ;;  %v15189_v35 = vpop.f32.mrf.mxu0  ;;  %15524 = vmatmul.mubr.msk.f32.gmra.mxu0 %vm325_vm1, %v18158_v24  ;;  %v6288_v0 = vld [vmem:[%s16268_s29 + $0xa3] sm:$0xff] }
 0x234   : > { %v15127_v56 = vpop.f32.mrf.mxu1  ;;  %15462 = vmatmul.mubr.msk.f32.gmra.mxu1 %vm325_vm1, %v6286_v32  ;;  %15526 = vmatprep.mubr.msk.f32.mxu0 %vm325_vm1, %v18162_v50  ;;  %v18178_v37 = vld [vmem:[%s16268_s29 + $0xa4] sm:$0xff] }
 0x235   : > { %20476 = vst [vmem:[#allocation4_spill] sm:$0xff] %v18164_v43  ;;  %v18170_v62 = vadd.f32 %v4324_v33, %v3917_v26  ;;  %v3920_v41 = vadd.f32 %v15127_v56, %v17843_v7  ;;  %15464 = vmatprep.mubr.msk.f32.mxu1 %vm325_vm1, %v6287_v42  ;;  %v4334_v58 = vpop.f32.mrf.mxu0  ;;  %v6289_v32 = vld [vmem:[%s16268_s29 + $0xab] sm:$0xff] }
 0x236   : > { %v3864_v46 = vpop.f32.mrf.mxu1  ;;  %v18182_v43 = vld [vmem:[%s16268_s29 + $0xac] sm:$0xff] }
 0x237   : > { %20477 = vst [vmem:[#allocation5_spill] sm:$0xff] %v18170_v62  ;;  %v18184_v33 = vadd.f32 %v15189_v35, %v3920_v41  ;;  %v3919_v7 = vadd.f32 %v3864_v46, %v17848_v5  ;;  %v15192_v26 = vpop.f32.mrf.mxu0  ;;  %15527 = vmatmul.mubr.msk.f32.gmra.mxu0 %vm325_vm1, %v18178_v37  ;;  %v6290_v41 = vld [vmem:[%s16268_s29 + $0xb3] sm:$0xff] }
 0x238   : > { %v15130_v42 = vpop.f32.mrf.mxu1  ;;  %15465 = vmatmul.mubr.msk.f32.gmra.mxu1 %vm325_vm1, %v6288_v0  ;;  %15529 = vmatprep.mubr.msk.f32.mxu0 %vm325_vm1, %v18182_v43  ;;  %v18198_v35 = vld [vmem:[%s16268_s29 + $0xb4] sm:$0xff] }
 0x239   : > { %20478 = vst [vmem:[#allocation6_spill] sm:$0xff] %v18184_v33  ;;  %v18190_v56 = vadd.f32 %v4334_v58, %v3919_v7  ;;  %v3922_v62 = vadd.f32 %v15130_v42, %v17857_v14  ;;  %15467 = vmatprep.mubr.msk.f32.mxu1 %vm325_vm1, %v6289_v32  ;;  %v4344_v46 = vpop.f32.mrf.mxu0  ;;  %v6291_v0 = vld [vmem:[%s16268_s29 + $0xbb] sm:$0xff] }
 0x23a   : > { %v3874_v5 = vpop.f32.mrf.mxu1  ;;  %v18202_v33 = vld [vmem:[%s16268_s29 + $0xbc] sm:$0xff] }
 0x23b   : > { %20479 = vst [vmem:[#allocation7_spill] sm:$0xff] %v18190_v56  ;;  %v18204_v58 = vadd.f32 %v15192_v26, %v3922_v62  ;;  %v3921_v14 = vadd.f32 %v3874_v5, %v17862_v3  ;;  %v15259_v7 = vpop.f32.mrf.mxu0  ;;  %15530 = vmatmul.mubr.msk.f32.gmra.mxu0 %vm325_vm1, %v18198_v35  ;;  %v6292_v62 = vld [vmem:[%s16268_s29 + $0xc3] sm:$0xff] }
 0x23c   : > { %v15197_v32 = vpop.f32.mrf.mxu1  ;;  %15468 = vmatmul.mubr.msk.f32.gmra.mxu1 %vm325_vm1, %v6290_v41  ;;  %15532 = vmatprep.mubr.msk.f32.mxu0 %vm325_vm1, %v18202_v33  ;;  %v18218_v26 = vld [vmem:[%s16268_s29 + $0xc4] sm:$0xff] }
 0x23d   : > { %20480 = vst [vmem:[#allocation8_spill] sm:$0xff] %v18204_v58  ;;  %v18210_v42 = vadd.f32 %v4344_v46, %v3921_v14  ;;  %v4824_v56 = vadd.f32 %v15197_v32, %v17871_v9  ;;  %15470 = vmatprep.mubr.msk.f32.mxu1 %vm325_vm1, %v6291_v0  ;;  %v5094_v5 = vpop.f32.mrf.mxu0  ;;  %v6293_v41 = vld [vmem:[%s16268_s29 + $0xcb] sm:$0xff] }
 0x23e   : > { %v4624_v3 = vpop.f32.mrf.mxu1  ;;  %v18222_v58 = vld [vmem:[%s16268_s29 + $0xcc] sm:$0xff] }
 0x23f   : > { %20481 = vst [vmem:[#allocation9_spill] sm:$0xff] %v18210_v42  ;;  %v18224_v46 = vadd.f32 %v15259_v7, %v4824_v56  ;;  %v4823_v9 = vadd.f32 %v4624_v3, %v17876_v6  ;;  %v15262_v14 = vpop.f32.mrf.mxu0  ;;  %15533 = vmatmul.mubr.msk.f32.gmra.mxu0 %vm325_vm1, %v18218_v26  ;;  %v6294_v56 = vld [vmem:[%s16268_s29 + $0xd3] sm:$0xff] }
 0x240   : > { %v15200_v0 = vpop.f32.mrf.mxu1  ;;  %15471 = vmatmul.mubr.msk.f32.gmra.mxu1 %vm325_vm1, %v6292_v62  ;;  %15535 = vmatprep.mubr.msk.f32.mxu0 %vm325_vm1, %v18222_v58  ;;  %v18238_v7 = vld [vmem:[%s16268_s29 + $0xd4] sm:$0xff] }
 0x241   : > { %20482 = vst [vmem:[#allocation10_spill] sm:$0xff] %v18224_v46  ;;  %v18230_v32 = vadd.f32 %v5094_v5, %v4823_v9  ;;  %v4826_v42 = vadd.f32 %v15200_v0, %v17885_v12  ;;  %15473 = vmatprep.mubr.msk.f32.mxu1 %vm325_vm1, %v6293_v41  ;;  %v5104_v3 = vpop.f32.mrf.mxu0  ;;  %v6295_v62 = vld [vmem:[%s16268_s29 + $0xdb] sm:$0xff] }
 0x242   : > { %v4634_v6 = vpop.f32.mrf.mxu1  ;;  %v18242_v46 = vld [vmem:[%s16268_s29 + $0xdc] sm:$0xff] }
 0x243   : > { %20483 = vst [vmem:[#allocation11_spill] sm:$0xff] %v18230_v32  ;;  %v18244_v5 = vadd.f32 %v15262_v14, %v4826_v42  ;;  %v4825_v12 = vadd.f32 %v4634_v6, %v17890_v11  ;;  %v15265_v9 = vpop.f32.mrf.mxu0  ;;  %15536 = vmatmul.mubr.msk.f32.gmra.mxu0 %vm325_vm1, %v18238_v7  ;;  %v6296_v42 = vld [vmem:[%s16268_s29 + $0xe3] sm:$0xff] }
 0x244   : > { %v15203_v41 = vpop.f32.mrf.mxu1  ;;  %15474 = vmatmul.mubr.msk.f32.gmra.mxu1 %vm325_vm1, %v6294_v56  ;;  %15538 = vmatprep.mubr.msk.f32.mxu0 %vm325_vm1, %v18242_v46  ;;  %v18258_v14 = vld [vmem:[%s16268_s29 + $0xe4] sm:$0xff] }
 0x245   : > { %20484 = vst [vmem:[#allocation12_spill] sm:$0xff] %v18244_v5  ;;  %v18250_v0 = vadd.f32 %v5104_v3, %v4825_v12  ;;  %v4828_v32 = vadd.f32 %v15203_v41, %v17899_v19  ;;  %15476 = vmatprep.mubr.msk.f32.mxu1 %vm325_vm1, %v6295_v62  ;;  %v5114_v6 = vpop.f32.mrf.mxu0  ;;  %v6297_v56 = vld [vmem:[%s16268_s29 + $0xeb] sm:$0xff] }
 0x246   : > { %v4644_v11 = vpop.f32.mrf.mxu1  ;;  %v18262_v5 = vld [vmem:[%s16268_s29 + $0xec] sm:$0xff] }
 0x247   : > { %20485 = vst [vmem:[#allocation13_spill] sm:$0xff] %v18250_v0  ;;  %v18264_v3 = vadd.f32 %v15265_v9, %v4828_v32  ;;  %v4827_v19 = vadd.f32 %v4644_v11, %v17904_v2  ;;  %v15268_v12 = vpop.f32.mrf.mxu0  ;;  %15539 = vmatmul.mubr.msk.f32.gmra.mxu0 %vm325_vm1, %v18258_v14  ;;  %v6298_v32 = vld [vmem:[%s16268_s29 + $0xf3] sm:$0xff] }
 0x248   : > { %v15206_v62 = vpop.f32.mrf.mxu1  ;;  %15477 = vmatmul.mubr.msk.f32.gmra.mxu1 %vm325_vm1, %v6296_v42  ;;  %15541 = vmatprep.mubr.msk.f32.mxu0 %vm325_vm1, %v18262_v5  ;;  %v18278_v9 = vld [vmem:[%s16268_s29 + $0xf4] sm:$0xff] }
 0x249   : > { %20486 = vst [vmem:[#allocation14_spill] sm:$0xff] %v18264_v3  ;;  %v18270_v41 = vadd.f32 %v5114_v6, %v4827_v19  ;;  %v4830_v0 = vadd.f32 %v15206_v62, %v17913_v1  ;;  %15479 = vmatprep.mubr.msk.f32.mxu1 %vm325_vm1, %v6297_v56  ;;  %v5124_v11 = vpop.f32.mrf.mxu0  ;;  %v6299_v42 = vld [vmem:[%s16268_s29 + $0xfb] sm:$0xff] }
 0x24a   : > { %v4654_v2 = vpop.f32.mrf.mxu1  ;;  %v18282_v3 = vld [vmem:[%s16268_s29 + $0xfc] sm:$0xff] }
 0x24b   : > { %20487 = vst [vmem:[#allocation15_spill] sm:$0xff] %v18270_v41  ;;  %v18284_v6 = vadd.f32 %v15268_v12, %v4830_v0  ;;  %v4829_v1 = vadd.f32 %v4654_v2, %v17918_v39  ;;  %v15271_v19 = vpop.f32.mrf.mxu0  ;;  %15542 = vmatmul.mubr.msk.f32.gmra.mxu0 %vm325_vm1, %v18278_v9  ;;  %v6300_v0 = vld [vmem:[%s16268_s29 + $0x103] sm:$0xff] }
 0x24c   : > { %v15209_v56 = vpop.f32.mrf.mxu1  ;;  %15480 = vmatmul.mubr.msk.f32.gmra.mxu1 %vm325_vm1, %v6298_v32  ;;  %15544 = vmatprep.mubr.msk.f32.mxu0 %vm325_vm1, %v18282_v3  ;;  %v18298_v12 = vld [vmem:[%s16268_s29 + $0x104] sm:$0xff] }
 0x24d   : > { %20488 = vst [vmem:[#allocation16_spill] sm:$0xff] %v18284_v6  ;;  %v18290_v62 = vadd.f32 %v5124_v11, %v4829_v1  ;;  %v4832_v41 = vadd.f32 %v15209_v56, %v17927_v16  ;;  %15482 = vmatprep.mubr.msk.f32.mxu1 %vm325_vm1, %v6299_v42  ;;  %v5134_v2 = vpop.f32.mrf.mxu0  ;;  %v6301_v32 = vld [vmem:[%s16268_s29 + $0x10b] sm:$0xff] }
 0x24e   : > { %v4664_v39 = vpop.f32.mrf.mxu1  ;;  %v18302_v6 = vld [vmem:[%s16268_s29 + $0x10c] sm:$0xff] }
 0x24f   : > { %20489 = vst [vmem:[#allocation17_spill] sm:$0xff] %v18290_v62  ;;  %v18304_v11 = vadd.f32 %v15271_v19, %v4832_v41  ;;  %v4831_v16 = vadd.f32 %v4664_v39, %v17932_v59  ;;  %v15274_v1 = vpop.f32.mrf.mxu0  ;;  %15545 = vmatmul.mubr.msk.f32.gmra.mxu0 %vm325_vm1, %v18298_v12  ;;  %v6302_v41 = vld [vmem:[%s16268_s29 + $0x113] sm:$0xff] }
 0x250   : > { %v15212_v42 = vpop.f32.mrf.mxu1  ;;  %15483 = vmatmul.mubr.msk.f32.gmra.mxu1 %vm325_vm1, %v6300_v0  ;;  %15547 = vmatprep.mubr.msk.f32.mxu0 %vm325_vm1, %v18302_v6  ;;  %v18318_v19 = vld [vmem:[%s16268_s29 + $0x114] sm:$0xff] }
 0x251   : > { %20490 = vst [vmem:[#allocation18_spill] sm:$0xff] %v18304_v11  ;;  %v18310_v56 = vadd.f32 %v5134_v2, %v4831_v16  ;;  %v4834_v62 = vadd.f32 %v15212_v42, %v17941_v27  ;;  %15485 = vmatprep.mubr.msk.f32.mxu1 %vm325_vm1, %v6301_v32  ;;  %v5144_v39 = vpop.f32.mrf.mxu0  ;;  %v6303_v0 = vld [vmem:[%s16268_s29 + $0x11b] sm:$0xff] }
 0x252   : > { %v4674_v59 = vpop.f32.mrf.mxu1  ;;  %v18322_v11 = vld [vmem:[%s16268_s29 + $0x11c] sm:$0xff] }
 0x253   : > { %20491 = vst [vmem:[#allocation19_spill] sm:$0xff] %v18310_v56  ;;  %v18324_v2 = vadd.f32 %v15274_v1, %v4834_v62  ;;  %v4833_v27 = vadd.f32 %v4674_v59, %v17946_v31  ;;  %v15277_v16 = vpop.f32.mrf.mxu0  ;;  %15548 = vmatmul.mubr.msk.f32.gmra.mxu0 %vm325_vm1, %v18318_v19  ;;  %v6304_v62 = vld [vmem:[%s16268_s29 + $0x123] sm:$0xff] }
 0x254   : > { %v15215_v32 = vpop.f32.mrf.mxu1  ;;  %15486 = vmatmul.mubr.msk.f32.gmra.mxu1 %vm325_vm1, %v6302_v41  ;;  %15550 = vmatprep.mubr.msk.f32.mxu0 %vm325_vm1, %v18322_v11  ;;  %v18338_v1 = vld [vmem:[%s16268_s29 + $0x124] sm:$0xff] }
 0x255   : > { %20492 = vst [vmem:[#allocation20_spill] sm:$0xff] %v18324_v2  ;;  %v18330_v42 = vadd.f32 %v5144_v39, %v4833_v27  ;;  %v4836_v56 = vadd.f32 %v15215_v32, %v17955_v38  ;;  %15488 = vmatprep.mubr.msk.f32.mxu1 %vm325_vm1, %v6303_v0  ;;  %v5154_v59 = vpop.f32.mrf.mxu0  ;;  %v6305_v41 = vld [vmem:[%s16268_s29 + $0x12b] sm:$0xff] }
 0x256   : > { %v4684_v31 = vpop.f32.mrf.mxu1  ;;  %v18342_v2 = vld [vmem:[%s16268_s29 + $0x12c] sm:$0xff] }
 0x257   : > { %20493 = vst [vmem:[#allocation21_spill] sm:$0xff] %v18330_v42  ;;  %v18344_v39 = vadd.f32 %v15277_v16, %v4836_v56  ;;  %v4835_v38 = vadd.f32 %v4684_v31, %v17960_v52  ;;  %v15280_v27 = vpop.f32.mrf.mxu0  ;;  %15551 = vmatmul.mubr.msk.f32.gmra.mxu0 %vm325_vm1, %v18338_v1  ;;  %v6306_v56 = vld [vmem:[%s16268_s29 + $0x133] sm:$0xff] }
 0x258   : > { %v15218_v0 = vpop.f32.mrf.mxu1  ;;  %15489 = vmatmul.mubr.msk.f32.gmra.mxu1 %vm325_vm1, %v6304_v62  ;;  %15553 = vmatprep.mubr.msk.f32.mxu0 %vm325_vm1, %v18342_v2  ;;  %v18358_v16 = vld [vmem:[%s16268_s29 + $0x134] sm:$0xff] }
 0x259   : > { %20494 = vst [vmem:[#allocation22_spill] sm:$0xff] %v18344_v39  ;;  %v18350_v32 = vadd.f32 %v5154_v59, %v4835_v38  ;;  %v4838_v42 = vadd.f32 %v15218_v0, %v17969_v60  ;;  %15491 = vmatprep.mubr.msk.f32.mxu1 %vm325_vm1, %v6305_v41  ;;  %v5164_v31 = vpop.f32.mrf.mxu0  ;;  %v6307_v62 = vld [vmem:[%s16268_s29 + $0x13b] sm:$0xff] }
 0x25a   : > { %v4694_v52 = vpop.f32.mrf.mxu1  ;;  %v18362_v39 = vld [vmem:[%s16268_s29 + $0x13c] sm:$0xff] }
 0x25b   : > { %20495 = vst [vmem:[#allocation23_spill] sm:$0xff] %v18350_v32  ;;  %v18364_v59 = vadd.f32 %v15280_v27, %v4838_v42  ;;  %v4837_v60 = vadd.f32 %v4694_v52, %v17974_v8  ;;  %v15283_v38 = vpop.f32.mrf.mxu0  ;;  %15554 = vmatmul.mubr.msk.f32.gmra.mxu0 %vm325_vm1, %v18358_v16  ;;  %v6308_v42 = vld [vmem:[%s16268_s29 + $0x143] sm:$0xff] }
 0x25c   : > { %v15221_v41 = vpop.f32.mrf.mxu1  ;;  %15492 = vmatmul.mubr.msk.f32.gmra.mxu1 %vm325_vm1, %v6306_v56  ;;  %15556 = vmatprep.mubr.msk.f32.mxu0 %vm325_vm1, %v18362_v39  ;;  %v18378_v27 = vld [vmem:[%s16268_s29 + $0x144] sm:$0xff] }
 0x25d   : > { %20496 = vst [vmem:[#allocation24_spill] sm:$0xff] %v18364_v59  ;;  %v18370_v0 = vadd.f32 %v5164_v31, %v4837_v60  ;;  %v4840_v32 = vadd.f32 %v15221_v41, %v17983_v15  ;;  %15494 = vmatprep.mubr.msk.f32.mxu1 %vm325_vm1, %v6307_v62  ;;  %v5174_v52 = vpop.f32.mrf.mxu0  ;;  %v6309_v56 = vld [vmem:[%s16268_s29 + $0x14b] sm:$0xff] }
 0x25e   : > { %v4704_v8 = vpop.f32.mrf.mxu1  ;;  %v18382_v59 = vld [vmem:[%s16268_s29 + $0x14c] sm:$0xff] }
 0x25f   : > { %20497 = vst [vmem:[#allocation25_spill] sm:$0xff] %v18370_v0  ;;  %v18384_v31 = vadd.f32 %v15283_v38, %v4840_v32  ;;  %v4839_v15 = vadd.f32 %v4704_v8, %v17988_v30  ;;  %v15286_v60 = vpop.f32.mrf.mxu0  ;;  %15557 = vmatmul.mubr.msk.f32.gmra.mxu0 %vm325_vm1, %v18378_v27  ;;  %v6310_v32 = vld [vmem:[%s16268_s29 + $0x153] sm:$0xff] }
 0x260   : > { %v15224_v62 = vpop.f32.mrf.mxu1  ;;  %15495 = vmatmul.mubr.msk.f32.gmra.mxu1 %vm325_vm1, %v6308_v42  ;;  %15559 = vmatprep.mubr.msk.f32.mxu0 %vm325_vm1, %v18382_v59  ;;  %v18398_v38 = vld [vmem:[%s16268_s29 + $0x154] sm:$0xff] }
 0x261   : > { %20498 = vst [vmem:[#allocation26_spill] sm:$0xff] %v18384_v31  ;;  %v18390_v41 = vadd.f32 %v5174_v52, %v4839_v15  ;;  %v4842_v0 = vadd.f32 %v15224_v62, %v17997_v28  ;;  %15497 = vmatprep.mubr.msk.f32.mxu1 %vm325_vm1, %v6309_v56  ;;  %v5184_v8 = vpop.f32.mrf.mxu0  ;;  %v6311_v42 = vld [vmem:[%s16268_s29 + $0x15b] sm:$0xff] }
 0x262   : > { %v4714_v30 = vpop.f32.mrf.mxu1  ;;  %v18402_v31 = vld [vmem:[%s16268_s29 + $0x15c] sm:$0xff] }
 0x263   : > { %20499 = vst [vmem:[#allocation27_spill] sm:$0xff] %v18390_v41  ;;  %v18404_v52 = vadd.f32 %v15286_v60, %v4842_v0  ;;  %v4841_v28 = vadd.f32 %v4714_v30, %v18002_v22  ;;  %v15289_v56 = vpop.f32.mrf.mxu0  ;;  %15560 = vmatmul.mubr.msk.f32.gmra.mxu0 %vm325_vm1, %v18398_v38  ;;  %v6312_v0 = vld [vmem:[%s16268_s29 + $0x163] sm:$0xff] }
 0x264   : > { %v15227_v15 = vpop.f32.mrf.mxu1  ;;  %15498 = vmatmul.mubr.msk.f32.gmra.mxu1 %vm325_vm1, %v6310_v32  ;;  %15562 = vmatprep.mubr.msk.f32.mxu0 %vm325_vm1, %v18402_v31  ;;  %v18418_v60 = vld [vmem:[%s16268_s29 + $0x164] sm:$0xff] }
 0x265   : > { %20500 = vst [vmem:[#allocation28_spill] sm:$0xff] %v18404_v52  ;;  %v18410_v62 = vadd.f32 %v5184_v8, %v4841_v28  ;;  %v4844_v41 = vadd.f32 %v15227_v15, %v18011_v40  ;;  %15500 = vmatprep.mubr.msk.f32.mxu1 %vm325_vm1, %v6311_v42  ;;  %v5194_v30 = vpop.f32.mrf.mxu0  ;;  %v7683_v52 = vld [vmem:[%s16268_s29 + $0x3d] sm:$0xff] }
 0x266   : > { %v4724_v22 = vpop.f32.mrf.mxu1 }
 0x267   : > { %20501 = vst [vmem:[#allocation29_spill] sm:$0xff] %v18410_v62  ;;  %v18421_v32 = vadd.f32 %v15289_v56, %v4844_v41  ;;  %v4843_v8 = vadd.f32 %v4724_v22, %v18016_v13  ;;  %v15292_v62 = vpop.f32.mrf.mxu0  ;;  %15563 = vmatmul.mubr.msk.f32.gmra.mxu0 %vm325_vm1, %v18418_v60  ;;  %v7684_v41 = vld [vmem:[%s16268_s29 + $0x45] sm:$0xff]  ;;  %v7685_v22 = vld [vmem:[%s16268_s29 + $0x4d] sm:$0xff] }
 0x268   : > { %v15230_v28 = vpop.f32.mrf.mxu1  ;;  %15501 = vmatmul.mubr.msk.f32.gmra.mxu1 %vm325_vm1, %v6312_v0  ;;  %15629 = vmatprep.mubr.msk.f32.mxu0 %vm325_vm1, %v7683_v52 }
 0x269   : > { %20502 = vst [vmem:[#allocation30_spill] sm:$0xff] %v18421_v32  ;;  %v18427_v40 = vadd.f32 %v5194_v30, %v4843_v8  ;;  %v4846_v42 = vadd.f32 %v15230_v28, %v18023_v29  ;;  %15567 = vmatprep.mubr.msk.f32.mxu1 %vm325_vm1, %v18028_v20  ;;  %v5204_v13 = vpop.f32.mrf.mxu0  ;;  %v18444_v29 = vld [vmem:[%s20447_s1 + $0x4c] sm:$0xf]  ;;  %v18449_v20 = vld [vmem:[%s20447_s1 + $0x50] sm:$0xf]  ;;  %v7687_v28 = vld [vmem:[%s16268_s29 + $0x5d] sm:$0xff] }
 0x26a   : > { %v4734_v15 = vpop.f32.mrf.mxu1 }
 0x26b   : > { %v18434_v56 = vadd.f32 %v15292_v62, %v4846_v42  ;;  %v4845_v0 = vadd.f32 %v4734_v15, %v18042_v25  ;;  %v15295_v30 = vpop.f32.mrf.mxu0  ;;  %15630 = vmatmul.mubr.msk.f32.vlgmr.msra.gmra.mxu0 %vm325_vm1, %v7684_v41 }
 0x26c   : > { %v15233_v32 = vpop.f32.mrf.mxu1  ;;  %15568 = vmatmul.mubr.msk.f32.vlgmr.msra.gmra.mxu1 %vm325_vm1, %v18051_v51  ;;  %15752 = vmatpush3.msk.msra.mxu0 %vm446_vm0, %v18040_v23  ;;  %v7686_v51 = vld [vmem:[%s16268_s29 + $0x55] sm:$0xff] }
 0x26d   : > { %v18451_v25 = vadd.f32 %v5204_v13, %v4845_v0  ;;  %v4848_v52 = vadd.f32 %v15233_v32, %v18060_v21  ;;  %15690 = vmatpush3.msk.msra.mxu1 %vm446_vm0, %v18035_v44  ;;  %v5214_v8 = vpop.f32.mrf.mxu0  ;;  %15570 = vmatprep.mubr.msk.f32.mxu1 %vm325_vm1, %v18058_v47  ;;  %v7689_v13 = vld [vmem:[%s16268_s29 + $0x6d] sm:$0xff] }
 0x26e   : > { %v4744_v62 = vpop.f32.mrf.mxu1  ;;  %15632 = vmatprep.mubr.msk.f32.mxu0 %vm325_vm1, %v7685_v22  ;;  %15813 = vmatprep.subr.msk.mxu1 %vm446_vm0, %v18444_v29 }
 0x26f   : > { %v18463_v42 = vadd.f32 %v15295_v30, %v4848_v52  ;;  %v4847_v21 = vadd.f32 %v4744_v62, %v18070_v48  ;;  %15875 = vmatprep.subr.msk.mxu0 %vm446_vm0, %v18449_v20  ;;  %v15298_v23 = vpop.f32.mrf.mxu0  ;;  %15633 = vmatmul.mubr.msk.f32.gmra.mxu0 %vm325_vm1, %v7686_v51  ;;  %v7688_v48 = vld [vmem:[%s16268_s29 + $0x65] sm:$0xff]  ;;  %v7690_v52 = vld [vmem:[%s16268_s29 + $0x75] sm:$0xff]  ;;  %v7691_v62 = vld [vmem:[%s16268_s29 + $0x7d] sm:$0xff] }
 0x270   : > { %v15236_v44 = vpop.f32.mrf.mxu1  ;;  %15571 = vmatmul.mubr.msk.f32.gmra.mxu1 %vm325_vm1, %v18078_v45  ;;  %15635 = vmatprep.mubr.msk.f32.mxu0 %vm325_vm1, %v7687_v28 }
 0x271   : > { %v18473_v47 = vadd.f32 %v5214_v8, %v4847_v21  ;;  %v4850_v32 = vadd.f32 %v15236_v44, %v18084_v18  ;;  %15573 = vmatprep.mubr.msk.f32.mxu1 %vm325_vm1, %v18082_v63  ;;  %v5224_v15 = vpop.f32.mrf.mxu0  ;;  %v7692_v44 = vld [vmem:[%s16268_s29 + $0x85] sm:$0xff] }
 0x272   : > { %v4754_v41 = vpop.f32.mrf.mxu1 }
 0x273   : > { %v18481_v0 = vadd.f32 %v15298_v23, %v4850_v32  ;;  %v4849_v45 = vadd.f32 %v4754_v41, %v18090_v61  ;;  %v15301_v30 = vpop.f32.mrf.mxu0  ;;  %15636 = vmatmul.mubr.msk.f32.gmra.mxu0 %vm325_vm1, %v7688_v48  ;;  %v7693_v32 = vld [vmem:[%s16268_s29 + $0x8d] sm:$0xff] }
 0x274   : > { %v15239_v22 = vpop.f32.mrf.mxu1  ;;  %15574 = vmatmul.mubr.msk.f32.gmra.mxu1 %vm325_vm1, %v18098_v54  ;;  %15638 = vmatprep.mubr.msk.f32.mxu0 %vm325_vm1, %v7689_v13 }
 0x275   : > { %v18487_v63 = vadd.f32 %v5224_v15, %v4849_v45  ;;  %v4852_v18 = vadd.f32 %v15239_v22, %v18104_v57  ;;  %15576 = vmatprep.mubr.msk.f32.mxu1 %vm325_vm1, %v18102_v36  ;;  %v5234_v61 = vpop.f32.mrf.mxu0  ;;  %v7694_v45 = vld [vmem:[%s16268_s29 + $0x95] sm:$0xff] }
 0x276   : > { %v4764_v51 = vpop.f32.mrf.mxu1 }
 0x277   : > { %v18495_v8 = vadd.f32 %v15301_v30, %v4852_v18  ;;  %v4851_v54 = vadd.f32 %v4764_v51, %v18110_v10  ;;  %v15304_v21 = vpop.f32.mrf.mxu0  ;;  %15639 = vmatmul.mubr.msk.f32.gmra.mxu0 %vm325_vm1, %v7690_v52  ;;  %v7695_v30 = vld [vmem:[%s16268_s29 + $0x9d] sm:$0xff] }
 0x278   : > { %v15242_v28 = vpop.f32.mrf.mxu1  ;;  %15577 = vmatmul.mubr.msk.f32.gmra.mxu1 %vm325_vm1, %v18118_v53  ;;  %15641 = vmatprep.mubr.msk.f32.mxu0 %vm325_vm1, %v7691_v62  ;;  %v20505_v62 = vld [vmem:[#allocation4_spill] sm:$0xff] }
 0x279   : > { %v18501_v36 = vadd.f32 %v5234_v61, %v4851_v54  ;;  %v4854_v57 = vadd.f32 %v15242_v28, %v18124_v4  ;;  %15579 = vmatprep.mubr.msk.f32.mxu1 %vm325_vm1, %v18122_v34  ;;  %v5244_v10 = vpop.f32.mrf.mxu0  ;;  %v20503_v4 = vld [vmem:[#allocation2_spill] sm:$0xff] }
 0x27a   : > { %v4774_v23 = vpop.f32.mrf.mxu1  ;;  %v7696_v28 = vld [vmem:[%s16268_s29 + $0xa5] sm:$0xff] }
 0x27b   : > { %v18509_v48 = vadd.f32 %v15304_v21, %v4854_v57  ;;  %v4853_v53 = vadd.f32 %v4774_v23, %v18130_v49  ;;  %v15307_v15 = vpop.f32.mrf.mxu0  ;;  %15642 = vmatmul.mubr.msk.f32.gmra.mxu0 %vm325_vm1, %v7692_v44  ;;  %v7697_v44 = vld [vmem:[%s16268_s29 + $0xad] sm:$0xff] }
 0x27c   : > { %v15245_v41 = vpop.f32.mrf.mxu1  ;;  %15580 = vmatmul.mubr.msk.f32.gmra.mxu1 %vm325_vm1, %v18138_v17  ;;  %15644 = vmatprep.mubr.msk.f32.mxu0 %vm325_vm1, %v7693_v32  ;;  %v20504_v17 = vld [vmem:[#allocation3_spill] sm:$0xff] }
 0x27d   : > { %v18515_v34 = vadd.f32 %v5244_v10, %v4853_v53  ;;  %v4856_v13 = vadd.f32 %v15245_v41, %v20503_v4  ;;  %15582 = vmatprep.mubr.msk.f32.mxu1 %vm325_vm1, %v18142_v55  ;;  %v5254_v49 = vpop.f32.mrf.mxu0  ;;  %v20507_v41 = vld [vmem:[#allocation6_spill] sm:$0xff]  ;;  %v7698_v4 = vld [vmem:[%s16268_s29 + $0xb5] sm:$0xff] }
 0x27e   : > { %v4784_v22 = vpop.f32.mrf.mxu1 }
 0x27f   : > { %v18523_v18 = vadd.f32 %v15307_v15, %v4856_v13  ;;  %v4855_v52 = vadd.f32 %v4784_v22, %v20504_v17  ;;  %v15310_v61 = vpop.f32.mrf.mxu0  ;;  %15645 = vmatmul.mubr.msk.f32.gmra.mxu0 %vm325_vm1, %v7694_v45  ;;  %v7699_v22 = vld [vmem:[%s16268_s29 + $0xbd] sm:$0xff] }
 0x280   : > { %v15248_v51 = vpop.f32.mrf.mxu1  ;;  %15583 = vmatmul.mubr.msk.f32.gmra.mxu1 %vm325_vm1, %v18158_v24  ;;  %15647 = vmatprep.mubr.msk.f32.mxu0 %vm325_vm1, %v7695_v30  ;;  %v20506_v24 = vld [vmem:[#allocation5_spill] sm:$0xff] }
 0x281   : > { %v18529_v55 = vadd.f32 %v5254_v49, %v4855_v52  ;;  %v4858_v54 = vadd.f32 %v15248_v51, %v20505_v62  ;;  %15585 = vmatprep.mubr.msk.f32.mxu1 %vm325_vm1, %v18162_v50  ;;  %v5264_v57 = vpop.f32.mrf.mxu0  ;;  %v20509_v51 = vld [vmem:[#allocation8_spill] sm:$0xff]  ;;  %v7700_v62 = vld [vmem:[%s16268_s29 + $0xc5] sm:$0xff] }
 0x282   : > { %v4794_v21 = vpop.f32.mrf.mxu1 }
 0x283   : > { %v18537_v23 = vadd.f32 %v15310_v61, %v4858_v54  ;;  %v4857_v10 = vadd.f32 %v4794_v21, %v20506_v24  ;;  %v15313_v53 = vpop.f32.mrf.mxu0  ;;  %15648 = vmatmul.mubr.msk.f32.gmra.mxu0 %vm325_vm1, %v7696_v28  ;;  %v7701_v21 = vld [vmem:[%s16268_s29 + $0xcd] sm:$0xff] }
 0x284   : > { %v15251_v32 = vpop.f32.mrf.mxu1  ;;  %15586 = vmatmul.mubr.msk.f32.gmra.mxu1 %vm325_vm1, %v18178_v37  ;;  %15650 = vmatprep.mubr.msk.f32.mxu0 %vm325_vm1, %v7697_v44  ;;  %v20508_v37 = vld [vmem:[#allocation7_spill] sm:$0xff] }
 0x285   : > { %v18543_v50 = vadd.f32 %v5264_v57, %v4857_v10  ;;  %v4860_v15 = vadd.f32 %v15251_v32, %v20507_v41  ;;  %15588 = vmatprep.mubr.msk.f32.mxu1 %vm325_vm1, %v18182_v43  ;;  %v5274_v45 = vpop.f32.mrf.mxu0  ;;  %v20511_v32 = vld [vmem:[#allocation10_spill] sm:$0xff]  ;;  %v7702_v41 = vld [vmem:[%s16268_s29 + $0xd5] sm:$0xff] }
 0x286   : > { %v4804_v13 = vpop.f32.mrf.mxu1 }
 0x287   : > { %v18551_v49 = vadd.f32 %v15313_v53, %v4860_v15  ;;  %v4859_v30 = vadd.f32 %v4804_v13, %v20508_v37  ;;  %v15316_v52 = vpop.f32.mrf.mxu0  ;;  %15651 = vmatmul.mubr.msk.f32.gmra.mxu0 %vm325_vm1, %v7698_v4  ;;  %v7703_v13 = vld [vmem:[%s16268_s29 + $0xdd] sm:$0xff] }
 0x288   : > { %v15254_v17 = vpop.f32.mrf.mxu1  ;;  %15589 = vmatmul.mubr.msk.f32.gmra.mxu1 %vm325_vm1, %v18198_v35  ;;  %15653 = vmatprep.mubr.msk.f32.mxu0 %vm325_vm1, %v7699_v22  ;;  %v20510_v35 = vld [vmem:[#allocation9_spill] sm:$0xff] }
 0x289   : > { %v18557_v43 = vadd.f32 %v5274_v45, %v4859_v30  ;;  %v4862_v61 = vadd.f32 %v15254_v17, %v20509_v51  ;;  %15591 = vmatprep.mubr.msk.f32.mxu1 %vm325_vm1, %v18202_v33  ;;  %v5284_v28 = vpop.f32.mrf.mxu0  ;;  %v20513_v17 = vld [vmem:[#allocation12_spill] sm:$0xff]  ;;  %v7704_v51 = vld [vmem:[%s16268_s29 + $0xe5] sm:$0xff] }
 0x28a   : > { %v4814_v54 = vpop.f32.mrf.mxu1 }
 0x28b   : > { %v18565_v57 = vadd.f32 %v15316_v52, %v4862_v61  ;;  %v4861_v44 = vadd.f32 %v4814_v54, %v20510_v35  ;;  %v15383_v10 = vpop.f32.mrf.mxu0  ;;  %15654 = vmatmul.mubr.msk.f32.gmra.mxu0 %vm325_vm1, %v7700_v62  ;;  %v7705_v54 = vld [vmem:[%s16268_s29 + $0xed] sm:$0xff] }
 0x28c   : > { %v15321_v24 = vpop.f32.mrf.mxu1  ;;  %15592 = vmatmul.mubr.msk.f32.gmra.mxu1 %vm325_vm1, %v18218_v26  ;;  %15656 = vmatprep.mubr.msk.f32.mxu0 %vm325_vm1, %v7701_v21  ;;  %v20512_v26 = vld [vmem:[#allocation11_spill] sm:$0xff] }
 0x28d   : > { %v18571_v33 = vadd.f32 %v5284_v28, %v4861_v44  ;;  %v5764_v53 = vadd.f32 %v15321_v24, %v20511_v32  ;;  %15594 = vmatprep.mubr.msk.f32.mxu1 %vm325_vm1, %v18222_v58  ;;  %v6034_v4 = vpop.f32.mrf.mxu0  ;;  %v20515_v24 = vld [vmem:[#allocation14_spill] sm:$0xff]  ;;  %v7706_v32 = vld [vmem:[%s16268_s29 + $0xf5] sm:$0xff] }
 0x28e   : > { %v5564_v15 = vpop.f32.mrf.mxu1 }
 0x28f   : > { %v18579_v45 = vadd.f32 %v15383_v10, %v5764_v53  ;;  %v5763_v22 = vadd.f32 %v5564_v15, %v20512_v26  ;;  %v15386_v30 = vpop.f32.mrf.mxu0  ;;  %15657 = vmatmul.mubr.msk.f32.gmra.mxu0 %vm325_vm1, %v7702_v41  ;;  %v7707_v15 = vld [vmem:[%s16268_s29 + $0xfd] sm:$0xff] }
 0x290   : > { %v15324_v37 = vpop.f32.mrf.mxu1  ;;  %15595 = vmatmul.mubr.msk.f32.gmra.mxu1 %vm325_vm1, %v18238_v7  ;;  %15659 = vmatprep.mubr.msk.f32.mxu0 %vm325_vm1, %v7703_v13  ;;  %v20514_v7 = vld [vmem:[#allocation13_spill] sm:$0xff] }
 0x291   : > { %v18585_v58 = vadd.f32 %v6034_v4, %v5763_v22  ;;  %v5766_v52 = vadd.f32 %v15324_v37, %v20513_v17  ;;  %15597 = vmatprep.mubr.msk.f32.mxu1 %vm325_vm1, %v18242_v46  ;;  %v6044_v62 = vpop.f32.mrf.mxu0  ;;  %v20517_v37 = vld [vmem:[#allocation16_spill] sm:$0xff]  ;;  %v7708_v17 = vld [vmem:[%s16268_s29 + $0x105] sm:$0xff] }
 0x292   : > { %v5574_v61 = vpop.f32.mrf.mxu1 }
 0x293   : > { %v18593_v28 = vadd.f32 %v15386_v30, %v5766_v52  ;;  %v5765_v21 = vadd.f32 %v5574_v61, %v20514_v7  ;;  %v15389_v44 = vpop.f32.mrf.mxu0  ;;  %15660 = vmatmul.mubr.msk.f32.gmra.mxu0 %vm325_vm1, %v7704_v51  ;;  %v7709_v61 = vld [vmem:[%s16268_s29 + $0x10d] sm:$0xff] }
 0x294   : > { %v15327_v35 = vpop.f32.mrf.mxu1  ;;  %15598 = vmatmul.mubr.msk.f32.gmra.mxu1 %vm325_vm1, %v18258_v14  ;;  %15662 = vmatprep.mubr.msk.f32.mxu0 %vm325_vm1, %v7705_v54  ;;  %v20516_v14 = vld [vmem:[#allocation15_spill] sm:$0xff] }
 0x295   : > { %v18599_v46 = vadd.f32 %v6044_v62, %v5765_v21  ;;  %v5768_v10 = vadd.f32 %v15327_v35, %v20515_v24  ;;  %15600 = vmatprep.mubr.msk.f32.mxu1 %vm325_vm1, %v18262_v5  ;;  %v6054_v41 = vpop.f32.mrf.mxu0  ;;  %v20519_v35 = vld [vmem:[#allocation18_spill] sm:$0xff]  ;;  %v7710_v24 = vld [vmem:[%s16268_s29 + $0x115] sm:$0xff] }
 0x296   : > { %v5584_v53 = vpop.f32.mrf.mxu1 }
 0x297   : > { %v18607_v4 = vadd.f32 %v15389_v44, %v5768_v10  ;;  %v5767_v13 = vadd.f32 %v5584_v53, %v20516_v14  ;;  %v15392_v22 = vpop.f32.mrf.mxu0  ;;  %15663 = vmatmul.mubr.msk.f32.gmra.mxu0 %vm325_vm1, %v7706_v32  ;;  %v7711_v53 = vld [vmem:[%s16268_s29 + $0x11d] sm:$0xff] }
 0x298   : > { %v15330_v26 = vpop.f32.mrf.mxu1  ;;  %15601 = vmatmul.mubr.msk.f32.gmra.mxu1 %vm325_vm1, %v18278_v9  ;;  %15665 = vmatprep.mubr.msk.f32.mxu0 %vm325_vm1, %v7707_v15  ;;  %v20518_v9 = vld [vmem:[#allocation17_spill] sm:$0xff] }
 0x299   : > { %v18613_v5 = vadd.f32 %v6054_v41, %v5767_v13  ;;  %v5770_v30 = vadd.f32 %v15330_v26, %v20517_v37  ;;  %15603 = vmatprep.mubr.msk.f32.mxu1 %vm325_vm1, %v18282_v3  ;;  %v6064_v51 = vpop.f32.mrf.mxu0  ;;  %v20521_v26 = vld [vmem:[#allocation20_spill] sm:$0xff]  ;;  %v7712_v37 = vld [vmem:[%s16268_s29 + $0x125] sm:$0xff] }
 0x29a   : > { %v5594_v52 = vpop.f32.mrf.mxu1 }
 0x29b   : > { %v18621_v62 = vadd.f32 %v15392_v22, %v5770_v30  ;;  %v5769_v54 = vadd.f32 %v5594_v52, %v20518_v9  ;;  %v15395_v21 = vpop.f32.mrf.mxu0  ;;  %15666 = vmatmul.mubr.msk.f32.gmra.mxu0 %vm325_vm1, %v7708_v17  ;;  %v7713_v52 = vld [vmem:[%s16268_s29 + $0x12d] sm:$0xff] }
 0x29c   : > { %v15333_v7 = vpop.f32.mrf.mxu1  ;;  %15604 = vmatmul.mubr.msk.f32.gmra.mxu1 %vm325_vm1, %v18298_v12  ;;  %15668 = vmatprep.mubr.msk.f32.mxu0 %vm325_vm1, %v7709_v61  ;;  %v20520_v12 = vld [vmem:[#allocation19_spill] sm:$0xff] }
 0x29d   : > { %v18627_v3 = vadd.f32 %v6064_v51, %v5769_v54  ;;  %v5772_v44 = vadd.f32 %v15333_v7, %v20519_v35  ;;  %15606 = vmatprep.mubr.msk.f32.mxu1 %vm325_vm1, %v18302_v6  ;;  %v6074_v32 = vpop.f32.mrf.mxu0  ;;  %v20523_v7 = vld [vmem:[#allocation22_spill] sm:$0xff]  ;;  %v7714_v35 = vld [vmem:[%s16268_s29 + $0x135] sm:$0xff] }
 0x29e   : > { %v5604_v10 = vpop.f32.mrf.mxu1 }
 0x29f   : > { %v18635_v41 = vadd.f32 %v15395_v21, %v5772_v44  ;;  %v5771_v15 = vadd.f32 %v5604_v10, %v20520_v12  ;;  %v15398_v13 = vpop.f32.mrf.mxu0  ;;  %15669 = vmatmul.mubr.msk.f32.gmra.mxu0 %vm325_vm1, %v7710_v24  ;;  %v7715_v10 = vld [vmem:[%s16268_s29 + $0x13d] sm:$0xff] }
 0x2a0   : > { %v15336_v14 = vpop.f32.mrf.mxu1  ;;  %15607 = vmatmul.mubr.msk.f32.gmra.mxu1 %vm325_vm1, %v18318_v19  ;;  %15671 = vmatprep.mubr.msk.f32.mxu0 %vm325_vm1, %v7711_v53  ;;  %v20522_v19 = vld [vmem:[#allocation21_spill] sm:$0xff] }
 0x2a1   : > { %v18641_v6 = vadd.f32 %v6074_v32, %v5771_v15  ;;  %v5774_v22 = vadd.f32 %v15336_v14, %v20521_v26  ;;  %15609 = vmatprep.mubr.msk.f32.mxu1 %vm325_vm1, %v18322_v11  ;;  %v6084_v17 = vpop.f32.mrf.mxu0  ;;  %v20525_v14 = vld [vmem:[#allocation24_spill] sm:$0xff]  ;;  %v7716_v26 = vld [vmem:[%s16268_s29 + $0x145] sm:$0xff] }
 0x2a2   : > { %v5614_v30 = vpop.f32.mrf.mxu1 }
 0x2a3   : > { %v18649_v51 = vadd.f32 %v15398_v13, %v5774_v22  ;;  %v5773_v61 = vadd.f32 %v5614_v30, %v20522_v19  ;;  %v15401_v54 = vpop.f32.mrf.mxu0  ;;  %15672 = vmatmul.mubr.msk.f32.gmra.mxu0 %vm325_vm1, %v7712_v37  ;;  %v7717_v30 = vld [vmem:[%s16268_s29 + $0x14d] sm:$0xff] }
 0x2a4   : > { %v15339_v9 = vpop.f32.mrf.mxu1  ;;  %15610 = vmatmul.mubr.msk.f32.gmra.mxu1 %vm325_vm1, %v18338_v1  ;;  %15674 = vmatprep.mubr.msk.f32.mxu0 %vm325_vm1, %v7713_v52  ;;  %v20524_v1 = vld [vmem:[#allocation23_spill] sm:$0xff] }
 0x2a5   : > { %v18655_v11 = vadd.f32 %v6084_v17, %v5773_v61  ;;  %v5776_v21 = vadd.f32 %v15339_v9, %v20523_v7  ;;  %15612 = vmatprep.mubr.msk.f32.mxu1 %vm325_vm1, %v18342_v2  ;;  %v6094_v24 = vpop.f32.mrf.mxu0  ;;  %v20527_v9 = vld [vmem:[#allocation26_spill] sm:$0xff]  ;;  %v7718_v7 = vld [vmem:[%s16268_s29 + $0x155] sm:$0xff] }
 0x2a6   : > { %v5624_v44 = vpop.f32.mrf.mxu1 }
 0x2a7   : > { %v18663_v32 = vadd.f32 %v15401_v54, %v5776_v21  ;;  %v5775_v53 = vadd.f32 %v5624_v44, %v20524_v1  ;;  %v15404_v15 = vpop.f32.mrf.mxu0  ;;  %15675 = vmatmul.mubr.msk.f32.gmra.mxu0 %vm325_vm1, %v7714_v35  ;;  %v7719_v44 = vld [vmem:[%s16268_s29 + $0x15d] sm:$0xff] }
 0x2a8   : > { %v15342_v12 = vpop.f32.mrf.mxu1  ;;  %15613 = vmatmul.mubr.msk.f32.gmra.mxu1 %vm325_vm1, %v18358_v16  ;;  %15677 = vmatprep.mubr.msk.f32.mxu0 %vm325_vm1, %v7715_v10  ;;  %v20526_v16 = vld [vmem:[#allocation25_spill] sm:$0xff] }
 0x2a9   : > { %v18669_v2 = vadd.f32 %v6094_v24, %v5775_v53  ;;  %v5778_v13 = vadd.f32 %v15342_v12, %v20525_v14  ;;  %15615 = vmatprep.mubr.msk.f32.mxu1 %vm325_vm1, %v18362_v39  ;;  %v6104_v37 = vpop.f32.mrf.mxu0  ;;  %v20529_v12 = vld [vmem:[#allocation28_spill] sm:$0xff]  ;;  %v7720_v14 = vld [vmem:[%s16268_s29 + $0x165] sm:$0xff] }
 0x2aa   : > { %v5634_v22 = vpop.f32.mrf.mxu1 }
 0x2ab   : > { %v18677_v17 = vadd.f32 %v15404_v15, %v5778_v13  ;;  %v5777_v52 = vadd.f32 %v5634_v22, %v20526_v16  ;;  %v15407_v61 = vpop.f32.mrf.mxu0  ;;  %15678 = vmatmul.mubr.msk.f32.gmra.mxu0 %vm325_vm1, %v7716_v26  ;;  %v7251_v22 = vld [vmem:[%s16268_s29 + $0x16c] sm:$0xff] }
 0x2ac   : > { %v15345_v19 = vpop.f32.mrf.mxu1  ;;  %15616 = vmatmul.mubr.msk.f32.gmra.mxu1 %vm325_vm1, %v18378_v27  ;;  %15680 = vmatprep.mubr.msk.f32.mxu0 %vm325_vm1, %v7717_v30  ;;  %v20528_v27 = vld [vmem:[#allocation27_spill] sm:$0xff]  ;;  %v20530_v30 = vld [vmem:[#allocation29_spill] sm:$0xff] }
 0x2ad   : > { %v18683_v39 = vadd.f32 %v6104_v37, %v5777_v52  ;;  %v5780_v54 = vadd.f32 %v15345_v19, %v20527_v9  ;;  %15618 = vmatprep.mubr.msk.f32.mxu1 %vm325_vm1, %v18382_v59  ;;  %v6114_v35 = vpop.f32.mrf.mxu0  ;;  %v7721_v37 = vld [vmem:[%s16268_s29 + $0x16d] sm:$0xff] }
 0x2ae   : > { %v5644_v21 = vpop.f32.mrf.mxu1 }
 0x2af   : > { %v18691_v24 = vadd.f32 %v15407_v61, %v5780_v54  ;;  %v5779_v10 = vadd.f32 %v5644_v21, %v20528_v27  ;;  %v15410_v53 = vpop.f32.mrf.mxu0  ;;  %15681 = vmatmul.mubr.msk.f32.gmra.mxu0 %vm325_vm1, %v7718_v7  ;;  %v20531_v61 = vld [vmem:[#allocation30_spill] sm:$0xff]  ;;  %v7252_v54 = vld [vmem:[%s16268_s29 + $0x174] sm:$0xff] }
 0x2b0   : > { %v15348_v1 = vpop.f32.mrf.mxu1  ;;  %15619 = vmatmul.mubr.msk.f32.gmra.mxu1 %vm325_vm1, %v18398_v38  ;;  %15683 = vmatprep.mubr.msk.f32.mxu0 %vm325_vm1, %v7719_v44  ;;  %v7722_v7 = vld [vmem:[%s16268_s29 + $0x175] sm:$0xff]  ;;  %v8153_v44 = vld [vmem:[%s16268_s29 + $0x3e] sm:$0xff] }
 0x2b1   : > { %v18697_v59 = vadd.f32 %v6114_v35, %v5779_v10  ;;  %v5782_v15 = vadd.f32 %v15348_v1, %v20529_v12  ;;  %15621 = vmatprep.mubr.msk.f32.mxu1 %vm325_vm1, %v18402_v31  ;;  %v6124_v26 = vpop.f32.mrf.mxu0  ;;  %v8623_v27 = vld [vmem:[%s16268_s29 + $0x3f] sm:$0xff] }
 0x2b2   : > { %v5654_v13 = vpop.f32.mrf.mxu1 }
 0x2b3   : > { %v18706_v38 = vadd.f32 %v15410_v53, %v5782_v15  ;;  %v5781_v16 = vadd.f32 %v5654_v13, %v20530_v30  ;;  %v15413_v19 = vpop.f32.mrf.mxu0  ;;  %15684 = vmatmul.mubr.msk.f32.gmra.mxu0 %vm325_vm1, %v7720_v14  ;;  %v8154_v14 = vld [vmem:[%s16268_s29 + $0x46] sm:$0xff]  ;;  %v8155_v30 = vld [vmem:[%s16268_s29 + $0x4e] sm:$0xff] }
 0x2b4   : > { %v15351_v52 = vpop.f32.mrf.mxu1  ;;  %15622 = vmatmul.mubr.msk.f32.gmra.mxu1 %vm325_vm1, %v18418_v60  ;;  %15686 = vmatprep.mubr.msk.f32.mxu0 %vm325_vm1, %v7721_v37  ;;  %v8624_v13 = vld [vmem:[%s16268_s29 + $0x47] sm:$0xff] }
 0x2b5   : > { %v18712_v31 = vadd.f32 %v6124_v26, %v5781_v16  ;;  %v5784_v9 = vadd.f32 %v15351_v52, %v20531_v61  ;;  %15624 = vmatprep.mubr.msk.f32.mxu1 %vm325_vm1, %v7251_v22  ;;  %v6134_v35 = vpop.f32.mrf.mxu0  ;;  %v8625_v16 = vld [vmem:[%s16268_s29 + $0x4f] sm:$0xff]  ;;  %v18748_v61 = vld [vmem:[%s20447_s1 + $0x58] sm:$0xf] }
 0x2b6   : > { %v5664_v21 = vpop.f32.mrf.mxu1 }
 0x2b7   : > { %v18721_v10 = vadd.f32 %v15413_v19, %v5784_v9  ;;  %v5783_v60 = vadd.f32 %v5664_v21, %v18427_v40  ;;  %v15416_v53 = vpop.f32.mrf.mxu0  ;;  %15687 = vmatmul.mubr.msk.f32.gmra.mxu0 %vm325_vm1, %v7722_v7  ;;  %v8626_v7 = vld [vmem:[%s16268_s29 + $0x57] sm:$0xff] }
 0x2b8   : > { %v15354_v1 = vpop.f32.mrf.mxu1  ;;  %15625 = vmatmul.mubr.msk.f32.gmra.mxu1 %vm325_vm1, %v7252_v54  ;;  %15753 = vmatprep.mubr.msk.f32.mxu0 %vm325_vm1, %v8623_v27  ;;  %v8156_v54 = vld [vmem:[%s16268_s29 + $0x56] sm:$0xff]  ;;  %v8627_v27 = vld [vmem:[%s16268_s29 + $0x5f] sm:$0xff] }
 0x2b9   : > { %v18726_v12 = vadd.f32 %v6134_v35, %v5783_v60  ;;  %v5786_v15 = vadd.f32 %v15354_v1, %v18434_v56  ;;  %15691 = vmatprep.mubr.msk.f32.mxu1 %vm325_vm1, %v8153_v44  ;;  %v6144_v40 = vpop.f32.mrf.mxu0  ;;  %v18743_v56 = vld [vmem:[%s20447_s1 + $0x54] sm:$0xf]  ;;  %v8157_v44 = vld [vmem:[%s16268_s29 + $0x5e] sm:$0xff] }
 0x2ba   : > { %v5674_v26 = vpop.f32.mrf.mxu1 }
 0x2bb   : > { %v18733_v22 = vadd.f32 %v15416_v53, %v5786_v15  ;;  %v5785_v37 = vadd.f32 %v5674_v26, %v18451_v25  ;;  %v15419_v19 = vpop.f32.mrf.mxu0  ;;  %15754 = vmatmul.mubr.msk.f32.vlgmr.msra.gmra.mxu0 %vm325_vm1, %v8624_v13  ;;  %v8628_v15 = vld [vmem:[%s16268_s29 + $0x67] sm:$0xff] }
 0x2bc   : > { %v15357_v52 = vpop.f32.mrf.mxu1  ;;  %15692 = vmatmul.mubr.msk.f32.vlgmr.msra.gmra.mxu1 %vm325_vm1, %v8154_v14  ;;  %15876 = vmatpush3.msk.msra.mxu0 %vm446_vm0, %v18449_v20  ;;  %v8159_v26 = vld [vmem:[%s16268_s29 + $0x6e] sm:$0xff] }
 0x2bd   : > { %v18750_v25 = vadd.f32 %v6144_v40, %v5785_v37  ;;  %v5788_v9 = vadd.f32 %v15357_v52, %v18463_v42  ;;  %15814 = vmatpush3.msk.msra.mxu1 %vm446_vm0, %v18444_v29  ;;  %v6154_v35 = vpop.f32.mrf.mxu0  ;;  %15694 = vmatprep.mubr.msk.f32.mxu1 %vm325_vm1, %v8155_v30  ;;  %v8629_v40 = vld [vmem:[%s16268_s29 + $0x6f] sm:$0xff] }
 0x2be   : > { %v5684_v21 = vpop.f32.mrf.mxu1  ;;  %15756 = vmatprep.mubr.msk.f32.mxu0 %vm325_vm1, %v8625_v16  ;;  %15937 = vmatprep.subr.msk.mxu1 %vm446_vm0, %v18743_v56 }
 0x2bf   : > { %v18763_v60 = vadd.f32 %v15419_v19, %v5788_v9  ;;  %v5787_v29 = vadd.f32 %v5684_v21, %v18473_v47  ;;  %15999 = vmatprep.subr.msk.mxu0 %vm446_vm0, %v18748_v61  ;;  %v15422_v42 = vpop.f32.mrf.mxu0  ;;  %15757 = vmatmul.mubr.msk.f32.gmra.mxu0 %vm325_vm1, %v8626_v7  ;;  %v8158_v47 = vld [vmem:[%s16268_s29 + $0x66] sm:$0xff]  ;;  %v8160_v9 = vld [vmem:[%s16268_s29 + $0x76] sm:$0xff]  ;;  %v8161_v21 = vld [vmem:[%s16268_s29 + $0x7e] sm:$0xff] }
 0x2c0   : > { %v15360_v20 = vpop.f32.mrf.mxu1  ;;  %15695 = vmatmul.mubr.msk.f32.gmra.mxu1 %vm325_vm1, %v8156_v54  ;;  %15759 = vmatprep.mubr.msk.f32.mxu0 %vm325_vm1, %v8627_v27  ;;  %v8630_v54 = vld [vmem:[%s16268_s29 + $0x77] sm:$0xff] }
 0x2c1   : > { %v18772_v1 = vadd.f32 %v6154_v35, %v5787_v29  ;;  %v5790_v53 = vadd.f32 %v15360_v20, %v18481_v0  ;;  %15697 = vmatprep.mubr.msk.f32.mxu1 %vm325_vm1, %v8157_v44  ;;  %v6164_v13 = vpop.f32.mrf.mxu0  ;;  %v8631_v35 = vld [vmem:[%s16268_s29 + $0x7f] sm:$0xff] }
 0x2c2   : > { %v5694_v14 = vpop.f32.mrf.mxu1 }
 0x2c3   : > { %v18781_v37 = vadd.f32 %v15422_v42, %v5790_v53  ;;  %v5789_v30 = vadd.f32 %v5694_v14, %v18487_v63  ;;  %v15425_v0 = vpop.f32.mrf.mxu0  ;;  %15760 = vmatmul.mubr.msk.f32.gmra.mxu0 %vm325_vm1, %v8628_v15  ;;  %v8162_v53 = vld [vmem:[%s16268_s29 + $0x86] sm:$0xff]  ;;  %v8163_v14 = vld [vmem:[%s16268_s29 + $0x8e] sm:$0xff] }
 0x2c4   : > { %v15363_v16 = vpop.f32.mrf.mxu1  ;;  %15698 = vmatmul.mubr.msk.f32.gmra.mxu1 %vm325_vm1, %v8158_v47  ;;  %15762 = vmatprep.mubr.msk.f32.mxu0 %vm325_vm1, %v8629_v40  ;;  %v8632_v47 = vld [vmem:[%s16268_s29 + $0x87] sm:$0xff] }
 0x2c5   : > { %v18786_v52 = vadd.f32 %v6164_v13, %v5789_v30  ;;  %v5792_v19 = vadd.f32 %v15363_v16, %v18495_v8  ;;  %15700 = vmatprep.mubr.msk.f32.mxu1 %vm325_vm1, %v8159_v26  ;;  %v6174_v63 = vpop.f32.mrf.mxu0  ;;  %v8633_v13 = vld [vmem:[%s16268_s29 + $0x8f] sm:$0xff] }
 0x2c6   : > { %v5704_v7 = vpop.f32.mrf.mxu1 }
 0x2c7   : > { %v18795_v44 = vadd.f32 %v15425_v0, %v5792_v19  ;;  %v5791_v27 = vadd.f32 %v5704_v7, %v18501_v36  ;;  %v15428_v8 = vpop.f32.mrf.mxu0  ;;  %15763 = vmatmul.mubr.msk.f32.gmra.mxu0 %vm325_vm1, %v8630_v54  ;;  %v8164_v19 = vld [vmem:[%s16268_s29 + $0x96] sm:$0xff]  ;;  %v8165_v7 = vld [vmem:[%s16268_s29 + $0x9e] sm:$0xff] }
 0x2c8   : > { %v15366_v29 = vpop.f32.mrf.mxu1  ;;  %15701 = vmatmul.mubr.msk.f32.gmra.mxu1 %vm325_vm1, %v8160_v9  ;;  %15765 = vmatprep.mubr.msk.f32.mxu0 %vm325_vm1, %v8631_v35  ;;  %v8634_v9 = vld [vmem:[%s16268_s29 + $0x97] sm:$0xff] }
 0x2c9   : > { %v18800_v20 = vadd.f32 %v6174_v63, %v5791_v27  ;;  %v5794_v42 = vadd.f32 %v15366_v29, %v18509_v48  ;;  %15703 = vmatprep.mubr.msk.f32.mxu1 %vm325_vm1, %v8161_v21  ;;  %v6184_v36 = vpop.f32.mrf.mxu0  ;;  %v8635_v63 = vld [vmem:[%s16268_s29 + $0x9f] sm:$0xff] }
 0x2ca   : > { %v5714_v15 = vpop.f32.mrf.mxu1 }
 0x2cb   : > { %v18809_v26 = vadd.f32 %v15428_v8, %v5794_v42  ;;  %v5793_v40 = vadd.f32 %v5714_v15, %v18515_v34  ;;  %v15431_v48 = vpop.f32.mrf.mxu0  ;;  %15766 = vmatmul.mubr.msk.f32.gmra.mxu0 %vm325_vm1, %v8632_v47  ;;  %v8166_v42 = vld [vmem:[%s16268_s29 + $0xa6] sm:$0xff]  ;;  %v8167_v15 = vld [vmem:[%s16268_s29 + $0xae] sm:$0xff] }
 0x2cc   : > { %v15369_v30 = vpop.f32.mrf.mxu1  ;;  %15704 = vmatmul.mubr.msk.f32.gmra.mxu1 %vm325_vm1, %v8162_v53  ;;  %15768 = vmatprep.mubr.msk.f32.mxu0 %vm325_vm1, %v8633_v13  ;;  %v8636_v53 = vld [vmem:[%s16268_s29 + $0xa7] sm:$0xff] }
 0x2cd   : > { %v18814_v16 = vadd.f32 %v6184_v36, %v5793_v40  ;;  %v5796_v0 = vadd.f32 %v15369_v30, %v18523_v18  ;;  %15706 = vmatprep.mubr.msk.f32.mxu1 %vm325_vm1, %v8163_v14  ;;  %v6194_v34 = vpop.f32.mrf.mxu0  ;;  %v8637_v36 = vld [vmem:[%s16268_s29 + $0xaf] sm:$0xff] }
 0x2ce   : > { %v5724_v54 = vpop.f32.mrf.mxu1 }
 0x2cf   : > { %v18823_v21 = vadd.f32 %v15431_v48, %v5796_v0  ;;  %v5795_v35 = vadd.f32 %v5724_v54, %v18529_v55  ;;  %v15434_v18 = vpop.f32.mrf.mxu0  ;;  %15769 = vmatmul.mubr.msk.f32.gmra.mxu0 %vm325_vm1, %v8634_v9  ;;  %v8168_v0 = vld [vmem:[%s16268_s29 + $0xb6] sm:$0xff]  ;;  %v8169_v54 = vld [vmem:[%s16268_s29 + $0xbe] sm:$0xff] }
 0x2d0   : > { %v15372_v27 = vpop.f32.mrf.mxu1  ;;  %15707 = vmatmul.mubr.msk.f32.gmra.mxu1 %vm325_vm1, %v8164_v19  ;;  %15771 = vmatprep.mubr.msk.f32.mxu0 %vm325_vm1, %v8635_v63  ;;  %v8638_v19 = vld [vmem:[%s16268_s29 + $0xb7] sm:$0xff] }
 0x2d1   : > { %v18828_v29 = vadd.f32 %v6194_v34, %v5795_v35  ;;  %v5798_v8 = vadd.f32 %v15372_v27, %v18537_v23  ;;  %15709 = vmatprep.mubr.msk.f32.mxu1 %vm325_vm1, %v8165_v7  ;;  %v6204_v55 = vpop.f32.mrf.mxu0  ;;  %v8639_v34 = vld [vmem:[%s16268_s29 + $0xbf] sm:$0xff] }
 0x2d2   : > { %v5734_v47 = vpop.f32.mrf.mxu1 }
 0x2d3   : > { %v18837_v14 = vadd.f32 %v15434_v18, %v5798_v8  ;;  %v5797_v13 = vadd.f32 %v5734_v47, %v18543_v50  ;;  %v15437_v23 = vpop.f32.mrf.mxu0  ;;  %15772 = vmatmul.mubr.msk.f32.gmra.mxu0 %vm325_vm1, %v8636_v53  ;;  %v8170_v8 = vld [vmem:[%s16268_s29 + $0xc6] sm:$0xff]  ;;  %v8171_v47 = vld [vmem:[%s16268_s29 + $0xce] sm:$0xff] }
 0x2d4   : > { %v15375_v40 = vpop.f32.mrf.mxu1  ;;  %15710 = vmatmul.mubr.msk.f32.gmra.mxu1 %vm325_vm1, %v8166_v42  ;;  %15774 = vmatprep.mubr.msk.f32.mxu0 %vm325_vm1, %v8637_v36  ;;  %v8640_v42 = vld [vmem:[%s16268_s29 + $0xc7] sm:$0xff] }
 0x2d5   : > { %v18842_v30 = vadd.f32 %v6204_v55, %v5797_v13  ;;  %v5800_v48 = vadd.f32 %v15375_v40, %v18551_v49  ;;  %15712 = vmatprep.mubr.msk.f32.mxu1 %vm325_vm1, %v8167_v15  ;;  %v6214_v50 = vpop.f32.mrf.mxu0  ;;  %v8641_v55 = vld [vmem:[%s16268_s29 + $0xcf] sm:$0xff] }
 0x2d6   : > { %v5744_v9 = vpop.f32.mrf.mxu1 }
 0x2d7   : > { %v18851_v7 = vadd.f32 %v15437_v23, %v5800_v48  ;;  %v5799_v63 = vadd.f32 %v5744_v9, %v18557_v43  ;;  %v15440_v49 = vpop.f32.mrf.mxu0  ;;  %15775 = vmatmul.mubr.msk.f32.gmra.mxu0 %vm325_vm1, %v8638_v19  ;;  %v8172_v48 = vld [vmem:[%s16268_s29 + $0xd6] sm:$0xff]  ;;  %v8173_v9 = vld [vmem:[%s16268_s29 + $0xde] sm:$0xff] }
 0x2d8   : > { %v15378_v35 = vpop.f32.mrf.mxu1  ;;  %15713 = vmatmul.mubr.msk.f32.gmra.mxu1 %vm325_vm1, %v8168_v0  ;;  %15777 = vmatprep.mubr.msk.f32.mxu0 %vm325_vm1, %v8639_v34  ;;  %v8642_v0 = vld [vmem:[%s16268_s29 + $0xd7] sm:$0xff] }
 0x2d9   : > { %v18856_v27 = vadd.f32 %v6214_v50, %v5799_v63  ;;  %v5802_v18 = vadd.f32 %v15378_v35, %v18565_v57  ;;  %15715 = vmatprep.mubr.msk.f32.mxu1 %vm325_vm1, %v8169_v54  ;;  %v6224_v43 = vpop.f32.mrf.mxu0  ;;  %v8643_v50 = vld [vmem:[%s16268_s29 + $0xdf] sm:$0xff] }
 0x2da   : > { %v5754_v53 = vpop.f32.mrf.mxu1 }
 0x2db   : > { %v18865_v15 = vadd.f32 %v15440_v49, %v5802_v18  ;;  %v5801_v36 = vadd.f32 %v5754_v53, %v18571_v33  ;;  %v15507_v57 = vpop.f32.mrf.mxu0  ;;  %15778 = vmatmul.mubr.msk.f32.gmra.mxu0 %vm325_vm1, %v8640_v42  ;;  %v8174_v18 = vld [vmem:[%s16268_s29 + $0xe6] sm:$0xff]  ;;  %v8175_v53 = vld [vmem:[%s16268_s29 + $0xee] sm:$0xff] }
 0x2dc   : > { %v15445_v13 = vpop.f32.mrf.mxu1  ;;  %15716 = vmatmul.mubr.msk.f32.gmra.mxu1 %vm325_vm1, %v8170_v8  ;;  %15780 = vmatprep.mubr.msk.f32.mxu0 %vm325_vm1, %v8641_v55  ;;  %v8644_v8 = vld [vmem:[%s16268_s29 + $0xe7] sm:$0xff] }
 0x2dd   : > { %v18870_v40 = vadd.f32 %v6224_v43, %v5801_v36  ;;  %v6704_v23 = vadd.f32 %v15445_v13, %v18579_v45  ;;  %15718 = vmatprep.mubr.msk.f32.mxu1 %vm325_vm1, %v8171_v47  ;;  %v6974_v33 = vpop.f32.mrf.mxu0  ;;  %v8645_v43 = vld [vmem:[%s16268_s29 + $0xef] sm:$0xff] }
 0x2de   : > { %v6504_v19 = vpop.f32.mrf.mxu1 }
 0x2df   : > { %v18879_v54 = vadd.f32 %v15507_v57, %v6704_v23  ;;  %v6703_v34 = vadd.f32 %v6504_v19, %v18585_v58  ;;  %v15510_v45 = vpop.f32.mrf.mxu0  ;;  %15781 = vmatmul.mubr.msk.f32.gmra.mxu0 %vm325_vm1, %v8642_v0  ;;  %v8176_v23 = vld [vmem:[%s16268_s29 + $0xf6] sm:$0xff]  ;;  %v8177_v19 = vld [vmem:[%s16268_s29 + $0xfe] sm:$0xff] }
 0x2e0   : > { %v15448_v63 = vpop.f32.mrf.mxu1  ;;  %15719 = vmatmul.mubr.msk.f32.gmra.mxu1 %vm325_vm1, %v8172_v48  ;;  %15783 = vmatprep.mubr.msk.f32.mxu0 %vm325_vm1, %v8643_v50  ;;  %v8646_v48 = vld [vmem:[%s16268_s29 + $0xf7] sm:$0xff] }
 0x2e1   : > { %v18884_v35 = vadd.f32 %v6974_v33, %v6703_v34  ;;  %v6706_v49 = vadd.f32 %v15448_v63, %v18593_v28  ;;  %15721 = vmatprep.mubr.msk.f32.mxu1 %vm325_vm1, %v8173_v9  ;;  %v6984_v58 = vpop.f32.mrf.mxu0  ;;  %v8647_v33 = vld [vmem:[%s16268_s29 + $0xff] sm:$0xff] }
 0x2e2   : > { %v6514_v42 = vpop.f32.mrf.mxu1 }
 0x2e3   : > { %v18893_v47 = vadd.f32 %v15510_v45, %v6706_v49  ;;  %v6705_v55 = vadd.f32 %v6514_v42, %v18599_v46  ;;  %v15513_v28 = vpop.f32.mrf.mxu0  ;;  %15784 = vmatmul.mubr.msk.f32.gmra.mxu0 %vm325_vm1, %v8644_v8  ;;  %v8178_v49 = vld [vmem:[%s16268_s29 + $0x106] sm:$0xff]  ;;  %v8179_v42 = vld [vmem:[%s16268_s29 + $0x10e] sm:$0xff] }
 0x2e4   : > { %v15451_v36 = vpop.f32.mrf.mxu1  ;;  %15722 = vmatmul.mubr.msk.f32.gmra.mxu1 %vm325_vm1, %v8174_v18  ;;  %15786 = vmatprep.mubr.msk.f32.mxu0 %vm325_vm1, %v8645_v43  ;;  %v8648_v18 = vld [vmem:[%s16268_s29 + $0x107] sm:$0xff] }
 0x2e5   : > { %v18898_v13 = vadd.f32 %v6984_v58, %v6705_v55  ;;  %v6708_v57 = vadd.f32 %v15451_v36, %v18607_v4  ;;  %15724 = vmatprep.mubr.msk.f32.mxu1 %vm325_vm1, %v8175_v53  ;;  %v6994_v46 = vpop.f32.mrf.mxu0  ;;  %v8649_v58 = vld [vmem:[%s16268_s29 + $0x10f] sm:$0xff] }
 0x2e6   : > { %v6524_v0 = vpop.f32.mrf.mxu1 }
 0x2e7   : > { %v18907_v9 = vadd.f32 %v15513_v28, %v6708_v57  ;;  %v6707_v50 = vadd.f32 %v6524_v0, %v18613_v5  ;;  %v15516_v4 = vpop.f32.mrf.mxu0  ;;  %15787 = vmatmul.mubr.msk.f32.gmra.mxu0 %vm325_vm1, %v8646_v48  ;;  %v8180_v57 = vld [vmem:[%s16268_s29 + $0x116] sm:$0xff]  ;;  %v8181_v0 = vld [vmem:[%s16268_s29 + $0x11e] sm:$0xff] }
 0x2e8   : > { %v15454_v34 = vpop.f32.mrf.mxu1  ;;  %15725 = vmatmul.mubr.msk.f32.gmra.mxu1 %vm325_vm1, %v8176_v23  ;;  %15789 = vmatprep.mubr.msk.f32.mxu0 %vm325_vm1, %v8647_v33  ;;  %v8650_v23 = vld [vmem:[%s16268_s29 + $0x117] sm:$0xff] }
 0x2e9   : > { %v18912_v63 = vadd.f32 %v6994_v46, %v6707_v50  ;;  %v6710_v45 = vadd.f32 %v15454_v34, %v18621_v62  ;;  %15727 = vmatprep.mubr.msk.f32.mxu1 %vm325_vm1, %v8177_v19  ;;  %v7004_v5 = vpop.f32.mrf.mxu0  ;;  %v8651_v46 = vld [vmem:[%s16268_s29 + $0x11f] sm:$0xff] }
 0x2ea   : > { %v6534_v8 = vpop.f32.mrf.mxu1 }
 0x2eb   : > { %v18921_v53 = vadd.f32 %v15516_v4, %v6710_v45  ;;  %v6709_v43 = vadd.f32 %v6534_v8, %v18627_v3  ;;  %v15519_v62 = vpop.f32.mrf.mxu0  ;;  %15790 = vmatmul.mubr.msk.f32.gmra.mxu0 %vm325_vm1, %v8648_v18  ;;  %v8182_v45 = vld [vmem:[%s16268_s29 + $0x126] sm:$0xff]  ;;  %v8183_v8 = vld [vmem:[%s16268_s29 + $0x12e] sm:$0xff] }
 0x2ec   : > { %v15457_v55 = vpop.f32.mrf.mxu1  ;;  %15728 = vmatmul.mubr.msk.f32.gmra.mxu1 %vm325_vm1, %v8178_v49  ;;  %15792 = vmatprep.mubr.msk.f32.mxu0 %vm325_vm1, %v8649_v58  ;;  %v8652_v49 = vld [vmem:[%s16268_s29 + $0x127] sm:$0xff] }
 0x2ed   : > { %v18926_v36 = vadd.f32 %v7004_v5, %v6709_v43  ;;  %v6712_v28 = vadd.f32 %v15457_v55, %v18635_v41  ;;  %15730 = vmatprep.mubr.msk.f32.mxu1 %vm325_vm1, %v8179_v42  ;;  %v7014_v3 = vpop.f32.mrf.mxu0  ;;  %v8653_v5 = vld [vmem:[%s16268_s29 + $0x12f] sm:$0xff] }
 0x2ee   : > { %v6544_v48 = vpop.f32.mrf.mxu1 }
 0x2ef   : > { %v18935_v19 = vadd.f32 %v15519_v62, %v6712_v28  ;;  %v6711_v33 = vadd.f32 %v6544_v48, %v18641_v6  ;;  %v15522_v41 = vpop.f32.mrf.mxu0  ;;  %15793 = vmatmul.mubr.msk.f32.gmra.mxu0 %vm325_vm1, %v8650_v23  ;;  %v8184_v28 = vld [vmem:[%s16268_s29 + $0x136] sm:$0xff]  ;;  %v8185_v48 = vld [vmem:[%s16268_s29 + $0x13e] sm:$0xff] }
 0x2f0   : > { %v15460_v50 = vpop.f32.mrf.mxu1  ;;  %15731 = vmatmul.mubr.msk.f32.gmra.mxu1 %vm325_vm1, %v8180_v57  ;;  %15795 = vmatprep.mubr.msk.f32.mxu0 %vm325_vm1, %v8651_v46  ;;  %v8654_v57 = vld [vmem:[%s16268_s29 + $0x137] sm:$0xff] }
 0x2f1   : > { %v18940_v34 = vadd.f32 %v7014_v3, %v6711_v33  ;;  %v6714_v4 = vadd.f32 %v15460_v50, %v18649_v51  ;;  %15733 = vmatprep.mubr.msk.f32.mxu1 %vm325_vm1, %v8181_v0  ;;  %v7024_v6 = vpop.f32.mrf.mxu0  ;;  %v8655_v3 = vld [vmem:[%s16268_s29 + $0x13f] sm:$0xff] }
 0x2f2   : > { %v6554_v18 = vpop.f32.mrf.mxu1 }
 0x2f3   : > { %v18949_v42 = vadd.f32 %v15522_v41, %v6714_v4  ;;  %v6713_v58 = vadd.f32 %v6554_v18, %v18655_v11  ;;  %v15525_v51 = vpop.f32.mrf.mxu0  ;;  %15796 = vmatmul.mubr.msk.f32.gmra.mxu0 %vm325_vm1, %v8652_v49  ;;  %v8186_v4 = vld [vmem:[%s16268_s29 + $0x146] sm:$0xff]  ;;  %v8187_v18 = vld [vmem:[%s16268_s29 + $0x14e] sm:$0xff] }
 0x2f4   : > { %v15463_v43 = vpop.f32.mrf.mxu1  ;;  %15734 = vmatmul.mubr.msk.f32.gmra.mxu1 %vm325_vm1, %v8182_v45  ;;  %15798 = vmatprep.mubr.msk.f32.mxu0 %vm325_vm1, %v8653_v5  ;;  %v8656_v45 = vld [vmem:[%s16268_s29 + $0x147] sm:$0xff] }
 0x2f5   : > { %v18954_v55 = vadd.f32 %v7024_v6, %v6713_v58  ;;  %v6716_v62 = vadd.f32 %v15463_v43, %v18663_v32  ;;  %15736 = vmatprep.mubr.msk.f32.mxu1 %vm325_vm1, %v8183_v8  ;;  %v7034_v11 = vpop.f32.mrf.mxu0  ;;  %v8657_v6 = vld [vmem:[%s16268_s29 + $0x14f] sm:$0xff] }
 0x2f6   : > { %v6564_v23 = vpop.f32.mrf.mxu1 }
 0x2f7   : > { %v18963_v0 = vadd.f32 %v15525_v51, %v6716_v62  ;;  %v6715_v46 = vadd.f32 %v6564_v23, %v18669_v2  ;;  %v15528_v32 = vpop.f32.mrf.mxu0  ;;  %15799 = vmatmul.mubr.msk.f32.gmra.mxu0 %vm325_vm1, %v8654_v57  ;;  %v8188_v62 = vld [vmem:[%s16268_s29 + $0x156] sm:$0xff]  ;;  %v8189_v23 = vld [vmem:[%s16268_s29 + $0x15e] sm:$0xff] }
 0x2f8   : > { %v15466_v33 = vpop.f32.mrf.mxu1  ;;  %15737 = vmatmul.mubr.msk.f32.gmra.mxu1 %vm325_vm1, %v8184_v28  ;;  %15801 = vmatprep.mubr.msk.f32.mxu0 %vm325_vm1, %v8655_v3  ;;  %v8658_v28 = vld [vmem:[%s16268_s29 + $0x157] sm:$0xff] }
 0x2f9   : > { %v18968_v50 = vadd.f32 %v7034_v11, %v6715_v46  ;;  %v6718_v41 = vadd.f32 %v15466_v33, %v18677_v17  ;;  %15739 = vmatprep.mubr.msk.f32.mxu1 %vm325_vm1, %v8185_v48  ;;  %v7044_v2 = vpop.f32.mrf.mxu0  ;;  %v8659_v11 = vld [vmem:[%s16268_s29 + $0x15f] sm:$0xff] }
 0x2fa   : > { %v6574_v49 = vpop.f32.mrf.mxu1 }
 0x2fb   : > { %v18977_v8 = vadd.f32 %v15528_v32, %v6718_v41  ;;  %v6717_v5 = vadd.f32 %v6574_v49, %v18683_v39  ;;  %v15531_v17 = vpop.f32.mrf.mxu0  ;;  %15802 = vmatmul.mubr.msk.f32.gmra.mxu0 %vm325_vm1, %v8656_v45  ;;  %v8190_v41 = vld [vmem:[%s16268_s29 + $0x166] sm:$0xff]  ;;  %v8191_v49 = vld [vmem:[%s16268_s29 + $0x16e] sm:$0xff] }
 0x2fc   : > { %v15469_v58 = vpop.f32.mrf.mxu1  ;;  %15740 = vmatmul.mubr.msk.f32.gmra.mxu1 %vm325_vm1, %v8186_v4  ;;  %15804 = vmatprep.mubr.msk.f32.mxu0 %vm325_vm1, %v8657_v6  ;;  %v8660_v4 = vld [vmem:[%s16268_s29 + $0x167] sm:$0xff] }
 0x2fd   : > { %v18982_v43 = vadd.f32 %v7044_v2, %v6717_v5  ;;  %v6720_v51 = vadd.f32 %v15469_v58, %v18691_v24  ;;  %15742 = vmatprep.mubr.msk.f32.mxu1 %vm325_vm1, %v8187_v18  ;;  %v7054_v39 = vpop.f32.mrf.mxu0  ;;  %v8661_v2 = vld [vmem:[%s16268_s29 + $0x16f] sm:$0xff] }
 0x2fe   : > { %v6584_v57 = vpop.f32.mrf.mxu1 }
 0x2ff   : > { %v18991_v48 = vadd.f32 %v15531_v17, %v6720_v51  ;;  %v6719_v3 = vadd.f32 %v6584_v57, %v18697_v59  ;;  %v15534_v24 = vpop.f32.mrf.mxu0  ;;  %15805 = vmatmul.mubr.msk.f32.gmra.mxu0 %vm325_vm1, %v8658_v28  ;;  %v8192_v51 = vld [vmem:[%s16268_s29 + $0x176] sm:$0xff]  ;;  %v9093_v57 = vld [vmem:[%s16268_s29 + $0x40] sm:$0xff] }
 0x300   : > { %v15472_v46 = vpop.f32.mrf.mxu1  ;;  %15743 = vmatmul.mubr.msk.f32.gmra.mxu1 %vm325_vm1, %v8188_v62  ;;  %15807 = vmatprep.mubr.msk.f32.mxu0 %vm325_vm1, %v8659_v11  ;;  %v8662_v62 = vld [vmem:[%s16268_s29 + $0x177] sm:$0xff] }
 0x301   : > { %v18996_v33 = vadd.f32 %v7054_v39, %v6719_v3  ;;  %v6722_v32 = vadd.f32 %v15472_v46, %v18706_v38  ;;  %15745 = vmatprep.mubr.msk.f32.mxu1 %vm325_vm1, %v8189_v23  ;;  %v7064_v59 = vpop.f32.mrf.mxu0  ;;  %v9563_v39 = vld [vmem:[%s16268_s29 + $0x50] sm:$0xff] }
 0x302   : > { %v6594_v45 = vpop.f32.mrf.mxu1 }
 0x303   : > { %v19005_v18 = vadd.f32 %v15534_v24, %v6722_v32  ;;  %v6721_v6 = vadd.f32 %v6594_v45, %v18712_v31  ;;  %v15537_v38 = vpop.f32.mrf.mxu0  ;;  %15808 = vmatmul.mubr.msk.f32.gmra.mxu0 %vm325_vm1, %v8660_v4  ;;  %v9094_v32 = vld [vmem:[%s16268_s29 + $0x48] sm:$0xff] }
 0x304   : > { %v15475_v5 = vpop.f32.mrf.mxu1  ;;  %15746 = vmatmul.mubr.msk.f32.gmra.mxu1 %vm325_vm1, %v8190_v41  ;;  %15810 = vmatprep.mubr.msk.f32.mxu0 %vm325_vm1, %v8661_v2  ;;  %v9564_v41 = vld [vmem:[%s16268_s29 + $0x58] sm:$0xff] }
 0x305   : > { %v19010_v58 = vadd.f32 %v7064_v59, %v6721_v6  ;;  %v6724_v17 = vadd.f32 %v15475_v5, %v18721_v10  ;;  %15748 = vmatprep.mubr.msk.f32.mxu1 %vm325_vm1, %v8191_v49  ;;  %v7074_v31 = vpop.f32.mrf.mxu0  ;;  %v9565_v49 = vld [vmem:[%s16268_s29 + $0x60] sm:$0xff] }
 0x306   : > { %v6604_v28 = vpop.f32.mrf.mxu1  ;;  %v19045_v5 = vld [vmem:[%s20447_s1 + $0x60] sm:$0xf] }
 0x307   : > { %v19019_v23 = vadd.f32 %v15537_v38, %v6724_v17  ;;  %v6723_v11 = vadd.f32 %v6604_v28, %v18726_v12  ;;  %v15540_v46 = vpop.f32.mrf.mxu0  ;;  %15811 = vmatmul.mubr.msk.f32.gmra.mxu0 %vm325_vm1, %v8662_v62  ;;  %v9566_v17 = vld [vmem:[%s16268_s29 + $0x68] sm:$0xff]  ;;  %v9567_v28 = vld [vmem:[%s16268_s29 + $0x70] sm:$0xff] }
 0x308   : > { %v15478_v3 = vpop.f32.mrf.mxu1  ;;  %15749 = vmatmul.mubr.msk.f32.gmra.mxu1 %vm325_vm1, %v8192_v51  ;;  %15877 = vmatprep.mubr.msk.f32.mxu0 %vm325_vm1, %v9563_v39 }
 0x309   : > { %v19024_v10 = vadd.f32 %v7074_v31, %v6723_v11  ;;  %v6726_v24 = vadd.f32 %v15478_v3, %v18733_v22  ;;  %15815 = vmatprep.mubr.msk.f32.mxu1 %vm325_vm1, %v9093_v57  ;;  %v7084_v45 = vpop.f32.mrf.mxu0  ;;  %v19040_v22 = vld [vmem:[%s20447_s1 + $0x5c] sm:$0xf] }
 0x30a   : > { %v6614_v4 = vpop.f32.mrf.mxu1 }
 0x30b   : > { %v19031_v12 = vadd.f32 %v15540_v46, %v6726_v24  ;;  %v6725_v59 = vadd.f32 %v6614_v4, %v18750_v25  ;;  %v15543_v6 = vpop.f32.mrf.mxu0  ;;  %15878 = vmatmul.mubr.msk.f32.vlgmr.msra.gmra.mxu0 %vm325_vm1, %v9564_v41  ;;  %v9569_v46 = vld [vmem:[%s16268_s29 + $0x80] sm:$0xff] }
 0x30c   : > { %v15481_v2 = vpop.f32.mrf.mxu1  ;;  %15816 = vmatmul.mubr.msk.f32.vlgmr.msra.gmra.mxu1 %vm325_vm1, %v9094_v32  ;;  %16000 = vmatpush3.msk.msra.mxu0 %vm446_vm0, %v18748_v61 }
 0x30d   : > { %v19047_v38 = vadd.f32 %v7084_v45, %v6725_v59  ;;  %v6728_v25 = vadd.f32 %v15481_v2, %v18763_v60  ;;  %15938 = vmatpush3.msk.msra.mxu1 %vm446_vm0, %v18743_v56  ;;  %v7094_v62 = vpop.f32.mrf.mxu0  ;;  %15818 = vmatprep.mubr.msk.f32.mxu1 %vm325_vm1, %v9563_v39  ;;  %v9570_v59 = vld [vmem:[%s16268_s29 + $0x88] sm:$0xff] }
 0x30e   : > { %v6624_v51 = vpop.f32.mrf.mxu1  ;;  %15880 = vmatprep.mubr.msk.f32.mxu0 %vm325_vm1, %v9565_v49  ;;  %16061 = vmatprep.subr.msk.mxu1 %vm446_vm0, %v19040_v22 }
 0x30f   : > { %v19058_v31 = vadd.f32 %v15543_v6, %v6728_v25  ;;  %v6727_v60 = vadd.f32 %v6624_v51, %v18772_v1  ;;  %16123 = vmatprep.subr.msk.mxu0 %vm446_vm0, %v19045_v5  ;;  %v15546_v61 = vpop.f32.mrf.mxu0  ;;  %15881 = vmatmul.mubr.msk.f32.gmra.mxu0 %vm325_vm1, %v9566_v17  ;;  %v9568_v1 = vld [vmem:[%s16268_s29 + $0x78] sm:$0xff] }
 0x310   : > { %v15484_v56 = vpop.f32.mrf.mxu1  ;;  %15819 = vmatmul.mubr.msk.f32.gmra.mxu1 %vm325_vm1, %v9564_v41  ;;  %15883 = vmatprep.mubr.msk.f32.mxu0 %vm325_vm1, %v9567_v28 }
 0x311   : > { %v19067_v57 = vadd.f32 %v7094_v62, %v6727_v60  ;;  %v6730_v39 = vadd.f32 %v15484_v56, %v18781_v37  ;;  %15821 = vmatprep.mubr.msk.f32.mxu1 %vm325_vm1, %v9565_v49  ;;  %v7104_v3 = vpop.f32.mrf.mxu0 }
 0x312   : > { %v6634_v11 = vpop.f32.mrf.mxu1 }
 0x313   : > { %v19074_v24 = vadd.f32 %v15546_v61, %v6730_v39  ;;  %v6729_v32 = vadd.f32 %v6634_v11, %v18786_v52  ;;  %v15549_v4 = vpop.f32.mrf.mxu0  ;;  %15884 = vmatmul.mubr.msk.f32.gmra.mxu0 %vm325_vm1, %v9568_v1  ;;  %v9571_v52 = vld [vmem:[%s16268_s29 + $0x90] sm:$0xff] }
 0x314   : > { %v15487_v41 = vpop.f32.mrf.mxu1  ;;  %15822 = vmatmul.mubr.msk.f32.gmra.mxu1 %vm325_vm1, %v9566_v17  ;;  %15886 = vmatprep.mubr.msk.f32.mxu0 %vm325_vm1, %v9569_v46 }
 0x315   : > { %v19079_v37 = vadd.f32 %v7104_v3, %v6729_v32  ;;  %v6732_v45 = vadd.f32 %v15487_v41, %v18795_v44  ;;  %15824 = vmatprep.mubr.msk.f32.mxu1 %vm325_vm1, %v9567_v28  ;;  %v7114_v2 = vpop.f32.mrf.mxu0  ;;  %v9572_v28 = vld [vmem:[%s16268_s29 + $0x98] sm:$0xff] }
 0x316   : > { %v6644_v49 = vpop.f32.mrf.mxu1 }
 0x317   : > { %v19086_v6 = vadd.f32 %v15549_v4, %v6732_v45  ;;  %v6731_v25 = vadd.f32 %v6644_v49, %v18800_v20  ;;  %v15552_v51 = vpop.f32.mrf.mxu0  ;;  %15887 = vmatmul.mubr.msk.f32.gmra.mxu0 %vm325_vm1, %v9570_v59  ;;  %v9573_v20 = vld [vmem:[%s16268_s29 + $0xa0] sm:$0xff] }
 0x318   : > { %v15490_v17 = vpop.f32.mrf.mxu1  ;;  %15825 = vmatmul.mubr.msk.f32.gmra.mxu1 %vm325_vm1, %v9568_v1  ;;  %15889 = vmatprep.mubr.msk.f32.mxu0 %vm325_vm1, %v9571_v52 }
 0x319   : > { %v19091_v44 = vadd.f32 %v7114_v2, %v6731_v25  ;;  %v6734_v62 = vadd.f32 %v15490_v17, %v18809_v26  ;;  %15827 = vmatprep.mubr.msk.f32.mxu1 %vm325_vm1, %v9569_v46  ;;  %v7124_v56 = vpop.f32.mrf.mxu0  ;;  %v9574_v46 = vld [vmem:[%s16268_s29 + $0xa8] sm:$0xff] }
 0x31a   : > { %v6654_v60 = vpop.f32.mrf.mxu1 }
 0x31b   : > { %v19098_v61 = vadd.f32 %v15552_v51, %v6734_v62  ;;  %v6733_v39 = vadd.f32 %v6654_v60, %v18814_v16  ;;  %v15555_v11 = vpop.f32.mrf.mxu0  ;;  %15890 = vmatmul.mubr.msk.f32.gmra.mxu0 %vm325_vm1, %v9572_v28  ;;  %v9575_v16 = vld [vmem:[%s16268_s29 + $0xb0] sm:$0xff] }
 0x31c   : > { %v15493_v1 = vpop.f32.mrf.mxu1  ;;  %15828 = vmatmul.mubr.msk.f32.gmra.mxu1 %vm325_vm1, %v9570_v59  ;;  %15892 = vmatprep.mubr.msk.f32.mxu0 %vm325_vm1, %v9573_v20 }
 0x31d   : > { %v19103_v26 = vadd.f32 %v7124_v56, %v6733_v39  ;;  %v6736_v3 = vadd.f32 %v15493_v1, %v18823_v21  ;;  %15830 = vmatprep.mubr.msk.f32.mxu1 %vm325_vm1, %v9571_v52  ;;  %v7134_v41 = vpop.f32.mrf.mxu0  ;;  %v9576_v52 = vld [vmem:[%s16268_s29 + $0xb8] sm:$0xff] }
 0x31e   : > { %v6664_v32 = vpop.f32.mrf.mxu1 }
 0x31f   : > { %v19110_v4 = vadd.f32 %v15555_v11, %v6736_v3  ;;  %v6735_v45 = vadd.f32 %v6664_v32, %v18828_v29  ;;  %v15558_v49 = vpop.f32.mrf.mxu0  ;;  %15893 = vmatmul.mubr.msk.f32.gmra.mxu0 %vm325_vm1, %v9574_v46  ;;  %v9577_v29 = vld [vmem:[%s16268_s29 + $0xc0] sm:$0xff] }
 0x320   : > { %v15496_v59 = vpop.f32.mrf.mxu1  ;;  %15831 = vmatmul.mubr.msk.f32.gmra.mxu1 %vm325_vm1, %v9572_v28  ;;  %15895 = vmatprep.mubr.msk.f32.mxu0 %vm325_vm1, %v9575_v16 }
 0x321   : > { %v19115_v21 = vadd.f32 %v7134_v41, %v6735_v45  ;;  %v6738_v2 = vadd.f32 %v15496_v59, %v18837_v14  ;;  %15833 = vmatprep.mubr.msk.f32.mxu1 %vm325_vm1, %v9573_v20  ;;  %v7144_v17 = vpop.f32.mrf.mxu0  ;;  %v9578_v20 = vld [vmem:[%s16268_s29 + $0xc8] sm:$0xff]  ;;  %v9580_v45 = vld [vmem:[%s16268_s29 + $0xd8] sm:$0xff] }
 0x322   : > { %v6674_v25 = vpop.f32.mrf.mxu1 }
 0x323   : > { %v19122_v51 = vadd.f32 %v15558_v49, %v6738_v2  ;;  %v6737_v62 = vadd.f32 %v6674_v25, %v18842_v30  ;;  %v15561_v60 = vpop.f32.mrf.mxu0  ;;  %15896 = vmatmul.mubr.msk.f32.gmra.mxu0 %vm325_vm1, %v9576_v52  ;;  %v9579_v30 = vld [vmem:[%s16268_s29 + $0xd0] sm:$0xff]  ;;  %v9581_v49 = vld [vmem:[%s16268_s29 + $0xe0] sm:$0xff]  ;;  %v16208_v2 = vmov 0  }
 0x324   : > { %v15499_v28 = vpop.f32.mrf.mxu1  ;;  %15834 = vmatmul.mubr.msk.f32.gmra.mxu1 %vm325_vm1, %v9574_v46  ;;  %15898 = vmatprep.mubr.msk.f32.mxu0 %vm325_vm1, %v9577_v29 }
 0x325   : > { %v19127_v14 = vadd.f32 %v7144_v17, %v6737_v62  ;;  %v6740_v56 = vadd.f32 %v15499_v28, %v18851_v7  ;;  %15836 = vmatprep.mubr.msk.f32.mxu1 %vm325_vm1, %v9575_v16  ;;  %v7154_v1 = vpop.f32.mrf.mxu0  ;;  %v11954_v7 = vld [vmem:[%s20448_s2] sm:$0xff]  ;;  %16198 = vset.pattern.permute.xlu0 %v16208_v2  ;;  %v11955_v62 = vld [vmem:[%s20448_s2 + $0x8] sm:$0xff] }
 0x326   : > { %v6684_v39 = vpop.f32.mrf.mxu1  ;;  %16199 = vset.pattern.permute.xlu1 %v16208_v2  ;;  %11996 = vperm.xlu0 %16198, %v11954_v7  }
 0x327   : > { %v19134_v11 = vadd.f32 %v15561_v60, %v6740_v56  ;;  %v6739_v3 = vadd.f32 %v6684_v39, %v18856_v27  ;;  %v15564_v32 = vpop.f32.mrf.mxu0  ;;  %15899 = vmatmul.mubr.msk.f32.gmra.mxu0 %vm325_vm1, %v9578_v20  ;;  %v9583_v39 = vld [vmem:[%s16268_s29 + $0xf0] sm:$0xff] }
 0x328   : > { %v15502_v46 = vpop.f32.mrf.mxu1  ;;  %15837 = vmatmul.mubr.msk.f32.gmra.mxu1 %vm325_vm1, %v9576_v52  ;;  %15901 = vmatprep.mubr.msk.f32.mxu0 %vm325_vm1, %v9579_v30 }
 0x329   : > { %v19142_v41 = vadd.f32 %v7154_v1, %v6739_v3  ;;  %v6742_v16 = vadd.f32 %v15502_v46, %v18865_v15  ;;  %15839 = vmatprep.mubr.msk.f32.mxu1 %vm325_vm1, %v9577_v29  ;;  %v7164_v59 = vpop.f32.mrf.mxu0  ;;  %v11956_v29 = vld [vmem:[%s20448_s2 + $0x10] sm:$0xff] }
 0x32a   : > { %v6694_v27 = vpop.f32.mrf.mxu1  ;;  %12006 = vperm.xlu1 %16199, %v11956_v29   ;;  %12001 = vperm.xlu0 %16198, %v11955_v62  }
 0x32b   : > { %v19149_v52 = vadd.f32 %v15564_v32, %v6742_v16  ;;  %v6741_v25 = vadd.f32 %v6694_v27, %v18870_v40  ;;  %v15631_v15 = vpop.f32.mrf.mxu0  ;;  %15902 = vmatmul.mubr.msk.f32.gmra.mxu0 %vm325_vm1, %v9580_v45  ;;  %v9582_v40 = vld [vmem:[%s16268_s29 + $0xe8] sm:$0xff] }
 0x32c   : > { %v15569_v17 = vpop.f32.mrf.mxu1  ;;  %15840 = vmatmul.mubr.msk.f32.gmra.mxu1 %vm325_vm1, %v9578_v20  ;;  %15904 = vmatprep.mubr.msk.f32.mxu0 %vm325_vm1, %v9581_v49 }
 0x32d   : > { %v19160_v28 = vadd.f32 %v7164_v59, %v6741_v25  ;;  %v7644_v60 = vadd.f32 %v15569_v17, %v18879_v54  ;;  %15842 = vmatprep.mubr.msk.f32.mxu1 %vm325_vm1, %v9579_v30  ;;  %v7914_v20 = vpop.f32.mrf.mxu0  ;;  %v11957_v54 = vld [vmem:[%s20448_s2 + $0x18] sm:$0xff]  ;;  %v11958_v30 = vld [vmem:[%s20448_s2 + $0x20] sm:$0xff] }
 0x32e   : > { %v7444_v56 = vpop.f32.mrf.mxu1  ;;  %v9585_v59 = vld [vmem:[%s16268_s29 + $0x100] sm:$0xff]  ;;  %12011 = vperm.xlu1 %16199, %v11957_v54   ;;  %12016 = vperm.xlu0 %16198, %v11958_v30  }
 0x32f   : > { %v19167_v1 = vadd.f32 %v15631_v15, %v7644_v60  ;;  %v7643_v3 = vadd.f32 %v7444_v56, %v18884_v35  ;;  %v15634_v32 = vpop.f32.mrf.mxu0  ;;  %15905 = vmatmul.mubr.msk.f32.gmra.mxu0 %vm325_vm1, %v9582_v40  ;;  %v9584_v35 = vld [vmem:[%s16268_s29 + $0xf8] sm:$0xff]  ;;  %v9587_v56 = vld [vmem:[%s16268_s29 + $0x110] sm:$0xff] }
 0x330   : > { %v15572_v46 = vpop.f32.mrf.mxu1  ;;  %15843 = vmatmul.mubr.msk.f32.gmra.mxu1 %vm325_vm1, %v9580_v45  ;;  %15907 = vmatprep.mubr.msk.f32.mxu0 %vm325_vm1, %v9583_v39 }
 0x331   : > { %v19178_v7 = vadd.f32 %v7914_v20, %v7643_v3  ;;  %v7646_v16 = vadd.f32 %v15572_v46, %v18893_v47  ;;  %15845 = vmatprep.mubr.msk.f32.mxu1 %vm325_vm1, %v9581_v49  ;;  %v7924_v27 = vpop.f32.mrf.mxu0  ;;  %v11959_v47 = vld [vmem:[%s20448_s2 + $0x28] sm:$0xff]  ;;  %v11960_v49 = vld [vmem:[%s20448_s2 + $0x30] sm:$0xff] }
 0x332   : > { %v7454_v45 = vpop.f32.mrf.mxu1  ;;  %12021 = vperm.xlu1 %16199, %v11959_v47   ;;  %12026 = vperm.xlu0 %16198, %v11960_v49  }
 0x333   : > { %v19185_v2 = vadd.f32 %v15634_v32, %v7646_v16  ;;  %v7645_v25 = vadd.f32 %v7454_v45, %v18898_v13  ;;  %v15637_v15 = vpop.f32.mrf.mxu0  ;;  %15908 = vmatmul.mubr.msk.f32.gmra.mxu0 %vm325_vm1, %v9584_v35  ;;  %v9586_v13 = vld [vmem:[%s16268_s29 + $0x108] sm:$0xff]  ;;  %v9589_v45 = vld [vmem:[%s16268_s29 + $0x120] sm:$0xff] }
 0x334   : > { %v15575_v17 = vpop.f32.mrf.mxu1  ;;  %15846 = vmatmul.mubr.msk.f32.gmra.mxu1 %vm325_vm1, %v9582_v40  ;;  %15910 = vmatprep.mubr.msk.f32.mxu0 %vm325_vm1, %v9585_v59 }
 0x335   : > { %v19196_v29 = vadd.f32 %v7924_v27, %v7645_v25  ;;  %v7648_v62 = vadd.f32 %v15575_v17, %v18907_v9  ;;  %15848 = vmatprep.mubr.msk.f32.mxu1 %vm325_vm1, %v9583_v39  ;;  %v7934_v40 = vpop.f32.mrf.mxu0  ;;  %v11961_v9 = vld [vmem:[%s20448_s2 + $0x38] sm:$0xff]  ;;  %v11962_v39 = vld [vmem:[%s20448_s2 + $0x40] sm:$0xff] }
 0x336   : > { %v7464_v60 = vpop.f32.mrf.mxu1  ;;  %12031 = vperm.xlu1 %16199, %v11961_v9   ;;  %12036 = vperm.xlu0 %16198, %v11962_v39  }
 0x337   : > { %v19203_v20 = vadd.f32 %v15637_v15, %v7648_v62  ;;  %v7647_v3 = vadd.f32 %v7464_v60, %v18912_v63  ;;  %v15640_v32 = vpop.f32.mrf.mxu0  ;;  %15911 = vmatmul.mubr.msk.f32.gmra.mxu0 %vm325_vm1, %v9586_v13  ;;  %v9588_v63 = vld [vmem:[%s16268_s29 + $0x118] sm:$0xff]  ;;  %v9591_v60 = vld [vmem:[%s16268_s29 + $0x130] sm:$0xff] }
 0x338   : > { %v15578_v46 = vpop.f32.mrf.mxu1  ;;  %15849 = vmatmul.mubr.msk.f32.gmra.mxu1 %vm325_vm1, %v9584_v35  ;;  %15913 = vmatprep.mubr.msk.f32.mxu0 %vm325_vm1, %v9587_v56 }
 0x339   : > { %v19214_v54 = vadd.f32 %v7934_v40, %v7647_v3  ;;  %v7650_v30 = vadd.f32 %v15578_v46, %v18921_v53  ;;  %15851 = vmatprep.mubr.msk.f32.mxu1 %vm325_vm1, %v9585_v59  ;;  %v7944_v35 = vpop.f32.mrf.mxu0  ;;  %v11963_v53 = vld [vmem:[%s20448_s2 + $0x48] sm:$0xff]  ;;  %v11964_v59 = vld [vmem:[%s20448_s2 + $0x50] sm:$0xff] }
 0x33a   : > { %v7474_v16 = vpop.f32.mrf.mxu1  ;;  %12041 = vperm.xlu1 %16199, %v11963_v53   ;;  %12046 = vperm.xlu0 %16198, %v11964_v59  }
 0x33b   : > { %v19221_v27 = vadd.f32 %v15640_v32, %v7650_v30  ;;  %v7649_v25 = vadd.f32 %v7474_v16, %v18926_v36  ;;  %v15643_v15 = vpop.f32.mrf.mxu0  ;;  %15914 = vmatmul.mubr.msk.f32.gmra.mxu0 %vm325_vm1, %v9588_v63  ;;  %v9590_v36 = vld [vmem:[%s16268_s29 + $0x128] sm:$0xff]  ;;  %v9593_v16 = vld [vmem:[%s16268_s29 + $0x140] sm:$0xff] }
 0x33c   : > { %v15581_v17 = vpop.f32.mrf.mxu1  ;;  %15852 = vmatmul.mubr.msk.f32.gmra.mxu1 %vm325_vm1, %v9586_v13  ;;  %15916 = vmatprep.mubr.msk.f32.mxu0 %vm325_vm1, %v9589_v45 }
 0x33d   : > { %v19232_v47 = vadd.f32 %v7944_v35, %v7649_v25  ;;  %v7652_v49 = vadd.f32 %v15581_v17, %v18935_v19  ;;  %15854 = vmatprep.mubr.msk.f32.mxu1 %vm325_vm1, %v9587_v56  ;;  %v7954_v13 = vpop.f32.mrf.mxu0  ;;  %v11965_v19 = vld [vmem:[%s20448_s2 + $0x58] sm:$0xff]  ;;  %v11966_v56 = vld [vmem:[%s20448_s2 + $0x60] sm:$0xff] }
 0x33e   : > { %v7484_v62 = vpop.f32.mrf.mxu1  ;;  %12051 = vperm.xlu1 %16199, %v11965_v19   ;;  %12056 = vperm.xlu0 %16198, %v11966_v56  }
 0x33f   : > { %v19239_v40 = vadd.f32 %v15643_v15, %v7652_v49  ;;  %v7651_v3 = vadd.f32 %v7484_v62, %v18940_v34  ;;  %v15646_v32 = vpop.f32.mrf.mxu0  ;;  %15917 = vmatmul.mubr.msk.f32.gmra.mxu0 %vm325_vm1, %v9590_v36  ;;  %v9592_v34 = vld [vmem:[%s16268_s29 + $0x138] sm:$0xff]  ;;  %v9595_v62 = vld [vmem:[%s16268_s29 + $0x150] sm:$0xff] }
 0x340   : > { %v15584_v46 = vpop.f32.mrf.mxu1  ;;  %15855 = vmatmul.mubr.msk.f32.gmra.mxu1 %vm325_vm1, %v9588_v63  ;;  %15919 = vmatprep.mubr.msk.f32.mxu0 %vm325_vm1, %v9591_v60 }
 0x341   : > { %v19250_v9 = vadd.f32 %v7954_v13, %v7651_v3  ;;  %v7654_v39 = vadd.f32 %v15584_v46, %v18949_v42  ;;  %15857 = vmatprep.mubr.msk.f32.mxu1 %vm325_vm1, %v9589_v45  ;;  %v7964_v63 = vpop.f32.mrf.mxu0  ;;  %v11967_v42 = vld [vmem:[%s20448_s2 + $0x68] sm:$0xff]  ;;  %v11968_v45 = vld [vmem:[%s20448_s2 + $0x70] sm:$0xff] }
 0x342   : > { %v7494_v30 = vpop.f32.mrf.mxu1  ;;  %12061 = vperm.xlu1 %16199, %v11967_v42   ;;  %12066 = vperm.xlu0 %16198, %v11968_v45  }
 0x343   : > { %v19257_v35 = vadd.f32 %v15646_v32, %v7654_v39  ;;  %v7653_v25 = vadd.f32 %v7494_v30, %v18954_v55  ;;  %v15649_v15 = vpop.f32.mrf.mxu0  ;;  %15920 = vmatmul.mubr.msk.f32.gmra.mxu0 %vm325_vm1, %v9592_v34  ;;  %v9594_v55 = vld [vmem:[%s16268_s29 + $0x148] sm:$0xff]  ;;  %v9597_v30 = vld [vmem:[%s16268_s29 + $0x160] sm:$0xff] }
 0x344   : > { %v15587_v17 = vpop.f32.mrf.mxu1  ;;  %15858 = vmatmul.mubr.msk.f32.gmra.mxu1 %vm325_vm1, %v9590_v36  ;;  %15922 = vmatprep.mubr.msk.f32.mxu0 %vm325_vm1, %v9593_v16 }
 0x345   : > { %v19268_v53 = vadd.f32 %v7964_v63, %v7653_v25  ;;  %v7656_v59 = vadd.f32 %v15587_v17, %v18963_v0  ;;  %15860 = vmatprep.mubr.msk.f32.mxu1 %vm325_vm1, %v9591_v60  ;;  %v7974_v36 = vpop.f32.mrf.mxu0  ;;  %v11969_v0 = vld [vmem:[%s20448_s2 + $0x78] sm:$0xff]  ;;  %v11970_v60 = vld [vmem:[%s20448_s2 + $0x80] sm:$0xff] }
 0x346   : > { %v7504_v49 = vpop.f32.mrf.mxu1  ;;  %12071 = vperm.xlu1 %16199, %v11969_v0   ;;  %12076 = vperm.xlu0 %16198, %v11970_v60  }
 0x347   : > { %v19275_v13 = vadd.f32 %v15649_v15, %v7656_v59  ;;  %v7655_v3 = vadd.f32 %v7504_v49, %v18968_v50  ;;  %v15652_v32 = vpop.f32.mrf.mxu0  ;;  %15923 = vmatmul.mubr.msk.f32.gmra.mxu0 %vm325_vm1, %v9594_v55  ;;  %v9596_v50 = vld [vmem:[%s16268_s29 + $0x158] sm:$0xff]  ;;  %v9599_v49 = vld [vmem:[%s16268_s29 + $0x170] sm:$0xff] }
 0x348   : > { %v15590_v46 = vpop.f32.mrf.mxu1  ;;  %15861 = vmatmul.mubr.msk.f32.gmra.mxu1 %vm325_vm1, %v9592_v34  ;;  %15925 = vmatprep.mubr.msk.f32.mxu0 %vm325_vm1, %v9595_v62 }
 0x349   : > { %v19286_v19 = vadd.f32 %v7974_v36, %v7655_v3  ;;  %v7658_v56 = vadd.f32 %v15590_v46, %v18977_v8  ;;  %15863 = vmatprep.mubr.msk.f32.mxu1 %vm325_vm1, %v9593_v16  ;;  %v7984_v34 = vpop.f32.mrf.mxu0  ;;  %v11971_v8 = vld [vmem:[%s20448_s2 + $0x88] sm:$0xff]  ;;  %v11972_v16 = vld [vmem:[%s20448_s2 + $0x90] sm:$0xff] }
 0x34a   : > { %v7514_v39 = vpop.f32.mrf.mxu1  ;;  %12081 = vperm.xlu1 %16199, %v11971_v8   ;;  %12086 = vperm.xlu0 %16198, %v11972_v16   ;;  %v9602_v16 = vld [vmem:[%s16268_s29 + $0x188] sm:$0xff] }
 0x34b   : > { %v19293_v63 = vadd.f32 %v15652_v32, %v7658_v56  ;;  %v7657_v25 = vadd.f32 %v7514_v39, %v18982_v43  ;;  %v15655_v15 = vpop.f32.mrf.mxu0  ;;  %15926 = vmatmul.mubr.msk.f32.gmra.mxu0 %vm325_vm1, %v9596_v50  ;;  %v9598_v43 = vld [vmem:[%s16268_s29 + $0x168] sm:$0xff]  ;;  %v9601_v39 = vld [vmem:[%s16268_s29 + $0x180] sm:$0xff] }
 0x34c   : > { %v15593_v17 = vpop.f32.mrf.mxu1  ;;  %15864 = vmatmul.mubr.msk.f32.gmra.mxu1 %vm325_vm1, %v9594_v55  ;;  %15928 = vmatprep.mubr.msk.f32.mxu0 %vm325_vm1, %v9597_v30 }
 0x34d   : > { %v19304_v42 = vadd.f32 %v7984_v34, %v7657_v25  ;;  %v7660_v45 = vadd.f32 %v15593_v17, %v18991_v48  ;;  %15866 = vmatprep.mubr.msk.f32.mxu1 %vm325_vm1, %v9595_v62  ;;  %v7994_v55 = vpop.f32.mrf.mxu0  ;;  %v11973_v48 = vld [vmem:[%s20448_s2 + $0x98] sm:$0xff]  ;;  %v11974_v62 = vld [vmem:[%s20448_s2 + $0xa0] sm:$0xff] }
 0x34e   : > { %v7524_v59 = vpop.f32.mrf.mxu1  ;;  %12091 = vperm.xlu1 %16199, %v11973_v48   ;;  %12096 = vperm.xlu0 %16198, %v11974_v62  }
 0x34f   : > { %v19311_v36 = vadd.f32 %v15655_v15, %v7660_v45  ;;  %v7659_v3 = vadd.f32 %v7524_v59, %v18996_v33  ;;  %v15658_v32 = vpop.f32.mrf.mxu0  ;;  %15929 = vmatmul.mubr.msk.f32.gmra.mxu0 %vm325_vm1, %v9598_v43  ;;  %v9600_v33 = vld [vmem:[%s16268_s29 + $0x178] sm:$0xff] }
 0x350   : > { %v15596_v46 = vpop.f32.mrf.mxu1  ;;  %15867 = vmatmul.mubr.msk.f32.gmra.mxu1 %vm325_vm1, %v9596_v50  ;;  %15931 = vmatprep.mubr.msk.f32.mxu0 %vm325_vm1, %v9599_v49  ;;  %v10033_v59 = vld [vmem:[%s16268_s29 + $0x51] sm:$0xff] }
 0x351   : > { %v19322_v0 = vadd.f32 %v7994_v55, %v7659_v3  ;;  %v7662_v60 = vadd.f32 %v15596_v46, %v19005_v18  ;;  %15869 = vmatprep.mubr.msk.f32.mxu1 %vm325_vm1, %v9597_v30  ;;  %v8004_v50 = vpop.f32.mrf.mxu0  ;;  %v11975_v18 = vld [vmem:[%s20448_s2 + $0xa8] sm:$0xff]  ;;  %v11976_v30 = vld [vmem:[%s20448_s2 + $0xb0] sm:$0xff] }
 0x352   : > { %v7534_v56 = vpop.f32.mrf.mxu1  ;;  %v10503_v55 = vld [vmem:[%s16268_s29 + $0x52] sm:$0xff]  ;;  %12101 = vperm.xlu1 %16199, %v11975_v18   ;;  %12106 = vperm.xlu0 %16198, %v11976_v30   ;;  %v11979_v30 = vld [vmem:[%s20448_s2 + $0xc8] sm:$0xff] }
 0x353   : > { %v19329_v34 = vadd.f32 %v15658_v32, %v7662_v60  ;;  %v7661_v25 = vadd.f32 %v7534_v56, %v19010_v58  ;;  %v15661_v15 = vpop.f32.mrf.mxu0  ;;  %15932 = vmatmul.mubr.msk.f32.gmra.mxu0 %vm325_vm1, %v9600_v33  ;;  %v10034_v60 = vld [vmem:[%s16268_s29 + $0x59] sm:$0xff] }
 0x354   : > { %v15599_v17 = vpop.f32.mrf.mxu1  ;;  %15870 = vmatmul.mubr.msk.f32.gmra.mxu1 %vm325_vm1, %v9598_v43  ;;  %15934 = vmatprep.mubr.msk.f32.mxu0 %vm325_vm1, %v9601_v39 }
 0x355   : > { %v19340_v8 = vadd.f32 %v8004_v50, %v7661_v25  ;;  %v7664_v58 = vadd.f32 %v15599_v17, %v19019_v23  ;;  %15872 = vmatprep.mubr.msk.f32.mxu1 %vm325_vm1, %v9599_v49  ;;  %v8014_v43 = vpop.f32.mrf.mxu0  ;;  %v11977_v23 = vld [vmem:[%s20448_s2 + $0xb8] sm:$0xff]  ;;  %v11978_v49 = vld [vmem:[%s20448_s2 + $0xc0] sm:$0xff] }
 0x356   : > { %v7544_v45 = vpop.f32.mrf.mxu1  ;;  %12111 = vperm.xlu1 %16199, %v11977_v23   ;;  %v10035_v17 = vld [vmem:[%s16268_s29 + $0x61] sm:$0xff]  ;;  %12116 = vperm.xlu0 %16198, %v11978_v49   ;;  %v11981_v23 = vld [vmem:[%s20448_s2 + $0xd8] sm:$0xff] }
 0x357   : > { %v19348_v3 = vadd.f32 %v15661_v15, %v7664_v58  ;;  %v7663_v46 = vadd.f32 %v7544_v45, %v19024_v10  ;;  %v15664_v48 = vpop.f32.mrf.mxu0  ;;  %15935 = vmatmul.mubr.msk.f32.gmra.mxu0 %vm325_vm1, %v9602_v16  ;;  %v10505_v15 = vld [vmem:[%s16268_s29 + $0x62] sm:$0xff]  ;;  %v11980_v58 = vld [vmem:[%s20448_s2 + $0xd0] sm:$0xff] }
 0x358   : > { %v15602_v32 = vpop.f32.mrf.mxu1  ;;  %15873 = vmatmul.mubr.msk.f32.gmra.mxu1 %vm325_vm1, %v9600_v33  ;;  %16001 = vmatprep.mubr.msk.f32.mxu0 %vm325_vm1, %v10503_v55  ;;  %v10504_v33 = vld [vmem:[%s16268_s29 + $0x5a] sm:$0xff]  ;;  %v10036_v45 = vld [vmem:[%s16268_s29 + $0x69] sm:$0xff] }
 0x359   : > { %v19359_v62 = vadd.f32 %v8014_v43, %v7663_v46  ;;  %v7666_v10 = vadd.f32 %v15602_v32, %v19031_v12  ;;  %15939 = vmatprep.mubr.msk.f32.mxu1 %vm325_vm1, %v10033_v59  ;;  %v8024_v50 = vpop.f32.mrf.mxu0  ;;  %v10506_v43 = vld [vmem:[%s16268_s29 + $0x6a] sm:$0xff]  ;;  %v10507_v32 = vld [vmem:[%s16268_s29 + $0x72] sm:$0xff]  ;;  %v11982_v49 = vld [vmem:[%s20448_s2 + $0xe0] sm:$0xff] }
 0x35a   : > { %v7554_v56 = vpop.f32.mrf.mxu1  ;;  %v10037_v46 = vld [vmem:[%s16268_s29 + $0x71] sm:$0xff]  ;;  %12121 = vperm.xlu1 %16199, %v11979_v30   ;;  %12126 = vperm.xlu0 %16198, %v11980_v58   ;;  %v11983_v30 = vld [vmem:[%s20448_s2 + $0xe8] sm:$0xff] }
 0x35b   : > { %v19366_v39 = vadd.f32 %v15664_v48, %v7666_v10  ;;  %v7665_v25 = vadd.f32 %v7554_v56, %v19047_v38  ;;  %v15667_v12 = vpop.f32.mrf.mxu0  ;;  %16002 = vmatmul.mubr.msk.f32.vlgmr.msra.gmra.mxu0 %vm325_vm1, %v10504_v33  ;;  %v10508_v33 = vld [vmem:[%s16268_s29 + $0x7a] sm:$0xff]  ;;  %v11984_v58 = vld [vmem:[%s20448_s2 + $0xf0] sm:$0xff] }
 0x35c   : > { %v15605_v18 = vpop.f32.mrf.mxu1  ;;  %15940 = vmatmul.mubr.msk.f32.vlgmr.msra.gmra.mxu1 %vm325_vm1, %v10034_v60  ;;  %16124 = vmatpush3.msk.msra.mxu0 %vm446_vm0, %v19045_v5  ;;  %v10038_v60 = vld [vmem:[%s16268_s29 + $0x79] sm:$0xff] }
 0x35d   : > { %v19379_v38 = vadd.f32 %v8024_v50, %v7665_v25  ;;  %v7668_v16 = vadd.f32 %v15605_v18, %v19058_v31  ;;  %16062 = vmatpush3.msk.msra.mxu1 %vm446_vm0, %v19040_v22  ;;  %v8034_v55 = vpop.f32.mrf.mxu0  ;;  %15942 = vmatprep.mubr.msk.f32.mxu1 %vm325_vm1, %v10035_v17  ;;  %v10039_v25 = vld [vmem:[%s16268_s29 + $0x81] sm:$0xff] }
 0x35e   : > { %v7564_v59 = vpop.f32.mrf.mxu1  ;;  %16004 = vmatprep.mubr.msk.f32.mxu0 %vm325_vm1, %v10505_v15  ;;  %v10509_v17 = vld [vmem:[%s16268_s29 + $0x82] sm:$0xff]  ;;  %12131 = vperm.xlu1 %16199, %v11981_v23   ;;  %v11985_v23 = vld [vmem:[%s20448_s2 + $0xf8] sm:$0xff] }
 0x35f   : > { %v19392_v48 = vadd.f32 %v15667_v12, %v7668_v16  ;;  %v7667_v31 = vadd.f32 %v7564_v59, %v19067_v57  ;;  %v15670_v5 = vpop.f32.mrf.mxu0  ;;  %16005 = vmatmul.mubr.msk.f32.gmra.mxu0 %vm325_vm1, %v10506_v43  ;;  %12136 = vperm.xlu0 %16198, %v11982_v49   ;;  %v10510_v43 = vld [vmem:[%s16268_s29 + $0x8a] sm:$0xff]  ;;  %v11986_v49 = vld [vmem:[%s20448_s2 + $0x100] sm:$0xff] }
 0x360   : > { %v15608_v22 = vpop.f32.mrf.mxu1  ;;  %15943 = vmatmul.mubr.msk.f32.gmra.mxu1 %vm325_vm1, %v10036_v45  ;;  %16007 = vmatprep.mubr.msk.f32.mxu0 %vm325_vm1, %v10507_v32  ;;  %v10040_v45 = vld [vmem:[%s16268_s29 + $0x89] sm:$0xff]  ;;  %v10511_v32 = vld [vmem:[%s16268_s29 + $0x92] sm:$0xff] }
 0x361   : > { %v19403_v10 = vadd.f32 %v8034_v55, %v7667_v31  ;;  %v7670_v57 = vadd.f32 %v15608_v22, %v19074_v24  ;;  %15945 = vmatprep.mubr.msk.f32.mxu1 %vm325_vm1, %v10037_v46  ;;  %v8044_v50 = vpop.f32.mrf.mxu0  ;;  %v10041_v46 = vld [vmem:[%s16268_s29 + $0x91] sm:$0xff] }
 0x362   : > { %v7574_v56 = vpop.f32.mrf.mxu1  ;;  %12141 = vperm.xlu1 %16199, %v11983_v30   ;;  %v11987_v30 = vld [vmem:[%s20448_s2 + $0x108] sm:$0xff] }
 0x363   : > { %v19412_v15 = vadd.f32 %v15670_v5, %v7670_v57  ;;  %v7669_v18 = vadd.f32 %v7574_v56, %v19079_v37  ;;  %v15673_v12 = vpop.f32.mrf.mxu0  ;;  %16008 = vmatmul.mubr.msk.f32.gmra.mxu0 %vm325_vm1, %v10508_v33  ;;  %12146 = vperm.xlu0 %16198, %v11984_v58   ;;  %v10512_v33 = vld [vmem:[%s16268_s29 + $0x9a] sm:$0xff]  ;;  %v11988_v58 = vld [vmem:[%s20448_s2 + $0x110] sm:$0xff] }
 0x364   : > { %v15611_v24 = vpop.f32.mrf.mxu1  ;;  %15946 = vmatmul.mubr.msk.f32.gmra.mxu1 %vm325_vm1, %v10038_v60  ;;  %16010 = vmatprep.mubr.msk.f32.mxu0 %vm325_vm1, %v10509_v17  ;;  %v10042_v60 = vld [vmem:[%s16268_s29 + $0x99] sm:$0xff]  ;;  %v10513_v17 = vld [vmem:[%s16268_s29 + $0xa2] sm:$0xff] }
 0x365   : > { %v19423_v16 = vadd.f32 %v8044_v50, %v7669_v18  ;;  %v7672_v37 = vadd.f32 %v15611_v24, %v19086_v6  ;;  %15948 = vmatprep.mubr.msk.f32.mxu1 %vm325_vm1, %v10039_v25  ;;  %v8054_v55 = vpop.f32.mrf.mxu0  ;;  %v10043_v25 = vld [vmem:[%s16268_s29 + $0xa1] sm:$0xff] }
 0x366   : > { %v7584_v59 = vpop.f32.mrf.mxu1  ;;  %12151 = vperm.xlu1 %16199, %v11985_v23   ;;  %v11989_v23 = vld [vmem:[%s20448_s2 + $0x118] sm:$0xff] }
 0x367   : > { %v19432_v31 = vadd.f32 %v15673_v12, %v7672_v37  ;;  %v7671_v22 = vadd.f32 %v7584_v59, %v19091_v44  ;;  %v15676_v5 = vpop.f32.mrf.mxu0  ;;  %16011 = vmatmul.mubr.msk.f32.gmra.mxu0 %vm325_vm1, %v10510_v43  ;;  %12156 = vperm.xlu0 %16198, %v11986_v49   ;;  %v10514_v43 = vld [vmem:[%s16268_s29 + $0xaa] sm:$0xff]  ;;  %v11990_v49 = vld [vmem:[%s20448_s2 + $0x120] sm:$0xff] }
 0x368   : > { %v15614_v6 = vpop.f32.mrf.mxu1  ;;  %15949 = vmatmul.mubr.msk.f32.gmra.mxu1 %vm325_vm1, %v10040_v45  ;;  %16013 = vmatprep.mubr.msk.f32.mxu0 %vm325_vm1, %v10511_v32  ;;  %v10044_v45 = vld [vmem:[%s16268_s29 + $0xa9] sm:$0xff]  ;;  %v10515_v32 = vld [vmem:[%s16268_s29 + $0xb2] sm:$0xff] }
 0x369   : > { %v19443_v57 = vadd.f32 %v8054_v55, %v7671_v22  ;;  %v7674_v44 = vadd.f32 %v15614_v6, %v19098_v61  ;;  %15951 = vmatprep.mubr.msk.f32.mxu1 %vm325_vm1, %v10041_v46  ;;  %v8064_v50 = vpop.f32.mrf.mxu0  ;;  %v10045_v46 = vld [vmem:[%s16268_s29 + $0xb1] sm:$0xff] }
 0x36a   : > { %v7594_v56 = vpop.f32.mrf.mxu1  ;;  %12161 = vperm.xlu1 %16199, %v11987_v30   ;;  %v11991_v30 = vld [vmem:[%s20448_s2 + $0x128] sm:$0xff] }
 0x36b   : > { %v19452_v18 = vadd.f32 %v15676_v5, %v7674_v44  ;;  %v7673_v24 = vadd.f32 %v7594_v56, %v19103_v26  ;;  %v15679_v12 = vpop.f32.mrf.mxu0  ;;  %16014 = vmatmul.mubr.msk.f32.gmra.mxu0 %vm325_vm1, %v10512_v33  ;;  %12166 = vperm.xlu0 %16198, %v11988_v58   ;;  %v10516_v33 = vld [vmem:[%s16268_s29 + $0xba] sm:$0xff]  ;;  %v11992_v58 = vld [vmem:[%s20448_s2 + $0x130] sm:$0xff] }
 0x36c   : > { %v15617_v61 = vpop.f32.mrf.mxu1  ;;  %15952 = vmatmul.mubr.msk.f32.gmra.mxu1 %vm325_vm1, %v10042_v60  ;;  %16016 = vmatprep.mubr.msk.f32.mxu0 %vm325_vm1, %v10513_v17  ;;  %v10046_v60 = vld [vmem:[%s16268_s29 + $0xb9] sm:$0xff]  ;;  %v10517_v17 = vld [vmem:[%s16268_s29 + $0xc2] sm:$0xff] }
 0x36d   : > { %v19463_v37 = vadd.f32 %v8064_v50, %v7673_v24  ;;  %v7676_v26 = vadd.f32 %v15617_v61, %v19110_v4  ;;  %15954 = vmatprep.mubr.msk.f32.mxu1 %vm325_vm1, %v10043_v25  ;;  %v8074_v55 = vpop.f32.mrf.mxu0  ;;  %v10047_v25 = vld [vmem:[%s16268_s29 + $0xc1] sm:$0xff] }
 0x36e   : > { %v7604_v59 = vpop.f32.mrf.mxu1  ;;  %12171 = vperm.xlu1 %16199, %v11989_v23   ;;  %v11993_v23 = vld [vmem:[%s20448_s2 + $0x138] sm:$0xff] }
 0x36f   : > { %v19472_v22 = vadd.f32 %v15679_v12, %v7676_v26  ;;  %v7675_v6 = vadd.f32 %v7604_v59, %v19115_v21  ;;  %v15682_v5 = vpop.f32.mrf.mxu0  ;;  %16017 = vmatmul.mubr.msk.f32.gmra.mxu0 %vm325_vm1, %v10514_v43  ;;  %12176 = vperm.xlu0 %16198, %v11990_v49   ;;  %v10518_v43 = vld [vmem:[%s16268_s29 + $0xca] sm:$0xff] }
 0x370   : > { %v15620_v4 = vpop.f32.mrf.mxu1  ;;  %15955 = vmatmul.mubr.msk.f32.gmra.mxu1 %vm325_vm1, %v10044_v45  ;;  %16019 = vmatprep.mubr.msk.f32.mxu0 %vm325_vm1, %v10515_v32  ;;  %v10048_v45 = vld [vmem:[%s16268_s29 + $0xc9] sm:$0xff]  ;;  %v10519_v32 = vld [vmem:[%s16268_s29 + $0xd2] sm:$0xff] }
 0x371   : > { %v19483_v44 = vadd.f32 %v8074_v55, %v7675_v6  ;;  %v7678_v21 = vadd.f32 %v15620_v4, %v19122_v51  ;;  %15957 = vmatprep.mubr.msk.f32.mxu1 %vm325_vm1, %v10045_v46  ;;  %v8084_v50 = vpop.f32.mrf.mxu0  ;;  %v10049_v46 = vld [vmem:[%s16268_s29 + $0xd1] sm:$0xff] }
 0x372   : > { %v7614_v56 = vpop.f32.mrf.mxu1  ;;  %12181 = vperm.xlu1 %16199, %v11991_v30  }
 0x373   : > { %v19492_v24 = vadd.f32 %v15682_v5, %v7678_v21  ;;  %v7677_v61 = vadd.f32 %v7614_v56, %v19127_v14  ;;  %v15685_v12 = vpop.f32.mrf.mxu0  ;;  %16020 = vmatmul.mubr.msk.f32.gmra.mxu0 %vm325_vm1, %v10516_v33  ;;  %12186 = vperm.xlu0 %16198, %v11992_v58   ;;  %v10052_v58 = vld [vmem:[%s16268_s29 + $0xe9] sm:$0xff] }
 0x374   : > { %v15623_v51 = vpop.f32.mrf.mxu1  ;;  %15958 = vmatmul.mubr.msk.f32.gmra.mxu1 %vm325_vm1, %v10046_v60  ;;  %16022 = vmatprep.mubr.msk.f32.mxu0 %vm325_vm1, %v10517_v17  ;;  %v10520_v60 = vld [vmem:[%s16268_s29 + $0xda] sm:$0xff] }
 0x375   : > { %v19503_v26 = vadd.f32 %v8084_v50, %v7677_v61  ;;  %v7680_v14 = vadd.f32 %v15623_v51, %v19134_v11  ;;  %15960 = vmatprep.mubr.msk.f32.mxu1 %vm325_vm1, %v10047_v25  ;;  %v8094_v55 = vpop.f32.mrf.mxu0  ;;  %v10051_v50 = vld [vmem:[%s16268_s29 + $0xe1] sm:$0xff] }
 0x376   : > { %v7624_v59 = vpop.f32.mrf.mxu1  ;;  %v10521_v25 = vld [vmem:[%s16268_s29 + $0xe2] sm:$0xff]  ;;  %12191 = vperm.xlu1 %16199, %v11993_v23   ;;  %v10524_v23 = vld [vmem:[%s16268_s29 + $0xfa] sm:$0xff] }
 0x377   : > { %v19512_v6 = vadd.f32 %v15685_v12, %v7680_v14  ;;  %v7679_v4 = vadd.f32 %v7624_v59, %v19142_v41  ;;  %v15688_v5 = vpop.f32.mrf.mxu0  ;;  %16023 = vmatmul.mubr.msk.f32.gmra.mxu0 %vm325_vm1, %v10518_v43  ;;  %v10050_v41 = vld [vmem:[%s16268_s29 + $0xd9] sm:$0xff]  ;;  %v10522_v14 = vld [vmem:[%s16268_s29 + $0xea] sm:$0xff] }
 0x378   : > { %v15626_v11 = vpop.f32.mrf.mxu1  ;;  %15961 = vmatmul.mubr.msk.f32.gmra.mxu1 %vm325_vm1, %v10048_v45  ;;  %16025 = vmatprep.mubr.msk.f32.mxu0 %vm325_vm1, %v10519_v32  ;;  %v10053_v43 = vld [vmem:[%s16268_s29 + $0xf1] sm:$0xff] }
 0x379   : > { %v19520_v49 = vadd.f32 %v8094_v55, %v7679_v4  ;;  %v7682_v21 = vadd.f32 %v15626_v11, %v19149_v52  ;;  %15963 = vmatprep.mubr.msk.f32.mxu1 %vm325_vm1, %v10049_v46  ;;  %v8104_v56 = vpop.f32.mrf.mxu0  ;;  %v10523_v59 = vld [vmem:[%s16268_s29 + $0xf2] sm:$0xff] }
 0x37a   : > { %v7634_v33 = vpop.f32.mrf.mxu1 }
 0x37b   : > { %v19529_v17 = vadd.f32 %v15688_v5, %v7682_v21  ;;  %v7681_v61 = vadd.f32 %v7634_v33, %v19160_v28  ;;  %v15755_v51 = vpop.f32.mrf.mxu0  ;;  %16026 = vmatmul.mubr.msk.f32.gmra.mxu0 %vm325_vm1, %v10520_v60  ;;  %v10054_v5 = vld [vmem:[%s16268_s29 + $0xf9] sm:$0xff]  ;;  %v10525_v60 = vld [vmem:[%s16268_s29 + $0x102] sm:$0xff] }
 0x37c   : > { %v15693_v52 = vpop.f32.mrf.mxu1  ;;  %15964 = vmatmul.mubr.msk.f32.gmra.mxu1 %vm325_vm1, %v10050_v41  ;;  %16028 = vmatprep.mubr.msk.f32.mxu0 %vm325_vm1, %v10521_v25  ;;  %v10055_v41 = vld [vmem:[%s16268_s29 + $0x101] sm:$0xff] }
 0x37d   : > { %v19534_v12 = vadd.f32 %v8104_v56, %v7681_v61  ;;  %v8584_v30 = vadd.f32 %v15693_v52, %v19167_v1  ;;  %15966 = vmatprep.mubr.msk.f32.mxu1 %vm325_vm1, %v10051_v50  ;;  %v8854_v45 = vpop.f32.mrf.mxu0  ;;  %v10056_v52 = vld [vmem:[%s16268_s29 + $0x109] sm:$0xff] }
 0x37e   : > { %v8384_v28 = vpop.f32.mrf.mxu1 }
 0x37f   : > { %v19543_v55 = vadd.f32 %v15755_v51, %v8584_v30  ;;  %v8583_v46 = vadd.f32 %v8384_v28, %v19178_v7  ;;  %v15758_v1 = vpop.f32.mrf.mxu0  ;;  %16029 = vmatmul.mubr.msk.f32.gmra.mxu0 %vm325_vm1, %v10522_v14  ;;  %v10526_v51 = vld [vmem:[%s16268_s29 + $0x10a] sm:$0xff]  ;;  %v10527_v14 = vld [vmem:[%s16268_s29 + $0x112] sm:$0xff] }
 0x380   : > { %v15696_v32 = vpop.f32.mrf.mxu1  ;;  %15967 = vmatmul.mubr.msk.f32.gmra.mxu1 %vm325_vm1, %v10052_v58  ;;  %16031 = vmatprep.mubr.msk.f32.mxu0 %vm325_vm1, %v10523_v59  ;;  %v10057_v58 = vld [vmem:[%s16268_s29 + $0x111] sm:$0xff] }
 0x381   : > { %v19548_v4 = vadd.f32 %v8854_v45, %v8583_v46  ;;  %v8586_v11 = vadd.f32 %v15696_v32, %v19185_v2  ;;  %15969 = vmatprep.mubr.msk.f32.mxu1 %vm325_vm1, %v10053_v43  ;;  %v8864_v7 = vpop.f32.mrf.mxu0  ;;  %v10058_v32 = vld [vmem:[%s16268_s29 + $0x119] sm:$0xff] }
 0x382   : > { %v8394_v21 = vpop.f32.mrf.mxu1 }
 0x383   : > { %v19557_v33 = vadd.f32 %v15758_v1, %v8586_v11  ;;  %v8585_v56 = vadd.f32 %v8394_v21, %v19196_v29  ;;  %v15761_v2 = vpop.f32.mrf.mxu0  ;;  %16032 = vmatmul.mubr.msk.f32.gmra.mxu0 %vm325_vm1, %v10524_v23  ;;  %v10528_v1 = vld [vmem:[%s16268_s29 + $0x11a] sm:$0xff]  ;;  %v10529_v23 = vld [vmem:[%s16268_s29 + $0x122] sm:$0xff] }
 0x384   : > { %v15699_v50 = vpop.f32.mrf.mxu1  ;;  %15970 = vmatmul.mubr.msk.f32.gmra.mxu1 %vm325_vm1, %v10054_v5  ;;  %16034 = vmatprep.mubr.msk.f32.mxu0 %vm325_vm1, %v10525_v60  ;;  %v10059_v5 = vld [vmem:[%s16268_s29 + $0x121] sm:$0xff] }
 0x385   : > { %v19562_v25 = vadd.f32 %v8864_v7, %v8585_v56  ;;  %v8588_v61 = vadd.f32 %v15699_v50, %v19203_v20  ;;  %15972 = vmatprep.mubr.msk.f32.mxu1 %vm325_vm1, %v10055_v41  ;;  %v8874_v29 = vpop.f32.mrf.mxu0  ;;  %v10060_v50 = vld [vmem:[%s16268_s29 + $0x129] sm:$0xff] }
 0x386   : > { %v8404_v30 = vpop.f32.mrf.mxu1 }
 0x387   : > { %v19571_v28 = vadd.f32 %v15761_v2, %v8588_v61  ;;  %v8587_v45 = vadd.f32 %v8404_v30, %v19214_v54  ;;  %v15764_v20 = vpop.f32.mrf.mxu0  ;;  %16035 = vmatmul.mubr.msk.f32.gmra.mxu0 %vm325_vm1, %v10526_v51  ;;  %v10530_v2 = vld [vmem:[%s16268_s29 + $0x12a] sm:$0xff]  ;;  %v10531_v51 = vld [vmem:[%s16268_s29 + $0x132] sm:$0xff] }
 0x388   : > { %v15702_v43 = vpop.f32.mrf.mxu1  ;;  %15973 = vmatmul.mubr.msk.f32.gmra.mxu1 %vm325_vm1, %v10056_v52  ;;  %16037 = vmatprep.mubr.msk.f32.mxu0 %vm325_vm1, %v10527_v14  ;;  %v10061_v52 = vld [vmem:[%s16268_s29 + $0x131] sm:$0xff] }
 0x389   : > { %v19576_v59 = vadd.f32 %v8874_v29, %v8587_v45  ;;  %v8590_v46 = vadd.f32 %v15702_v43, %v19221_v27  ;;  %15975 = vmatprep.mubr.msk.f32.mxu1 %vm325_vm1, %v10057_v58  ;;  %v8884_v54 = vpop.f32.mrf.mxu0  ;;  %v10062_v43 = vld [vmem:[%s16268_s29 + $0x139] sm:$0xff] }
 0x38a   : > { %v8414_v11 = vpop.f32.mrf.mxu1 }
 0x38b   : > { %v19585_v21 = vadd.f32 %v15764_v20, %v8590_v46  ;;  %v8589_v7 = vadd.f32 %v8414_v11, %v19232_v47  ;;  %v15767_v27 = vpop.f32.mrf.mxu0  ;;  %16038 = vmatmul.mubr.msk.f32.gmra.mxu0 %vm325_vm1, %v10528_v1  ;;  %v10532_v20 = vld [vmem:[%s16268_s29 + $0x13a] sm:$0xff]  ;;  %v10533_v1 = vld [vmem:[%s16268_s29 + $0x142] sm:$0xff] }
 0x38c   : > { %v15705_v41 = vpop.f32.mrf.mxu1  ;;  %15976 = vmatmul.mubr.msk.f32.gmra.mxu1 %vm325_vm1, %v10058_v32  ;;  %16040 = vmatprep.mubr.msk.f32.mxu0 %vm325_vm1, %v10529_v23  ;;  %v10063_v32 = vld [vmem:[%s16268_s29 + $0x141] sm:$0xff] }
 0x38d   : > { %v19590_v60 = vadd.f32 %v8884_v54, %v8589_v7  ;;  %v8592_v56 = vadd.f32 %v15705_v41, %v19239_v40  ;;  %15978 = vmatprep.mubr.msk.f32.mxu1 %vm325_vm1, %v10059_v5  ;;  %v8894_v47 = vpop.f32.mrf.mxu0  ;;  %v10064_v41 = vld [vmem:[%s16268_s29 + $0x149] sm:$0xff] }
 0x38e   : > { %v8424_v61 = vpop.f32.mrf.mxu1 }
 0x38f   : > { %v19599_v30 = vadd.f32 %v15767_v27, %v8592_v56  ;;  %v8591_v29 = vadd.f32 %v8424_v61, %v19250_v9  ;;  %v15770_v40 = vpop.f32.mrf.mxu0  ;;  %16041 = vmatmul.mubr.msk.f32.gmra.mxu0 %vm325_vm1, %v10530_v2  ;;  %v10534_v27 = vld [vmem:[%s16268_s29 + $0x14a] sm:$0xff]  ;;  %v10535_v2 = vld [vmem:[%s16268_s29 + $0x152] sm:$0xff] }
 0x390   : > { %v15708_v58 = vpop.f32.mrf.mxu1  ;;  %15979 = vmatmul.mubr.msk.f32.gmra.mxu1 %vm325_vm1, %v10060_v50  ;;  %16043 = vmatprep.mubr.msk.f32.mxu0 %vm325_vm1, %v10531_v51  ;;  %v10065_v50 = vld [vmem:[%s16268_s29 + $0x151] sm:$0xff] }
 0x391   : > { %v19604_v14 = vadd.f32 %v8894_v47, %v8591_v29  ;;  %v8594_v45 = vadd.f32 %v15708_v58, %v19257_v35  ;;  %15981 = vmatprep.mubr.msk.f32.mxu1 %vm325_vm1, %v10061_v52  ;;  %v8904_v9 = vpop.f32.mrf.mxu0  ;;  %v10066_v58 = vld [vmem:[%s16268_s29 + $0x159] sm:$0xff] }
 0x392   : > { %v8434_v46 = vpop.f32.mrf.mxu1 }
 0x393   : > { %v19613_v11 = vadd.f32 %v15770_v40, %v8594_v45  ;;  %v8593_v54 = vadd.f32 %v8434_v46, %v19268_v53  ;;  %v15773_v35 = vpop.f32.mrf.mxu0  ;;  %16044 = vmatmul.mubr.msk.f32.gmra.mxu0 %vm325_vm1, %v10532_v20  ;;  %v10536_v40 = vld [vmem:[%s16268_s29 + $0x15a] sm:$0xff]  ;;  %v10537_v20 = vld [vmem:[%s16268_s29 + $0x162] sm:$0xff] }
 0x394   : > { %v15711_v5 = vpop.f32.mrf.mxu1  ;;  %15982 = vmatmul.mubr.msk.f32.gmra.mxu1 %vm325_vm1, %v10062_v43  ;;  %16046 = vmatprep.mubr.msk.f32.mxu0 %vm325_vm1, %v10533_v1  ;;  %v10067_v43 = vld [vmem:[%s16268_s29 + $0x161] sm:$0xff] }
 0x395   : > { %v19618_v23 = vadd.f32 %v8904_v9, %v8593_v54  ;;  %v8596_v7 = vadd.f32 %v15711_v5, %v19275_v13  ;;  %15984 = vmatprep.mubr.msk.f32.mxu1 %vm325_vm1, %v10063_v32  ;;  %v8914_v53 = vpop.f32.mrf.mxu0  ;;  %v10068_v5 = vld [vmem:[%s16268_s29 + $0x169] sm:$0xff] }
 0x396   : > { %v8444_v56 = vpop.f32.mrf.mxu1 }
 0x397   : > { %v19627_v61 = vadd.f32 %v15773_v35, %v8596_v7  ;;  %v8595_v47 = vadd.f32 %v8444_v56, %v19286_v19  ;;  %v15776_v13 = vpop.f32.mrf.mxu0  ;;  %16047 = vmatmul.mubr.msk.f32.gmra.mxu0 %vm325_vm1, %v10534_v27  ;;  %v10538_v35 = vld [vmem:[%s16268_s29 + $0x16a] sm:$0xff]  ;;  %v10539_v27 = vld [vmem:[%s16268_s29 + $0x172] sm:$0xff] }
 0x398   : > { %v15714_v52 = vpop.f32.mrf.mxu1  ;;  %15985 = vmatmul.mubr.msk.f32.gmra.mxu1 %vm325_vm1, %v10064_v41  ;;  %16049 = vmatprep.mubr.msk.f32.mxu0 %vm325_vm1, %v10535_v2  ;;  %v10069_v41 = vld [vmem:[%s16268_s29 + $0x171] sm:$0xff] }
 0x399   : > { %v19632_v51 = vadd.f32 %v8914_v53, %v8595_v47  ;;  %v8598_v29 = vadd.f32 %v15714_v52, %v19293_v63  ;;  %15987 = vmatprep.mubr.msk.f32.mxu1 %vm325_vm1, %v10065_v50  ;;  %v8924_v19 = vpop.f32.mrf.mxu0  ;;  %v10070_v52 = vld [vmem:[%s16268_s29 + $0x179] sm:$0xff] }
 0x39a   : > { %v8454_v45 = vpop.f32.mrf.mxu1 }
 0x39b   : > { %v19641_v46 = vadd.f32 %v15776_v13, %v8598_v29  ;;  %v8597_v9 = vadd.f32 %v8454_v45, %v19304_v42  ;;  %v15779_v63 = vpop.f32.mrf.mxu0  ;;  %16050 = vmatmul.mubr.msk.f32.gmra.mxu0 %vm325_vm1, %v10536_v40  ;;  %v10540_v13 = vld [vmem:[%s16268_s29 + $0x17a] sm:$0xff]  ;;  %v10541_v40 = vld [vmem:[%s16268_s29 + $0x182] sm:$0xff] }
 0x39c   : > { %v15717_v32 = vpop.f32.mrf.mxu1  ;;  %15988 = vmatmul.mubr.msk.f32.gmra.mxu1 %vm325_vm1, %v10066_v58  ;;  %16052 = vmatprep.mubr.msk.f32.mxu0 %vm325_vm1, %v10537_v20  ;;  %v10071_v58 = vld [vmem:[%s16268_s29 + $0x181] sm:$0xff] }
 0x39d   : > { %v19646_v1 = vadd.f32 %v8924_v19, %v8597_v9  ;;  %v8600_v54 = vadd.f32 %v15717_v32, %v19311_v36  ;;  %15990 = vmatprep.mubr.msk.f32.mxu1 %vm325_vm1, %v10067_v43  ;;  %v8934_v42 = vpop.f32.mrf.mxu0  ;;  %v10072_v32 = vld [vmem:[%s16268_s29 + $0x189] sm:$0xff] }
 0x39e   : > { %v8464_v7 = vpop.f32.mrf.mxu1 }
 0x39f   : > { %v19655_v56 = vadd.f32 %v15779_v63, %v8600_v54  ;;  %v8599_v53 = vadd.f32 %v8464_v7, %v19322_v0  ;;  %v15782_v36 = vpop.f32.mrf.mxu0  ;;  %16053 = vmatmul.mubr.msk.f32.gmra.mxu0 %vm325_vm1, %v10538_v35  ;;  %v10542_v63 = vld [vmem:[%s16268_s29 + $0x18a] sm:$0xff]  ;;  %v11443_v35 = vld [vmem:[%s16268_s29 + $0x54] sm:$0xff] }
 0x3a0   : > { %v15720_v50 = vpop.f32.mrf.mxu1  ;;  %15991 = vmatmul.mubr.msk.f32.gmra.mxu1 %vm325_vm1, %v10068_v5  ;;  %16055 = vmatprep.mubr.msk.f32.mxu0 %vm325_vm1, %v10539_v27  ;;  %v10973_v5 = vld [vmem:[%s16268_s29 + $0x53] sm:$0xff] }
 0x3a1   : > { %v19660_v2 = vadd.f32 %v8934_v42, %v8599_v53  ;;  %v8602_v47 = vadd.f32 %v15720_v50, %v19329_v34  ;;  %15993 = vmatprep.mubr.msk.f32.mxu1 %vm325_vm1, %v10069_v41  ;;  %v8944_v0 = vpop.f32.mrf.mxu0  ;;  %v10974_v50 = vld [vmem:[%s16268_s29 + $0x5b] sm:$0xff] }
 0x3a2   : > { %v8474_v29 = vpop.f32.mrf.mxu1 }
 0x3a3   : > { %v19669_v45 = vadd.f32 %v15782_v36, %v8602_v47  ;;  %v8601_v19 = vadd.f32 %v8474_v29, %v19340_v8  ;;  %v15785_v34 = vpop.f32.mrf.mxu0  ;;  %16056 = vmatmul.mubr.msk.f32.gmra.mxu0 %vm325_vm1, %v10540_v13  ;;  %v11444_v36 = vld [vmem:[%s16268_s29 + $0x5c] sm:$0xff]  ;;  %v11445_v13 = vld [vmem:[%s16268_s29 + $0x64] sm:$0xff] }
 0x3a4   : > { %v15723_v43 = vpop.f32.mrf.mxu1  ;;  %15994 = vmatmul.mubr.msk.f32.gmra.mxu1 %vm325_vm1, %v10070_v52  ;;  %16058 = vmatprep.mubr.msk.f32.mxu0 %vm325_vm1, %v10541_v40  ;;  %v10975_v52 = vld [vmem:[%s16268_s29 + $0x63] sm:$0xff] }
 0x3a5   : > { %v19674_v20 = vadd.f32 %v8944_v0, %v8601_v19  ;;  %v8604_v9 = vadd.f32 %v15723_v43, %v19348_v3  ;;  %15996 = vmatprep.mubr.msk.f32.mxu1 %vm325_vm1, %v10071_v58  ;;  %v8954_v8 = vpop.f32.mrf.mxu0  ;;  %v10976_v43 = vld [vmem:[%s16268_s29 + $0x6b] sm:$0xff] }
 0x3a6   : > { %v8484_v54 = vpop.f32.mrf.mxu1 }
 0x3a7   : > { %v19683_v7 = vadd.f32 %v15785_v34, %v8604_v9  ;;  %v8603_v42 = vadd.f32 %v8484_v54, %v19359_v62  ;;  %v15788_v3 = vpop.f32.mrf.mxu0  ;;  %16059 = vmatmul.mubr.msk.f32.gmra.mxu0 %vm325_vm1, %v10542_v63  ;;  %v11446_v34 = vld [vmem:[%s16268_s29 + $0x6c] sm:$0xff]  ;;  %v11447_v63 = vld [vmem:[%s16268_s29 + $0x74] sm:$0xff] }
 0x3a8   : > { %v15726_v41 = vpop.f32.mrf.mxu1  ;;  %15997 = vmatmul.mubr.msk.f32.gmra.mxu1 %vm325_vm1, %v10072_v32  ;;  %16125 = vmatprep.mubr.msk.f32.mxu0 %vm325_vm1, %v11443_v35  ;;  %v10977_v32 = vld [vmem:[%s16268_s29 + $0x73] sm:$0xff] }
 0x3a9   : > { %v19688_v27 = vadd.f32 %v8954_v8, %v8603_v42  ;;  %v8606_v53 = vadd.f32 %v15726_v41, %v19366_v39  ;;  %16063 = vmatprep.mubr.msk.f32.mxu1 %vm325_vm1, %v10973_v5  ;;  %v8964_v62 = vpop.f32.mrf.mxu0  ;;  %v10978_v41 = vld [vmem:[%s16268_s29 + $0x7b] sm:$0xff] }
 0x3aa   : > { %v8494_v47 = vpop.f32.mrf.mxu1 }
 0x3ab   : > { %v19697_v29 = vadd.f32 %v15788_v3, %v8606_v53  ;;  %v8605_v0 = vadd.f32 %v8494_v47, %v19379_v38  ;;  %v15791_v39 = vpop.f32.mrf.mxu0  ;;  %16126 = vmatmul.mubr.msk.f32.vlgmr.msra.gmra.mxu0 %vm325_vm1, %v11444_v36  ;;  %v11448_v3 = vld [vmem:[%s16268_s29 + $0x7c] sm:$0xff]  ;;  %v11449_v36 = vld [vmem:[%s16268_s29 + $0x84] sm:$0xff] }
 0x3ac   : > { %v15729_v58 = vpop.f32.mrf.mxu1  ;;  %16064 = vmatmul.mubr.msk.f32.vlgmr.msra.gmra.mxu1 %vm325_vm1, %v10974_v50  ;;  %16128 = vmatprep.mubr.msk.f32.mxu0 %vm325_vm1, %v11445_v13  ;;  %v10979_v50 = vld [vmem:[%s16268_s29 + $0x83] sm:$0xff] }
 0x3ad   : > { %v19702_v40 = vadd.f32 %v8964_v62, %v8605_v0  ;;  %v8608_v19 = vadd.f32 %v15729_v58, %v19392_v48  ;;  %16066 = vmatprep.mubr.msk.f32.mxu1 %vm325_vm1, %v10975_v52  ;;  %v8974_v38 = vpop.f32.mrf.mxu0  ;;  %v10980_v58 = vld [vmem:[%s16268_s29 + $0x8b] sm:$0xff] }
 0x3ae   : > { %v8504_v9 = vpop.f32.mrf.mxu1 }
 0x3af   : > { %v19711_v54 = vadd.f32 %v15791_v39, %v8608_v19  ;;  %v8607_v8 = vadd.f32 %v8504_v9, %v19403_v10  ;;  %v15794_v48 = vpop.f32.mrf.mxu0  ;;  %16129 = vmatmul.mubr.msk.f32.gmra.mxu0 %vm325_vm1, %v11446_v34  ;;  %v11450_v39 = vld [vmem:[%s16268_s29 + $0x8c] sm:$0xff]  ;;  %v11451_v34 = vld [vmem:[%s16268_s29 + $0x94] sm:$0xff] }
 0x3b0   : > { %v15732_v5 = vpop.f32.mrf.mxu1  ;;  %16067 = vmatmul.mubr.msk.f32.gmra.mxu1 %vm325_vm1, %v10976_v43  ;;  %16131 = vmatprep.mubr.msk.f32.mxu0 %vm325_vm1, %v11447_v63  ;;  %v10981_v43 = vld [vmem:[%s16268_s29 + $0x93] sm:$0xff] }
 0x3b1   : > { %v19716_v35 = vadd.f32 %v8974_v38, %v8607_v8  ;;  %v8610_v42 = vadd.f32 %v15732_v5, %v19412_v15  ;;  %16069 = vmatprep.mubr.msk.f32.mxu1 %vm325_vm1, %v10977_v32  ;;  %v8984_v10 = vpop.f32.mrf.mxu0  ;;  %v10982_v5 = vld [vmem:[%s16268_s29 + $0x9b] sm:$0xff] }
 0x3b2   : > { %v8514_v53 = vpop.f32.mrf.mxu1 }
 0x3b3   : > { %v19725_v47 = vadd.f32 %v15794_v48, %v8610_v42  ;;  %v8609_v62 = vadd.f32 %v8514_v53, %v19423_v16  ;;  %v15797_v15 = vpop.f32.mrf.mxu0  ;;  %16132 = vmatmul.mubr.msk.f32.gmra.mxu0 %vm325_vm1, %v11448_v3  ;;  %v11452_v48 = vld [vmem:[%s16268_s29 + $0x9c] sm:$0xff]  ;;  %v11453_v3 = vld [vmem:[%s16268_s29 + $0xa4] sm:$0xff] }
 0x3b4   : > { %v15735_v52 = vpop.f32.mrf.mxu1  ;;  %16070 = vmatmul.mubr.msk.f32.gmra.mxu1 %vm325_vm1, %v10978_v41  ;;  %16134 = vmatprep.mubr.msk.f32.mxu0 %vm325_vm1, %v11449_v36  ;;  %v10983_v41 = vld [vmem:[%s16268_s29 + $0xa3] sm:$0xff] }
 0x3b5   : > { %v19730_v13 = vadd.f32 %v8984_v10, %v8609_v62  ;;  %v8612_v0 = vadd.f32 %v15735_v52, %v19432_v31  ;;  %16072 = vmatprep.mubr.msk.f32.mxu1 %vm325_vm1, %v10979_v50  ;;  %v8994_v16 = vpop.f32.mrf.mxu0  ;;  %v10984_v52 = vld [vmem:[%s16268_s29 + $0xab] sm:$0xff] }
 0x3b6   : > { %v8524_v19 = vpop.f32.mrf.mxu1 }
 0x3b7   : > { %v19739_v9 = vadd.f32 %v15797_v15, %v8612_v0  ;;  %v8611_v38 = vadd.f32 %v8524_v19, %v19443_v57  ;;  %v15800_v31 = vpop.f32.mrf.mxu0  ;;  %16135 = vmatmul.mubr.msk.f32.gmra.mxu0 %vm325_vm1, %v11450_v39  ;;  %v11454_v15 = vld [vmem:[%s16268_s29 + $0xac] sm:$0xff]  ;;  %v11455_v39 = vld [vmem:[%s16268_s29 + $0xb4] sm:$0xff] }
 0x3b8   : > { %v15738_v32 = vpop.f32.mrf.mxu1  ;;  %16073 = vmatmul.mubr.msk.f32.gmra.mxu1 %vm325_vm1, %v10980_v58  ;;  %16137 = vmatprep.mubr.msk.f32.mxu0 %vm325_vm1, %v11451_v34  ;;  %v10985_v58 = vld [vmem:[%s16268_s29 + $0xb3] sm:$0xff] }
 0x3b9   : > { %v19744_v63 = vadd.f32 %v8994_v16, %v8611_v38  ;;  %v8614_v8 = vadd.f32 %v15738_v32, %v19452_v18  ;;  %16075 = vmatprep.mubr.msk.f32.mxu1 %vm325_vm1, %v10981_v43  ;;  %v9004_v57 = vpop.f32.mrf.mxu0  ;;  %v10986_v32 = vld [vmem:[%s16268_s29 + $0xbb] sm:$0xff] }
 0x3ba   : > { %v8534_v42 = vpop.f32.mrf.mxu1 }
 0x3bb   : > { %v19753_v53 = vadd.f32 %v15800_v31, %v8614_v8  ;;  %v8613_v10 = vadd.f32 %v8534_v42, %v19463_v37  ;;  %v15803_v18 = vpop.f32.mrf.mxu0  ;;  %16138 = vmatmul.mubr.msk.f32.gmra.mxu0 %vm325_vm1, %v11452_v48  ;;  %v11456_v31 = vld [vmem:[%s16268_s29 + $0xbc] sm:$0xff]  ;;  %v11457_v48 = vld [vmem:[%s16268_s29 + $0xc4] sm:$0xff] }
 0x3bc   : > { %v15741_v50 = vpop.f32.mrf.mxu1  ;;  %16076 = vmatmul.mubr.msk.f32.gmra.mxu1 %vm325_vm1, %v10982_v5  ;;  %16140 = vmatprep.mubr.msk.f32.mxu0 %vm325_vm1, %v11453_v3  ;;  %v10987_v5 = vld [vmem:[%s16268_s29 + $0xc3] sm:$0xff] }
 0x3bd   : > { %v19758_v36 = vadd.f32 %v9004_v57, %v8613_v10  ;;  %v8616_v62 = vadd.f32 %v15741_v50, %v19472_v22  ;;  %16078 = vmatprep.mubr.msk.f32.mxu1 %vm325_vm1, %v10983_v41  ;;  %v9014_v37 = vpop.f32.mrf.mxu0  ;;  %v10988_v50 = vld [vmem:[%s16268_s29 + $0xcb] sm:$0xff] }
 0x3be   : > { %v8544_v0 = vpop.f32.mrf.mxu1 }
 0x3bf   : > { %v19767_v19 = vadd.f32 %v15803_v18, %v8616_v62  ;;  %v8615_v16 = vadd.f32 %v8544_v0, %v19483_v44  ;;  %v15806_v22 = vpop.f32.mrf.mxu0  ;;  %16141 = vmatmul.mubr.msk.f32.gmra.mxu0 %vm325_vm1, %v11454_v15  ;;  %v11458_v18 = vld [vmem:[%s16268_s29 + $0xcc] sm:$0xff]  ;;  %v11459_v15 = vld [vmem:[%s16268_s29 + $0xd4] sm:$0xff] }
 0x3c0   : > { %v15744_v43 = vpop.f32.mrf.mxu1  ;;  %16079 = vmatmul.mubr.msk.f32.gmra.mxu1 %vm325_vm1, %v10984_v52  ;;  %16143 = vmatprep.mubr.msk.f32.mxu0 %vm325_vm1, %v11455_v39  ;;  %v10989_v52 = vld [vmem:[%s16268_s29 + $0xd3] sm:$0xff] }
 0x3c1   : > { %v19772_v34 = vadd.f32 %v9014_v37, %v8615_v16  ;;  %v8618_v38 = vadd.f32 %v15744_v43, %v19492_v24  ;;  %16081 = vmatprep.mubr.msk.f32.mxu1 %vm325_vm1, %v10985_v58  ;;  %v9024_v44 = vpop.f32.mrf.mxu0  ;;  %v10990_v43 = vld [vmem:[%s16268_s29 + $0xdb] sm:$0xff] }
 0x3c2   : > { %v8554_v8 = vpop.f32.mrf.mxu1 }
 0x3c3   : > { %v19781_v42 = vadd.f32 %v15806_v22, %v8618_v38  ;;  %v8617_v57 = vadd.f32 %v8554_v8, %v19503_v26  ;;  %v15809_v24 = vpop.f32.mrf.mxu0  ;;  %16144 = vmatmul.mubr.msk.f32.gmra.mxu0 %vm325_vm1, %v11456_v31  ;;  %v11460_v22 = vld [vmem:[%s16268_s29 + $0xdc] sm:$0xff]  ;;  %v11461_v31 = vld [vmem:[%s16268_s29 + $0xe4] sm:$0xff] }
 0x3c4   : > { %v15747_v41 = vpop.f32.mrf.mxu1  ;;  %16082 = vmatmul.mubr.msk.f32.gmra.mxu1 %vm325_vm1, %v10986_v32  ;;  %16146 = vmatprep.mubr.msk.f32.mxu0 %vm325_vm1, %v11457_v48  ;;  %v10991_v32 = vld [vmem:[%s16268_s29 + $0xe3] sm:$0xff] }
 0x3c5   : > { %v19786_v3 = vadd.f32 %v9024_v44, %v8617_v57  ;;  %v8620_v10 = vadd.f32 %v15747_v41, %v19512_v6  ;;  %16084 = vmatprep.mubr.msk.f32.mxu1 %vm325_vm1, %v10987_v5  ;;  %v9034_v26 = vpop.f32.mrf.mxu0  ;;  %v10992_v41 = vld [vmem:[%s16268_s29 + $0xeb] sm:$0xff] }
 0x3c6   : > { %v8564_v62 = vpop.f32.mrf.mxu1 }
 0x3c7   : > { %v19795_v0 = vadd.f32 %v15809_v24, %v8620_v10  ;;  %v8619_v37 = vadd.f32 %v8564_v62, %v19520_v49  ;;  %v15812_v6 = vpop.f32.mrf.mxu0  ;;  %16147 = vmatmul.mubr.msk.f32.gmra.mxu0 %vm325_vm1, %v11458_v18  ;;  %v11462_v24 = vld [vmem:[%s16268_s29 + $0xec] sm:$0xff]  ;;  %v11463_v18 = vld [vmem:[%s16268_s29 + $0xf4] sm:$0xff] }
 0x3c8   : > { %v15750_v58 = vpop.f32.mrf.mxu1  ;;  %16085 = vmatmul.mubr.msk.f32.gmra.mxu1 %vm325_vm1, %v10988_v50  ;;  %16149 = vmatprep.mubr.msk.f32.mxu0 %vm325_vm1, %v11459_v15  ;;  %v10993_v50 = vld [vmem:[%s16268_s29 + $0xf3] sm:$0xff] }
 0x3c9   : > { %v19800_v39 = vadd.f32 %v9034_v26, %v8619_v37  ;;  %v8622_v16 = vadd.f32 %v15750_v58, %v19529_v17  ;;  %16087 = vmatprep.mubr.msk.f32.mxu1 %vm325_vm1, %v10989_v52  ;;  %v9044_v49 = vpop.f32.mrf.mxu0  ;;  %v10994_v58 = vld [vmem:[%s16268_s29 + $0xfb] sm:$0xff] }
 0x3ca   : > { %v8574_v38 = vpop.f32.mrf.mxu1 }
 0x3cb   : > { %v19809_v8 = vadd.f32 %v15812_v6, %v8622_v16  ;;  %v8621_v44 = vadd.f32 %v8574_v38, %v19534_v12  ;;  %v15879_v17 = vpop.f32.mrf.mxu0  ;;  %16150 = vmatmul.mubr.msk.f32.gmra.mxu0 %vm325_vm1, %v11460_v22  ;;  %v11464_v6 = vld [vmem:[%s16268_s29 + $0xfc] sm:$0xff]  ;;  %v11465_v22 = vld [vmem:[%s16268_s29 + $0x104] sm:$0xff] }
 0x3cc   : > { %v15817_v5 = vpop.f32.mrf.mxu1  ;;  %16088 = vmatmul.mubr.msk.f32.gmra.mxu1 %vm325_vm1, %v10990_v43  ;;  %16152 = vmatprep.mubr.msk.f32.mxu0 %vm325_vm1, %v11461_v31  ;;  %v10995_v43 = vld [vmem:[%s16268_s29 + $0x103] sm:$0xff] }
 0x3cd   : > { %v19814_v48 = vadd.f32 %v9044_v49, %v8621_v44  ;;  %v9524_v57 = vadd.f32 %v15817_v5, %v19543_v55  ;;  %16090 = vmatprep.mubr.msk.f32.mxu1 %vm325_vm1, %v10991_v32  ;;  %v9794_v12 = vpop.f32.mrf.mxu0  ;;  %v10996_v5 = vld [vmem:[%s16268_s29 + $0x10b] sm:$0xff] }
 0x3ce   : > { %v9324_v10 = vpop.f32.mrf.mxu1 }
 0x3cf   : > { %v19823_v62 = vadd.f32 %v15879_v17, %v9524_v57  ;;  %v9523_v26 = vadd.f32 %v9324_v10, %v19548_v4  ;;  %v15882_v55 = vpop.f32.mrf.mxu0  ;;  %16153 = vmatmul.mubr.msk.f32.gmra.mxu0 %vm325_vm1, %v11462_v24  ;;  %v11466_v17 = vld [vmem:[%s16268_s29 + $0x10c] sm:$0xff]  ;;  %v11467_v24 = vld [vmem:[%s16268_s29 + $0x114] sm:$0xff] }
 0x3d0   : > { %v15820_v52 = vpop.f32.mrf.mxu1  ;;  %16091 = vmatmul.mubr.msk.f32.gmra.mxu1 %vm325_vm1, %v10992_v41  ;;  %16155 = vmatprep.mubr.msk.f32.mxu0 %vm325_vm1, %v11463_v18  ;;  %v10997_v41 = vld [vmem:[%s16268_s29 + $0x113] sm:$0xff] }
 0x3d1   : > { %v19828_v15 = vadd.f32 %v9794_v12, %v9523_v26  ;;  %v9526_v37 = vadd.f32 %v15820_v52, %v19557_v33  ;;  %16093 = vmatprep.mubr.msk.f32.mxu1 %vm325_vm1, %v10993_v50  ;;  %v9804_v4 = vpop.f32.mrf.mxu0  ;;  %v10998_v52 = vld [vmem:[%s16268_s29 + $0x11b] sm:$0xff] }
 0x3d2   : > { %v9334_v16 = vpop.f32.mrf.mxu1 }
 0x3d3   : > { %v19837_v38 = vadd.f32 %v15882_v55, %v9526_v37  ;;  %v9525_v49 = vadd.f32 %v9334_v16, %v19562_v25  ;;  %v15885_v33 = vpop.f32.mrf.mxu0  ;;  %16156 = vmatmul.mubr.msk.f32.gmra.mxu0 %vm325_vm1, %v11464_v6  ;;  %v11468_v55 = vld [vmem:[%s16268_s29 + $0x11c] sm:$0xff]  ;;  %v11469_v6 = vld [vmem:[%s16268_s29 + $0x124] sm:$0xff] }
 0x3d4   : > { %v15823_v32 = vpop.f32.mrf.mxu1  ;;  %16094 = vmatmul.mubr.msk.f32.gmra.mxu1 %vm325_vm1, %v10994_v58  ;;  %16158 = vmatprep.mubr.msk.f32.mxu0 %vm325_vm1, %v11465_v22  ;;  %v10999_v58 = vld [vmem:[%s16268_s29 + $0x123] sm:$0xff] }
 0x3d5   : > { %v19842_v31 = vadd.f32 %v9804_v4, %v9525_v49  ;;  %v9528_v44 = vadd.f32 %v15823_v32, %v19571_v28  ;;  %16096 = vmatprep.mubr.msk.f32.mxu1 %vm325_vm1, %v10995_v43  ;;  %v9814_v25 = vpop.f32.mrf.mxu0  ;;  %v11000_v32 = vld [vmem:[%s16268_s29 + $0x12b] sm:$0xff] }
 0x3d6   : > { %v9344_v57 = vpop.f32.mrf.mxu1 }
 0x3d7   : > { %v19851_v10 = vadd.f32 %v15885_v33, %v9528_v44  ;;  %v9527_v12 = vadd.f32 %v9344_v57, %v19576_v59  ;;  %v15888_v28 = vpop.f32.mrf.mxu0  ;;  %16159 = vmatmul.mubr.msk.f32.gmra.mxu0 %vm325_vm1, %v11466_v17  ;;  %v11470_v33 = vld [vmem:[%s16268_s29 + $0x12c] sm:$0xff]  ;;  %v11471_v17 = vld [vmem:[%s16268_s29 + $0x134] sm:$0xff] }
 0x3d8   : > { %v15826_v50 = vpop.f32.mrf.mxu1  ;;  %16097 = vmatmul.mubr.msk.f32.gmra.mxu1 %vm325_vm1, %v10996_v5  ;;  %16161 = vmatprep.mubr.msk.f32.mxu0 %vm325_vm1, %v11467_v24  ;;  %v11001_v5 = vld [vmem:[%s16268_s29 + $0x133] sm:$0xff] }
 0x3d9   : > { %v19856_v18 = vadd.f32 %v9814_v25, %v9527_v12  ;;  %v9530_v26 = vadd.f32 %v15826_v50, %v19585_v21  ;;  %16099 = vmatprep.mubr.msk.f32.mxu1 %vm325_vm1, %v10997_v41  ;;  %v9824_v59 = vpop.f32.mrf.mxu0  ;;  %v11002_v50 = vld [vmem:[%s16268_s29 + $0x13b] sm:$0xff] }
 0x3da   : > { %v9354_v37 = vpop.f32.mrf.mxu1 }
 0x3db   : > { %v19865_v16 = vadd.f32 %v15888_v28, %v9530_v26  ;;  %v9529_v4 = vadd.f32 %v9354_v37, %v19590_v60  ;;  %v15891_v21 = vpop.f32.mrf.mxu0  ;;  %16162 = vmatmul.mubr.msk.f32.gmra.mxu0 %vm325_vm1, %v11468_v55  ;;  %v11472_v28 = vld [vmem:[%s16268_s29 + $0x13c] sm:$0xff]  ;;  %v11473_v55 = vld [vmem:[%s16268_s29 + $0x144] sm:$0xff] }
 0x3dc   : > { %v15829_v43 = vpop.f32.mrf.mxu1  ;;  %16100 = vmatmul.mubr.msk.f32.gmra.mxu1 %vm325_vm1, %v10998_v52  ;;  %16164 = vmatprep.mubr.msk.f32.mxu0 %vm325_vm1, %v11469_v6  ;;  %v11003_v52 = vld [vmem:[%s16268_s29 + $0x143] sm:$0xff] }
 0x3dd   : > { %v19870_v22 = vadd.f32 %v9824_v59, %v9529_v4  ;;  %v9532_v49 = vadd.f32 %v15829_v43, %v19599_v30  ;;  %16102 = vmatprep.mubr.msk.f32.mxu1 %vm325_vm1, %v10999_v58  ;;  %v9834_v60 = vpop.f32.mrf.mxu0  ;;  %v11004_v43 = vld [vmem:[%s16268_s29 + $0x14b] sm:$0xff] }
 0x3de   : > { %v9364_v44 = vpop.f32.mrf.mxu1 }
 0x3df   : > { %v19879_v57 = vadd.f32 %v15891_v21, %v9532_v49  ;;  %v9531_v25 = vadd.f32 %v9364_v44, %v19604_v14  ;;  %v15894_v30 = vpop.f32.mrf.mxu0  ;;  %16165 = vmatmul.mubr.msk.f32.gmra.mxu0 %vm325_vm1, %v11470_v33  ;;  %v11474_v21 = vld [vmem:[%s16268_s29 + $0x14c] sm:$0xff]  ;;  %v11475_v33 = vld [vmem:[%s16268_s29 + $0x154] sm:$0xff] }
 0x3e0   : > { %v15832_v41 = vpop.f32.mrf.mxu1  ;;  %16103 = vmatmul.mubr.msk.f32.gmra.mxu1 %vm325_vm1, %v11000_v32  ;;  %16167 = vmatprep.mubr.msk.f32.mxu0 %vm325_vm1, %v11471_v17  ;;  %v11005_v32 = vld [vmem:[%s16268_s29 + $0x153] sm:$0xff] }
 0x3e1   : > { %v19884_v24 = vadd.f32 %v9834_v60, %v9531_v25  ;;  %v9534_v12 = vadd.f32 %v15832_v41, %v19613_v11  ;;  %16105 = vmatprep.mubr.msk.f32.mxu1 %vm325_vm1, %v11001_v5  ;;  %v9844_v14 = vpop.f32.mrf.mxu0  ;;  %v11006_v41 = vld [vmem:[%s16268_s29 + $0x15b] sm:$0xff] }
 0x3e2   : > { %v9374_v26 = vpop.f32.mrf.mxu1 }
 0x3e3   : > { %v19893_v37 = vadd.f32 %v15894_v30, %v9534_v12  ;;  %v9533_v59 = vadd.f32 %v9374_v26, %v19618_v23  ;;  %v15897_v11 = vpop.f32.mrf.mxu0  ;;  %16168 = vmatmul.mubr.msk.f32.gmra.mxu0 %vm325_vm1, %v11472_v28  ;;  %v11476_v30 = vld [vmem:[%s16268_s29 + $0x15c] sm:$0xff]  ;;  %v11477_v28 = vld [vmem:[%s16268_s29 + $0x164] sm:$0xff] }
 0x3e4   : > { %v15835_v58 = vpop.f32.mrf.mxu1  ;;  %16106 = vmatmul.mubr.msk.f32.gmra.mxu1 %vm325_vm1, %v11002_v50  ;;  %16170 = vmatprep.mubr.msk.f32.mxu0 %vm325_vm1, %v11473_v55  ;;  %v11007_v50 = vld [vmem:[%s16268_s29 + $0x163] sm:$0xff] }
 0x3e5   : > { %v19898_v6 = vadd.f32 %v9844_v14, %v9533_v59  ;;  %v9536_v4 = vadd.f32 %v15835_v58, %v19627_v61  ;;  %16108 = vmatprep.mubr.msk.f32.mxu1 %vm325_vm1, %v11003_v52  ;;  %v9854_v23 = vpop.f32.mrf.mxu0  ;;  %v11008_v58 = vld [vmem:[%s16268_s29 + $0x16b] sm:$0xff] }
 0x3e6   : > { %v9384_v49 = vpop.f32.mrf.mxu1 }
 0x3e7   : > { %v19907_v44 = vadd.f32 %v15897_v11, %v9536_v4  ;;  %v9535_v60 = vadd.f32 %v9384_v49, %v19632_v51  ;;  %v15900_v61 = vpop.f32.mrf.mxu0  ;;  %16171 = vmatmul.mubr.msk.f32.gmra.mxu0 %vm325_vm1, %v11474_v21  ;;  %v11478_v11 = vld [vmem:[%s16268_s29 + $0x16c] sm:$0xff]  ;;  %v11479_v21 = vld [vmem:[%s16268_s29 + $0x174] sm:$0xff] }
 0x3e8   : > { %v15838_v5 = vpop.f32.mrf.mxu1  ;;  %16109 = vmatmul.mubr.msk.f32.gmra.mxu1 %vm325_vm1, %v11004_v43  ;;  %16173 = vmatprep.mubr.msk.f32.mxu0 %vm325_vm1, %v11475_v33  ;;  %v11009_v43 = vld [vmem:[%s16268_s29 + $0x173] sm:$0xff] }
 0x3e9   : > { %v19912_v17 = vadd.f32 %v9854_v23, %v9535_v60  ;;  %v9538_v25 = vadd.f32 %v15838_v5, %v19641_v46  ;;  %16111 = vmatprep.mubr.msk.f32.mxu1 %vm325_vm1, %v11005_v32  ;;  %v9864_v51 = vpop.f32.mrf.mxu0  ;;  %v11010_v5 = vld [vmem:[%s16268_s29 + $0x17b] sm:$0xff] }
 0x3ea   : > { %v9394_v12 = vpop.f32.mrf.mxu1 }
 0x3eb   : > { %v19921_v26 = vadd.f32 %v15900_v61, %v9538_v25  ;;  %v9537_v14 = vadd.f32 %v9394_v12, %v19646_v1  ;;  %v15903_v46 = vpop.f32.mrf.mxu0  ;;  %16174 = vmatmul.mubr.msk.f32.gmra.mxu0 %vm325_vm1, %v11476_v30  ;;  %v11480_v61 = vld [vmem:[%s16268_s29 + $0x17c] sm:$0xff]  ;;  %v11481_v30 = vld [vmem:[%s16268_s29 + $0x184] sm:$0xff] }
 0x3ec   : > { %v15841_v52 = vpop.f32.mrf.mxu1  ;;  %16112 = vmatmul.mubr.msk.f32.gmra.mxu1 %vm325_vm1, %v11006_v41  ;;  %16176 = vmatprep.mubr.msk.f32.mxu0 %vm325_vm1, %v11477_v28  ;;  %v11011_v41 = vld [vmem:[%s16268_s29 + $0x183] sm:$0xff] }
 0x3ed   : > { %v19926_v55 = vadd.f32 %v9864_v51, %v9537_v14  ;;  %v9540_v59 = vadd.f32 %v15841_v52, %v19655_v56  ;;  %16114 = vmatprep.mubr.msk.f32.mxu1 %vm325_vm1, %v11007_v50  ;;  %v9874_v1 = vpop.f32.mrf.mxu0  ;;  %v11012_v52 = vld [vmem:[%s16268_s29 + $0x18b] sm:$0xff] }
 0x3ee   : > { %v9404_v4 = vpop.f32.mrf.mxu1 }
 0x3ef   : > { %v19935_v49 = vadd.f32 %v15903_v46, %v9540_v59  ;;  %v9539_v23 = vadd.f32 %v9404_v4, %v19660_v2  ;;  %v15906_v56 = vpop.f32.mrf.mxu0  ;;  %16177 = vmatmul.mubr.msk.f32.gmra.mxu0 %vm325_vm1, %v11478_v11  ;;  %v11482_v46 = vld [vmem:[%s16268_s29 + $0x18c] sm:$0xff]  ;;  %s16188_s29 = smul.u32 320, %s20545_s19 }
 0x3f0   : > { %v15844_v32 = vpop.f32.mrf.mxu1  ;;  %16115 = vmatmul.mubr.msk.f32.gmra.mxu1 %vm325_vm1, %v11008_v58  ;;  %16179 = vmatprep.mubr.msk.f32.mxu0 %vm325_vm1, %v11479_v21 }
 0x3f1   : > { %v19940_v33 = vadd.f32 %v9874_v1, %v9539_v23  ;;  %v9542_v60 = vadd.f32 %v15844_v32, %v19669_v45  ;;  %16117 = vmatprep.mubr.msk.f32.mxu1 %vm325_vm1, %v11009_v43  ;;  %v9884_v2 = vpop.f32.mrf.mxu0  ;;  %s20171_s23 = scalar_lea.vmem %s20449_s3, %s16188_s29 }
 0x3f2   : > { %v9414_v25 = vpop.f32.mrf.mxu1 }
 0x3f3   : > { %v19949_v12 = vadd.f32 %v15906_v56, %v9542_v60  ;;  %v9541_v51 = vadd.f32 %v9414_v25, %v19674_v20  ;;  %v15909_v28 = vpop.f32.mrf.mxu0  ;;  %16180 = vmatmul.mubr.msk.f32.gmra.mxu0 %vm325_vm1, %v11480_v61 }
 0x3f4   : > { %v15847_v50 = vpop.f32.mrf.mxu1  ;;  %16118 = vmatmul.mubr.msk.f32.gmra.mxu1 %vm325_vm1, %v11010_v5  ;;  %16182 = vmatprep.mubr.msk.f32.mxu0 %vm325_vm1, %v11481_v30 }
 0x3f5   : > { %v19954_v45 = vadd.f32 %v9884_v2, %v9541_v51  ;;  %v9544_v14 = vadd.f32 %v15847_v50, %v19683_v7  ;;  %16120 = vmatprep.mubr.msk.f32.mxu1 %vm325_vm1, %v11011_v41  ;;  %v9894_v58 = vpop.f32.mrf.mxu0 }
 0x3f6   : > { %v9424_v59 = vpop.f32.mrf.mxu1 }
 0x3f7   : > { %v19961_v11 = vadd.f32 %v15909_v28, %v9544_v14  ;;  %v9543_v20 = vadd.f32 %v9424_v59, %v19688_v27  ;;  %v15912_v1 = vpop.f32.mrf.mxu0  ;;  %16183 = vmatmul.mubr.msk.f32.gmra.mxu0 %vm325_vm1, %v11482_v46 }
 0x3f8   : > { %v15850_v4 = vpop.f32.mrf.mxu1  ;;  %16121 = vmatmul.mubr.msk.f32.gmra.mxu1 %vm325_vm1, %v11012_v52 }
 0x3f9   : > { %v19966_v43 = vadd.f32 %v9894_v58, %v9543_v20  ;;  %v9546_v7 = vadd.f32 %v15850_v4, %v19697_v29  ;;  %v9904_v23 = vpop.f32.mrf.mxu0 }
 0x3fa   : > { %v9434_v21 = vpop.f32.mrf.mxu1 }
 0x3fb   : > { %v19969_v32 = vadd.f32 %v15912_v1, %v9546_v7  ;;  %v9545_v56 = vadd.f32 %v9434_v21, %v19702_v40  ;;  %v15915_v5 = vpop.f32.mrf.mxu0 }
 0x3fc   : > { %v15853_v60 = vpop.f32.mrf.mxu1 }
 0x3fd   : > { %v19972_v61 = vadd.f32 %v9904_v23, %v9545_v56  ;;  %v9548_v27 = vadd.f32 %v15853_v60, %v19711_v54  ;;  %v9914_v2 = vpop.f32.mrf.mxu0 }
 0x3fe   : > { %v9444_v25 = vpop.f32.mrf.mxu1 }
 0x3ff   : > { %v19975_v41 = vadd.f32 %v15915_v5, %v9548_v27  ;;  %v9547_v30 = vadd.f32 %v9444_v25, %v19716_v35  ;;  %v15918_v29 = vpop.f32.mrf.mxu0 }
 0x400   : > { %v15856_v51 = vpop.f32.mrf.mxu1 }
 0x401   : > { %v19978_v50 = vadd.f32 %v9914_v2, %v9547_v30  ;;  %v9550_v28 = vadd.f32 %v15856_v51, %v19725_v47  ;;  %v9924_v40 = vpop.f32.mrf.mxu0 }
 0x402   : > { %v9454_v14 = vpop.f32.mrf.mxu1 }
 0x403   : > { %v19981_v52 = vadd.f32 %v15918_v29, %v9550_v28  ;;  %v9549_v46 = vadd.f32 %v9454_v14, %v19730_v13  ;;  %v15921_v54 = vpop.f32.mrf.mxu0 }
 0x404   : > { %v15859_v59 = vpop.f32.mrf.mxu1 }
 0x405   : > { %v19984_v58 = vadd.f32 %v9924_v40, %v9549_v46  ;;  %v9552_v20 = vadd.f32 %v15859_v59, %v19739_v9  ;;  %v9934_v35 = vpop.f32.mrf.mxu0 }
 0x406   : > { %v9464_v4 = vpop.f32.mrf.mxu1 }
 0x407   : > { %v19987_v1 = vadd.f32 %v15921_v54, %v9552_v20  ;;  %v9551_v7 = vadd.f32 %v9464_v4, %v19744_v63  ;;  %v15924_v47 = vpop.f32.mrf.mxu0 }
 0x408   : > { %v15862_v21 = vpop.f32.mrf.mxu1 }
 0x409   : > { %v19990_v23 = vadd.f32 %v9934_v35, %v9551_v7  ;;  %v9554_v56 = vadd.f32 %v15862_v21, %v19753_v53  ;;  %v9944_v13 = vpop.f32.mrf.mxu0 }
 0x40a   : > { %v9474_v60 = vpop.f32.mrf.mxu1 }
 0x40b   : > { %v19993_v5 = vadd.f32 %v15924_v47, %v9554_v56  ;;  %v9553_v27 = vadd.f32 %v9474_v60, %v19758_v36  ;;  %v15927_v9 = vpop.f32.mrf.mxu0 }
 0x40c   : > { %v15865_v25 = vpop.f32.mrf.mxu1 }
 0x40d   : > { %v19996_v2 = vadd.f32 %v9944_v13, %v9553_v27  ;;  %v9556_v30 = vadd.f32 %v15865_v25, %v19767_v19  ;;  %v9954_v63 = vpop.f32.mrf.mxu0 }
 0x40e   : > { %v9484_v51 = vpop.f32.mrf.mxu1 }
 0x40f   : > { %v19999_v29 = vadd.f32 %v15927_v9, %v9556_v30  ;;  %v9555_v28 = vadd.f32 %v9484_v51, %v19772_v34  ;;  %v15930_v53 = vpop.f32.mrf.mxu0 }
 0x410   : > { %v15868_v14 = vpop.f32.mrf.mxu1 }
 0x411   : > { %v20002_v40 = vadd.f32 %v9954_v63, %v9555_v28  ;;  %v9558_v46 = vadd.f32 %v15868_v14, %v19781_v42  ;;  %v9964_v36 = vpop.f32.mrf.mxu0 }
 0x412   : > { %v9494_v59 = vpop.f32.mrf.mxu1 }
 0x413   : > { %v20005_v54 = vadd.f32 %v15930_v53, %v9558_v46  ;;  %v9557_v20 = vadd.f32 %v9494_v59, %v19786_v3  ;;  %v15933_v19 = vpop.f32.mrf.mxu0 }
 0x414   : > { %v15871_v4 = vpop.f32.mrf.mxu1 }
 0x415   : > { %v20008_v35 = vadd.f32 %v9964_v36, %v9557_v20  ;;  %v9560_v7 = vadd.f32 %v15871_v4, %v19795_v0  ;;  %v9974_v34 = vpop.f32.mrf.mxu0 }
 0x416   : > { %v9504_v21 = vpop.f32.mrf.mxu1 }
 0x417   : > { %v20011_v47 = vadd.f32 %v15933_v19, %v9560_v7  ;;  %v9559_v56 = vadd.f32 %v9504_v21, %v19800_v39  ;;  %v15936_v42 = vpop.f32.mrf.mxu0 }
 0x418   : > { %v15874_v60 = vpop.f32.mrf.mxu1 }
 0x419   : > { %v20014_v13 = vadd.f32 %v9974_v34, %v9559_v56  ;;  %v9562_v27 = vadd.f32 %v15874_v60, %v19809_v8  ;;  %v9984_v3 = vpop.f32.mrf.mxu0 }
 0x41a   : > { %v9514_v25 = vpop.f32.mrf.mxu1 }
 0x41b   : > { %v20017_v9 = vadd.f32 %v15936_v42, %v9562_v27  ;;  %v9561_v30 = vadd.f32 %v9514_v25, %v19814_v48  ;;  %v16003_v0 = vpop.f32.mrf.mxu0 }
 0x41c   : > { %v15941_v51 = vpop.f32.mrf.mxu1 }
 0x41d   : > { %v20020_v63 = vadd.f32 %v9984_v3, %v9561_v30  ;;  %v10464_v28 = vadd.f32 %v15941_v51, %v19823_v62  ;;  %v10734_v39 = vpop.f32.mrf.mxu0 }
 0x41e   : > { %v10264_v14 = vpop.f32.mrf.mxu1 }
 0x41f   : > { %v20023_v53 = vadd.f32 %v16003_v0, %v10464_v28  ;;  %v10463_v46 = vadd.f32 %v10264_v14, %v19828_v15  ;;  %v16006_v8 = vpop.f32.mrf.mxu0 }
 0x420   : > { %v15944_v59 = vpop.f32.mrf.mxu1 }
 0x421   : > { %v20026_v36 = vadd.f32 %v10734_v39, %v10463_v46  ;;  %v10466_v20 = vadd.f32 %v15944_v59, %v19837_v38  ;;  %v10744_v48 = vpop.f32.mrf.mxu0 }
 0x422   : > { %v10274_v4 = vpop.f32.mrf.mxu1 }
 0x423   : > { %v20029_v19 = vadd.f32 %v16006_v8, %v10466_v20  ;;  %v10465_v7 = vadd.f32 %v10274_v4, %v19842_v31  ;;  %v16009_v62 = vpop.f32.mrf.mxu0 }
 0x424   : > { %v15947_v21 = vpop.f32.mrf.mxu1 }
 0x425   : > { %v20032_v34 = vadd.f32 %v10744_v48, %v10465_v7  ;;  %v10468_v56 = vadd.f32 %v15947_v21, %v19851_v10  ;;  %v10754_v15 = vpop.f32.mrf.mxu0 }
 0x426   : > { %v10284_v60 = vpop.f32.mrf.mxu1 }
 0x427   : > { %v20035_v42 = vadd.f32 %v16009_v62, %v10468_v56  ;;  %v10467_v27 = vadd.f32 %v10284_v60, %v19856_v18  ;;  %v16012_v38 = vpop.f32.mrf.mxu0 }
 0x428   : > { %v15950_v25 = vpop.f32.mrf.mxu1 }
 0x429   : > { %v20038_v3 = vadd.f32 %v10754_v15, %v10467_v27  ;;  %v10470_v30 = vadd.f32 %v15950_v25, %v19865_v16  ;;  %v10764_v31 = vpop.f32.mrf.mxu0 }
 0x42a   : > { %v10294_v51 = vpop.f32.mrf.mxu1 }
 0x42b   : > { %v20041_v0 = vadd.f32 %v16012_v38, %v10470_v30  ;;  %v10469_v28 = vadd.f32 %v10294_v51, %v19870_v22  ;;  %v16015_v10 = vpop.f32.mrf.mxu0 }
 0x42c   : > { %v15953_v14 = vpop.f32.mrf.mxu1 }
 0x42d   : > { %v20044_v39 = vadd.f32 %v10764_v31, %v10469_v28  ;;  %v10472_v46 = vadd.f32 %v15953_v14, %v19879_v57  ;;  %v10774_v18 = vpop.f32.mrf.mxu0 }
 0x42e   : > { %v10304_v59 = vpop.f32.mrf.mxu1 }
 0x42f   : > { %v20047_v8 = vadd.f32 %v16015_v10, %v10472_v46  ;;  %v10471_v20 = vadd.f32 %v10304_v59, %v19884_v24  ;;  %v16018_v16 = vpop.f32.mrf.mxu0 }
 0x430   : > { %v15956_v4 = vpop.f32.mrf.mxu1 }
 0x431   : > { %v20050_v48 = vadd.f32 %v10774_v18, %v10471_v20  ;;  %v10474_v7 = vadd.f32 %v15956_v4, %v19893_v37  ;;  %v10784_v22 = vpop.f32.mrf.mxu0 }
 0x432   : > { %v10314_v21 = vpop.f32.mrf.mxu1 }
 0x433   : > { %v20053_v62 = vadd.f32 %v16018_v16, %v10474_v7  ;;  %v10473_v56 = vadd.f32 %v10314_v21, %v19898_v6  ;;  %v16021_v57 = vpop.f32.mrf.mxu0 }
 0x434   : > { %v15959_v60 = vpop.f32.mrf.mxu1 }
 0x435   : > { %v20056_v15 = vadd.f32 %v10784_v22, %v10473_v56  ;;  %v10476_v27 = vadd.f32 %v15959_v60, %v19907_v44  ;;  %v10794_v24 = vpop.f32.mrf.mxu0 }
 0x436   : > { %v10324_v25 = vpop.f32.mrf.mxu1 }
 0x437   : > { %v20059_v38 = vadd.f32 %v16021_v57, %v10476_v27  ;;  %v10475_v30 = vadd.f32 %v10324_v25, %v19912_v17  ;;  %v16024_v37 = vpop.f32.mrf.mxu0 }
 0x438   : > { %v15962_v51 = vpop.f32.mrf.mxu1 }
 0x439   : > { %v20062_v31 = vadd.f32 %v10794_v24, %v10475_v30  ;;  %v10478_v28 = vadd.f32 %v15962_v51, %v19921_v26  ;;  %v10804_v6 = vpop.f32.mrf.mxu0 }
 0x43a   : > { %v10334_v14 = vpop.f32.mrf.mxu1 }
 0x43b   : > { %v20065_v10 = vadd.f32 %v16024_v37, %v10478_v28  ;;  %v10477_v46 = vadd.f32 %v10334_v14, %v19926_v55  ;;  %v16027_v44 = vpop.f32.mrf.mxu0 }
 0x43c   : > { %v15965_v59 = vpop.f32.mrf.mxu1 }
 0x43d   : > { %v20068_v18 = vadd.f32 %v10804_v6, %v10477_v46  ;;  %v10480_v20 = vadd.f32 %v15965_v59, %v19935_v49  ;;  %v10814_v17 = vpop.f32.mrf.mxu0 }
 0x43e   : > { %v10344_v4 = vpop.f32.mrf.mxu1 }
 0x43f   : > { %v20071_v16 = vadd.f32 %v16027_v44, %v10480_v20  ;;  %v10479_v7 = vadd.f32 %v10344_v4, %v19940_v33  ;;  %v16030_v26 = vpop.f32.mrf.mxu0  ;;  %v20089_v44 = vpop.permute.xlu1 %12006 }
 0x440   : > { %v15968_v21 = vpop.f32.mrf.mxu1 }
 0x441   : > { %v20074_v22 = vadd.f32 %v10814_v17, %v10479_v7  ;;  %v10482_v56 = vadd.f32 %v15968_v21, %v19949_v12  ;;  %v10824_v55 = vpop.f32.mrf.mxu0  ;;  %v20094_v7 = vpop.permute.xlu0 %11996 }
 0x442   : > { %v10354_v60 = vpop.f32.mrf.mxu1 }
 0x443   : > { %v20077_v57 = vadd.f32 %v16030_v26, %v10482_v56  ;;  %v10481_v27 = vadd.f32 %v10354_v60, %v19954_v45  ;;  %v16033_v49 = vpop.f32.mrf.mxu0 }
 0x444   : > { %v15971_v25 = vpop.f32.mrf.mxu1 }
 0x445   : > { %v20080_v24 = vadd.f32 %v10824_v55, %v10481_v27  ;;  %v10484_v30 = vadd.f32 %v15971_v25, %v19961_v11  ;;  %v10834_v33 = vpop.f32.mrf.mxu0  ;;  %v20102_v25 = vpop.permute.xlu1 %12011 }
 0x446   : > { %v10364_v51 = vpop.f32.mrf.mxu1 }
 0x447   : > { %v20083_v37 = vadd.f32 %v16033_v49, %v10484_v30  ;;  %v10483_v28 = vadd.f32 %v10364_v51, %v19966_v43  ;;  %v16036_v12 = vpop.f32.mrf.mxu0 }
 0x448   : > { %v15974_v14 = vpop.f32.mrf.mxu1 }
 0x449   : > { %v20086_v6 = vadd.f32 %v10834_v33, %v10483_v28  ;;  %v10486_v46 = vadd.f32 %v15974_v14, %v19969_v32  ;;  %v10844_v45 = vpop.f32.mrf.mxu0  ;;  %v20107_v33 = vpop.permute.xlu0 %12001 }
 0x44a   : > { %v10374_v59 = vpop.f32.mrf.mxu1 }
 0x44b   : > { %v20091_v20 = vadd.f32 %v16036_v12, %v10486_v46  ;;  %v10485_v11 = vadd.f32 %v10374_v59, %v19972_v61  ;;  %v16039_v17 = vpop.f32.mrf.mxu0 }
 0x44c   : > { %v15977_v4 = vpop.f32.mrf.mxu1 }
 0x44d   : > { %v20096_v21 = vadd.f32 %v10844_v45, %v10485_v11  ;;  %v10488_v43 = vadd.f32 %v15977_v4, %v19975_v41  ;;  %v10854_v56 = vpop.f32.mrf.mxu0  ;;  %v20115_v11 = vpop.permute.xlu1 %12021 }
 0x44e   : > { %v10384_v26 = vpop.f32.mrf.mxu1 }
 0x44f   : > { %v20099_v60 = vadd.f32 %v16039_v17, %v10488_v43  ;;  %v10487_v32 = vadd.f32 %v10384_v26, %v19978_v50  ;;  %v16042_v27 = vpop.f32.mrf.mxu0  ;;  %v20120_v26 = vpop.permute.xlu0 %12016 }
 0x450   : > { %v15980_v55 = vpop.f32.mrf.mxu1 }
 0x451   : > { %v20104_v49 = vadd.f32 %v10854_v56, %v10487_v32  ;;  %v10490_v61 = vadd.f32 %v15980_v55, %v19981_v52  ;;  %v10864_v51 = vpop.f32.mrf.mxu0 }
 0x452   : > { %v10394_v30 = vpop.f32.mrf.mxu1 }
 0x453   : > { %v20109_v28 = vadd.f32 %v16042_v27, %v10490_v61  ;;  %v10489_v41 = vadd.f32 %v10394_v30, %v19984_v58  ;;  %v16045_v12 = vpop.f32.mrf.mxu0 }
 0x454   : > { %v15983_v14 = vpop.f32.mrf.mxu1 }
 0x455   : > { %v20112_v46 = vadd.f32 %v10864_v51, %v10489_v41  ;;  %v10492_v50 = vadd.f32 %v15983_v14, %v19987_v1  ;;  %v10874_v45 = vpop.f32.mrf.mxu0  ;;  %v20128_v51 = vpop.permute.xlu1 %12031 }
 0x456   : > { %v10404_v59 = vpop.f32.mrf.mxu1 }
 0x457   : > { %v20117_v4 = vadd.f32 %v16045_v12, %v10492_v50  ;;  %v10491_v52 = vadd.f32 %v10404_v59, %v19990_v23  ;;  %v16048_v43 = vpop.f32.mrf.mxu0  ;;  %v20133_v50 = vpop.permute.xlu0 %12026 }
 0x458   : > { %v15986_v17 = vpop.f32.mrf.mxu1 }
 0x459   : > { %v20122_v56 = vadd.f32 %v10874_v45, %v10491_v52  ;;  %v10494_v58 = vadd.f32 %v15986_v17, %v19993_v5  ;;  %v10884_v55 = vpop.f32.mrf.mxu0 }
 0x45a   : > { %v10414_v32 = vpop.f32.mrf.mxu1 }
 0x45b   : > { %v20125_v27 = vadd.f32 %v16048_v43, %v10494_v58  ;;  %v10493_v1 = vadd.f32 %v10414_v32, %v19996_v2  ;;  %v16051_v30 = vpop.f32.mrf.mxu0  ;;  %v20141_v32 = vpop.permute.xlu1 %12041 }
 0x45c   : > { %v15989_v61 = vpop.f32.mrf.mxu1 }
 0x45d   : > { %v20130_v41 = vadd.f32 %v10884_v55, %v10493_v1  ;;  %v10496_v23 = vadd.f32 %v15989_v61, %v19999_v29  ;;  %v10894_v12 = vpop.f32.mrf.mxu0 }
 0x45e   : > { %v10424_v14 = vpop.f32.mrf.mxu1 }
 0x45f   : > { %v20135_v59 = vadd.f32 %v16051_v30, %v10496_v23  ;;  %v10495_v5 = vadd.f32 %v10424_v14, %v20002_v40  ;;  %v16054_v52 = vpop.f32.mrf.mxu0  ;;  %v20146_v30 = vpop.permute.xlu0 %12036 }
 0x460   : > { %v15992_v45 = vpop.f32.mrf.mxu1 }
 0x461   : > { %v20138_v17 = vadd.f32 %v10894_v12, %v10495_v5  ;;  %v10498_v2 = vadd.f32 %v15992_v45, %v20005_v54  ;;  %v10904_v58 = vpop.f32.mrf.mxu0 }
 0x462   : > { %v10434_v43 = vpop.f32.mrf.mxu1 }
 0x463   : > { %20532 = vst [vmem:[#allocation2_spill] sm:$0xff] %v20138_v17  ;;  %v20143_v55 = vadd.f32 %v16054_v52, %v10498_v2  ;;  %v10497_v29 = vadd.f32 %v10434_v43, %v20008_v35  ;;  %v16057_v61 = vpop.f32.mrf.mxu0  ;;  %v20154_v2 = vpop.permute.xlu1 %12051 }
 0x464   : > { %v15995_v1 = vpop.f32.mrf.mxu1 }
 0x465   : > { %20533 = vst [vmem:[#allocation3_spill] sm:$0xff] %v20143_v55  ;;  %v20148_v40 = vadd.f32 %v10904_v58, %v10497_v29  ;;  %v10500_v23 = vadd.f32 %v15995_v1, %v20011_v47  ;;  %v10914_v12 = vpop.f32.mrf.mxu0  ;;  %v20160_v58 = vpop.permute.xlu0 %12046 }
 0x466   : > { %v10444_v14 = vpop.f32.mrf.mxu1 }
 0x467   : > { %v20151_v54 = vadd.f32 %v16057_v61, %v10500_v23  ;;  %v10499_v5 = vadd.f32 %v10444_v14, %v20014_v13  ;;  %v16060_v52 = vpop.f32.mrf.mxu0 }
 0x468   : > { %v15998_v45 = vpop.f32.mrf.mxu1 }
 0x469   : > { %20534 = vst [vmem:[#allocation4_spill] sm:$0xff] %v20151_v54  ;;  %v20156_v35 = vadd.f32 %v10914_v12, %v10499_v5  ;;  %v10502_v43 = vadd.f32 %v15998_v45, %v20017_v9  ;;  %v10924_v17 = vpop.f32.mrf.mxu0  ;;  %v20173_v12 = vpop.permute.xlu1 %12061 }
 0x46a   : > { %v10454_v55 = vpop.f32.mrf.mxu1  ;;  %v20176_v45 = vpop.permute.xlu0 %12056 }
 0x46b   : > { %20535 = vst [vmem:[#allocation5_spill] sm:$0xff] %v20156_v35  ;;  %v20162_v47 = vadd.f32 %v16060_v52, %v10502_v43  ;;  %v10501_v29 = vadd.f32 %v10454_v55, %v20020_v63  ;;  %v16127_v61 = vpop.f32.mrf.mxu0 }
 0x46c   : > { %v16065_v1 = vpop.f32.mrf.mxu1 }
 0x46d   : > { %20536 = vst [vmem:[#allocation6_spill] sm:$0xff] %v20162_v47  ;;  %v20165_v13 = vadd.f32 %v10924_v17, %v10501_v29  ;;  %v11404_v23 = vadd.f32 %v16065_v1, %v20023_v53  ;;  %v11674_v14 = vpop.f32.mrf.mxu0  ;;  %v20186_v35 = vpop.permute.xlu1 %12071 }
 0x46e   : > { %v11204_v9 = vpop.f32.mrf.mxu1 }
 0x46f   : > { %20537 = vst [vmem:[#allocation7_spill] sm:$0xff] %v20165_v13  ;;  %v11874_v5 = vadd.f32 %v16127_v61, %v11404_v23  ;;  %v11403_v63 = vadd.f32 %v11204_v9, %v20026_v36  ;;  %v16130_v17 = vpop.f32.mrf.mxu0 }
 0x470   : > { %v16068_v55 = vpop.f32.mrf.mxu1 }
 0x471   : > { %11915 = vst.msk [vmem:[%s20171_s23 + $0x8] sm:$0xff] %vm11913_vm2, %v11874_v5  ;;  %v12195_v53 = vmul.f32 %v20107_v33, %v11874_v5  ;;  %v11873_v52 = vadd.f32 %v11674_v14, %v11403_v63  ;;  %v11406_v43 = vadd.f32 %v16068_v55, %v20029_v19  ;;  %v11684_v1 = vpop.f32.mrf.mxu0 }
 0x472   : > { %v11214_v29 = vpop.f32.mrf.mxu1 }
 0x473   : > { %v12322_v13 = vmul.f32 %v12195_v53, %v11874_v5  ;;  %11914 = vst.msk [vmem:[%s20171_s23] sm:$0xff] %vm11913_vm2, %v11873_v52  ;;  %v12194_v61 = vmul.f32 %v20094_v7, %v11873_v52  ;;  %v11876_v36 = vadd.f32 %v16130_v17, %v11406_v43  ;;  %v11405_v23 = vadd.f32 %v11214_v29, %v20032_v34  ;;  %v16133_v47 = vpop.f32.mrf.mxu0  ;;  %v20194_v43 = vpop.permute.xlu0 %12066 }
 0x474   : > { %v16071_v9 = vpop.f32.mrf.mxu1  ;;  %v12235_v33 = vsel %vm11913_vm2, %v12195_v53, 0.0 }
 0x475   : > { %v12234_v14 = vsel %vm11913_vm2, %v12194_v61, 0.0  ;;  %v12321_v19 = vmul.f32 %v12194_v61, %v11873_v52  ;;  %11917 = vst.msk [vmem:[%s20171_s23 + $0x18] sm:$0xff] %vm11913_vm2, %v11876_v36  ;;  %v12197_v63 = vmul.f32 %v20102_v25, %v11876_v36  ;;  %v11875_v55 = vadd.f32 %v11684_v1, %v11405_v23  ;;  %v11694_v34 = vpop.f32.mrf.mxu0 }
 0x476   : > { %v12236_v5 = vadd.f32 %v12235_v33, %v12234_v14  ;;  %v11408_v7 = vadd.f32 %v16071_v9, %v20035_v42  ;;  %v11224_v17 = vpop.f32.mrf.mxu1  ;;  %v12362_v29 = vsel %vm11913_vm2, %v12322_v13, 0.0 }
 0x477   : > { %v12361_v53 = vsel %vm11913_vm2, %v12321_v19, 0.0  ;;  %v11407_v54 = vadd.f32 %v11224_v17, %v20038_v3  ;;  %11916 = vst.msk [vmem:[%s20171_s23 + $0x10] sm:$0xff] %vm11913_vm2, %v11875_v55  ;;  %v12196_v25 = vmul.f32 %v20089_v44, %v11875_v55  ;;  %v16136_v42 = vpop.f32.mrf.mxu0  ;;  %v12324_v33 = vmul.f32 %v12197_v63, %v11876_v36 }
 0x478   : > { %v12363_v52 = vadd.f32 %v12362_v29, %v12361_v53  ;;  %v11878_v1 = vadd.f32 %v16133_v47, %v11408_v7  ;;  %v16074_v61 = vpop.f32.mrf.mxu1  ;;  %v20207_v29 = vpop.permute.xlu1 %12081  ;;  %v12239_v36 = vsel %vm11913_vm2, %v12197_v63, 0.0 }
 0x479   : > { %v11877_v23 = vadd.f32 %v11694_v34, %v11407_v54  ;;  %v11410_v9 = vadd.f32 %v16074_v61, %v20041_v0  ;;  %v12237_v14 = vsel %vm11913_vm2, %v12196_v25, 0.0  ;;  %v12323_v13 = vmul.f32 %v12196_v25, %v11875_v55  ;;  %v11704_v17 = vpop.f32.mrf.mxu0  ;;  %v20215_v53 = vpop.permute.xlu0 %12076 }
 0x47a   : > { %11919 = vst.msk [vmem:[%s20171_s23 + $0x28] sm:$0xff] %vm11913_vm2, %v11878_v1  ;;  %v12199_v3 = vmul.f32 %v20115_v11, %v11878_v1  ;;  %v11234_v19 = vpop.f32.mrf.mxu1  ;;  %v12238_v44 = vadd.f32 %v12237_v14, %v12236_v5 }
 0x47b   : > { %11918 = vst.msk [vmem:[%s20171_s23 + $0x20] sm:$0xff] %vm11913_vm2, %v11877_v23  ;;  %v12198_v54 = vmul.f32 %v20120_v26, %v11877_v23  ;;  %v11880_v47 = vadd.f32 %v16136_v42, %v11410_v9  ;;  %v11409_v0 = vadd.f32 %v11234_v19, %v20044_v39  ;;  %v12364_v55 = vsel %vm11913_vm2, %v12323_v13, 0.0  ;;  %v16139_v11 = vpop.f32.mrf.mxu0 }
 0x47c   : > { %v12326_v7 = vmul.f32 %v12199_v3, %v11878_v1  ;;  %v16077_v34 = vpop.f32.mrf.mxu1  ;;  %v12365_v25 = vadd.f32 %v12364_v55, %v12363_v52  ;;  %v12240_v61 = vadd.f32 %v12239_v36, %v12238_v44  ;;  %v12366_v26 = vsel %vm11913_vm2, %v12324_v33, 0.0 }
 0x47d   : > { %v12241_v5 = vsel %vm11913_vm2, %v12198_v54, 0.0  ;;  %v12325_v14 = vmul.f32 %v12198_v54, %v11877_v23  ;;  %11921 = vst.msk [vmem:[%s20171_s23 + $0x38] sm:$0xff] %vm11913_vm2, %v11880_v47  ;;  %v12201_v39 = vmul.f32 %v20128_v51, %v11880_v47  ;;  %v11879_v63 = vadd.f32 %v11704_v17, %v11409_v0  ;;  %v11714_v9 = vpop.f32.mrf.mxu0  ;;  %v20230_v0 = vpop.permute.xlu1 %12091 }
 0x47e   : > { %v11412_v42 = vadd.f32 %v16077_v34, %v20047_v8  ;;  %v11244_v1 = vpop.f32.mrf.mxu1  ;;  %v12242_v13 = vadd.f32 %v12241_v5, %v12240_v61  ;;  %v12367_v19 = vadd.f32 %v12366_v26, %v12365_v25  ;;  %v12243_v23 = vsel %vm11913_vm2, %v12199_v3, 0.0  ;;  %v20237_v5 = vpop.permute.xlu0 %12086 }
 0x47f   : > { %v12368_v52 = vsel %vm11913_vm2, %v12325_v14, 0.0  ;;  %v11411_v44 = vadd.f32 %v11244_v1, %v20050_v48  ;;  %v12370_v54 = vsel %vm11913_vm2, %v12326_v7, 0.0  ;;  %11920 = vst.msk [vmem:[%s20171_s23 + $0x30] sm:$0xff] %vm11913_vm2, %v11879_v63  ;;  %v12200_v51 = vmul.f32 %v20133_v50, %v11879_v63  ;;  %v16142_v8 = vpop.f32.mrf.mxu0 }
 0x480   : > { %v11882_v33 = vadd.f32 %v16139_v11, %v11412_v42  ;;  %v16080_v17 = vpop.f32.mrf.mxu1  ;;  %v12369_v36 = vadd.f32 %v12368_v52, %v12367_v19  ;;  %v12244_v55 = vadd.f32 %v12243_v23, %v12242_v13  ;;  %v12328_v25 = vmul.f32 %v12201_v39, %v11880_v47 }
 0x481   : > { %v11881_v34 = vadd.f32 %v11714_v9, %v11411_v44  ;;  %v11414_v48 = vadd.f32 %v16080_v17, %v20053_v62  ;;  %v12245_v3 = vsel %vm11913_vm2, %v12200_v51, 0.0  ;;  %v12327_v61 = vmul.f32 %v12200_v51, %v11879_v63  ;;  %v11724_v11 = vpop.f32.mrf.mxu0 }
 0x482   : > { %11923 = vst.msk [vmem:[%s20171_s23 + $0x48] sm:$0xff] %vm11913_vm2, %v11882_v33  ;;  %v12203_v7 = vmul.f32 %v20141_v32, %v11882_v33  ;;  %v11254_v50 = vpop.f32.mrf.mxu1  ;;  %v12246_v14 = vadd.f32 %v12245_v3, %v12244_v55  ;;  %v12371_v26 = vadd.f32 %v12370_v54, %v12369_v36  ;;  %v12247_v47 = vsel %vm11913_vm2, %v12201_v39, 0.0 }
 0x483   : > { %11922 = vst.msk [vmem:[%s20171_s23 + $0x40] sm:$0xff] %vm11913_vm2, %v11881_v34  ;;  %v12202_v42 = vmul.f32 %v20146_v30, %v11881_v34  ;;  %v11884_v62 = vadd.f32 %v16142_v8, %v11414_v48  ;;  %v12372_v63 = vsel %vm11913_vm2, %v12327_v61, 0.0  ;;  %v11413_v9 = vadd.f32 %v11254_v50, %v20056_v15  ;;  %v16145_v13 = vpop.f32.mrf.mxu0  ;;  %v20251_v15 = vpop.permute.xlu1 %12101 }
 0x484   : > { %v12330_v1 = vmul.f32 %v12203_v7, %v11882_v33  ;;  %v16083_v32 = vpop.f32.mrf.mxu1  ;;  %v12373_v19 = vadd.f32 %v12372_v63, %v12371_v26  ;;  %v12248_v52 = vadd.f32 %v12247_v47, %v12246_v14  ;;  %v12374_v30 = vsel %vm11913_vm2, %v12328_v25, 0.0  ;;  %v20260_v50 = vpop.permute.xlu0 %12096 }
 0x485   : > { %v12249_v44 = vsel %vm11913_vm2, %v12202_v42, 0.0  ;;  %v12329_v23 = vmul.f32 %v12202_v42, %v11881_v34  ;;  %11925 = vst.msk [vmem:[%s20171_s23 + $0x58] sm:$0xff] %vm11913_vm2, %v11884_v62  ;;  %v12205_v54 = vmul.f32 %v20154_v2, %v11884_v62  ;;  %v11883_v39 = vadd.f32 %v11724_v11, %v11413_v9  ;;  %v11734_v17 = vpop.f32.mrf.mxu0 }
 0x486   : > { %v11416_v51 = vadd.f32 %v16083_v32, %v20059_v38  ;;  %v11264_v33 = vpop.f32.mrf.mxu1  ;;  %v12250_v8 = vadd.f32 %v12249_v44, %v12248_v52  ;;  %v12375_v36 = vadd.f32 %v12374_v30, %v12373_v19  ;;  %v12251_v34 = vsel %vm11913_vm2, %v12203_v7, 0.0 }
 0x487   : > { %v12376_v55 = vsel %vm11913_vm2, %v12329_v23, 0.0  ;;  %v11415_v48 = vadd.f32 %v11264_v33, %v20062_v31  ;;  %v12378_v25 = vsel %vm11913_vm2, %v12330_v1, 0.0  ;;  %11924 = vst.msk [vmem:[%s20171_s23 + $0x50] sm:$0xff] %vm11913_vm2, %v11883_v39  ;;  %v12204_v2 = vmul.f32 %v20160_v58, %v11883_v39  ;;  %v16148_v61 = vpop.f32.mrf.mxu0 }
 0x488   : > { %v11886_v38 = vadd.f32 %v16145_v13, %v11416_v51  ;;  %v16086_v3 = vpop.f32.mrf.mxu1  ;;  %v12377_v11 = vadd.f32 %v12376_v55, %v12375_v36  ;;  %v12252_v14 = vadd.f32 %v12251_v34, %v12250_v8  ;;  %v12332_v42 = vmul.f32 %v12205_v54, %v11884_v62 }
 0x489   : > { %v11885_v26 = vadd.f32 %v11734_v17, %v11415_v48  ;;  %v11418_v31 = vadd.f32 %v16086_v3, %v20065_v10  ;;  %v12253_v7 = vsel %vm11913_vm2, %v12204_v2, 0.0  ;;  %v12331_v47 = vmul.f32 %v12204_v2, %v11883_v39  ;;  %v11744_v1 = vpop.f32.mrf.mxu0  ;;  %v20281_v48 = vpop.permute.xlu0 %12106 }
 0x48a   : > { %11927 = vst.msk [vmem:[%s20171_s23 + $0x68] sm:$0xff] %vm11913_vm2, %v11886_v38  ;;  %v12207_v63 = vmul.f32 %v20173_v12, %v11886_v38  ;;  %v11274_v58 = vpop.f32.mrf.mxu1  ;;  %v12254_v9 = vadd.f32 %v12253_v7, %v12252_v14  ;;  %v12379_v32 = vadd.f32 %v12378_v25, %v12377_v11  ;;  %v12255_v10 = vsel %vm11913_vm2, %v12205_v54, 0.0  ;;  %v20273_v12 = vpop.permute.xlu1 %12111 }
 0x48b   : > { %11926 = vst.msk [vmem:[%s20171_s23 + $0x60] sm:$0xff] %vm11913_vm2, %v11885_v26  ;;  %v12206_v13 = vmul.f32 %v20176_v45, %v11885_v26  ;;  %v11888_v19 = vadd.f32 %v16148_v61, %v11418_v31  ;;  %v12380_v62 = vsel %vm11913_vm2, %v12331_v47, 0.0  ;;  %v11417_v44 = vadd.f32 %v11274_v58, %v20068_v18  ;;  %v16151_v30 = vpop.f32.mrf.mxu0 }
 0x48c   : > { %v12334_v52 = vmul.f32 %v12207_v63, %v11886_v38  ;;  %v16089_v23 = vpop.f32.mrf.mxu1  ;;  %v12381_v39 = vadd.f32 %v12380_v62, %v12379_v32  ;;  %v12256_v51 = vadd.f32 %v12255_v10, %v12254_v9  ;;  %v12382_v45 = vsel %vm11913_vm2, %v12332_v42, 0.0 }
 0x48d   : > { %v12257_v33 = vsel %vm11913_vm2, %v12206_v13, 0.0  ;;  %v12333_v17 = vmul.f32 %v12206_v13, %v11885_v26  ;;  %11929 = vst.msk [vmem:[%s20171_s23 + $0x78] sm:$0xff] %vm11913_vm2, %v11888_v19  ;;  %v12209_v54 = vmul.f32 %v20186_v35, %v11888_v19  ;;  %v11887_v8 = vadd.f32 %v11744_v1, %v11417_v44  ;;  %v11754_v55 = vpop.f32.mrf.mxu0 }
 0x48e   : > { %v11420_v36 = vadd.f32 %v16089_v23, %v20071_v16  ;;  %v11284_v18 = vpop.f32.mrf.mxu1  ;;  %v12258_v34 = vadd.f32 %v12257_v33, %v12256_v51  ;;  %v12383_v25 = vadd.f32 %v12382_v45, %v12381_v39  ;;  %v12259_v3 = vsel %vm11913_vm2, %v12207_v63, 0.0 }
 0x48f   : > { %v12384_v2 = vsel %vm11913_vm2, %v12333_v17, 0.0  ;;  %v11419_v38 = vadd.f32 %v11284_v18, %v20074_v22  ;;  %v12386_v61 = vsel %vm11913_vm2, %v12334_v52, 0.0  ;;  %11928 = vst.msk [vmem:[%s20171_s23 + $0x70] sm:$0xff] %vm11913_vm2, %v11887_v8  ;;  %v12208_v35 = vmul.f32 %v20194_v43, %v11887_v8  ;;  %v16154_v14 = vpop.f32.mrf.mxu0  ;;  %v20295_v43 = vpop.permute.xlu1 %12121 }
 0x490   : > { %v11890_v16 = vadd.f32 %v16151_v30, %v11420_v36  ;;  %v16092_v11 = vpop.f32.mrf.mxu1  ;;  %v12385_v26 = vadd.f32 %v12384_v2, %v12383_v25  ;;  %v12260_v31 = vadd.f32 %v12259_v3, %v12258_v34  ;;  %v12336_v47 = vmul.f32 %v12209_v54, %v11888_v19  ;;  %v20303_v30 = vpop.permute.xlu0 %12116 }
 0x491   : > { %v11889_v42 = vadd.f32 %v11754_v55, %v11419_v38  ;;  %v11422_v7 = vadd.f32 %v16092_v11, %v20077_v57  ;;  %v12261_v22 = vsel %vm11913_vm2, %v12208_v35, 0.0  ;;  %v12335_v58 = vmul.f32 %v12208_v35, %v11887_v8  ;;  %v11764_v9 = vpop.f32.mrf.mxu0 }
 0x492   : > { %11931 = vst.msk [vmem:[%s20171_s23 + $0x88] sm:$0xff] %vm11913_vm2, %v11890_v16  ;;  %v12211_v63 = vmul.f32 %v20207_v29, %v11890_v16  ;;  %v11294_v1 = vpop.f32.mrf.mxu1  ;;  %v12262_v32 = vadd.f32 %v12261_v22, %v12260_v31  ;;  %v12387_v13 = vadd.f32 %v12386_v61, %v12385_v26  ;;  %v12263_v19 = vsel %vm11913_vm2, %v12209_v54, 0.0 }
 0x493   : > { %11930 = vst.msk [vmem:[%s20171_s23 + $0x80] sm:$0xff] %vm11913_vm2, %v11889_v42  ;;  %v12210_v10 = vmul.f32 %v20215_v53, %v11889_v42  ;;  %v11892_v57 = vadd.f32 %v16154_v14, %v11422_v7  ;;  %v12388_v62 = vsel %vm11913_vm2, %v12335_v58, 0.0  ;;  %v11421_v44 = vadd.f32 %v11294_v1, %v20080_v24  ;;  %v16157_v23 = vpop.f32.mrf.mxu0  ;;  %v20318_v35 = vpop.permute.xlu1 %12131 }
 0x494   : > { %v12338_v52 = vmul.f32 %v12211_v63, %v11890_v16  ;;  %v16095_v29 = vpop.f32.mrf.mxu1  ;;  %v12389_v39 = vadd.f32 %v12388_v62, %v12387_v13  ;;  %v12264_v51 = vadd.f32 %v12263_v19, %v12262_v32  ;;  %v12390_v53 = vsel %vm11913_vm2, %v12336_v47, 0.0  ;;  %v20325_v22 = vpop.permute.xlu0 %12126 }
 0x495   : > { %v12265_v33 = vsel %vm11913_vm2, %v12210_v10, 0.0  ;;  %v12337_v17 = vmul.f32 %v12210_v10, %v11889_v42  ;;  %11933 = vst.msk [vmem:[%s20171_s23 + $0x98] sm:$0xff] %vm11913_vm2, %v11892_v57  ;;  %v12213_v45 = vmul.f32 %v20230_v0, %v11892_v57  ;;  %v11891_v54 = vadd.f32 %v11764_v9, %v11421_v44  ;;  %v11774_v36 = vpop.f32.mrf.mxu0 }
 0x496   : > { %v11424_v8 = vadd.f32 %v16095_v29, %v20083_v37  ;;  %v11304_v24 = vpop.f32.mrf.mxu1  ;;  %v12266_v18 = vadd.f32 %v12265_v33, %v12264_v51  ;;  %v12391_v55 = vadd.f32 %v12390_v53, %v12389_v39  ;;  %v12267_v2 = vsel %vm11913_vm2, %v12211_v63, 0.0 }
 0x497   : > { %v12392_v34 = vsel %vm11913_vm2, %v12337_v17, 0.0  ;;  %v11423_v25 = vadd.f32 %v11304_v24, %v20086_v6  ;;  %v12394_v38 = vsel %vm11913_vm2, %v12338_v52, 0.0  ;;  %11932 = vst.msk [vmem:[%s20171_s23 + $0x90] sm:$0xff] %vm11913_vm2, %v11891_v54  ;;  %v12212_v0 = vmul.f32 %v20237_v5, %v11891_v54  ;;  %v16160_v37 = vpop.f32.mrf.mxu0 }
 0x498   : > { %v11894_v3 = vadd.f32 %v16157_v23, %v11424_v8  ;;  %v16098_v61 = vpop.f32.mrf.mxu1  ;;  %v12393_v16 = vadd.f32 %v12392_v34, %v12391_v55  ;;  %v12268_v11 = vadd.f32 %v12267_v2, %v12266_v18  ;;  %v12340_v26 = vmul.f32 %v12213_v45, %v11892_v57  ;;  %v12137_v55 = vpop.permute.xlu0 %12136 }
 0x499   : > { %v11893_v14 = vadd.f32 %v11774_v36, %v11423_v25  ;;  %v11426_v6 = vadd.f32 %v16098_v61, %v20091_v20  ;;  %v12269_v31 = vsel %vm11913_vm2, %v12212_v0, 0.0  ;;  %v12339_v42 = vmul.f32 %v12212_v0, %v11891_v54  ;;  %v11784_v47 = vpop.f32.mrf.mxu0 }
 0x49a   : > { %11935 = vst.msk [vmem:[%s20171_s23 + $0xa8] sm:$0xff] %vm11913_vm2, %v11894_v3  ;;  %v12215_v7 = vmul.f32 %v20251_v15, %v11894_v3  ;;  %v11314_v5 = vpop.f32.mrf.mxu1  ;;  %v12270_v58 = vadd.f32 %v12269_v31, %v12268_v11  ;;  %v12395_v63 = vadd.f32 %v12394_v38, %v12393_v16  ;;  %v12271_v9 = vsel %vm11913_vm2, %v12213_v45, 0.0 }
 0x49b   : > { %11934 = vst.msk [vmem:[%s20171_s23 + $0xa0] sm:$0xff] %vm11913_vm2, %v11893_v14  ;;  %v12214_v1 = vmul.f32 %v20260_v50, %v11893_v14  ;;  %v11896_v20 = vadd.f32 %v16160_v37, %v11426_v6  ;;  %v12396_v32 = vsel %vm11913_vm2, %v12339_v42, 0.0  ;;  %v11425_v10 = vadd.f32 %v11314_v5, %v20096_v21  ;;  %v16163_v57 = vpop.f32.mrf.mxu0  ;;  %v20339_v21 = vpop.permute.xlu1 %12141 }
 0x49c   : > { %v12342_v13 = vmul.f32 %v12215_v7, %v11894_v3  ;;  %v16101_v15 = vpop.f32.mrf.mxu1  ;;  %v12397_v19 = vadd.f32 %v12396_v32, %v12395_v63  ;;  %v12272_v62 = vadd.f32 %v12271_v9, %v12270_v58  ;;  %v12398_v50 = vsel %vm11913_vm2, %v12340_v26, 0.0 }
 0x49d   : > { %v12273_v52 = vsel %vm11913_vm2, %v12214_v1, 0.0  ;;  %v12341_v44 = vmul.f32 %v12214_v1, %v11893_v14  ;;  %11937 = vst.msk [vmem:[%s20171_s23 + $0xb8] sm:$0xff] %vm11913_vm2, %v11896_v20  ;;  %v12217_v29 = vmul.f32 %v20273_v12, %v11896_v20  ;;  %v11895_v23 = vadd.f32 %v11784_v47, %v11425_v10  ;;  %v11794_v33 = vpop.f32.mrf.mxu0  ;;  %v12147_v10 = vpop.permute.xlu0 %12146 }
 0x49e   : > { %v11428_v39 = vadd.f32 %v16101_v15, %v20099_v60  ;;  %v11324_v51 = vpop.f32.mrf.mxu1  ;;  %v12274_v17 = vadd.f32 %v12273_v52, %v12272_v62  ;;  %v12399_v53 = vadd.f32 %v12398_v50, %v12397_v19  ;;  %v12275_v8 = vsel %vm11913_vm2, %v12215_v7, 0.0 }
 0x49f   : > { %v12400_v45 = vsel %vm11913_vm2, %v12341_v44, 0.0  ;;  %v11427_v54 = vadd.f32 %v11324_v51, %v20104_v49  ;;  %v12402_v24 = vsel %vm11913_vm2, %v12342_v13, 0.0  ;;  %11936 = vst.msk [vmem:[%s20171_s23 + $0xb0] sm:$0xff] %vm11913_vm2, %v11895_v23  ;;  %v12216_v12 = vmul.f32 %v20281_v48, %v11895_v23  ;;  %v16166_v18 = vpop.f32.mrf.mxu0 }
 0x4a0   : > { %v11898_v60 = vadd.f32 %v16163_v57, %v11428_v39  ;;  %v16104_v36 = vpop.f32.mrf.mxu1  ;;  %v12401_v34 = vadd.f32 %v12400_v45, %v12399_v53  ;;  %v12276_v25 = vadd.f32 %v12275_v8, %v12274_v17  ;;  %v12344_v49 = vmul.f32 %v12217_v29, %v11896_v20 }
 0x4a1   : > { %v11897_v2 = vadd.f32 %v11794_v33, %v11427_v54  ;;  %v11430_v38 = vadd.f32 %v16104_v36, %v20109_v28  ;;  %v12277_v0 = vsel %vm11913_vm2, %v12216_v12, 0.0  ;;  %v12343_v3 = vmul.f32 %v12216_v12, %v11895_v23  ;;  %v11804_v48 = vpop.f32.mrf.mxu0 }
 0x4a2   : > { %11939 = vst.msk [vmem:[%s20171_s23 + $0xc8] sm:$0xff] %vm11913_vm2, %v11898_v60  ;;  %v12219_v61 = vmul.f32 %v20295_v43, %v11898_v60  ;;  %v11334_v37 = vpop.f32.mrf.mxu1  ;;  %v12278_v16 = vadd.f32 %v12277_v0, %v12276_v25  ;;  %v12403_v11 = vadd.f32 %v12402_v24, %v12401_v34  ;;  %v12279_v28 = vsel %vm11913_vm2, %v12217_v29, 0.0  ;;  %v12152_v43 = vpop.permute.xlu1 %12151 }
 0x4a3   : > { %11938 = vst.msk [vmem:[%s20171_s23 + $0xc0] sm:$0xff] %vm11913_vm2, %v11897_v2  ;;  %v12218_v14 = vmul.f32 %v20303_v30, %v11897_v2  ;;  %v11900_v6 = vadd.f32 %v16166_v18, %v11430_v38  ;;  %v12404_v26 = vsel %vm11913_vm2, %v12343_v3, 0.0  ;;  %v11429_v42 = vadd.f32 %v11334_v37, %v20112_v46  ;;  %v16169_v5 = vpop.f32.mrf.mxu0 }
 0x4a4   : > { %v12346_v31 = vmul.f32 %v12219_v61, %v11898_v60  ;;  %v16107_v7 = vpop.f32.mrf.mxu1  ;;  %v12405_v47 = vadd.f32 %v12404_v26, %v12403_v11  ;;  %v12280_v58 = vadd.f32 %v12279_v28, %v12278_v16  ;;  %v12406_v30 = vsel %vm11913_vm2, %v12344_v49, 0.0  ;;  %v20538_v26 = vld [vmem:[#allocation2_spill] sm:$0xff] }
 0x4a5   : > { %v12281_v63 = vsel %vm11913_vm2, %v12218_v14, 0.0  ;;  %v12345_v1 = vmul.f32 %v12218_v14, %v11897_v2  ;;  %11941 = vst.msk [vmem:[%s20171_s23 + $0xd8] sm:$0xff] %vm11913_vm2, %v11900_v6  ;;  %v12221_v20 = vmul.f32 %v20318_v35, %v11900_v6  ;;  %v11899_v9 = vadd.f32 %v11804_v48, %v11429_v42  ;;  %v11814_v46 = vpop.f32.mrf.mxu0 }
 0x4a6   : > { %v11432_v32 = vadd.f32 %v16107_v7, %v20117_v4  ;;  %v11344_v13 = vpop.f32.mrf.mxu1  ;;  %v12282_v15 = vadd.f32 %v12281_v63, %v12280_v58  ;;  %v12407_v57 = vadd.f32 %v12406_v30, %v12405_v47  ;;  %v12283_v52 = vsel %vm11913_vm2, %v12219_v61, 0.0 }
 0x4a7   : > { %v12408_v19 = vsel %vm11913_vm2, %v12345_v1, 0.0  ;;  %v11431_v62 = vadd.f32 %v11344_v13, %v20122_v56  ;;  %v12410_v44 = vsel %vm11913_vm2, %v12346_v31, 0.0  ;;  %11940 = vst.msk [vmem:[%s20171_s23 + $0xd0] sm:$0xff] %vm11913_vm2, %v11899_v9  ;;  %v12220_v35 = vmul.f32 %v20325_v22, %v11899_v9  ;;  %v16172_v29 = vpop.f32.mrf.mxu0  ;;  %v12162_v22 = vpop.permute.xlu1 %12161 }
 0x4a8   : > { %v11902_v50 = vadd.f32 %v16169_v5, %v11432_v32  ;;  %v16110_v4 = vpop.f32.mrf.mxu1  ;;  %v12409_v23 = vadd.f32 %v12408_v19, %v12407_v57  ;;  %v12284_v39 = vadd.f32 %v12283_v52, %v12282_v15  ;;  %v12348_v17 = vmul.f32 %v12221_v20, %v11900_v6 }
 0x4a9   : > { %v11901_v51 = vadd.f32 %v11814_v46, %v11431_v62  ;;  %v11434_v33 = vadd.f32 %v16110_v4, %v20125_v27  ;;  %v12285_v56 = vsel %vm11913_vm2, %v12220_v35, 0.0  ;;  %v12347_v53 = vmul.f32 %v12220_v35, %v11899_v9  ;;  %v11824_v8 = vpop.f32.mrf.mxu0 }
 0x4aa   : > { %11943 = vst.msk [vmem:[%s20171_s23 + $0xe8] sm:$0xff] %vm11913_vm2, %v11902_v50  ;;  %v12223_v45 = vmul.f32 %v20339_v21, %v11902_v50  ;;  %v11354_v54 = vpop.f32.mrf.mxu1  ;;  %v12286_v24 = vadd.f32 %v12285_v56, %v12284_v39  ;;  %v12411_v12 = vadd.f32 %v12410_v44, %v12409_v23  ;;  %v12287_v27 = vsel %vm11913_vm2, %v12221_v20, 0.0  ;;  %v12157_v21 = vpop.permute.xlu0 %12156  ;;  %v20539_v20 = vld [vmem:[#allocation3_spill] sm:$0xff] }
 0x4ab   : > { %11942 = vst.msk [vmem:[%s20171_s23 + $0xe0] sm:$0xff] %vm11913_vm2, %v11901_v51  ;;  %v12222_v60 = vmul.f32 %v12137_v55, %v11901_v51  ;;  %v11904_v36 = vadd.f32 %v16172_v29, %v11434_v33  ;;  %v12412_v18 = vsel %vm11913_vm2, %v12347_v53, 0.0  ;;  %v11433_v25 = vadd.f32 %v11354_v54, %v20130_v41  ;;  %v16175_v38 = vpop.f32.mrf.mxu0 }
 0x4ac   : > { %v12350_v34 = vmul.f32 %v12223_v45, %v11902_v50  ;;  %v16113_v2 = vpop.f32.mrf.mxu1  ;;  %v12413_v49 = vadd.f32 %v12412_v18, %v12411_v12  ;;  %v12288_v0 = vadd.f32 %v12287_v27, %v12286_v24  ;;  %v12414_v55 = vsel %vm11913_vm2, %v12348_v17, 0.0 }
 0x4ad   : > { %v12289_v3 = vsel %vm11913_vm2, %v12222_v60, 0.0  ;;  %v12349_v61 = vmul.f32 %v12222_v60, %v11901_v51  ;;  %11945 = vst.msk [vmem:[%s20171_s23 + $0xf8] sm:$0xff] %vm11913_vm2, %v11904_v36  ;;  %v12225_v37 = vmul.f32 %v12152_v43, %v11904_v36  ;;  %v11903_v48 = vadd.f32 %v11824_v8, %v11433_v25  ;;  %v11834_v14 = vpop.f32.mrf.mxu0 }
 0x4ae   : > { %v11436_v16 = vadd.f32 %v16113_v2, %v20135_v59  ;;  %v11364_v11 = vpop.f32.mrf.mxu1  ;;  %v12290_v41 = vadd.f32 %v12289_v3, %v12288_v0  ;;  %v12415_v6 = vadd.f32 %v12414_v55, %v12413_v49  ;;  %v12291_v42 = vsel %vm11913_vm2, %v12223_v45, 0.0  ;;  %v12172_v59 = vpop.permute.xlu1 %12171 }
 0x4af   : > { %v12416_v28 = vsel %vm11913_vm2, %v12349_v61, 0.0  ;;  %v11435_v31 = vadd.f32 %v11364_v11, %v20538_v26  ;;  %v12418_v7 = vsel %vm11913_vm2, %v12350_v34, 0.0  ;;  %11944 = vst.msk [vmem:[%s20171_s23 + $0xf0] sm:$0xff] %vm11913_vm2, %v11903_v48  ;;  %v12224_v5 = vmul.f32 %v12147_v10, %v11903_v48  ;;  %v16178_v58 = vpop.f32.mrf.mxu0  ;;  %v12167_v10 = vpop.permute.xlu0 %12166  ;;  %v20541_v34 = vld [vmem:[#allocation5_spill] sm:$0xff] }
 0x4b0   : > { %v11906_v43 = vadd.f32 %v16175_v38, %v11436_v16  ;;  %v16116_v47 = vpop.f32.mrf.mxu1  ;;  %v12417_v63 = vadd.f32 %v12416_v28, %v12415_v6  ;;  %v12292_v1 = vadd.f32 %v12291_v42, %v12290_v41  ;;  %v12352_v32 = vmul.f32 %v12225_v37, %v11904_v36 }
 0x4b1   : > { %v11905_v30 = vadd.f32 %v11834_v14, %v11435_v31  ;;  %v11438_v9 = vadd.f32 %v16116_v47, %v20539_v20  ;;  %v12293_v13 = vsel %vm11913_vm2, %v12224_v5, 0.0  ;;  %v12351_v46 = vmul.f32 %v12224_v5, %v11903_v48  ;;  %v11844_v19 = vpop.f32.mrf.mxu0  ;;  %v20542_v48 = vld [vmem:[#allocation6_spill] sm:$0xff] }
 0x4b2   : > { %11947 = vst.msk [vmem:[%s20171_s23 + $0x108] sm:$0xff] %vm11913_vm2, %v11906_v43  ;;  %v12227_v15 = vmul.f32 %v12162_v22, %v11906_v43  ;;  %v11374_v57 = vpop.f32.mrf.mxu1  ;;  %v12294_v62 = vadd.f32 %v12293_v13, %v12292_v1  ;;  %v12419_v52 = vadd.f32 %v12418_v7, %v12417_v63  ;;  %v12295_v50 = vsel %vm11913_vm2, %v12225_v37, 0.0  ;;  %v20540_v22 = vld [vmem:[#allocation4_spill] sm:$0xff]  ;;  %v12182_v36 = vpop.permute.xlu1 %12181 }
 0x4b3   : > { %11946 = vst.msk [vmem:[%s20171_s23 + $0x100] sm:$0xff] %vm11913_vm2, %v11905_v30  ;;  %v12226_v44 = vmul.f32 %v12157_v21, %v11905_v30  ;;  %v11908_v35 = vadd.f32 %v16178_v58, %v11438_v9  ;;  %v12420_v4 = vsel %vm11913_vm2, %v12351_v46, 0.0  ;;  %v11437_v23 = vadd.f32 %v11374_v57, %v20148_v40  ;;  %v16181_v51 = vpop.f32.mrf.mxu0  ;;  %v12177_v3 = vpop.permute.xlu0 %12176  ;;  %v20543_v58 = vld [vmem:[#allocation7_spill] sm:$0xff] }
 0x4b4   : > { %v12354_v29 = vmul.f32 %v12227_v15, %v11906_v43  ;;  %v16119_v39 = vpop.f32.mrf.mxu1  ;;  %v12421_v33 = vadd.f32 %v12420_v4, %v12419_v52  ;;  %v12296_v17 = vadd.f32 %v12295_v50, %v12294_v62  ;;  %v12422_v45 = vsel %vm11913_vm2, %v12352_v32, 0.0 }
 0x4b5   : > { %v12297_v56 = vsel %vm11913_vm2, %v12226_v44, 0.0  ;;  %v12353_v53 = vmul.f32 %v12226_v44, %v11905_v30  ;;  %11949 = vst.msk [vmem:[%s20171_s23 + $0x118] sm:$0xff] %vm11913_vm2, %v11908_v35  ;;  %v12229_v54 = vmul.f32 %v12172_v59, %v11908_v35  ;;  %v11907_v8 = vadd.f32 %v11844_v19, %v11437_v23  ;;  %v11854_v60 = vpop.f32.mrf.mxu0 }
 0x4b6   : > { %v11440_v24 = vadd.f32 %v16119_v39, %v20540_v22  ;;  %v11384_v12 = vpop.f32.mrf.mxu1  ;;  %v12298_v40 = vadd.f32 %v12297_v56, %v12296_v17  ;;  %v12423_v27 = vadd.f32 %v12422_v45, %v12421_v33  ;;  %v12299_v2 = vsel %vm11913_vm2, %v12227_v15, 0.0  ;;  %v12192_v63 = vpop.permute.xlu1 %12191 }
 0x4b7   : > { %v12424_v18 = vsel %vm11913_vm2, %v12353_v53, 0.0  ;;  %v11439_v25 = vadd.f32 %v11384_v12, %v20541_v34  ;;  %v12426_v38 = vsel %vm11913_vm2, %v12354_v29, 0.0  ;;  %11948 = vst.msk [vmem:[%s20171_s23 + $0x110] sm:$0xff] %vm11913_vm2, %v11907_v8  ;;  %v12228_v21 = vmul.f32 %v12167_v10, %v11907_v8  ;;  %v16184_v11 = vpop.f32.mrf.mxu0  ;;  %v12187_v19 = vpop.permute.xlu0 %12186 }
 0x4b8   : > { %v11910_v49 = vadd.f32 %v16181_v51, %v11440_v24  ;;  %v16122_v0 = vpop.f32.mrf.mxu1  ;;  %v12425_v61 = vadd.f32 %v12424_v18, %v12423_v27  ;;  %v12300_v55 = vadd.f32 %v12299_v2, %v12298_v40  ;;  %v12356_v14 = vmul.f32 %v12229_v54, %v11908_v35 }
 0x4b9   : > { %v11909_v37 = vadd.f32 %v11854_v60, %v11439_v25  ;;  %v11442_v16 = vadd.f32 %v16122_v0, %v20542_v48  ;;  %v12301_v41 = vsel %vm11913_vm2, %v12228_v21, 0.0  ;;  %v12355_v6 = vmul.f32 %v12228_v21, %v11907_v8  ;;  %v11864_v32 = vpop.f32.mrf.mxu0 }
 0x4ba   : > { %11951 = vst.msk [vmem:[%s20171_s23 + $0x128] sm:$0xff] %vm11913_vm2, %v11910_v49  ;;  %v12231_v28 = vmul.f32 %v12182_v36, %v11910_v49  ;;  %v11394_v26 = vpop.f32.mrf.mxu1  ;;  %v12302_v31 = vadd.f32 %v12301_v41, %v12300_v55  ;;  %v12427_v42 = vadd.f32 %v12426_v38, %v12425_v61  ;;  %v12303_v43 = vsel %vm11913_vm2, %v12229_v54, 0.0 }
 0x4bb   : > { %11950 = vst.msk [vmem:[%s20171_s23 + $0x120] sm:$0xff] %vm11913_vm2, %v11909_v37  ;;  %v12230_v7 = vmul.f32 %v12177_v3, %v11909_v37  ;;  %v11912_v5 = vadd.f32 %v16184_v11, %v11442_v16  ;;  %v12428_v47 = vsel %vm11913_vm2, %v12355_v6, 0.0  ;;  %v11441_v59 = vadd.f32 %v11394_v26, %v20543_v58 }
 0x4bc   : > { %v12429_v1 = vadd.f32 %v12428_v47, %v12427_v42  ;;  %v12304_v30 = vadd.f32 %v12303_v43, %v12302_v31  ;;  %v12430_v13 = vsel %vm11913_vm2, %v12356_v14, 0.0  ;;  %v12358_v46 = vmul.f32 %v12231_v28, %v11910_v49 }
 0x4bd   : > { %v12305_v20 = vsel %vm11913_vm2, %v12230_v7, 0.0  ;;  %v12357_v9 = vmul.f32 %v12230_v7, %v11909_v37  ;;  %11953 = vst.msk [vmem:[%s20171_s23 + $0x138] sm:$0xff] %vm11913_vm2, %v11912_v5  ;;  %v12233_v15 = vmul.f32 %v12192_v63, %v11912_v5  ;;  %v11911_v57 = vadd.f32 %v11864_v32, %v11441_v59 }
 0x4be   : > { %v12306_v10 = vadd.f32 %v12305_v20, %v12304_v30  ;;  %v12431_v62 = vadd.f32 %v12430_v13, %v12429_v1  ;;  %v12307_v44 = vsel %vm11913_vm2, %v12231_v28, 0.0  ;;  %v12434_v29 = vsel %vm11913_vm2, %v12358_v46, 0.0 }
 0x4bf   : > { %v12432_v52 = vsel %vm11913_vm2, %v12357_v9, 0.0  ;;  %11952 = vst.msk [vmem:[%s20171_s23 + $0x130] sm:$0xff] %vm11913_vm2, %v11911_v57  ;;  %v12232_v35 = vmul.f32 %v12187_v19, %v11911_v57  ;;  %v12360_v23 = vmul.f32 %v12233_v15, %v11912_v5  ;;  %v12311_v56 = vsel %vm11913_vm2, %v12233_v15, 0.0 }
 0x4c0   : > { %v12433_v50 = vadd.f32 %v12432_v52, %v12431_v62  ;;  %v12308_v4 = vadd.f32 %v12307_v44, %v12306_v10 }
 0x4c1   : > { %v12309_v39 = vsel %vm11913_vm2, %v12232_v35, 0.0  ;;  %v12359_v51 = vmul.f32 %v12232_v35, %v11911_v57  ;;  %v12438_v8 = vsel %vm11913_vm2, %v12360_v23, 0.0 }
 0x4c2   : > { %v12310_v33 = vadd.f32 %v12309_v39, %v12308_v4  ;;  %v12435_v17 = vadd.f32 %v12434_v29, %v12433_v50 }
 0x4c3   : > { %v12436_v53 = vsel %vm11913_vm2, %v12359_v51, 0.0 }
 0x4c4   : > { %v12312_v45 = vadd.f32 %v12311_v56, %v12310_v33  ;;  %v12437_v54 = vadd.f32 %v12436_v53, %v12435_v17 }
 0x4c6   : > { %v12313_v22 = vrot.slane %v12312_v45, 4  ;;  %v12439_v24 = vadd.f32 %v12438_v8, %v12437_v54 }
 0x4c8   : > { %v12314_v12 = vadd.f32 %v12313_v22, %v12312_v45  ;;  %v12440_v60 = vrot.slane %v12439_v24, 4 }
 0x4ca   : > { %v12315_v36 = vrot.slane %v12314_v12, 2  ;;  %v12441_v40 = vadd.f32 %v12440_v60, %v12439_v24 }
 0x4cc   : > { %v12316_v27 = vadd.f32 %v12315_v36, %v12314_v12  ;;  %v12442_v18 = vrot.slane %v12441_v40, 2 }
 0x4ce   : > { %v12317_v34 = vrot.slane %v12316_v27, 1  ;;  %v12443_v25 = vadd.f32 %v12442_v18, %v12441_v40 }
 0x4d0   : > { %v12318_v2 = vadd.f32 %v12317_v34, %v12316_v27  ;;  %v12444_v38 = vrot.slane %v12443_v25, 1 }
 0x4d2   : > { %12320 = vst.msk [vmem:[%s238_s26] sm:$0x1] %vm12319_vm3, %v12318_v2  ;;  %v12445_v21 = vadd.f32 %v12444_v38, %v12443_v25 }
 0x4d4   : > { %12446 = vst.msk [vmem:[%s241_s30] sm:$0x1] %vm12319_vm3, %v12445_v21 }
 0x4d5 PF: > { %s16_s18 = sadd.s32 1, %s16206_s18  }
 0x4d6   : > { %p13_p4 = scmp.ge.s32.totalorder %s16_s18, 4  }
 0x4d8   :  { %15 = sbr.rel (!%p13_p4) target bundleno = 1 (0x1), region = 110 }

</bundles_post_ra>
